<compile_context>
chip_gen: v5e
topology: v5e:2x2
jax: 0.10.0
libtpu: 0.0.40
codegen_flags: <defaults>
</compile_context>

<pallas_src>
import functools

import jax
import jax.numpy as jnp
from jax import lax
from jax.experimental import pallas as pl
from jax.experimental.pallas import tpu as pltpu

# Geometry implied by the module (fc1 = Linear(16*64*64, 10) => 128x128 input).
C_IN, C_OUT, KH, KW = 3, 16, 3, 3
H = W = 128
PH, PW = H // 2, W // 2            # 64 x 64 pooled spatial
NUM_CLASSES = 10
NPIX = H * W                       # 16384 conv output positions per image
QPIX = PH * PW                     # 4096 positions per pooling-parity quadrant
K_ROWS = 32                        # 27 shifted planes + 1 ones (bias) row + 4 zero pad
FC_COLS = C_OUT * NUM_CLASSES      # 160 channel-blocked FC output columns
OUT_LANES = 128                    # lane-dense padded logits row


# ----------------------------- Pallas kernel -------------------------------

def fused_cnn_kernel(wc_ref, s_ref, wbig_ref, mask_ref, fold_ref, o_ref, *,
                     batch_tile):
    # wc_ref   : VMEM (16, 32)            bf16  conv weight (+bias col 27), resident
    # s_ref    : VMEM (1, 32, T*16384)    bf16  shifted-plane slab for T images
    # wbig_ref : VMEM (4096, 160)         bf16  FC weight, channel-blocked, resident
    # mask_ref : VMEM (16, 160)           f32   keeps column block c*10..c*10+9 in row c
    # fold_ref : VMEM (160, 10)           f32   folds the 16 ten-wide blocks onto 10 cols
    # o_ref    : VMEM (T, 8, 128)         f32   padded logits rows for these T images
    wc = wc_ref[...]
    wbig = wbig_ref[...]
    mask = mask_ref[...]
    fold = fold_ref[...]

    o_ref[...] = jnp.zeros_like(o_ref)

    for t in range(batch_tile):                      # static unroll, T small
        base = t * NPIX
        # Conv (+bias via the ones row) as one MXU matmul per parity quadrant;
        # running max over the 4 quadrants == MaxPool2d(2,2).
        pooled = None
        for s in range(4):
            sq = s_ref[0, :, pl.ds(base + s * QPIX, QPIX)]            # (32, 4096) bf16
            y = jnp.dot(wc, sq, preferred_element_type=jnp.float32)   # (16, 4096) f32
            pooled = y if pooled is None else jnp.maximum(pooled, y)
        pooled = jnp.maximum(pooled, 0.0)            # ReLU (monotone => after the max)

        # Fused FC on the MXU in bf16 with f32 accumulation.
        pb = pooled.astype(jnp.bfloat16)                              # (16, 4096)
        r = jnp.dot(pb, wbig, preferred_element_type=jnp.float32)     # (16, 160)
        part = jnp.dot(r * mask, fold,
                       preferred_element_type=jnp.float32)            # (16, 10)
        logits = jnp.sum(part, axis=0, keepdims=True)                 # (1, 10)
        o_ref[t, 0:1, 0:NUM_CLASSES] = logits


# ------------------------------ wrappers ------------------------------------

def prepare_params(w_conv, b_conv, w_fc):
    """One-time (init) repack of the parameters into MXU-friendly bf16 layouts."""
    wc = jnp.concatenate(
        [w_conv.reshape(C_OUT, C_IN * KH * KW),          # cols 0..26: conv taps
         b_conv.reshape(C_OUT, 1),                       # col 27: bias (x ones row)
         jnp.zeros((C_OUT, K_ROWS - C_IN * KH * KW - 1), w_conv.dtype)],
        axis=1).astype(jnp.bfloat16)                     # (16, 32)
    # wbig[q, c*10 + n] = fc1.weight[n, c*4096 + q], q in pooled (h//2,w//2) order.
    wbig = (w_fc.reshape(NUM_CLASSES, C_OUT, QPIX)
                .transpose(2, 1, 0)
                .reshape(QPIX, FC_COLS)
                .astype(jnp.bfloat16))                   # (4096, 160)
    return wc, wbig


def _pick_batch_tile(batch):
    """Largest of (4,2,1) dividing batch while keeping >=2 grid steps if possible."""
    for t in (4, 2, 1):
        if batch % t == 0 and (batch // t >= 2 or t == 1):
            return t
    return 1


def _build_input_planes(x, batch_tile):
    """Per-call cheap XLA fusion: bf16 cast, zero halo, 27 shifted planes + ones
    row, pooling-parity flattening, and grouping of batch_tile images per block."""
    batch = x.shape[0]
    xb = x.astype(jnp.bfloat16)
    xp = jnp.pad(xb, ((0, 0), (0, 0), (1, 1), (1, 1)))   # zero halo for padding=1
    planes = [xp[:, ci, dy:dy + H, dx:dx + W]
              for ci in range(C_IN) for dy in range(KH) for dx in range(KW)]
    planes.append(jnp.ones((batch, H, W), jnp.bfloat16))  # ones row -> conv bias
    s = jnp.stack(planes, axis=1)                          # (B, 28, 128, 128)
    s = jnp.concatenate(
        [s, jnp.zeros((batch, K_ROWS - s.shape[1], H, W), jnp.bfloat16)], axis=1)
    # Parity-split flatten: p = (h%2*2 + w%2)*4096 + (h//2)*64 + (w//2), so each
    # 2x2 pool window maps to the same offset in 4 aligned 4096-wide quadrants.
    s = s.reshape(batch, K_ROWS, PH, 2, PW, 2)
    s = s.transpose(0, 1, 3, 5, 2, 4)
    s = s.reshape(batch, K_ROWS, NPIX)
    # Group batch_tile images per grid step, images contiguous along the lane dim.
    s = s.reshape(batch // batch_tile, batch_tile, K_ROWS, NPIX)
    s = s.transpose(0, 2, 1, 3).reshape(batch // batch_tile, K_ROWS,
                                        batch_tile * NPIX)
    return s


def single_cnn_forward(x, wc, wbig, b_fc):
    batch = x.shape[0]
    assert x.shape[1:] == (C_IN, H, W), "SingleCNN expects (B, 3, 128, 128)"
    bt = _pick_batch_tile(batch)
    s_all = _build_input_planes(x, bt)                     # (B/bt, 32, bt*16384) bf16

    mask = (jnp.arange(FC_COLS)[None, :] // NUM_CLASSES
            == jnp.arange(C_OUT)[:, None]).astype(jnp.float32)        # (16, 160)
    fold = (jnp.arange(FC_COLS)[:, None] % NUM_CLASSES
            == jnp.arange(NUM_CLASSES)[None, :]).astype(jnp.float32)  # (160, 10)

    out_pad = pl.pallas_call(
        functools.partial(fused_cnn_kernel, batch_tile=bt),
        out_shape=jax.ShapeDtypeStruct((batch, 8, OUT_LANES), jnp.float32),
        grid=(batch // bt,),
        in_specs=[
            pl.BlockSpec((C_OUT, K_ROWS), lambda g: (0, 0)),             # conv weight
            pl.BlockSpec((1, K_ROWS, bt * NPIX), lambda g: (g, 0, 0)),   # input slab
            pl.BlockSpec((QPIX, FC_COLS), lambda g: (0, 0)),             # FC weight
            pl.BlockSpec((C_OUT, FC_COLS), lambda g: (0, 0)),            # mask
            pl.BlockSpec((FC_COLS, NUM_CLASSES), lambda g: (0, 0)),      # fold
        ],
        out_specs=pl.BlockSpec((bt, 8, OUT_LANES), lambda g: (g, 0, 0)),
        compiler_params=pltpu.CompilerParams(
            dimension_semantics=("parallel",),
            vmem_limit_bytes=32 * 1024 * 1024,
        ),
    )(wc, s_all, wbig, mask, fold)

    return out_pad[:, 0, :NUM_CLASSES] + b_fc[None, :].astype(jnp.float32)


# ------------------------------ reference -----------------------------------

def reference_forward(x, w_conv, b_conv, w_fc, b_fc):
    y = lax.conv_general_dilated(
        x, w_conv, window_strides=(1, 1), padding=((1, 1), (1, 1)),
        dimension_numbers=("NCHW", "OIHW", "NCHW"))
    y = y + b_conv[None, :, None, None]
    y = jnp.maximum(y, 0.0)
    y = lax.reduce_window(y, -jnp.inf, lax.max,
                          (1, 1, 2, 2), (1, 1, 2, 2), "VALID")
    y = y.reshape(x.shape[0], -1)
    return y @ w_fc.T + b_fc


# -------------------------------- main ---------------------------------------

if __name__ == "__main__":
    key = jax.random.PRNGKey(0)
    kx, kw1, kb1, kw2, kb2 = jax.random.split(key, 5)

    B = 2
    x = jax.random.normal(kx, (B, C_IN, H, W), jnp.float32)

    # Deterministic synthetic parameters (PyTorch layouts).
    w_conv = 0.1 * jax.random.normal(kw1, (C_OUT, C_IN, KH, KW), jnp.float32)
    b_conv = 0.1 * jax.random.normal(kb1, (C_OUT,), jnp.float32)
    w_fc = jax.random.normal(kw2, (NUM_CLASSES, C_OUT * PH * PW), jnp.float32) / 256.0
    b_fc = 0.1 * jax.random.normal(kb2, (NUM_CLASSES,), jnp.float32)

    # One-time weight repack ("init" time, outside jit).
    wc, wbig = prepare_params(w_conv, b_conv, w_fc)

    out = jax.jit(single_cnn_forward)(x, wc, wbig, b_fc)
    out = jax.block_until_ready(out)
    assert out.shape == (B, NUM_CLASSES)

    ref = jax.block_until_ready(reference_forward(x, w_conv, b_conv, w_fc, b_fc))
    max_err = float(jnp.max(jnp.abs(out - ref)))
    assert max_err < 5e-2, f"mismatch vs reference: max abs err = {max_err}"

    print("KERNEL_OK")
</pallas_src>

<mosaic_0001>
module attributes {stable_mosaic.version = 11 : i64} {
  func.func @fused_cnn_kernel(%arg0: i32, %arg1: memref<16x32xbf16, #tpu.memory_space<vmem>>, %arg2: memref<1x32x16384xbf16, #tpu.memory_space<vmem>>, %arg3: memref<4096x160xbf16, #tpu.memory_space<vmem>>, %arg4: memref<16x160xf32, #tpu.memory_space<vmem>>, %arg5: memref<160x10xf32, #tpu.memory_space<vmem>>, %arg6: memref<1x8x128xf32, #tpu.memory_space<vmem>>) attributes {dimension_semantics = [#tpu.dimension_semantics<parallel>], iteration_bounds = array<i64: 2>, scalar_prefetch = 0 : i64, scratch_operands = 0 : i64, tpu.core_type = #tpu.core_type<tc>, window_params = [{pipeline_mode = #tpu.pipeline_mode<synchronous>, transform_indices = @transform_0, window_bounds = array<i64: 16, 32>}, {transform_indices = @transform_1, window_bounds = array<i64: 1, 32, 16384>}, {pipeline_mode = #tpu.pipeline_mode<synchronous>, transform_indices = @transform_2, window_bounds = array<i64: 4096, 160>}, {pipeline_mode = #tpu.pipeline_mode<synchronous>, transform_indices = @transform_3, window_bounds = array<i64: 16, 160>}, {pipeline_mode = #tpu.pipeline_mode<synchronous>, transform_indices = @transform_4, window_bounds = array<i64: 160, 10>}, {transform_indices = @transform_5, window_bounds = array<i64: 1, 8, 128>}]} {
    %c0 = arith.constant 0 : index
    %c0_0 = arith.constant 0 : index
    %0 = vector.load %arg1[%c0, %c0_0] : memref<16x32xbf16, #tpu.memory_space<vmem>>, vector<16x32xbf16>
    %c0_1 = arith.constant 0 : index
    %c0_2 = arith.constant 0 : index
    %1 = vector.load %arg3[%c0_1, %c0_2] : memref<4096x160xbf16, #tpu.memory_space<vmem>>, vector<4096x160xbf16>
    %c0_3 = arith.constant 0 : index
    %c0_4 = arith.constant 0 : index
    %2 = vector.load %arg4[%c0_3, %c0_4] : memref<16x160xf32, #tpu.memory_space<vmem>>, vector<16x160xf32>
    %c0_5 = arith.constant 0 : index
    %c0_6 = arith.constant 0 : index
    %3 = vector.load %arg5[%c0_5, %c0_6] : memref<160x10xf32, #tpu.memory_space<vmem>>, vector<160x10xf32>
    %cst = arith.constant 0.000000e+00 : f32
    %4 = vector.broadcast %cst : f32 to vector<1x8x128xf32>
    %c0_7 = arith.constant 0 : index
    %c0_8 = arith.constant 0 : index
    %c0_9 = arith.constant 0 : index
    %5 = vector.load %arg6[%c0_7, %c0_8, %c0_9] : memref<1x8x128xf32, #tpu.memory_space<vmem>>, vector<1x8x128xf32>
    tpu.vector_store %arg6[%c0_7, %c0_8, %c0_9], %4 {strides = array<i32>} : memref<1x8x128xf32, #tpu.memory_space<vmem>>, vector<1x8x128xf32>,
    %c0_10 = arith.constant 0 : index
    %c0_11 = arith.constant 0 : index
    %c0_12 = arith.constant 0 : index
    %6 = vector.load %arg2[%c0_10, %c0_11, %c0_12] : memref<1x32x16384xbf16, #tpu.memory_space<vmem>>, vector<1x32x4096xbf16>
    %7 = vector.shape_cast %6 : vector<1x32x4096xbf16> to vector<32x4096xbf16>
    %cst_13 = arith.constant dense<0.000000e+00> : vector<16x4096xf32>
    %8 = tpu.matmul %0, %7, %cst_13 {dimension_numbers = #tpu.dot_dimension_numbers<[1], [0], [0], [1], [0, 0, 1, 1], [], []>} : vector<16x32xbf16>, vector<32x4096xbf16>, vector<16x4096xf32> -> vector<16x4096xf32>
    %c0_14 = arith.constant 0 : index
    %c0_15 = arith.constant 0 : index
    %c4096 = arith.constant 4096 : index
    %9 = vector.load %arg2[%c0_14, %c0_15, %c4096] : memref<1x32x16384xbf16, #tpu.memory_space<vmem>>, vector<1x32x4096xbf16>
    %10 = vector.shape_cast %9 : vector<1x32x4096xbf16> to vector<32x4096xbf16>
    %cst_16 = arith.constant dense<0.000000e+00> : vector<16x4096xf32>
    %11 = tpu.matmul %0, %10, %cst_16 {dimension_numbers = #tpu.dot_dimension_numbers<[1], [0], [0], [1], [0, 0, 1, 1], [], []>} : vector<16x32xbf16>, vector<32x4096xbf16>, vector<16x4096xf32> -> vector<16x4096xf32>
    %12 = arith.maximumf %8, %11 : vector<16x4096xf32>
    %c0_17 = arith.constant 0 : index
    %c0_18 = arith.constant 0 : index
    %c8192 = arith.constant 8192 : index
    %13 = vector.load %arg2[%c0_17, %c0_18, %c8192] : memref<1x32x16384xbf16, #tpu.memory_space<vmem>>, vector<1x32x4096xbf16>
    %14 = vector.shape_cast %13 : vector<1x32x4096xbf16> to vector<32x4096xbf16>
    %cst_19 = arith.constant dense<0.000000e+00> : vector<16x4096xf32>
    %15 = tpu.matmul %0, %14, %cst_19 {dimension_numbers = #tpu.dot_dimension_numbers<[1], [0], [0], [1], [0, 0, 1, 1], [], []>} : vector<16x32xbf16>, vector<32x4096xbf16>, vector<16x4096xf32> -> vector<16x4096xf32>
    %16 = arith.maximumf %12, %15 : vector<16x4096xf32>
    %c0_20 = arith.constant 0 : index
    %c0_21 = arith.constant 0 : index
    %c12288 = arith.constant 12288 : index
    %17 = vector.load %arg2[%c0_20, %c0_21, %c12288] : memref<1x32x16384xbf16, #tpu.memory_space<vmem>>, vector<1x32x4096xbf16>
    %18 = vector.shape_cast %17 : vector<1x32x4096xbf16> to vector<32x4096xbf16>
    %cst_22 = arith.constant dense<0.000000e+00> : vector<16x4096xf32>
    %19 = tpu.matmul %0, %18, %cst_22 {dimension_numbers = #tpu.dot_dimension_numbers<[1], [0], [0], [1], [0, 0, 1, 1], [], []>} : vector<16x32xbf16>, vector<32x4096xbf16>, vector<16x4096xf32> -> vector<16x4096xf32>
    %20 = arith.maximumf %16, %19 : vector<16x4096xf32>
    %cst_23 = arith.constant 0.000000e+00 : f32
    %21 = vector.broadcast %cst_23 : f32 to vector<16x4096xf32>
    %22 = arith.maximumf %20, %21 : vector<16x4096xf32>
    %23 = arith.truncf %22 : vector<16x4096xf32> to vector<16x4096xbf16>
    %cst_24 = arith.constant dense<0.000000e+00> : vector<16x160xf32>
    %24 = tpu.matmul %23, %1, %cst_24 {dimension_numbers = #tpu.dot_dimension_numbers<[1], [0], [0], [1], [0, 0, 1, 1], [], []>} : vector<16x4096xbf16>, vector<4096x160xbf16>, vector<16x160xf32> -> vector<16x160xf32>
    %25 = arith.mulf %24, %2 : vector<16x160xf32>
    %cst_25 = arith.constant dense<0.000000e+00> : vector<16x10xf32>
    %26 = tpu.matmul %25, %3, %cst_25 {dimension_numbers = #tpu.dot_dimension_numbers<[1], [0], [0], [1], [0, 0, 1, 1], [], []>} : vector<16x160xf32>, vector<160x10xf32>, vector<16x10xf32> -> vector<16x10xf32>
    %cst_26 = arith.constant dense<0.000000e+00> : vector<10xf32>
    %27 = vector.multi_reduction <add>, %26, %cst_26 [0] : vector<16x10xf32> to vector<10xf32>
    %28 = vector.shape_cast %27 : vector<10xf32> to vector<1x10xf32>
    %c0_27 = arith.constant 0 : index
    %c0_28 = arith.constant 0 : index
    %c0_29 = arith.constant 0 : index
    %29 = vector.load %arg6[%c0_27, %c0_28, %c0_29] : memref<1x8x128xf32, #tpu.memory_space<vmem>>, vector<1x1x10xf32>
    %30 = vector.shape_cast %29 : vector<1x1x10xf32> to vector<1x10xf32>
    %31 = vector.shape_cast %28 : vector<1x10xf32> to vector<1x1x10xf32>
    tpu.vector_store %arg6[%c0_27, %c0_28, %c0_29], %31 {strides = array<i32>} : memref<1x8x128xf32, #tpu.memory_space<vmem>>, vector<1x1x10xf32>,
    return
  }
  func.func @transform_0(%arg0: i32) -> (i32, i32) {
    %c0_i32 = arith.constant 0 : i32
    %c0_i32_0 = arith.constant 0 : i32
    %c0_i32_1 = arith.constant 0 : i32
    return %c0_i32, %c0_i32_0 : i32, i32
  }
  func.func @transform_1(%arg0: i32) -> (i32, i32, i32) {
    %c0_i32 = arith.constant 0 : i32
    %c0_i32_0 = arith.constant 0 : i32
    %c0_i32_1 = arith.constant 0 : i32
    return %arg0, %c0_i32, %c0_i32_0 : i32, i32, i32
  }
  func.func @transform_2(%arg0: i32) -> (i32, i32) {
    %c0_i32 = arith.constant 0 : i32
    %c0_i32_0 = arith.constant 0 : i32
    %c0_i32_1 = arith.constant 0 : i32
    return %c0_i32, %c0_i32_0 : i32, i32
  }
  func.func @transform_3(%arg0: i32) -> (i32, i32) {
    %c0_i32 = arith.constant 0 : i32
    %c0_i32_0 = arith.constant 0 : i32
    %c0_i32_1 = arith.constant 0 : i32
    return %c0_i32, %c0_i32_0 : i32, i32
  }
  func.func @transform_4(%arg0: i32) -> (i32, i32) {
    %c0_i32 = arith.constant 0 : i32
    %c0_i32_0 = arith.constant 0 : i32
    %c0_i32_1 = arith.constant 0 : i32
    return %c0_i32, %c0_i32_0 : i32, i32
  }
  func.func @transform_5(%arg0: i32) -> (i32, i32, i32) {
    %c0_i32 = arith.constant 0 : i32
    %c0_i32_0 = arith.constant 0 : i32
    %c0_i32_1 = arith.constant 0 : i32
    return %arg0, %c0_i32, %c0_i32_0 : i32, i32, i32
  }
}

</mosaic_0001>

<bundles_post_ra>
// kernel: single_cnn_forward.1
= control target key start
LH: loop header
LB: loop body
LE: loop exit
PB: predicated region body
PF: predicated region fallthrough
CT: control target
= control target key end

     0   :  { %s12002_s18 = smov 0   ;;  %s16861_s0 = inlined_call_operand.vmem [shape: bf16[16,32], index: 0, kind: input, shape index: {}]   ;;  %s16862_s1 = inlined_call_operand.vmem [shape: bf16[2,32,16384], index: 1, kind: input, shape index: {}]   ;;  %s16863_s2 = inlined_call_operand.vmem [shape: bf16[4096,160], index: 2, kind: input, shape index: {}]   ;;  %s16864_s3 = inlined_call_operand.vmem [shape: f32[16,160], index: 3, kind: input, shape index: {}]   ;;  %s16865_s4 = inlined_call_operand.vmem [shape: f32[160,10], index: 4, kind: input, shape index: {}]   ;;  %s16866_s5 = inlined_call_operand.vmem [shape: f32[2,8,128], index: 5, kind: output, shape index: {}]  }
   0x1 LB: > { %s7965_s19 = sadd.s32 4294967295, %s11969_s18   ;;  %p7969_p0 = scmp.ge.s32.totalorder %s11969_s18, 1  ;;  %s11969_s18 = sphi %s12002_s18, %s15_s18  }
   0x2   : > { %p187_p1 = scmp.lt.s32.totalorder %s11969_s18, 3 }
   0x4   : > { %p188_p2 = pnand %p7969_p0, %p187_p1 }
   0x6   : > { %191 = sbr.rel (%p188_p2) target bundleno = 1326 (0x52e), region = 40 }
   0xb   : > { %p214_p3 = scmp.lt.s32.totalorder %s7965_s19, 1  ;;  %vm1152_vm0 = vcmask 261120   ;;  %v12036_v21 = vld [vmem:[%s16861_s0] sm:$0xff]  ;;  %vm7900_vm1 = vcmask 80896   ;;  %vm7910_vm2 = vcmask 73728  }
   0xd   : > { %s17079_s19 = smov (!%p214_p3, %s7965_s19), 1 }
   0xe   : > { %s11181_s20 = sshll.u32 %s17079_s19, 11  ;;  %s7972_s11 = sshll.u32 %s17079_s19, 3 }
   0xf   : > { %s12016_s23 = scalar_lea.vmem %s16862_s1, %s11181_s20  ;;  %s222_s14 = scalar_lea.vmem %s16866_s5, %s7972_s11 }
  0x10   : > { %v8107_v0 = vld [vmem:[%s12016_s23 + $0x400] sm:$0xf]  ;;  %v11727_v2 = vld [vmem:[%s12016_s23 + $0x404] sm:$0xf]  ;;  %v11728_v5 = vld [vmem:[%s12016_s23 + $0x40c] sm:$0xf] }
  0x11   : > { %v11743_v1 = vld [vmem:[%s12016_s23 + $0x5fc] sm:$0xf0]  ;;  %v8109_v4 = vld [vmem:[%s12016_s23 + $0x600] sm:$0xf0]  ;;  %v8117_v6 = vld [vmem:[%s12016_s23 + $0x608] sm:$0xf0] }
  0x12   : > { %v8108_v3 = vor.u32 %v11743_v1, %v8107_v0  ;;  %v8112_v7 = vor.u32 %v11727_v2, %v8109_v4  ;;  %v8120_v8 = vor.u32 %v11728_v5, %v8117_v6  ;;  %v8123_v9 = vld [vmem:[%s12016_s23 + $0x410] sm:$0xf]  ;;  %v7979_v11 = vld [vmem:[%s12016_s23] sm:$0xf]  ;;  %v11695_v14 = vld [vmem:[%s12016_s23 + $0x4] sm:$0xf] }
  0x13   : > { %v11745_v10 = vld [vmem:[%s12016_s23 + $0x60c] sm:$0xf0]  ;;  %v11711_v13 = vld [vmem:[%s12016_s23 + $0x1fc] sm:$0xf0]  ;;  %v7981_v15 = vld [vmem:[%s12016_s23 + $0x200] sm:$0xf0] }
  0x14   : > { %1162 = vmatpush.bf16.msra.mxu2 %v8108_v3  ;;  %v8124_v12 = vor.u32 %v11745_v10, %v8123_v9  ;;  %1176 = vmatpush.bf16.msra.mxu1 %v8112_v7  ;;  %v7980_v16 = vor.u32 %v11711_v13, %v7979_v11  ;;  %v7984_v17 = vor.u32 %v11695_v14, %v7981_v15  ;;  %v11696_v18 = vld [vmem:[%s12016_s23 + $0xc] sm:$0xf]  ;;  %v7995_v20 = vld [vmem:[%s12016_s23 + $0x10] sm:$0xf]  ;;  %v8115_v24 = vld [vmem:[%s12016_s23 + $0x408] sm:$0xf] }
  0x15   : > { %1204 = vmatpush.bf16.msra.mxu3 %v8120_v8  ;;  %v7989_v19 = vld [vmem:[%s12016_s23 + $0x208] sm:$0xf0]  ;;  %v11713_v23 = vld [vmem:[%s12016_s23 + $0x20c] sm:$0xf0]  ;;  %v11744_v25 = vld [vmem:[%s12016_s23 + $0x604] sm:$0xf0] }
  0x16   : > { %1218 = vmatpush.bf16.msra.mxu0 %v8124_v12  ;;  %v7992_v22 = vor.u32 %v11696_v18, %v7989_v19  ;;  %v7996_v26 = vor.u32 %v11713_v23, %v7995_v20  ;;  %v8116_v27 = vor.u32 %v11744_v25, %v8115_v24  ;;  %v11729_v28 = vld [vmem:[%s12016_s23 + $0x414] sm:$0xf]  ;;  %v11730_v30 = vld [vmem:[%s12016_s23 + $0x41c] sm:$0xf]  ;;  %v8139_v33 = vld [vmem:[%s12016_s23 + $0x420] sm:$0xf] }
  0x17   : > { %v8125_v29 = vld [vmem:[%s12016_s23 + $0x610] sm:$0xf0]  ;;  %v8133_v32 = vld [vmem:[%s12016_s23 + $0x618] sm:$0xf0]  ;;  %v11747_v34 = vld [vmem:[%s12016_s23 + $0x61c] sm:$0xf0] }
  0x18   : > { %1163 = vmatpush.bf16.msra.mxu2 %v7980_v16  ;;  %v8128_v31 = vor.u32 %v11729_v28, %v8125_v29  ;;  %1177 = vmatpush.bf16.msra.mxu1 %v7984_v17  ;;  %v8136_v35 = vor.u32 %v11730_v30, %v8133_v32  ;;  %v7987_v36 = vld [vmem:[%s12016_s23 + $0x8] sm:$0xf]  ;;  %v11697_v38 = vld [vmem:[%s12016_s23 + $0x14] sm:$0xf]  ;;  %v8140_v39 = vor.u32 %v11747_v34, %v8139_v33  ;;  %v11698_v42 = vld [vmem:[%s12016_s23 + $0x1c] sm:$0xf] }
  0x19   : > { %1205 = vmatpush.bf16.msra.mxu3 %v7992_v22  ;;  %v11712_v37 = vld [vmem:[%s12016_s23 + $0x204] sm:$0xf0]  ;;  %v7997_v41 = vld [vmem:[%s12016_s23 + $0x210] sm:$0xf0]  ;;  %v8005_v43 = vld [vmem:[%s12016_s23 + $0x218] sm:$0xf0] }
  0x1a   : > { %1219 = vmatpush.bf16.msra.mxu0 %v7996_v26  ;;  %v7988_v40 = vor.u32 %v11712_v37, %v7987_v36  ;;  %v8000_v44 = vor.u32 %v11697_v38, %v7997_v41  ;;  %v8011_v45 = vld [vmem:[%s12016_s23 + $0x20] sm:$0xf]  ;;  %v8131_v47 = vld [vmem:[%s12016_s23 + $0x418] sm:$0xf]  ;;  %v11731_v49 = vld [vmem:[%s12016_s23 + $0x424] sm:$0xf]  ;;  %v8008_v51 = vor.u32 %v11698_v42, %v8005_v43 }
  0x1b   : > { %8233 = vmatmul.msk.bf16.vlgmr.msra.gmra.mxu2 %vm1152_vm0, %v12036_v21  ;;  %v11715_v46 = vld [vmem:[%s12016_s23 + $0x21c] sm:$0xf0]  ;;  %8234 = vmatmul.msk.bf16.vlgmr.msra.gmra.mxu1 %vm1152_vm0, %v12036_v21  ;;  %v11746_v48 = vld [vmem:[%s12016_s23 + $0x614] sm:$0xf0]  ;;  %v8141_v50 = vld [vmem:[%s12016_s23 + $0x620] sm:$0xf0] }
  0x1c   : > { %1190 = vmatpush.bf16.msrb.mxu2 %v8116_v27  ;;  %1232 = vmatpush.bf16.msrb.mxu1 %v8128_v31  ;;  %v8132_v52 = vor.u32 %v11746_v48, %v8131_v47  ;;  %v8144_v53 = vor.u32 %v11731_v49, %v8141_v50  ;;  %v11732_v54 = vld [vmem:[%s12016_s23 + $0x42c] sm:$0xf]  ;;  %v8155_v56 = vld [vmem:[%s12016_s23 + $0x430] sm:$0xf]  ;;  %v8012_v57 = vor.u32 %v11715_v46, %v8011_v45  ;;  %v8003_v60 = vld [vmem:[%s12016_s23 + $0x18] sm:$0xf] }
  0x1d   : > { %8236 = vmatmul.msk.bf16.vlgmr.msra.gmra.mxu3 %vm1152_vm0, %v12036_v21  ;;  %8237 = vmatmul.msk.bf16.vlgmr.msra.gmra.mxu0 %vm1152_vm0, %v12036_v21  ;;  %v8149_v55 = vld [vmem:[%s12016_s23 + $0x628] sm:$0xf0]  ;;  %v11749_v59 = vld [vmem:[%s12016_s23 + $0x62c] sm:$0xf0]  ;;  %v11714_v61 = vld [vmem:[%s12016_s23 + $0x214] sm:$0xf0] }
  0x1e   : > { %1260 = vmatpush.bf16.msrb.mxu3 %v8136_v35  ;;  %1274 = vmatpush.bf16.msrb.mxu0 %v8140_v39  ;;  %v8152_v58 = vor.u32 %v11732_v54, %v8149_v55  ;;  %v8156_v62 = vor.u32 %v11749_v59, %v8155_v56  ;;  %v8004_v63 = vor.u32 %v11714_v61, %v8003_v60  ;;  %v11699_v0 = vld [vmem:[%s12016_s23 + $0x24] sm:$0xf]  ;;  %v11700_v2 = vld [vmem:[%s12016_s23 + $0x2c] sm:$0xf]  ;;  %v8027_v5 = vld [vmem:[%s12016_s23 + $0x30] sm:$0xf] }
  0x1f   : > { %v8013_v1 = vld [vmem:[%s12016_s23 + $0x220] sm:$0xf0]  ;;  %v8021_v4 = vld [vmem:[%s12016_s23 + $0x228] sm:$0xf0]  ;;  %v11717_v6 = vld [vmem:[%s12016_s23 + $0x22c] sm:$0xf0] }
  0x20   : > { %1191 = vmatpush.bf16.msrb.mxu2 %v7988_v40  ;;  %1233 = vmatpush.bf16.msrb.mxu1 %v8000_v44  ;;  %v8016_v3 = vor.u32 %v11699_v0, %v8013_v1  ;;  %v8024_v7 = vor.u32 %v11700_v2, %v8021_v4  ;;  %v8028_v8 = vor.u32 %v11717_v6, %v8027_v5  ;;  %v8147_v9 = vld [vmem:[%s12016_s23 + $0x428] sm:$0xf]  ;;  %v11733_v11 = vld [vmem:[%s12016_s23 + $0x434] sm:$0xf]  ;;  %v11734_v13 = vld [vmem:[%s12016_s23 + $0x43c] sm:$0xf] }
  0x21   : > { %v11748_v10 = vld [vmem:[%s12016_s23 + $0x624] sm:$0xf0]  ;;  %v8157_v12 = vld [vmem:[%s12016_s23 + $0x630] sm:$0xf0]  ;;  %v8165_v14 = vld [vmem:[%s12016_s23 + $0x638] sm:$0xf0] }
  0x22   : > { %1261 = vmatpush.bf16.msrb.mxu3 %v8008_v51  ;;  %1275 = vmatpush.bf16.msrb.mxu0 %v8012_v57  ;;  %v8171_v15 = vld [vmem:[%s12016_s23 + $0x440] sm:$0xf]  ;;  %v8148_v17 = vor.u32 %v11748_v10, %v8147_v9  ;;  %v8160_v18 = vor.u32 %v11733_v11, %v8157_v12  ;;  %v8168_v19 = vor.u32 %v11734_v13, %v8165_v14  ;;  %v8019_v20 = vld [vmem:[%s12016_s23 + $0x28] sm:$0xf]  ;;  %v11701_v23 = vld [vmem:[%s12016_s23 + $0x34] sm:$0xf] }
  0x23   : > { %v11751_v16 = vld [vmem:[%s12016_s23 + $0x63c] sm:$0xf0]  ;;  %v11716_v22 = vld [vmem:[%s12016_s23 + $0x224] sm:$0xf0]  ;;  %v8029_v25 = vld [vmem:[%s12016_s23 + $0x230] sm:$0xf0] }
  0x24   : > { %1246 = vmatpush.bf16.msra.mxu2 %v8132_v52  ;;  %1288 = vmatpush.bf16.msra.mxu1 %v8144_v53  ;;  %v8172_v24 = vor.u32 %v11751_v16, %v8171_v15  ;;  %v11702_v26 = vld [vmem:[%s12016_s23 + $0x3c] sm:$0xf]  ;;  %v8043_v28 = vld [vmem:[%s12016_s23 + $0x40] sm:$0xf]  ;;  %v8020_v30 = vor.u32 %v11716_v22, %v8019_v20  ;;  %v8032_v31 = vor.u32 %v11701_v23, %v8029_v25  ;;  %v8163_v34 = vld [vmem:[%s12016_s23 + $0x438] sm:$0xf] }
  0x25   : > { %v8037_v27 = vld [vmem:[%s12016_s23 + $0x238] sm:$0xf0]  ;;  %v11719_v29 = vld [vmem:[%s12016_s23 + $0x23c] sm:$0xf0]  ;;  %v11750_v35 = vld [vmem:[%s12016_s23 + $0x634] sm:$0xf0] }
  0x26   : > { %1316 = vmatpush.bf16.msra.mxu3 %v8152_v58  ;;  %1330 = vmatpush.bf16.msra.mxu0 %v8156_v62  ;;  %v8040_v32 = vor.u32 %v11702_v26, %v8037_v27  ;;  %v8044_v33 = vor.u32 %v11719_v29, %v8043_v28  ;;  %v11735_v36 = vld [vmem:[%s12016_s23 + $0x444] sm:$0xf]  ;;  %v11736_v38 = vld [vmem:[%s12016_s23 + $0x44c] sm:$0xf]  ;;  %v8187_v40 = vld [vmem:[%s12016_s23 + $0x450] sm:$0xf]  ;;  %v8164_v42 = vor.u32 %v11750_v35, %v8163_v34 }
  0x27   : > { %v8173_v37 = vld [vmem:[%s12016_s23 + $0x640] sm:$0xf0]  ;;  %v8181_v39 = vld [vmem:[%s12016_s23 + $0x648] sm:$0xf0]  ;;  %v11753_v41 = vld [vmem:[%s12016_s23 + $0x64c] sm:$0xf0] }
  0x28   : > { %1247 = vmatpush.bf16.msra.mxu2 %v8004_v63  ;;  %1289 = vmatpush.bf16.msra.mxu1 %v8016_v3  ;;  %v8176_v43 = vor.u32 %v11735_v36, %v8173_v37  ;;  %v8184_v44 = vor.u32 %v11736_v38, %v8181_v39  ;;  %v8035_v45 = vld [vmem:[%s12016_s23 + $0x38] sm:$0xf]  ;;  %v11703_v47 = vld [vmem:[%s12016_s23 + $0x44] sm:$0xf]  ;;  %v8188_v48 = vor.u32 %v11753_v41, %v8187_v40  ;;  %v11704_v50 = vld [vmem:[%s12016_s23 + $0x4c] sm:$0xf] }
  0x29   : > { %v11718_v46 = vld [vmem:[%s12016_s23 + $0x234] sm:$0xf0]  ;;  %v8045_v49 = vld [vmem:[%s12016_s23 + $0x240] sm:$0xf0]  ;;  %v8053_v51 = vld [vmem:[%s12016_s23 + $0x248] sm:$0xf0] }
  0x2a   : > { %1317 = vmatpush.bf16.msra.mxu3 %v8024_v7  ;;  %1331 = vmatpush.bf16.msra.mxu0 %v8028_v8  ;;  %v8059_v52 = vld [vmem:[%s12016_s23 + $0x50] sm:$0xf]  ;;  %v8036_v54 = vor.u32 %v11718_v46, %v8035_v45  ;;  %v8048_v55 = vor.u32 %v11703_v47, %v8045_v49  ;;  %v8056_v56 = vor.u32 %v11704_v50, %v8053_v51  ;;  %v8179_v58 = vld [vmem:[%s12016_s23 + $0x448] sm:$0xf]  ;;  %v11737_v60 = vld [vmem:[%s12016_s23 + $0x454] sm:$0xf] }
  0x2b   : > { %8235 = vmatmul.msk.bf16.vlgmr.msrb.gmra.mxu2 %vm1152_vm0, %v12036_v21  ;;  %8238 = vmatmul.msk.bf16.vlgmr.msrb.gmra.mxu1 %vm1152_vm0, %v12036_v21  ;;  %v11721_v53 = vld [vmem:[%s12016_s23 + $0x24c] sm:$0xf0]  ;;  %v11752_v59 = vld [vmem:[%s12016_s23 + $0x644] sm:$0xf0]  ;;  %v8189_v61 = vld [vmem:[%s12016_s23 + $0x650] sm:$0xf0] }
  0x2c   : > { %1302 = vmatpush.bf16.msrb.mxu2 %v8148_v17  ;;  %1344 = vmatpush.bf16.msrb.mxu1 %v8160_v18  ;;  %v8060_v57 = vor.u32 %v11721_v53, %v8059_v52  ;;  %v11738_v62 = vld [vmem:[%s12016_s23 + $0x45c] sm:$0xf]  ;;  %v8203_v0 = vld [vmem:[%s12016_s23 + $0x460] sm:$0xf]  ;;  %v8180_v2 = vor.u32 %v11752_v59, %v8179_v58  ;;  %v8192_v3 = vor.u32 %v11737_v60, %v8189_v61  ;;  %v8051_v5 = vld [vmem:[%s12016_s23 + $0x48] sm:$0xf] }
  0x2d   : > { %8240 = vmatmul.msk.bf16.vlgmr.msrb.gmra.mxu3 %vm1152_vm0, %v12036_v21  ;;  %8241 = vmatmul.msk.bf16.vlgmr.msrb.gmra.mxu0 %vm1152_vm0, %v12036_v21  ;;  %v8197_v63 = vld [vmem:[%s12016_s23 + $0x658] sm:$0xf0]  ;;  %v11755_v1 = vld [vmem:[%s12016_s23 + $0x65c] sm:$0xf0]  ;;  %v11720_v6 = vld [vmem:[%s12016_s23 + $0x244] sm:$0xf0] }
  0x2e   : > { %1372 = vmatpush.bf16.msrb.mxu3 %v8168_v19  ;;  %1386 = vmatpush.bf16.msrb.mxu0 %v8172_v24  ;;  %v8200_v4 = vor.u32 %v11738_v62, %v8197_v63  ;;  %v11705_v7 = vld [vmem:[%s12016_s23 + $0x54] sm:$0xf]  ;;  %v8204_v8 = vor.u32 %v11755_v1, %v8203_v0  ;;  %v11706_v10 = vld [vmem:[%s12016_s23 + $0x5c] sm:$0xf]  ;;  %v8075_v12 = vld [vmem:[%s12016_s23 + $0x60] sm:$0xf]  ;;  %v8052_v14 = vor.u32 %v11720_v6, %v8051_v5 }
  0x2f   : > { %v8061_v9 = vld [vmem:[%s12016_s23 + $0x250] sm:$0xf0]  ;;  %v8069_v11 = vld [vmem:[%s12016_s23 + $0x258] sm:$0xf0]  ;;  %v11723_v13 = vld [vmem:[%s12016_s23 + $0x25c] sm:$0xf0] }
  0x30   : > { %1303 = vmatpush.bf16.msrb.mxu2 %v8020_v30  ;;  %1345 = vmatpush.bf16.msrb.mxu1 %v8032_v31  ;;  %v8064_v15 = vor.u32 %v11705_v7, %v8061_v9  ;;  %v8072_v16 = vor.u32 %v11706_v10, %v8069_v11  ;;  %v8076_v17 = vor.u32 %v11723_v13, %v8075_v12  ;;  %v8195_v18 = vld [vmem:[%s12016_s23 + $0x458] sm:$0xf]  ;;  %v11739_v20 = vld [vmem:[%s12016_s23 + $0x464] sm:$0xf]  ;;  %v11740_v23 = vld [vmem:[%s12016_s23 + $0x46c] sm:$0xf] }
  0x31   : > { %v11754_v19 = vld [vmem:[%s12016_s23 + $0x654] sm:$0xf0]  ;;  %v8205_v22 = vld [vmem:[%s12016_s23 + $0x660] sm:$0xf0]  ;;  %v8213_v24 = vld [vmem:[%s12016_s23 + $0x668] sm:$0xf0] }
  0x32   : > { %1373 = vmatpush.bf16.msrb.mxu3 %v8040_v32  ;;  %1387 = vmatpush.bf16.msrb.mxu0 %v8044_v33  ;;  %v8219_v25 = vld [vmem:[%s12016_s23 + $0x470] sm:$0xf]  ;;  %v8196_v27 = vor.u32 %v11754_v19, %v8195_v18  ;;  %v8208_v28 = vor.u32 %v11739_v20, %v8205_v22  ;;  %v8216_v29 = vor.u32 %v11740_v23, %v8213_v24  ;;  %v8067_v30 = vld [vmem:[%s12016_s23 + $0x58] sm:$0xf]  ;;  %v11707_v32 = vld [vmem:[%s12016_s23 + $0x64] sm:$0xf] }
  0x33   : > { %v11757_v26 = vld [vmem:[%s12016_s23 + $0x66c] sm:$0xf0]  ;;  %v11722_v31 = vld [vmem:[%s12016_s23 + $0x254] sm:$0xf0]  ;;  %v8077_v34 = vld [vmem:[%s12016_s23 + $0x260] sm:$0xf0] }
  0x34   : > { %v8220_v33 = vor.u32 %v11757_v26, %v8219_v25  ;;  %v11708_v35 = vld [vmem:[%s12016_s23 + $0x6c] sm:$0xf]  ;;  %v8091_v37 = vld [vmem:[%s12016_s23 + $0x70] sm:$0xf]  ;;  %v8068_v39 = vor.u32 %v11722_v31, %v8067_v30  ;;  %v8080_v40 = vor.u32 %v11707_v32, %v8077_v34  ;;  %v11741_v45 = vld [vmem:[%s12016_s23 + $0x474] sm:$0xf] }
  0x35   : > { %v8085_v36 = vld [vmem:[%s12016_s23 + $0x268] sm:$0xf0]  ;;  %v11725_v38 = vld [vmem:[%s12016_s23 + $0x26c] sm:$0xf0]  ;;  %v8221_v46 = vld [vmem:[%s12016_s23 + $0x670] sm:$0xf0] }
  0x36   : > { %v8088_v41 = vor.u32 %v11708_v35, %v8085_v36  ;;  %v11742_v47 = vld [vmem:[%s12016_s23 + $0x47c] sm:$0xf]  ;;  %v8395_v49 = vld [vmem:[%s12016_s23 + $0x480] sm:$0xf]  ;;  %v8224_v52 = vor.u32 %v11741_v45, %v8221_v46  ;;  %v8093_v58 = vld [vmem:[%s12016_s23 + $0x270] sm:$0xf0] }
  0x37   : > { %v11807_v50 = vld [vmem:[%s12016_s23 + $0x67c] sm:$0xf0]  ;;  %v11710_v59 = vld [vmem:[%s12016_s23 + $0x7c] sm:$0xf]  ;;  %v11791_v5 = vld [vmem:[%s12016_s23 + $0x484] sm:$0xf] }
  0x38   : > { %v8101_v60 = vld [vmem:[%s12016_s23 + $0x278] sm:$0xf0]  ;;  %v8267_v61 = vld [vmem:[%s12016_s23 + $0x80] sm:$0xf]  ;;  %v8397_v6 = vld [vmem:[%s12016_s23 + $0x680] sm:$0xf0] }
  0x39   : > { %v11775_v62 = vld [vmem:[%s12016_s23 + $0x27c] sm:$0xf0]  ;;  %v8104_v1 = vor.u32 %v11710_v59, %v8101_v60  ;;  %v11792_v7 = vld [vmem:[%s12016_s23 + $0x48c] sm:$0xf]  ;;  %v8411_v9 = vld [vmem:[%s12016_s23 + $0x490] sm:$0xf]  ;;  %v8400_v12 = vor.u32 %v11791_v5, %v8397_v6 }
  0x3a   : > { %v11809_v10 = vld [vmem:[%s12016_s23 + $0x68c] sm:$0xf0]  ;;  %v8269_v18 = vld [vmem:[%s12016_s23 + $0x280] sm:$0xf0]  ;;  %v11760_v19 = vld [vmem:[%s12016_s23 + $0x8c] sm:$0xf] }
  0x3b   : > { %8239 = vmatmul.msk.bf16.vlgmr.msra.gmra.mxu2 %vm1152_vm0, %v12036_v21  ;;  %8242 = vmatmul.msk.bf16.vlgmr.msra.gmra.mxu1 %vm1152_vm0, %v12036_v21  ;;  %v8277_v20 = vld [vmem:[%s12016_s23 + $0x288] sm:$0xf0]  ;;  %v8283_v22 = vld [vmem:[%s12016_s23 + $0x90] sm:$0xf]  ;;  %v11793_v30 = vld [vmem:[%s12016_s23 + $0x494] sm:$0xf] }
  0x3c   : > { %1358 = vmatpush.bf16.msra.mxu2 %v8164_v42  ;;  %1400 = vmatpush.bf16.msra.mxu1 %v8176_v43  ;;  %v8092_v42 = vor.u32 %v11725_v38, %v8091_v37  ;;  %v8211_v43 = vld [vmem:[%s12016_s23 + $0x468] sm:$0xf]  ;;  %v11777_v23 = vld [vmem:[%s12016_s23 + $0x28c] sm:$0xf0]  ;;  %v8280_v26 = vor.u32 %v11760_v19, %v8277_v20  ;;  %v8413_v31 = vld [vmem:[%s12016_s23 + $0x690] sm:$0xf0] }
  0x3d   : > { %8244 = vmatmul.msk.bf16.vlgmr.msra.gmra.mxu3 %vm1152_vm0, %v12036_v21  ;;  %8245 = vmatmul.msk.bf16.vlgmr.msra.gmra.mxu0 %vm1152_vm0, %v12036_v21  ;;  %v11794_v32 = vld [vmem:[%s12016_s23 + $0x49c] sm:$0xf]  ;;  %v8427_v34 = vld [vmem:[%s12016_s23 + $0x4a0] sm:$0xf]  ;;  %v8416_v37 = vor.u32 %v11793_v30, %v8413_v31  ;;  %v11813_v59 = vld [vmem:[%s12016_s23 + $0x6ac] sm:$0xf0] }
  0x3e   : > { %1428 = vmatpush.bf16.msra.mxu3 %v8184_v44  ;;  %1442 = vmatpush.bf16.msra.mxu0 %v8188_v48  ;;  %v11756_v44 = vld [vmem:[%s12016_s23 + $0x664] sm:$0xf0]  ;;  %v8229_v48 = vld [vmem:[%s12016_s23 + $0x678] sm:$0xf0]  ;;  %v11811_v35 = vld [vmem:[%s12016_s23 + $0x69c] sm:$0xf0] }
  0x3f   : > { %v8212_v51 = vor.u32 %v11756_v44, %v8211_v43  ;;  %v8232_v53 = vor.u32 %v11742_v47, %v8229_v48  ;;  %v8285_v43 = vld [vmem:[%s12016_s23 + $0x290] sm:$0xf0]  ;;  %v11762_v44 = vld [vmem:[%s12016_s23 + $0x9c] sm:$0xf]  ;;  %v8299_v46 = vld [vmem:[%s12016_s23 + $0xa0] sm:$0xf] }
  0x40   : > { %1359 = vmatpush.bf16.msra.mxu2 %v8036_v54  ;;  %1401 = vmatpush.bf16.msra.mxu1 %v8048_v55  ;;  %v8083_v54 = vld [vmem:[%s12016_s23 + $0x68] sm:$0xf]  ;;  %v8293_v45 = vld [vmem:[%s12016_s23 + $0x298] sm:$0xf0]  ;;  %v11779_v47 = vld [vmem:[%s12016_s23 + $0x29c] sm:$0xf0] }
  0x41   : > { %v11724_v55 = vld [vmem:[%s12016_s23 + $0x264] sm:$0xf0]  ;;  %v8301_v5 = vld [vmem:[%s12016_s23 + $0x2a0] sm:$0xf0]  ;;  %v11764_v6 = vld [vmem:[%s12016_s23 + $0xac] sm:$0xf] }
  0x42   : > { %1429 = vmatpush.bf16.msra.mxu3 %v8056_v56  ;;  %1443 = vmatpush.bf16.msra.mxu0 %v8060_v57  ;;  %v11709_v56 = vld [vmem:[%s12016_s23 + $0x74] sm:$0xf]  ;;  %v8396_v57 = vor.u32 %v11807_v50, %v8395_v49  ;;  %v8084_v63 = vor.u32 %v11724_v55, %v8083_v54  ;;  %v8296_v50 = vor.u32 %v11762_v44, %v8293_v45  ;;  %v11795_v54 = vld [vmem:[%s12016_s23 + $0x4a4] sm:$0xf]  ;;  %v8435_v19 = vld [vmem:[%s12016_s23 + $0x4a8] sm:$0xf] }
  0x43   : > { %v8096_v0 = vor.u32 %v11709_v56, %v8093_v58  ;;  %v8429_v55 = vld [vmem:[%s12016_s23 + $0x6a0] sm:$0xf0]  ;;  %v11796_v56 = vld [vmem:[%s12016_s23 + $0x4ac] sm:$0xf]  ;;  %v8443_v58 = vld [vmem:[%s12016_s23 + $0x4b0] sm:$0xf] }
  0x44   : > { %v11812_v20 = vld [vmem:[%s12016_s23 + $0x6a4] sm:$0xf0] }
  0x45   : > { %v8436_v30 = vor.u32 %v11812_v20, %v8435_v19 }
  0x4b   : > { %8243 = vmatmul.msk.bf16.vlgmr.msrb.gmra.mxu2 %vm1152_vm0, %v12036_v21  ;;  %8246 = vmatmul.msk.bf16.vlgmr.msrb.gmra.mxu1 %vm1152_vm0, %v12036_v21 }
  0x4c   : > { %1414 = vmatpush.bf16.msrb.mxu2 %v8180_v2  ;;  %1456 = vmatpush.bf16.msrb.mxu1 %v8192_v3  ;;  %v8268_v2 = vor.u32 %v11775_v62, %v8267_v61  ;;  %v8227_v3 = vld [vmem:[%s12016_s23 + $0x478] sm:$0xf] }
  0x4d   : > { %8248 = vmatmul.msk.bf16.vlgmr.msrb.gmra.mxu3 %vm1152_vm0, %v12036_v21  ;;  %8249 = vmatmul.msk.bf16.vlgmr.msrb.gmra.mxu0 %vm1152_vm0, %v12036_v21 }
  0x4e   : > { %1484 = vmatpush.bf16.msrb.mxu3 %v8200_v4  ;;  %1498 = vmatpush.bf16.msrb.mxu0 %v8204_v8  ;;  %v11758_v4 = vld [vmem:[%s12016_s23 + $0x674] sm:$0xf0]  ;;  %v8405_v8 = vld [vmem:[%s12016_s23 + $0x688] sm:$0xf0] }
  0x4f   : > { %v8228_v11 = vor.u32 %v11758_v4, %v8227_v3  ;;  %v8408_v13 = vor.u32 %v11792_v7, %v8405_v8  ;;  %v11763_v3 = vld [vmem:[%s12016_s23 + $0xa4] sm:$0xf]  ;;  %v8444_v4 = vor.u32 %v11813_v59, %v8443_v58  ;;  %v8309_v7 = vld [vmem:[%s12016_s23 + $0x2a8] sm:$0xf0]  ;;  %v8315_v8 = vld [vmem:[%s12016_s23 + $0xb0] sm:$0xf] }
  0x50   : > { %1415 = vmatpush.bf16.msrb.mxu2 %v8052_v14  ;;  %1457 = vmatpush.bf16.msrb.mxu1 %v8064_v15  ;;  %v8099_v14 = vld [vmem:[%s12016_s23 + $0x78] sm:$0xf]  ;;  %v8469_v58 = vld [vmem:[%s12016_s23 + $0x6c8] sm:$0xf0]  ;;  %v8475_v59 = vld [vmem:[%s12016_s23 + $0x4d0] sm:$0xf] }
  0x51   : > { %v11726_v15 = vld [vmem:[%s12016_s23 + $0x274] sm:$0xf0] }
  0x52   : > { %1485 = vmatpush.bf16.msrb.mxu3 %v8072_v16  ;;  %1499 = vmatpush.bf16.msrb.mxu0 %v8076_v17  ;;  %v11759_v16 = vld [vmem:[%s12016_s23 + $0x84] sm:$0xf]  ;;  %v8412_v17 = vor.u32 %v11809_v10, %v8411_v9  ;;  %v8100_v24 = vor.u32 %v11726_v15, %v8099_v14  ;;  %v11781_v9 = vld [vmem:[%s12016_s23 + $0x2ac] sm:$0xf0] }
  0x53   : > { %v8272_v25 = vor.u32 %v11759_v16, %v8269_v18  ;;  %v8316_v15 = vor.u32 %v11781_v9, %v8315_v8  ;;  %v8333_v8 = vld [vmem:[%s12016_s23 + $0x2c0] sm:$0xf0]  ;;  %v11768_v9 = vld [vmem:[%s12016_s23 + $0xcc] sm:$0xf] }
  0x5b   : > { %8247 = vmatmul.msk.bf16.vlgmr.msra.gmra.mxu2 %vm1152_vm0, %v12036_v21  ;;  %8250 = vmatmul.msk.bf16.vlgmr.msra.gmra.mxu1 %vm1152_vm0, %v12036_v21 }
  0x5c   : > { %1470 = vmatpush.bf16.msra.mxu2 %v8196_v27  ;;  %1512 = vmatpush.bf16.msra.mxu1 %v8208_v28  ;;  %v8284_v27 = vor.u32 %v11777_v23, %v8283_v22  ;;  %v8403_v28 = vld [vmem:[%s12016_s23 + $0x488] sm:$0xf]  ;;  %v11797_v22 = vld [vmem:[%s12016_s23 + $0x4b4] sm:$0xf] }
  0x5d   : > { %8252 = vmatmul.msk.bf16.vlgmr.msra.gmra.mxu3 %vm1152_vm0, %v12036_v21  ;;  %8253 = vmatmul.msk.bf16.vlgmr.msra.gmra.mxu0 %vm1152_vm0, %v12036_v21 }
  0x5e   : > { %1540 = vmatpush.bf16.msra.mxu3 %v8216_v29  ;;  %1554 = vmatpush.bf16.msra.mxu0 %v8220_v33  ;;  %v11808_v29 = vld [vmem:[%s12016_s23 + $0x684] sm:$0xf0]  ;;  %v8421_v33 = vld [vmem:[%s12016_s23 + $0x698] sm:$0xf0] }
  0x5f   : > { %v8404_v36 = vor.u32 %v11808_v29, %v8403_v28  ;;  %v8424_v38 = vor.u32 %v11794_v32, %v8421_v33  ;;  %v11815_v28 = vld [vmem:[%s12016_s23 + $0x6bc] sm:$0xf0] }
  0x60   : > { %1471 = vmatpush.bf16.msra.mxu2 %v8068_v39  ;;  %1513 = vmatpush.bf16.msra.mxu1 %v8080_v40  ;;  %v8275_v39 = vld [vmem:[%s12016_s23 + $0x88] sm:$0xf] }
  0x61   : > { %v11776_v40 = vld [vmem:[%s12016_s23 + $0x284] sm:$0xf0] }
  0x62   : > { %1541 = vmatpush.bf16.msra.mxu3 %v8088_v41  ;;  %1555 = vmatpush.bf16.msra.mxu0 %v8092_v42  ;;  %v11761_v41 = vld [vmem:[%s12016_s23 + $0x94] sm:$0xf]  ;;  %v8428_v42 = vor.u32 %v11811_v35, %v8427_v34  ;;  %v8276_v48 = vor.u32 %v11776_v40, %v8275_v39  ;;  %v8307_v34 = vld [vmem:[%s12016_s23 + $0xa8] sm:$0xf]  ;;  %v11766_v39 = vld [vmem:[%s12016_s23 + $0xbc] sm:$0xf] }
  0x63   : > { %v8288_v49 = vor.u32 %v11761_v41, %v8285_v43  ;;  %v11780_v35 = vld [vmem:[%s12016_s23 + $0x2a4] sm:$0xf0]  ;;  %v8325_v40 = vld [vmem:[%s12016_s23 + $0x2b8] sm:$0xf0]  ;;  %v8331_v41 = vld [vmem:[%s12016_s23 + $0xc0] sm:$0xf] }
  0x64   : > { %v8308_v43 = vor.u32 %v11780_v35, %v8307_v34  ;;  %v8477_v35 = vld [vmem:[%s12016_s23 + $0x6d0] sm:$0xf0] }
  0x6b   : > { %8251 = vmatmul.msk.bf16.vlgmr.msrb.gmra.mxu2 %vm1152_vm0, %v12036_v21  ;;  %8254 = vmatmul.msk.bf16.vlgmr.msrb.gmra.mxu1 %vm1152_vm0, %v12036_v21 }
  0x6c   : > { %1526 = vmatpush.bf16.msrb.mxu2 %v8212_v51  ;;  %1568 = vmatpush.bf16.msrb.mxu1 %v8224_v52  ;;  %v8300_v51 = vor.u32 %v11779_v47, %v8299_v46  ;;  %v8419_v52 = vld [vmem:[%s12016_s23 + $0x498] sm:$0xf]  ;;  %v8328_v46 = vor.u32 %v11766_v39, %v8325_v40  ;;  %v11819_v39 = vld [vmem:[%s12016_s23 + $0x6dc] sm:$0xf0] }
  0x6d   : > { %8256 = vmatmul.msk.bf16.vlgmr.msrb.gmra.mxu3 %vm1152_vm0, %v12036_v21  ;;  %8257 = vmatmul.msk.bf16.vlgmr.msrb.gmra.mxu0 %vm1152_vm0, %v12036_v21 }
  0x6e   : > { %1596 = vmatpush.bf16.msrb.mxu3 %v8232_v53  ;;  %1994 = vmatpush.bf16.msrb.mxu0 %v8396_v57  ;;  %v11810_v53 = vld [vmem:[%s12016_s23 + $0x694] sm:$0xf0]  ;;  %v8437_v57 = vld [vmem:[%s12016_s23 + $0x6a8] sm:$0xf0] }
  0x6f   : > { %v8420_v61 = vor.u32 %v11810_v53, %v8419_v52  ;;  %v8451_v52 = vld [vmem:[%s12016_s23 + $0x4b8] sm:$0xf] }
  0x70   : > { %1527 = vmatpush.bf16.msrb.mxu2 %v8084_v63  ;;  %1569 = vmatpush.bf16.msrb.mxu1 %v8096_v0  ;;  %v8432_v63 = vor.u32 %v11795_v54, %v8429_v55  ;;  %v8440_v0 = vor.u32 %v11796_v56, %v8437_v57  ;;  %v11814_v53 = vld [vmem:[%s12016_s23 + $0x6b4] sm:$0xf0]  ;;  %v11799_v54 = vld [vmem:[%s12016_s23 + $0x4c4] sm:$0xf]  ;;  %v11800_v57 = vld [vmem:[%s12016_s23 + $0x4cc] sm:$0xf] }
  0x71   : > { %v8461_v56 = vld [vmem:[%s12016_s23 + $0x6c0] sm:$0xf0] }
  0x72   : > { %1597 = vmatpush.bf16.msrb.mxu3 %v8104_v1  ;;  %1995 = vmatpush.bf16.msrb.mxu0 %v8268_v2  ;;  %v8291_v1 = vld [vmem:[%s12016_s23 + $0x98] sm:$0xf] }
  0x73   : > { %v11778_v2 = vld [vmem:[%s12016_s23 + $0x294] sm:$0xf0] }
  0x74   : > { %v8292_v10 = vor.u32 %v11778_v2, %v8291_v1  ;;  %v8464_v2 = vor.u32 %v11799_v54, %v8461_v56  ;;  %v8349_v54 = vld [vmem:[%s12016_s23 + $0x2d0] sm:$0xf0]  ;;  %v11770_v56 = vld [vmem:[%s12016_s23 + $0xdc] sm:$0xf] }
  0x7b   : > { %8255 = vmatmul.msk.bf16.vlgmr.msra.gmra.mxu2 %vm1152_vm0, %v12036_v21  ;;  %8258 = vmatmul.msk.bf16.vlgmr.msra.gmra.mxu1 %vm1152_vm0, %v12036_v21 }
  0x7c   : > { %1582 = vmatpush.bf16.msra.mxu2 %v8228_v11  ;;  %2008 = vmatpush.bf16.msra.mxu1 %v8400_v12  ;;  %v8304_v12 = vor.u32 %v11763_v3, %v8301_v5  ;;  %v8472_v3 = vor.u32 %v11800_v57, %v8469_v58  ;;  %v11782_v5 = vld [vmem:[%s12016_s23 + $0x2b4] sm:$0xf0]  ;;  %v8357_v57 = vld [vmem:[%s12016_s23 + $0x2d8] sm:$0xf0]  ;;  %v8363_v58 = vld [vmem:[%s12016_s23 + $0xe0] sm:$0xf] }
  0x7d   : > { %8260 = vmatmul.msk.bf16.vlgmr.msra.gmra.mxu3 %vm1152_vm0, %v12036_v21  ;;  %8261 = vmatmul.msk.bf16.vlgmr.msra.gmra.mxu0 %vm1152_vm0, %v12036_v21 }
  0x7e   : > { %2036 = vmatpush.bf16.msra.mxu3 %v8408_v13  ;;  %2050 = vmatpush.bf16.msra.mxu0 %v8412_v17  ;;  %v8312_v13 = vor.u32 %v11764_v6, %v8309_v7  ;;  %v11767_v6 = vld [vmem:[%s12016_s23 + $0xc4] sm:$0xf] }
  0x7f   : > { %v8336_v20 = vor.u32 %v11767_v6, %v8333_v8  ;;  %v8483_v8 = vld [vmem:[%s12016_s23 + $0x4d8] sm:$0xf] }
  0x80   : > { %1583 = vmatpush.bf16.msra.mxu2 %v8100_v24  ;;  %2009 = vmatpush.bf16.msra.mxu1 %v8272_v25  ;;  %v8445_v24 = vld [vmem:[%s12016_s23 + $0x6b0] sm:$0xf0]  ;;  %v11798_v25 = vld [vmem:[%s12016_s23 + $0x4bc] sm:$0xf] }
  0x81   : > { %v8448_v32 = vor.u32 %v11797_v22, %v8445_v24 }
  0x82   : > { %2037 = vmatpush.bf16.msra.mxu3 %v8280_v26  ;;  %2051 = vmatpush.bf16.msra.mxu0 %v8284_v27  ;;  %v8453_v26 = vld [vmem:[%s12016_s23 + $0x6b8] sm:$0xf0]  ;;  %v8459_v27 = vld [vmem:[%s12016_s23 + $0x4c0] sm:$0xf] }
  0x83   : > { %v8456_v33 = vor.u32 %v11798_v25, %v8453_v26 }
  0x8b   : > { %8259 = vmatmul.msk.bf16.vlgmr.msrb.gmra.mxu2 %vm1152_vm0, %v12036_v21  ;;  %8262 = vmatmul.msk.bf16.vlgmr.msrb.gmra.mxu1 %vm1152_vm0, %v12036_v21 }
  0x8c   : > { %2022 = vmatpush.bf16.msrb.mxu2 %v8404_v36  ;;  %2064 = vmatpush.bf16.msrb.mxu1 %v8416_v37  ;;  %v11765_v36 = vld [vmem:[%s12016_s23 + $0xb4] sm:$0xf]  ;;  %v8460_v37 = vor.u32 %v11815_v28, %v8459_v27 }
  0x8d   : > { %8264 = vmatmul.msk.bf16.vlgmr.msrb.gmra.mxu3 %vm1152_vm0, %v12036_v21  ;;  %8521 = vmatmul.msk.bf16.vlgmr.msrb.gmra.mxu0 %vm1152_vm0, %v12036_v21 }
  0x8e   : > { %2092 = vmatpush.bf16.msrb.mxu3 %v8424_v38  ;;  %2106 = vmatpush.bf16.msrb.mxu0 %v8428_v42  ;;  %v8317_v38 = vld [vmem:[%s12016_s23 + $0x2b0] sm:$0xf0]  ;;  %v11783_v42 = vld [vmem:[%s12016_s23 + $0x2bc] sm:$0xf0] }
  0x8f   : > { %v8320_v45 = vor.u32 %v11765_v36, %v8317_v38  ;;  %v11802_v36 = vld [vmem:[%s12016_s23 + $0x4dc] sm:$0xf]  ;;  %v8491_v38 = vld [vmem:[%s12016_s23 + $0x4e0] sm:$0xf] }
  0x90   : > { %2023 = vmatpush.bf16.msrb.mxu2 %v8276_v48  ;;  %2065 = vmatpush.bf16.msrb.mxu1 %v8288_v49  ;;  %v8332_v48 = vor.u32 %v11783_v42, %v8331_v41 }
  0x92   : > { %2093 = vmatpush.bf16.msrb.mxu3 %v8296_v50  ;;  %2107 = vmatpush.bf16.msrb.mxu0 %v8300_v51 }
  0x98   : > { %v12255_v60 = vpop.f32.mrf.mxu1 }
  0x9a   : > { %v12257_v62 = vpop.f32.mrf.mxu0 }
  0x9b   : > { %8263 = vmatmul.msk.bf16.vlgmr.msra.gmra.mxu2 %vm1152_vm0, %v12036_v21  ;;  %8522 = vmatmul.msk.bf16.vlgmr.msra.gmra.mxu1 %vm1152_vm0, %v12036_v21 }
  0x9c   : > { %2078 = vmatpush.bf16.msra.mxu2 %v8420_v61  ;;  %2120 = vmatpush.bf16.msra.mxu1 %v8432_v63  ;;  %v11817_v61 = vld [vmem:[%s12016_s23 + $0x6cc] sm:$0xf0] }
  0x9d   : > { %8524 = vmatmul.msk.bf16.vlgmr.msra.gmra.mxu3 %vm1152_vm0, %v12036_v21  ;;  %8525 = vmatmul.msk.bf16.vlgmr.msra.gmra.mxu0 %vm1152_vm0, %v12036_v21  ;;  %v8476_v7 = vor.u32 %v11817_v61, %v8475_v59  ;;  %v11787_v59 = vld [vmem:[%s12016_s23 + $0x2dc] sm:$0xf0] }
  0x9e   : > { %v12275_v11 = vpop.f32.mrf.mxu2  ;;  %2148 = vmatpush.bf16.msra.mxu3 %v8440_v0  ;;  %2162 = vmatpush.bf16.msra.mxu0 %v8444_v4  ;;  %v8452_v0 = vor.u32 %v11814_v53, %v8451_v52  ;;  %v8323_v4 = vld [vmem:[%s12016_s23 + $0xb8] sm:$0xf]  ;;  %v11769_v52 = vld [vmem:[%s12016_s23 + $0xd4] sm:$0xf]  ;;  %v8492_v53 = vor.u32 %v11819_v39, %v8491_v38  ;;  %v11771_v39 = vld [vmem:[%s12016_s23 + $0xe4] sm:$0xf] }
  0x9f   : > { %v11786_v38 = vld [vmem:[%s12016_s23 + $0x2d4] sm:$0xf0] }
  0xa0   : > { %v12277_v14 = vpop.f32.mrf.mxu3  ;;  %v12279_v16 = vpop.f32.mrf.mxu1  ;;  %2079 = vmatpush.bf16.msra.mxu2 %v8292_v10  ;;  %2121 = vmatpush.bf16.msra.mxu1 %v8304_v12  ;;  %v8341_v10 = vld [vmem:[%s12016_s23 + $0x2c8] sm:$0xf0]  ;;  %v8347_v12 = vld [vmem:[%s12016_s23 + $0xd0] sm:$0xf] }
  0xa1   : > { %v8344_v22 = vor.u32 %v11768_v9, %v8341_v10  ;;  %v11818_v9 = vld [vmem:[%s12016_s23 + $0x6d4] sm:$0xf0]  ;;  %v11803_v10 = vld [vmem:[%s12016_s23 + $0x4e4] sm:$0xf] }
  0xa2   : > { %v12281_v17 = vpop.f32.mrf.mxu0  ;;  %2149 = vmatpush.bf16.msra.mxu3 %v8312_v13  ;;  %2163 = vmatpush.bf16.msra.mxu0 %v8316_v15  ;;  %v11785_v13 = vld [vmem:[%s12016_s23 + $0x2cc] sm:$0xf0]  ;;  %v8324_v15 = vor.u32 %v11782_v5, %v8323_v4  ;;  %v8364_v5 = vor.u32 %v11787_v59, %v8363_v58 }
  0xa3   : > { %v8348_v25 = vor.u32 %v11785_v13, %v8347_v12  ;;  %v8493_v13 = vld [vmem:[%s12016_s23 + $0x6e0] sm:$0xf0] }
  0xa6   : > { %v12283_v18 = vpop.f32.mrf.mxu2 }
  0xa8   : > { %v12288_v23 = vpop.f32.mrf.mxu3  ;;  %v12295_v29 = vpop.f32.mrf.mxu1 }
  0xaa   : > { %v12297_v31 = vpop.f32.mrf.mxu0 }
  0xab   : > { %8523 = vmatmul.msk.bf16.vlgmr.msrb.gmra.mxu2 %vm1152_vm0, %v12036_v21  ;;  %8526 = vmatmul.msk.bf16.vlgmr.msrb.gmra.mxu1 %vm1152_vm0, %v12036_v21 }
  0xac   : > { %2134 = vmatpush.bf16.msrb.mxu2 %v8436_v30  ;;  %2176 = vmatpush.bf16.msrb.mxu1 %v8448_v32  ;;  %v8467_v30 = vld [vmem:[%s12016_s23 + $0x4c8] sm:$0xf] }
  0xad   : > { %8528 = vmatmul.msk.bf16.vlgmr.msrb.gmra.mxu3 %vm1152_vm0, %v12036_v21  ;;  %8529 = vmatmul.msk.bf16.vlgmr.msrb.gmra.mxu0 %vm1152_vm0, %v12036_v21  ;;  %v11816_v32 = vld [vmem:[%s12016_s23 + $0x6c4] sm:$0xf0] }
  0xae   : > { %v12315_v44 = vpop.f32.mrf.mxu2  ;;  %2204 = vmatpush.bf16.msrb.mxu3 %v8456_v33  ;;  %2218 = vmatpush.bf16.msrb.mxu0 %v8460_v37  ;;  %v11801_v33 = vld [vmem:[%s12016_s23 + $0x4d4] sm:$0xf]  ;;  %v8485_v37 = vld [vmem:[%s12016_s23 + $0x6d8] sm:$0xf0]  ;;  %v8468_v41 = vor.u32 %v11816_v32, %v8467_v30  ;;  %v8484_v32 = vor.u32 %v11818_v9, %v8483_v8  ;;  %v8499_v8 = vld [vmem:[%s12016_s23 + $0x4e8] sm:$0xf] }
  0xaf   : > { %v11820_v9 = vld [vmem:[%s12016_s23 + $0x6e4] sm:$0xf0] }
  0xb0   : > { %v12317_v47 = vpop.f32.mrf.mxu3  ;;  %v12319_v49 = vpop.f32.mrf.mxu1  ;;  %2135 = vmatpush.bf16.msrb.mxu2 %v8308_v43  ;;  %2177 = vmatpush.bf16.msrb.mxu1 %v8320_v45  ;;  %v8480_v43 = vor.u32 %v11801_v33, %v8477_v35  ;;  %v8488_v45 = vor.u32 %v11802_v36, %v8485_v37  ;;  %v8496_v35 = vor.u32 %v11803_v10, %v8493_v13  ;;  %v8355_v37 = vld [vmem:[%s12016_s23 + $0xd8] sm:$0xf]  ;;  %v11805_v10 = vld [vmem:[%s12016_s23 + $0x4f4] sm:$0xf] }
  0xb2   : > { %v12321_v50 = vpop.f32.mrf.mxu0  ;;  %2205 = vmatpush.bf16.msrb.mxu3 %v8328_v46  ;;  %2219 = vmatpush.bf16.msrb.mxu0 %v8332_v48  ;;  %v8339_v46 = vld [vmem:[%s12016_s23 + $0xc8] sm:$0xf] }
  0xb3   : > { %v11784_v48 = vld [vmem:[%s12016_s23 + $0x2c4] sm:$0xf0] }
  0xb4   : > { %v8340_v61 = vor.u32 %v11784_v48, %v8339_v46  ;;  %v11772_v46 = vld [vmem:[%s12016_s23 + $0xec] sm:$0xf] }
  0xb5   : > { %v8373_v48 = vld [vmem:[%s12016_s23 + $0x2e8] sm:$0xf0] }
  0xb6   : > { %v12323_v51 = vpop.f32.mrf.mxu2  ;;  %v8376_v58 = vor.u32 %v11772_v46, %v8373_v48  ;;  %v11773_v46 = vld [vmem:[%s12016_s23 + $0xf4] sm:$0xf] }
  0xb8   : > { %v12328_v55 = vpop.f32.mrf.mxu3  ;;  %v12335_v63 = vpop.f32.mrf.mxu1 }
  0xba   : > { %v12337_v1 = vpop.f32.mrf.mxu0 }
  0xbb   : > { %8527 = vmatmul.msk.bf16.vlgmr.msra.gmra.mxu2 %vm1152_vm0, %v12036_v21  ;;  %8530 = vmatmul.msk.bf16.vlgmr.msra.gmra.mxu1 %vm1152_vm0, %v12036_v21 }
  0xbc   : > { %2190 = vmatpush.bf16.msra.mxu2 %v8452_v0  ;;  %2232 = vmatpush.bf16.msra.mxu1 %v8464_v2  ;;  %v8352_v2 = vor.u32 %v11769_v52, %v8349_v54  ;;  %v8379_v52 = vld [vmem:[%s12016_s23 + $0xf0] sm:$0xf]  ;;  %v8356_v54 = vor.u32 %v11786_v38, %v8355_v37 }
  0xbd   : > { %8532 = vmatmul.msk.bf16.vlgmr.msra.gmra.mxu3 %vm1152_vm0, %v12036_v21  ;;  %8533 = vmatmul.msk.bf16.vlgmr.msra.gmra.mxu0 %vm1152_vm0, %v12036_v21 }
  0xbe   : > { %v12355_v19 = vpop.f32.mrf.mxu2  ;;  %2260 = vmatpush.bf16.msra.mxu3 %v8472_v3  ;;  %2274 = vmatpush.bf16.msra.mxu0 %v8476_v7  ;;  %v8360_v3 = vor.u32 %v11770_v56, %v8357_v57 }
  0xc0   : > { %v12357_v24 = vpop.f32.mrf.mxu3  ;;  %v12359_v26 = vpop.f32.mrf.mxu1  ;;  %2191 = vmatpush.bf16.msra.mxu2 %v8324_v15  ;;  %2233 = vmatpush.bf16.msra.mxu1 %v8336_v20  ;;  %v11804_v15 = vld [vmem:[%s12016_s23 + $0x4ec] sm:$0xf] }
  0xc1   : > { %v8501_v20 = vld [vmem:[%s12016_s23 + $0x6e8] sm:$0xf0] }
  0xc2   : > { %v12361_v27 = vpop.f32.mrf.mxu0  ;;  %2261 = vmatpush.bf16.msra.mxu3 %v8344_v22  ;;  %2275 = vmatpush.bf16.msra.mxu0 %v8348_v25  ;;  %v8507_v22 = vld [vmem:[%s12016_s23 + $0x4f0] sm:$0xf]  ;;  %v8504_v36 = vor.u32 %v11804_v15, %v8501_v20  ;;  %v8509_v15 = vld [vmem:[%s12016_s23 + $0x6f0] sm:$0xf0]  ;;  %v11806_v20 = vld [vmem:[%s12016_s23 + $0x4fc] sm:$0xf] }
  0xc3   : > { %16868 = vst [vmem:[#allocation2_spill] sm:$0xff] %v12361_v27  ;;  %v11821_v25 = vld [vmem:[%s12016_s23 + $0x6ec] sm:$0xf0]  ;;  %v8512_v38 = vor.u32 %v11805_v10, %v8509_v15  ;;  %v8645_v27 = vld [vmem:[%s12016_s23 + $0x358] sm:$0xf0] }
  0xc6   : > { %v12363_v28 = vpop.f32.mrf.mxu2 }
  0xc7   : > { %16869 = vst [vmem:[#allocation3_spill] sm:$0xff] %v12363_v28  ;;  %v8637_v28 = vld [vmem:[%s12016_s23 + $0x350] sm:$0xf0] }
  0xc8   : > { %v12368_v34 = vpop.f32.mrf.mxu3  ;;  %v12375_v40 = vpop.f32.mrf.mxu1 }
  0xc9   : > { %16870 = vst [vmem:[#allocation4_spill] sm:$0xff] %v12368_v34  ;;  %v11833_v34 = vld [vmem:[%s12016_s23 + $0x154] sm:$0xf] }
  0xca   : > { %16871 = vst [vmem:[#allocation5_spill] sm:$0xff] %v12375_v40  ;;  %v12377_v42 = vpop.f32.mrf.mxu0  ;;  %v11848_v40 = vld [vmem:[%s12016_s23 + $0x344] sm:$0xf0] }
  0xcb   : > { %16872 = vst [vmem:[#allocation6_spill] sm:$0xff] %v12377_v42  ;;  %8531 = vmatmul.msk.bf16.vlgmr.msrb.gmra.mxu2 %vm1152_vm0, %v12036_v21  ;;  %8534 = vmatmul.msk.bf16.vlgmr.msrb.gmra.mxu1 %vm1152_vm0, %v12036_v21  ;;  %v8627_v42 = vld [vmem:[%s12016_s23 + $0x148] sm:$0xf] }
  0xcc   : > { %2246 = vmatpush.bf16.msrb.mxu2 %v8468_v41  ;;  %2288 = vmatpush.bf16.msrb.mxu1 %v8480_v43  ;;  %v12425_v41 = vld [vmem:[%s16861_s0] sm:$0xff]  ;;  %v8508_v43 = vor.u32 %v11821_v25, %v8507_v22  ;;  %v8517_v22 = vld [vmem:[%s12016_s23 + $0x6f8] sm:$0xf0] }
  0xcd   : > { %8536 = vmatmul.msk.bf16.vlgmr.msrb.gmra.mxu3 %vm1152_vm0, %v12036_v21  ;;  %8537 = vmatmul.msk.bf16.vlgmr.msrb.gmra.mxu0 %vm1152_vm0, %v12036_v21  ;;  %v8683_v25 = vld [vmem:[%s12016_s23 + $0x500] sm:$0xf] }
  0xce   : > { %v12395_v0 = vpop.f32.mrf.mxu2  ;;  %2316 = vmatpush.bf16.msrb.mxu3 %v8488_v45  ;;  %2330 = vmatpush.bf16.msrb.mxu0 %v8492_v53  ;;  %v8365_v45 = vld [vmem:[%s12016_s23 + $0x2e0] sm:$0xf0]  ;;  %v11789_v53 = vld [vmem:[%s12016_s23 + $0x2ec] sm:$0xf0] }
  0xcf   : > { %16873 = vst [vmem:[#allocation7_spill] sm:$0xff] %v12395_v0  ;;  %v8368_v57 = vor.u32 %v11771_v39, %v8365_v45  ;;  %v8520_v39 = vor.u32 %v11806_v20, %v8517_v22  ;;  %v11788_v45 = vld [vmem:[%s12016_s23 + $0x2e4] sm:$0xf0] }
  0xd0   : > { %v12397_v4 = vpop.f32.mrf.mxu3  ;;  %v12399_v21 = vpop.f32.mrf.mxu1  ;;  %2247 = vmatpush.bf16.msrb.mxu2 %v8340_v61  ;;  %2289 = vmatpush.bf16.msrb.mxu1 %v8352_v2  ;;  %v8380_v61 = vor.u32 %v11789_v53, %v8379_v52  ;;  %v8381_v52 = vld [vmem:[%s12016_s23 + $0x2f0] sm:$0xf0]  ;;  %v11774_v53 = vld [vmem:[%s12016_s23 + $0xfc] sm:$0xf] }
  0xd1   : > { %16874 = vst [vmem:[#allocation8_spill] sm:$0xff] %v12397_v4  ;;  %v8629_v4 = vld [vmem:[%s12016_s23 + $0x348] sm:$0xf0] }
  0xd2   : > { %16875 = vst [vmem:[#allocation9_spill] sm:$0xff] %v12399_v21  ;;  %v12401_v6 = vpop.f32.mrf.mxu0  ;;  %2317 = vmatpush.bf16.msrb.mxu3 %v8360_v3  ;;  %2331 = vmatpush.bf16.msrb.mxu0 %v8364_v5  ;;  %v11832_v21 = vld [vmem:[%s12016_s23 + $0x14c] sm:$0xf] }
  0xd3   : > { %16876 = vst [vmem:[#allocation10_spill] sm:$0xff] %v12401_v6  ;;  %v11826_v6 = vld [vmem:[%s12016_s23 + $0x11c] sm:$0xf] }
  0xd6   : > { %v12403_v7 = vpop.f32.mrf.mxu2 }
  0xd7   : > { %16877 = vst [vmem:[#allocation11_spill] sm:$0xff] %v12403_v7  ;;  %v8621_v7 = vld [vmem:[%s12016_s23 + $0x340] sm:$0xf0] }
  0xd8   : > { %v12408_v12 = vpop.f32.mrf.mxu3  ;;  %v12415_v30 = vpop.f32.mrf.mxu1 }
  0xd9   : > { %16878 = vst [vmem:[#allocation12_spill] sm:$0xff] %v12408_v12 }
  0xda   : > { %16879 = vst [vmem:[#allocation13_spill] sm:$0xff] %v12415_v30  ;;  %v12417_v33 = vpop.f32.mrf.mxu0  ;;  %v11831_v30 = vld [vmem:[%s12016_s23 + $0x144] sm:$0xf] }
  0xdb   : > { %16880 = vst [vmem:[#allocation14_spill] sm:$0xff] %v12417_v33  ;;  %8535 = vmatmul.msk.bf16.vlgmr.msra.gmra.mxu2 %vm1152_vm0, %v12425_v41  ;;  %8538 = vmatmul.msk.bf16.vlgmr.msra.gmra.mxu1 %vm1152_vm0, %v12425_v41  ;;  %v11846_v33 = vld [vmem:[%s12016_s23 + $0x334] sm:$0xf0] }
  0xdc   : > { %2302 = vmatpush.bf16.msra.mxu2 %v8484_v32  ;;  %2344 = vmatpush.bf16.msra.mxu1 %v8496_v35  ;;  %v11871_v32 = vld [vmem:[%s12016_s23 + $0x6fc] sm:$0xf0] }
  0xdd   : > { %8540 = vmatmul.msk.bf16.vlgmr.msra.gmra.mxu3 %vm1152_vm0, %v12425_v41  ;;  %8541 = vmatmul.msk.bf16.vlgmr.msra.gmra.mxu0 %vm1152_vm0, %v12425_v41  ;;  %v8684_v48 = vor.u32 %v11871_v32, %v8683_v25 }
  0xde   : > { %v12440_v56 = vpop.f32.mrf.mxu2  ;;  %2372 = vmatpush.bf16.msra.mxu3 %v8504_v36  ;;  %2386 = vmatpush.bf16.msra.mxu0 %v8508_v43  ;;  %v8500_v36 = vor.u32 %v11820_v9, %v8499_v8  ;;  %v8371_v43 = vld [vmem:[%s12016_s23 + $0xe8] sm:$0xf]  ;;  %v8384_v9 = vor.u32 %v11773_v46, %v8381_v52  ;;  %v11856_v46 = vld [vmem:[%s12016_s23 + $0x50c] sm:$0xf]  ;;  %v8699_v52 = vld [vmem:[%s12016_s23 + $0x510] sm:$0xf] }
  0xdf   : > { %16881 = vst [vmem:[#allocation15_spill] sm:$0xff] %v12440_v56  ;;  %v8611_v56 = vld [vmem:[%s12016_s23 + $0x138] sm:$0xf] }
  0xe0   : > { %v12442_v59 = vpop.f32.mrf.mxu3  ;;  %v12444_v2 = vpop.f32.mrf.mxu1  ;;  %2303 = vmatpush.bf16.msra.mxu2 %v8356_v54  ;;  %2345 = vmatpush.bf16.msra.mxu1 %v8368_v57  ;;  %v8389_v54 = vld [vmem:[%s12016_s23 + $0x2f8] sm:$0xf0]  ;;  %v8555_v57 = vld [vmem:[%s12016_s23 + $0x100] sm:$0xf] }
  0xe1   : > { %16882 = vst [vmem:[#allocation16_spill] sm:$0xff] %v12442_v59  ;;  %v8392_v10 = vor.u32 %v11774_v53, %v8389_v54  ;;  %v11873_v53 = vld [vmem:[%s12016_s23 + $0x70c] sm:$0xf0] }
  0xe2   : > { %16883 = vst [vmem:[#allocation17_spill] sm:$0xff] %v12444_v2  ;;  %v12446_v3 = vpop.f32.mrf.mxu0  ;;  %2373 = vmatpush.bf16.msra.mxu3 %v8376_v58  ;;  %2387 = vmatpush.bf16.msra.mxu0 %v8380_v61  ;;  %v11839_v58 = vld [vmem:[%s12016_s23 + $0x2fc] sm:$0xf0]  ;;  %v8372_v61 = vor.u32 %v11788_v45, %v8371_v43  ;;  %v8685_v45 = vld [vmem:[%s12016_s23 + $0x700] sm:$0xf0] }
  0xe3   : > { %16884 = vst [vmem:[#allocation18_spill] sm:$0xff] %v12446_v3  ;;  %v8556_v20 = vor.u32 %v11839_v58, %v8555_v57  ;;  %v8573_v2 = vld [vmem:[%s12016_s23 + $0x310] sm:$0xf0] }
  0xe6   : > { %v12448_v5 = vpop.f32.mrf.mxu2 }
  0xe7   : > { %16885 = vst [vmem:[#allocation19_spill] sm:$0xff] %v12448_v5  ;;  %v8613_v5 = vld [vmem:[%s12016_s23 + $0x338] sm:$0xf0] }
  0xe8   : > { %v12453_v13 = vpop.f32.mrf.mxu3  ;;  %v12460_v35 = vpop.f32.mrf.mxu1 }
  0xe9   : > { %16886 = vst [vmem:[#allocation20_spill] sm:$0xff] %v12453_v13  ;;  %v8565_v13 = vld [vmem:[%s12016_s23 + $0x308] sm:$0xf0] }
  0xea   : > { %16887 = vst [vmem:[#allocation21_spill] sm:$0xff] %v12460_v35  ;;  %v12462_v37 = vpop.f32.mrf.mxu0  ;;  %v11830_v35 = vld [vmem:[%s12016_s23 + $0x13c] sm:$0xf] }
  0xeb   : > { %16888 = vst [vmem:[#allocation22_spill] sm:$0xff] %v12462_v37  ;;  %8539 = vmatmul.msk.bf16.vlgmr.msrb.gmra.mxu2 %vm1152_vm0, %v12425_v41  ;;  %8542 = vmatmul.msk.bf16.vlgmr.msrb.gmra.mxu1 %vm1152_vm0, %v12425_v41  ;;  %v8605_v37 = vld [vmem:[%s12016_s23 + $0x330] sm:$0xf0] }
  0xec   : > { %2358 = vmatpush.bf16.msrb.mxu2 %v8500_v36  ;;  %2400 = vmatpush.bf16.msrb.mxu1 %v8512_v38  ;;  %v8515_v36 = vld [vmem:[%s12016_s23 + $0x4f8] sm:$0xf] }
  0xed   : > { %8544 = vmatmul.msk.bf16.vlgmr.msrb.gmra.mxu3 %vm1152_vm0, %v12425_v41  ;;  %8545 = vmatmul.msk.bf16.vlgmr.msrb.gmra.mxu0 %vm1152_vm0, %v12425_v41  ;;  %v11822_v38 = vld [vmem:[%s12016_s23 + $0x6f4] sm:$0xf0] }
  0xee   : > { %v12480_v8 = vpop.f32.mrf.mxu2  ;;  %2428 = vmatpush.bf16.msrb.mxu3 %v8520_v39  ;;  %2890 = vmatpush.bf16.msrb.mxu0 %v8684_v48  ;;  %v11855_v39 = vld [vmem:[%s12016_s23 + $0x504] sm:$0xf]  ;;  %v8693_v48 = vld [vmem:[%s12016_s23 + $0x708] sm:$0xf0]  ;;  %v8516_v57 = vor.u32 %v11822_v38, %v8515_v36  ;;  %v8571_v36 = vld [vmem:[%s12016_s23 + $0x110] sm:$0xf] }
  0xef   : > { %16889 = vst [vmem:[#allocation23_spill] sm:$0xff] %v12480_v8  ;;  %v11841_v38 = vld [vmem:[%s12016_s23 + $0x30c] sm:$0xf0] }
  0xf0   : > { %v12482_v15 = vpop.f32.mrf.mxu3  ;;  %v12484_v22 = vpop.f32.mrf.mxu1  ;;  %2359 = vmatpush.bf16.msrb.mxu2 %v8372_v61  ;;  %2401 = vmatpush.bf16.msrb.mxu1 %v8384_v9  ;;  %v8688_v61 = vor.u32 %v11855_v39, %v8685_v45  ;;  %v8696_v9 = vor.u32 %v11856_v46, %v8693_v48 }
  0xf1   : > { %16890 = vst [vmem:[#allocation24_spill] sm:$0xff] %v12482_v15  ;;  %v11829_v15 = vld [vmem:[%s12016_s23 + $0x134] sm:$0xf] }
  0xf2   : > { %16891 = vst [vmem:[#allocation25_spill] sm:$0xff] %v12484_v22  ;;  %v12486_v25 = vpop.f32.mrf.mxu0  ;;  %2429 = vmatpush.bf16.msrb.mxu3 %v8392_v10  ;;  %2891 = vmatpush.bf16.msrb.mxu0 %v8556_v20  ;;  %v8387_v10 = vld [vmem:[%s12016_s23 + $0xf8] sm:$0xf]  ;;  %v11824_v22 = vld [vmem:[%s12016_s23 + $0x10c] sm:$0xf] }
  0xf3   : > { %16892 = vst [vmem:[#allocation26_spill] sm:$0xff] %v12486_v25  ;;  %v11790_v20 = vld [vmem:[%s12016_s23 + $0x2f4] sm:$0xf0]  ;;  %v8557_v25 = vld [vmem:[%s12016_s23 + $0x300] sm:$0xf0]  ;;  %v8568_v48 = vor.u32 %v11824_v22, %v8565_v13 }
  0xf4   : > { %v8388_v39 = vor.u32 %v11790_v20, %v8387_v10  ;;  %v8691_v13 = vld [vmem:[%s12016_s23 + $0x508] sm:$0xf]  ;;  %v8709_v20 = vld [vmem:[%s12016_s23 + $0x718] sm:$0xf0] }
  0xf5   : > { %v11872_v22 = vld [vmem:[%s12016_s23 + $0x704] sm:$0xf0] }
  0xf6   : > { %v12488_v32 = vpop.f32.mrf.mxu2 }
  0xf7   : > { %16893 = vst [vmem:[#allocation27_spill] sm:$0xff] %v12488_v32  ;;  %v8700_v32 = vor.u32 %v11873_v53, %v8699_v52  ;;  %v8572_v53 = vor.u32 %v11841_v38, %v8571_v36  ;;  %v8715_v36 = vld [vmem:[%s12016_s23 + $0x520] sm:$0xf] }
  0xf8   : > { %v12493_v43 = vpop.f32.mrf.mxu3  ;;  %v12500_v54 = vpop.f32.mrf.mxu1  ;;  %v11875_v38 = vld [vmem:[%s12016_s23 + $0x71c] sm:$0xf0] }
  0xf9   : > { %16894 = vst [vmem:[#allocation28_spill] sm:$0xff] %v12493_v43  ;;  %v11823_v43 = vld [vmem:[%s12016_s23 + $0x104] sm:$0xf]  ;;  %v8716_v3 = vor.u32 %v11875_v38, %v8715_v36 }
  0xfa   : > { %16895 = vst [vmem:[#allocation29_spill] sm:$0xff] %v12500_v54  ;;  %v12502_v58 = vpop.f32.mrf.mxu0  ;;  %v8560_v46 = vor.u32 %v11823_v43, %v8557_v25  ;;  %v11857_v43 = vld [vmem:[%s12016_s23 + $0x514] sm:$0xf]  ;;  %v11844_v54 = vld [vmem:[%s12016_s23 + $0x324] sm:$0xf0] }
  0xfb   : > { %16896 = vst [vmem:[#allocation30_spill] sm:$0xff] %v12502_v58  ;;  %8543 = vmatmul.msk.bf16.vlgmr.msra.gmra.mxu2 %vm1152_vm0, %v12425_v41  ;;  %8546 = vmatmul.msk.bf16.vlgmr.msra.gmra.mxu1 %vm1152_vm0, %v12425_v41  ;;  %v8597_v58 = vld [vmem:[%s12016_s23 + $0x328] sm:$0xf0] }
  0xfc   : > { %2414 = vmatpush.bf16.msra.mxu2 %v8516_v57  ;;  %2904 = vmatpush.bf16.msra.mxu1 %v8688_v61  ;;  %v8701_v61 = vld [vmem:[%s12016_s23 + $0x710] sm:$0xf0] }
  0xfd   : > { %8548 = vmatmul.msk.bf16.vlgmr.msra.gmra.mxu3 %vm1152_vm0, %v12425_v41  ;;  %8549 = vmatmul.msk.bf16.vlgmr.msra.gmra.mxu0 %vm1152_vm0, %v12425_v41 }
  0xfe   : > { %v12520_v45 = vpop.f32.mrf.mxu2  ;;  %2932 = vmatpush.bf16.msra.mxu3 %v8696_v9  ;;  %2946 = vmatpush.bf16.msra.mxu0 %v8700_v32  ;;  %v11858_v9 = vld [vmem:[%s12016_s23 + $0x51c] sm:$0xf] }
  0xff   : > { %16897 = vst [vmem:[#allocation31_spill] sm:$0xff] %v12520_v45  ;;  %v11828_v45 = vld [vmem:[%s12016_s23 + $0x12c] sm:$0xf] }
 0x100   : > { %v12522_v52 = vpop.f32.mrf.mxu3  ;;  %v12524_v57 = vpop.f32.mrf.mxu1  ;;  %2415 = vmatpush.bf16.msra.mxu2 %v8388_v39  ;;  %2905 = vmatpush.bf16.msra.mxu1 %v8560_v46  ;;  %v8692_v46 = vor.u32 %v11872_v22, %v8691_v13  ;;  %v8587_v13 = vld [vmem:[%s12016_s23 + $0x120] sm:$0xf] }
 0x101   : > { %16898 = vst [vmem:[#allocation32_spill] sm:$0xff] %v12522_v52  ;;  %v8581_v52 = vld [vmem:[%s12016_s23 + $0x318] sm:$0xf0]  ;;  %v11843_v22 = vld [vmem:[%s12016_s23 + $0x31c] sm:$0xf0] }
 0x102   : > { %16899 = vst [vmem:[#allocation33_spill] sm:$0xff] %v12524_v57  ;;  %v12526_v10 = vpop.f32.mrf.mxu0  ;;  %2933 = vmatpush.bf16.msra.mxu3 %v8568_v48  ;;  %2947 = vmatpush.bf16.msra.mxu0 %v8572_v53  ;;  %v8704_v53 = vor.u32 %v11857_v43, %v8701_v61  ;;  %v11840_v57 = vld [vmem:[%s12016_s23 + $0x304] sm:$0xf0]  ;;  %v8588_v38 = vor.u32 %v11843_v22, %v8587_v13  ;;  %v8731_v13 = vld [vmem:[%s12016_s23 + $0x530] sm:$0xf] }
 0x103   : > { %16900 = vst [vmem:[#allocation34_spill] sm:$0xff] %v12526_v10  ;;  %v8563_v10 = vld [vmem:[%s12016_s23 + $0x108] sm:$0xf]  ;;  %v11877_v22 = vld [vmem:[%s12016_s23 + $0x72c] sm:$0xf0] }
 0x104   : > { %v8564_v43 = vor.u32 %v11840_v57, %v8563_v10  ;;  %v11859_v10 = vld [vmem:[%s12016_s23 + $0x524] sm:$0xf] }
 0x106   : > { %v12528_v25 = vpop.f32.mrf.mxu2 }
 0x107   : > { %16901 = vst [vmem:[#allocation35_spill] sm:$0xff] %v12528_v25  ;;  %v8712_v25 = vor.u32 %v11858_v9, %v8709_v20  ;;  %v8584_v20 = vor.u32 %v11826_v6, %v8581_v52  ;;  %v8707_v6 = vld [vmem:[%s12016_s23 + $0x518] sm:$0xf] }
 0x108   : > { %v12533_v32 = vpop.f32.mrf.mxu3  ;;  %v12540_v39 = vpop.f32.mrf.mxu1  ;;  %v11874_v52 = vld [vmem:[%s12016_s23 + $0x714] sm:$0xf0] }
 0x109   : > { %16902 = vst [vmem:[#allocation36_spill] sm:$0xff] %v12533_v32  ;;  %v11825_v32 = vld [vmem:[%s12016_s23 + $0x114] sm:$0xf] }
 0x10a   : > { %16903 = vst [vmem:[#allocation37_spill] sm:$0xff] %v12540_v39  ;;  %v12542_v48 = vpop.f32.mrf.mxu0  ;;  %v8576_v9 = vor.u32 %v11825_v32, %v8573_v2  ;;  %v11860_v32 = vld [vmem:[%s12016_s23 + $0x52c] sm:$0xf]  ;;  %v8589_v39 = vld [vmem:[%s12016_s23 + $0x320] sm:$0xf0] }
 0x10b   : > { %8547 = vmatmul.msk.bf16.vlgmr.msrb.gmra.mxu2 %vm1152_vm0, %v12425_v41  ;;  %8550 = vmatmul.msk.bf16.vlgmr.msrb.gmra.mxu1 %vm1152_vm0, %v12425_v41 }
 0x10c   : > { %2918 = vmatpush.bf16.msrb.mxu2 %v8692_v46  ;;  %2960 = vmatpush.bf16.msrb.mxu1 %v8704_v53  ;;  %v8725_v53 = vld [vmem:[%s12016_s23 + $0x728] sm:$0xf0] }
 0x10d   : > { %8552 = vmatmul.msk.bf16.vlgmr.msrb.gmra.mxu3 %vm1152_vm0, %v12425_v41  ;;  %8809 = vmatmul.msk.bf16.vlgmr.msrb.gmra.mxu0 %vm1152_vm0, %v12425_v41 }
 0x10e   : > { %v12560_v61 = vpop.f32.mrf.mxu2  ;;  %2988 = vmatpush.bf16.msrb.mxu3 %v8712_v25  ;;  %3002 = vmatpush.bf16.msrb.mxu0 %v8716_v3  ;;  %v8717_v25 = vld [vmem:[%s12016_s23 + $0x720] sm:$0xf0] }
 0x10f   : > { %16904 = vst [vmem:[#allocation38_spill] sm:$0xff] %v12560_v61  ;;  %v8732_v61 = vor.u32 %v11877_v22, %v8731_v13 }
 0x110   : > { %v12562_v36 = vpop.f32.mrf.mxu3  ;;  %v12564_v46 = vpop.f32.mrf.mxu1  ;;  %2919 = vmatpush.bf16.msrb.mxu2 %v8564_v43  ;;  %2961 = vmatpush.bf16.msrb.mxu1 %v8576_v9  ;;  %v8708_v9 = vor.u32 %v11874_v52, %v8707_v6  ;;  %v8603_v6 = vld [vmem:[%s12016_s23 + $0x130] sm:$0xf] }
 0x111   : > { %16905 = vst [vmem:[#allocation39_spill] sm:$0xff] %v12562_v36  ;;  %v11842_v36 = vld [vmem:[%s12016_s23 + $0x314] sm:$0xf0]  ;;  %v11845_v52 = vld [vmem:[%s12016_s23 + $0x32c] sm:$0xf0] }
 0x112   : > { %16906 = vst [vmem:[#allocation40_spill] sm:$0xff] %v12564_v46  ;;  %v12566_v57 = vpop.f32.mrf.mxu0  ;;  %2989 = vmatpush.bf16.msrb.mxu3 %v8584_v20  ;;  %3003 = vmatpush.bf16.msrb.mxu0 %v8588_v38  ;;  %v8720_v38 = vor.u32 %v11859_v10, %v8717_v25  ;;  %v8579_v46 = vld [vmem:[%s12016_s23 + $0x118] sm:$0xf]  ;;  %v8604_v22 = vor.u32 %v11845_v52, %v8603_v6  ;;  %v8747_v6 = vld [vmem:[%s12016_s23 + $0x540] sm:$0xf] }
 0x113   : > { %v8580_v10 = vor.u32 %v11842_v36, %v8579_v46  ;;  %v11861_v46 = vld [vmem:[%s12016_s23 + $0x534] sm:$0xf]  ;;  %v11879_v52 = vld [vmem:[%s12016_s23 + $0x73c] sm:$0xf0] }
 0x114   : > { %v8748_v8 = vor.u32 %v11879_v52, %v8747_v6 }
 0x116   : > { %v12568_v2 = vpop.f32.mrf.mxu2 }
 0x117   : > { %16907 = vst [vmem:[#allocation41_spill] sm:$0xff] %v12568_v2  ;;  %v8728_v2 = vor.u32 %v11860_v32, %v8725_v53  ;;  %v8600_v53 = vor.u32 %v11828_v45, %v8597_v58  ;;  %v8723_v58 = vld [vmem:[%s12016_s23 + $0x528] sm:$0xf] }
 0x118   : > { %v12573_v3 = vpop.f32.mrf.mxu3  ;;  %v12580_v43 = vpop.f32.mrf.mxu1  ;;  %v11876_v45 = vld [vmem:[%s12016_s23 + $0x724] sm:$0xf0] }
 0x119   : > { %16908 = vst [vmem:[#allocation42_spill] sm:$0xff] %v12573_v3  ;;  %v11827_v3 = vld [vmem:[%s12016_s23 + $0x124] sm:$0xf] }
 0x11a   : > { %v12582_v20 = vpop.f32.mrf.mxu0  ;;  %v8592_v32 = vor.u32 %v11827_v3, %v8589_v39  ;;  %v11862_v3 = vld [vmem:[%s12016_s23 + $0x53c] sm:$0xf] }
 0x11b   : > { %8551 = vmatmul.msk.bf16.vlgmr.msra.gmra.mxu2 %vm1152_vm0, %v12425_v41  ;;  %8810 = vmatmul.msk.bf16.vlgmr.msra.gmra.mxu1 %vm1152_vm0, %v12425_v41 }
 0x11c   : > { %2974 = vmatpush.bf16.msra.mxu2 %v8708_v9  ;;  %3016 = vmatpush.bf16.msra.mxu1 %v8720_v38  ;;  %v8741_v38 = vld [vmem:[%s12016_s23 + $0x738] sm:$0xf0] }
 0x11d   : > { %8812 = vmatmul.msk.bf16.vlgmr.msra.gmra.mxu3 %vm1152_vm0, %v12425_v41  ;;  %8813 = vmatmul.msk.bf16.vlgmr.msra.gmra.mxu0 %vm1152_vm0, %v12425_v41 }
 0x11e   : > { %v12600_v25 = vpop.f32.mrf.mxu2  ;;  %3044 = vmatpush.bf16.msra.mxu3 %v8728_v2  ;;  %3058 = vmatpush.bf16.msra.mxu0 %v8732_v61  ;;  %v8733_v2 = vld [vmem:[%s12016_s23 + $0x730] sm:$0xf0] }
 0x11f   : > { %16909 = vst [vmem:[#allocation43_spill] sm:$0xff] %v12600_v25  ;;  %v8595_v25 = vld [vmem:[%s12016_s23 + $0x128] sm:$0xf] }
 0x120   : > { %v12602_v13 = vpop.f32.mrf.mxu3  ;;  %v12604_v9 = vpop.f32.mrf.mxu1  ;;  %2975 = vmatpush.bf16.msra.mxu2 %v8580_v10  ;;  %3017 = vmatpush.bf16.msra.mxu1 %v8592_v32  ;;  %v8724_v32 = vor.u32 %v11876_v45, %v8723_v58  ;;  %v8619_v58 = vld [vmem:[%s12016_s23 + $0x140] sm:$0xf] }
 0x121   : > { %v11847_v45 = vld [vmem:[%s12016_s23 + $0x33c] sm:$0xf0] }
 0x122   : > { %v12606_v36 = vpop.f32.mrf.mxu0  ;;  %3045 = vmatpush.bf16.msra.mxu3 %v8600_v53  ;;  %3059 = vmatpush.bf16.msra.mxu0 %v8604_v22  ;;  %v8736_v22 = vor.u32 %v11861_v46, %v8733_v2  ;;  %v8596_v46 = vor.u32 %v11844_v54, %v8595_v25  ;;  %v8620_v52 = vor.u32 %v11847_v45, %v8619_v58  ;;  %v8749_v25 = vld [vmem:[%s12016_s23 + $0x740] sm:$0xf0]  ;;  %v8763_v58 = vld [vmem:[%s12016_s23 + $0x550] sm:$0xf] }
 0x123   : > { %v11881_v45 = vld [vmem:[%s12016_s23 + $0x74c] sm:$0xf0] }
 0x124   : > { %v8764_v12 = vor.u32 %v11881_v45, %v8763_v58 }
 0x126   : > { %v12608_v39 = vpop.f32.mrf.mxu2 }
 0x127   : > { %16910 = vst [vmem:[#allocation44_spill] sm:$0xff] %v12608_v39  ;;  %v8744_v39 = vor.u32 %v11862_v3, %v8741_v38  ;;  %v8608_v3 = vor.u32 %v11829_v15, %v8605_v37  ;;  %v8616_v38 = vor.u32 %v11830_v35, %v8613_v5  ;;  %v8739_v5 = vld [vmem:[%s12016_s23 + $0x538] sm:$0xf]  ;;  %v11863_v15 = vld [vmem:[%s12016_s23 + $0x544] sm:$0xf] }
 0x128   : > { %v12613_v61 = vpop.f32.mrf.mxu3  ;;  %v12620_v10 = vpop.f32.mrf.mxu1  ;;  %v11878_v35 = vld [vmem:[%s12016_s23 + $0x734] sm:$0xf0] }
 0x12a   : > { %v12622_v53 = vpop.f32.mrf.mxu0 }
 0x12b   : > { %8811 = vmatmul.msk.bf16.vlgmr.msrb.gmra.mxu2 %vm1152_vm0, %v12425_v41  ;;  %8814 = vmatmul.msk.bf16.vlgmr.msrb.gmra.mxu1 %vm1152_vm0, %v12425_v41 }
 0x12c   : > { %3030 = vmatpush.bf16.msrb.mxu2 %v8724_v32  ;;  %3072 = vmatpush.bf16.msrb.mxu1 %v8736_v22  ;;  %v8757_v22 = vld [vmem:[%s12016_s23 + $0x748] sm:$0xf0] }
 0x12d   : > { %8816 = vmatmul.msk.bf16.vlgmr.msrb.gmra.mxu3 %vm1152_vm0, %v12425_v41  ;;  %8817 = vmatmul.msk.bf16.vlgmr.msrb.gmra.mxu0 %vm1152_vm0, %v12425_v41 }
 0x12e   : > { %v12640_v2 = vpop.f32.mrf.mxu2  ;;  %3100 = vmatpush.bf16.msrb.mxu3 %v8744_v39  ;;  %3114 = vmatpush.bf16.msrb.mxu0 %v8748_v8  ;;  %v11864_v39 = vld [vmem:[%s12016_s23 + $0x54c] sm:$0xf] }
 0x12f   : > { %v8760_v59 = vor.u32 %v11864_v39, %v8757_v22  ;;  %v8624_v39 = vor.u32 %v11831_v30, %v8621_v7  ;;  %v8632_v22 = vor.u32 %v11832_v21, %v8629_v4  ;;  %v8755_v4 = vld [vmem:[%s12016_s23 + $0x548] sm:$0xf]  ;;  %v11865_v30 = vld [vmem:[%s12016_s23 + $0x554] sm:$0xf] }
 0x130   : > { %v12642_v6 = vpop.f32.mrf.mxu3  ;;  %v12644_v32 = vpop.f32.mrf.mxu1  ;;  %3031 = vmatpush.bf16.msrb.mxu2 %v8596_v46  ;;  %3073 = vmatpush.bf16.msrb.mxu1 %v8608_v3  ;;  %v8740_v3 = vor.u32 %v11878_v35, %v8739_v5  ;;  %v8635_v5 = vld [vmem:[%s12016_s23 + $0x150] sm:$0xf]  ;;  %v11880_v21 = vld [vmem:[%s12016_s23 + $0x744] sm:$0xf0] }
 0x131   : > { %v11849_v35 = vld [vmem:[%s12016_s23 + $0x34c] sm:$0xf0] }
 0x132   : > { %v12646_v54 = vpop.f32.mrf.mxu0  ;;  %3101 = vmatpush.bf16.msrb.mxu3 %v8616_v38  ;;  %3115 = vmatpush.bf16.msrb.mxu0 %v8620_v52  ;;  %v8752_v52 = vor.u32 %v11863_v15, %v8749_v25  ;;  %v8612_v15 = vor.u32 %v11846_v33, %v8611_v56  ;;  %v8636_v45 = vor.u32 %v11849_v35, %v8635_v5  ;;  %v8765_v56 = vld [vmem:[%s12016_s23 + $0x750] sm:$0xf0]  ;;  %v8779_v5 = vld [vmem:[%s12016_s23 + $0x560] sm:$0xf] }
 0x133   : > { %v11883_v35 = vld [vmem:[%s12016_s23 + $0x75c] sm:$0xf0] }
 0x136   : > { %v12648_v37 = vpop.f32.mrf.mxu2 }
 0x138   : > { %v12653_v8 = vpop.f32.mrf.mxu3  ;;  %v12660_v46 = vpop.f32.mrf.mxu1 }
 0x13a   : > { %v12662_v38 = vpop.f32.mrf.mxu0 }
 0x13b   : > { %8815 = vmatmul.msk.bf16.vlgmr.msra.gmra.mxu2 %vm1152_vm0, %v12425_v41  ;;  %8818 = vmatmul.msk.bf16.vlgmr.msra.gmra.mxu1 %vm1152_vm0, %v12425_v41 }
 0x13c   : > { %3086 = vmatpush.bf16.msra.mxu2 %v8740_v3  ;;  %3128 = vmatpush.bf16.msra.mxu1 %v8752_v52  ;;  %v8773_v52 = vld [vmem:[%s12016_s23 + $0x758] sm:$0xf0] }
 0x13d   : > { %8820 = vmatmul.msk.bf16.vlgmr.msra.gmra.mxu3 %vm1152_vm0, %v12425_v41  ;;  %8821 = vmatmul.msk.bf16.vlgmr.msra.gmra.mxu0 %vm1152_vm0, %v12425_v41 }
 0x13e   : > { %v12680_v25 = vpop.f32.mrf.mxu2  ;;  %3156 = vmatpush.bf16.msra.mxu3 %v8760_v59  ;;  %3170 = vmatpush.bf16.msra.mxu0 %v8764_v12  ;;  %v11866_v59 = vld [vmem:[%s12016_s23 + $0x55c] sm:$0xf] }
 0x13f   : > { %v8776_v0 = vor.u32 %v11866_v59, %v8773_v52  ;;  %v8640_v59 = vor.u32 %v11833_v34, %v8637_v28  ;;  %v11882_v34 = vld [vmem:[%s12016_s23 + $0x754] sm:$0xf0] }
 0x140   : > { %v12682_v58 = vpop.f32.mrf.mxu3  ;;  %v12684_v3 = vpop.f32.mrf.mxu1  ;;  %3087 = vmatpush.bf16.msra.mxu2 %v8612_v15  ;;  %3129 = vmatpush.bf16.msra.mxu1 %v8624_v39  ;;  %v8756_v39 = vor.u32 %v11880_v21, %v8755_v4  ;;  %v8651_v4 = vld [vmem:[%s12016_s23 + $0x160] sm:$0xf] }
 0x141   : > { %v11851_v21 = vld [vmem:[%s12016_s23 + $0x35c] sm:$0xf0] }
 0x142   : > { %v12686_v33 = vpop.f32.mrf.mxu0  ;;  %3157 = vmatpush.bf16.msra.mxu3 %v8632_v22  ;;  %3171 = vmatpush.bf16.msra.mxu0 %v8636_v45  ;;  %v8768_v45 = vor.u32 %v11865_v30, %v8765_v56  ;;  %v8628_v30 = vor.u32 %v11848_v40, %v8627_v42  ;;  %v11867_v42 = vld [vmem:[%s12016_s23 + $0x564] sm:$0xf] }
 0x143   : > { %16911 = vst [vmem:[#allocation45_spill] sm:$0xff] %v12686_v33  ;;  %v11890_v33 = vld [vmem:[%s12016_s23 + $0x19c] sm:$0xf] }
 0x146   : > { %v12688_v7 = vpop.f32.mrf.mxu2 }
 0x147   : > { %16912 = vst [vmem:[#allocation46_spill] sm:$0xff] %v12688_v7  ;;  %v11834_v7 = vld [vmem:[%s12016_s23 + $0x15c] sm:$0xf] }
 0x148   : > { %v12693_v12 = vpop.f32.mrf.mxu3  ;;  %v12700_v15 = vpop.f32.mrf.mxu1  ;;  %v8648_v52 = vor.u32 %v11834_v7, %v8645_v27  ;;  %v8771_v27 = vld [vmem:[%s12016_s23 + $0x558] sm:$0xf]  ;;  %v8781_v7 = vld [vmem:[%s12016_s23 + $0x760] sm:$0xf0] }
 0x149   : > { %16913 = vst [vmem:[#allocation47_spill] sm:$0xff] %v12693_v12  ;;  %v8780_v12 = vor.u32 %v11883_v35, %v8779_v5  ;;  %v8652_v35 = vor.u32 %v11851_v21, %v8651_v4  ;;  %v8795_v4 = vld [vmem:[%s12016_s23 + $0x570] sm:$0xf] }
 0x14a   : > { %16914 = vst [vmem:[#allocation48_spill] sm:$0xff] %v12700_v15  ;;  %v12702_v22 = vpop.f32.mrf.mxu0  ;;  %v11885_v21 = vld [vmem:[%s12016_s23 + $0x76c] sm:$0xf0]  ;;  %v8661_v15 = vld [vmem:[%s12016_s23 + $0x368] sm:$0xf0] }
 0x14b   : > { %16915 = vst [vmem:[#allocation49_spill] sm:$0xff] %v12702_v22  ;;  %8819 = vmatmul.msk.bf16.vlgmr.msrb.gmra.mxu2 %vm1152_vm0, %v12425_v41  ;;  %8822 = vmatmul.msk.bf16.vlgmr.msrb.gmra.mxu1 %vm1152_vm0, %v12425_v41  ;;  %v11836_v22 = vld [vmem:[%s12016_s23 + $0x16c] sm:$0xf] }
 0x14c   : > { %3142 = vmatpush.bf16.msrb.mxu2 %v8756_v39  ;;  %3184 = vmatpush.bf16.msrb.mxu1 %v8768_v45  ;;  %v8789_v45 = vld [vmem:[%s12016_s23 + $0x768] sm:$0xf0] }
 0x14d   : > { %8824 = vmatmul.msk.bf16.vlgmr.msrb.gmra.mxu3 %vm1152_vm0, %v12425_v41  ;;  %8825 = vmatmul.msk.bf16.vlgmr.msrb.gmra.mxu0 %vm1152_vm0, %v12425_v41 }
 0x14e   : > { %v12720_v56 = vpop.f32.mrf.mxu2  ;;  %3212 = vmatpush.bf16.msrb.mxu3 %v8776_v0  ;;  %3226 = vmatpush.bf16.msrb.mxu0 %v8780_v12  ;;  %v11868_v12 = vld [vmem:[%s12016_s23 + $0x56c] sm:$0xf] }
 0x14f   : > { %16916 = vst [vmem:[#allocation50_spill] sm:$0xff] %v12720_v56  ;;  %v8653_v56 = vld [vmem:[%s12016_s23 + $0x360] sm:$0xf0] }
 0x150   : > { %v12722_v5 = vpop.f32.mrf.mxu3  ;;  %v12724_v39 = vpop.f32.mrf.mxu1  ;;  %3143 = vmatpush.bf16.msrb.mxu2 %v8628_v30  ;;  %3185 = vmatpush.bf16.msrb.mxu1 %v8640_v59  ;;  %v8772_v59 = vor.u32 %v11882_v34, %v8771_v27  ;;  %v8667_v27 = vld [vmem:[%s12016_s23 + $0x170] sm:$0xf] }
 0x151   : > { %16917 = vst [vmem:[#allocation51_spill] sm:$0xff] %v12722_v5  ;;  %v8796_v5 = vor.u32 %v11885_v21, %v8795_v4  ;;  %v11853_v34 = vld [vmem:[%s12016_s23 + $0x36c] sm:$0xf0] }
 0x152   : > { %16918 = vst [vmem:[#allocation52_spill] sm:$0xff] %v12724_v39  ;;  %v12726_v40 = vpop.f32.mrf.mxu0  ;;  %3213 = vmatpush.bf16.msrb.mxu3 %v8648_v52  ;;  %3227 = vmatpush.bf16.msrb.mxu0 %v8652_v35  ;;  %v8784_v35 = vor.u32 %v11867_v42, %v8781_v7  ;;  %v11850_v39 = vld [vmem:[%s12016_s23 + $0x354] sm:$0xf0]  ;;  %v8668_v21 = vor.u32 %v11853_v34, %v8667_v27  ;;  %v8971_v27 = vld [vmem:[%s12016_s23 + $0x580] sm:$0xf] }
 0x153   : > { %16919 = vst [vmem:[#allocation53_spill] sm:$0xff] %v12726_v40  ;;  %v8792_v40 = vor.u32 %v11868_v12, %v8789_v45  ;;  %v8664_v45 = vor.u32 %v11836_v22, %v8661_v15  ;;  %v8787_v15 = vld [vmem:[%s12016_s23 + $0x568] sm:$0xf]  ;;  %v11935_v34 = vld [vmem:[%s12016_s23 + $0x77c] sm:$0xf0] }
 0x154   : > { %v11884_v22 = vld [vmem:[%s12016_s23 + $0x764] sm:$0xf0] }
 0x156   : > { %v12728_v28 = vpop.f32.mrf.mxu2 }
 0x157   : > { %16920 = vst [vmem:[#allocation54_spill] sm:$0xff] %v12728_v28  ;;  %v8643_v28 = vld [vmem:[%s12016_s23 + $0x158] sm:$0xf] }
 0x158   : > { %v12733_v0 = vpop.f32.mrf.mxu3  ;;  %v12740_v30 = vpop.f32.mrf.mxu1  ;;  %v8644_v42 = vor.u32 %v11850_v39, %v8643_v28  ;;  %v8797_v28 = vld [vmem:[%s12016_s23 + $0x770] sm:$0xf0] }
 0x159   : > { %16921 = vst [vmem:[#allocation55_spill] sm:$0xff] %v12733_v0  ;;  %v11835_v0 = vld [vmem:[%s12016_s23 + $0x164] sm:$0xf] }
 0x15a   : > { %16922 = vst [vmem:[#allocation56_spill] sm:$0xff] %v12740_v30  ;;  %v12742_v52 = vpop.f32.mrf.mxu0  ;;  %v8656_v12 = vor.u32 %v11835_v0, %v8653_v56  ;;  %v11870_v0 = vld [vmem:[%s12016_s23 + $0x57c] sm:$0xf] }
 0x15b   : > { %16923 = vst [vmem:[#allocation57_spill] sm:$0xff] %v12742_v52  ;;  %8823 = vmatmul.msk.bf16.vlgmr.msra.gmra.mxu2 %vm1152_vm0, %v12425_v41  ;;  %8826 = vmatmul.msk.bf16.vlgmr.msra.gmra.mxu1 %vm1152_vm0, %v12425_v41  ;;  %v11838_v52 = vld [vmem:[%s12016_s23 + $0x17c] sm:$0xf] }
 0x15c   : > { %3198 = vmatpush.bf16.msra.mxu2 %v8772_v59  ;;  %3240 = vmatpush.bf16.msra.mxu1 %v8784_v35  ;;  %v8805_v35 = vld [vmem:[%s12016_s23 + $0x778] sm:$0xf0] }
 0x15d   : > { %8828 = vmatmul.msk.bf16.vlgmr.msra.gmra.mxu3 %vm1152_vm0, %v12425_v41  ;;  %8829 = vmatmul.msk.bf16.vlgmr.msra.gmra.mxu0 %vm1152_vm0, %v12425_v41  ;;  %v8677_v30 = vld [vmem:[%s12016_s23 + $0x378] sm:$0xf0] }
 0x15e   : > { %v12760_v7 = vpop.f32.mrf.mxu2  ;;  %3268 = vmatpush.bf16.msra.mxu3 %v8792_v40  ;;  %3282 = vmatpush.bf16.msra.mxu0 %v8796_v5  ;;  %v11869_v40 = vld [vmem:[%s12016_s23 + $0x574] sm:$0xf] }
 0x15f   : > { %16924 = vst [vmem:[#allocation58_spill] sm:$0xff] %v12760_v7  ;;  %v8669_v7 = vld [vmem:[%s12016_s23 + $0x370] sm:$0xf0] }
 0x160   : > { %v12762_v4 = vpop.f32.mrf.mxu3  ;;  %v12764_v59 = vpop.f32.mrf.mxu1  ;;  %3199 = vmatpush.bf16.msra.mxu2 %v8644_v42  ;;  %3241 = vmatpush.bf16.msra.mxu1 %v8656_v12  ;;  %v8788_v12 = vor.u32 %v11884_v22, %v8787_v15  ;;  %v8843_v15 = vld [vmem:[%s12016_s23 + $0x180] sm:$0xf] }
 0x161   : > { %16925 = vst [vmem:[#allocation59_spill] sm:$0xff] %v12762_v4  ;;  %v8972_v4 = vor.u32 %v11935_v34, %v8971_v27  ;;  %v11903_v22 = vld [vmem:[%s12016_s23 + $0x37c] sm:$0xf0] }
 0x162   : > { %16926 = vst [vmem:[#allocation60_spill] sm:$0xff] %v12764_v59  ;;  %v12766_v39 = vpop.f32.mrf.mxu0  ;;  %3269 = vmatpush.bf16.msra.mxu3 %v8664_v45  ;;  %3283 = vmatpush.bf16.msra.mxu0 %v8668_v21  ;;  %v8800_v21 = vor.u32 %v11869_v40, %v8797_v28  ;;  %v8659_v59 = vld [vmem:[%s12016_s23 + $0x168] sm:$0xf]  ;;  %v8844_v34 = vor.u32 %v11903_v22, %v8843_v15  ;;  %v8987_v15 = vld [vmem:[%s12016_s23 + $0x590] sm:$0xf] }
 0x163   : > { %16927 = vst [vmem:[#allocation61_spill] sm:$0xff] %v12766_v39  ;;  %v8808_v39 = vor.u32 %v11870_v0, %v8805_v35  ;;  %v8680_v35 = vor.u32 %v11838_v52, %v8677_v30  ;;  %v8803_v30 = vld [vmem:[%s12016_s23 + $0x578] sm:$0xf]  ;;  %v11937_v22 = vld [vmem:[%s12016_s23 + $0x78c] sm:$0xf0] }
 0x164   : > { %v11886_v52 = vld [vmem:[%s12016_s23 + $0x774] sm:$0xf0] }
 0x166   : > { %v12768_v56 = vpop.f32.mrf.mxu2 }
 0x167   : > { %16928 = vst [vmem:[#allocation62_spill] sm:$0xff] %v12768_v56  ;;  %v11852_v56 = vld [vmem:[%s12016_s23 + $0x364] sm:$0xf0] }
 0x168   : > { %v12773_v5 = vpop.f32.mrf.mxu3  ;;  %v12780_v42 = vpop.f32.mrf.mxu1  ;;  %v8660_v40 = vor.u32 %v11852_v56, %v8659_v59  ;;  %v8973_v56 = vld [vmem:[%s12016_s23 + $0x780] sm:$0xf0] }
 0x169   : > { %16929 = vst [vmem:[#allocation63_spill] sm:$0xff] %v12773_v5  ;;  %v11837_v5 = vld [vmem:[%s12016_s23 + $0x174] sm:$0xf] }
 0x16a   : > { %16930 = vst [vmem:[#allocation64_spill] sm:$0xff] %v12780_v42  ;;  %v12782_v45 = vpop.f32.mrf.mxu0  ;;  %v8672_v0 = vor.u32 %v11837_v5, %v8669_v7  ;;  %v11920_v5 = vld [vmem:[%s12016_s23 + $0x58c] sm:$0xf] }
 0x16b   : > { %16931 = vst [vmem:[#allocation65_spill] sm:$0xff] %v12782_v45  ;;  %8827 = vmatmul.msk.bf16.vlgmr.msrb.gmra.mxu2 %vm1152_vm0, %v12425_v41  ;;  %8830 = vmatmul.msk.bf16.vlgmr.msrb.gmra.mxu1 %vm1152_vm0, %v12425_v41  ;;  %v11888_v45 = vld [vmem:[%s12016_s23 + $0x18c] sm:$0xf] }
 0x16c   : > { %3254 = vmatpush.bf16.msrb.mxu2 %v8788_v12  ;;  %3296 = vmatpush.bf16.msrb.mxu1 %v8800_v21  ;;  %v8981_v21 = vld [vmem:[%s12016_s23 + $0x788] sm:$0xf0] }
 0x16d   : > { %8832 = vmatmul.msk.bf16.vlgmr.msrb.gmra.mxu3 %vm1152_vm0, %v12425_v41  ;;  %8833 = vmatmul.msk.bf16.vlgmr.msrb.gmra.mxu0 %vm1152_vm0, %v12425_v41  ;;  %v8853_v42 = vld [vmem:[%s12016_s23 + $0x388] sm:$0xf0] }
 0x16e   : > { %v12800_v28 = vpop.f32.mrf.mxu2  ;;  %3324 = vmatpush.bf16.msrb.mxu3 %v8808_v39  ;;  %3786 = vmatpush.bf16.msrb.mxu0 %v8972_v4  ;;  %v11919_v39 = vld [vmem:[%s12016_s23 + $0x584] sm:$0xf] }
 0x16f   : > { %16932 = vst [vmem:[#allocation66_spill] sm:$0xff] %v12800_v28  ;;  %v8845_v28 = vld [vmem:[%s12016_s23 + $0x380] sm:$0xf0] }
 0x170   : > { %v12802_v27 = vpop.f32.mrf.mxu3  ;;  %v12804_v12 = vpop.f32.mrf.mxu1  ;;  %3255 = vmatpush.bf16.msrb.mxu2 %v8660_v40  ;;  %3297 = vmatpush.bf16.msrb.mxu1 %v8672_v0  ;;  %v8804_v0 = vor.u32 %v11886_v52, %v8803_v30  ;;  %v8859_v30 = vld [vmem:[%s12016_s23 + $0x190] sm:$0xf] }
 0x171   : > { %16933 = vst [vmem:[#allocation67_spill] sm:$0xff] %v12802_v27  ;;  %v8988_v27 = vor.u32 %v11937_v22, %v8987_v15  ;;  %v11905_v52 = vld [vmem:[%s12016_s23 + $0x38c] sm:$0xf0] }
 0x172   : > { %16934 = vst [vmem:[#allocation68_spill] sm:$0xff] %v12804_v12  ;;  %v12806_v59 = vpop.f32.mrf.mxu0  ;;  %3325 = vmatpush.bf16.msrb.mxu3 %v8680_v35  ;;  %3787 = vmatpush.bf16.msrb.mxu0 %v8844_v34  ;;  %v8976_v34 = vor.u32 %v11919_v39, %v8973_v56  ;;  %v11854_v12 = vld [vmem:[%s12016_s23 + $0x374] sm:$0xf0]  ;;  %v8860_v22 = vor.u32 %v11905_v52, %v8859_v30  ;;  %v9003_v30 = vld [vmem:[%s12016_s23 + $0x5a0] sm:$0xf] }
 0x173   : > { %16935 = vst [vmem:[#allocation69_spill] sm:$0xff] %v12806_v59  ;;  %v8675_v59 = vld [vmem:[%s12016_s23 + $0x178] sm:$0xf]  ;;  %v11939_v52 = vld [vmem:[%s12016_s23 + $0x79c] sm:$0xf0] }
 0x174   : > { %v8676_v39 = vor.u32 %v11854_v12, %v8675_v59 }
 0x176   : > { %v12808_v7 = vpop.f32.mrf.mxu2 }
 0x177   : > { %16936 = vst [vmem:[#allocation70_spill] sm:$0xff] %v12808_v7  ;;  %v8984_v7 = vor.u32 %v11920_v5, %v8981_v21  ;;  %v8856_v21 = vor.u32 %v11888_v45, %v8853_v42  ;;  %v8979_v42 = vld [vmem:[%s12016_s23 + $0x588] sm:$0xf] }
 0x178   : > { %v12813_v4 = vpop.f32.mrf.mxu3  ;;  %v12820_v40 = vpop.f32.mrf.mxu1  ;;  %v11936_v45 = vld [vmem:[%s12016_s23 + $0x784] sm:$0xf0] }
 0x179   : > { %16937 = vst [vmem:[#allocation71_spill] sm:$0xff] %v12813_v4  ;;  %v11887_v4 = vld [vmem:[%s12016_s23 + $0x184] sm:$0xf] }
 0x17a   : > { %16938 = vst [vmem:[#allocation72_spill] sm:$0xff] %v12820_v40  ;;  %v12822_v35 = vpop.f32.mrf.mxu0  ;;  %v8848_v5 = vor.u32 %v11887_v4, %v8845_v28  ;;  %v11921_v28 = vld [vmem:[%s12016_s23 + $0x594] sm:$0xf]  ;;  %v11922_v4 = vld [vmem:[%s12016_s23 + $0x59c] sm:$0xf] }
 0x17b   : > { %16939 = vst [vmem:[#allocation73_spill] sm:$0xff] %v12822_v35  ;;  %8831 = vmatmul.msk.bf16.vlgmr.msra.gmra.mxu2 %vm1152_vm0, %v12425_v41  ;;  %8834 = vmatmul.msk.bf16.vlgmr.msra.gmra.mxu1 %vm1152_vm0, %v12425_v41  ;;  %v9004_v35 = vor.u32 %v11939_v52, %v9003_v30  ;;  %v8861_v40 = vld [vmem:[%s12016_s23 + $0x390] sm:$0xf0]  ;;  %v9013_v52 = vld [vmem:[%s12016_s23 + $0x7a8] sm:$0xf0] }
 0x17c   : > { %3310 = vmatpush.bf16.msra.mxu2 %v8804_v0  ;;  %3800 = vmatpush.bf16.msra.mxu1 %v8976_v34  ;;  %v8997_v34 = vld [vmem:[%s12016_s23 + $0x798] sm:$0xf0] }
 0x17d   : > { %8836 = vmatmul.msk.bf16.vlgmr.msra.gmra.mxu3 %vm1152_vm0, %v12425_v41  ;;  %8837 = vmatmul.msk.bf16.vlgmr.msra.gmra.mxu0 %vm1152_vm0, %v12425_v41 }
 0x17e   : > { %v12840_v56 = vpop.f32.mrf.mxu2  ;;  %3828 = vmatpush.bf16.msra.mxu3 %v8984_v7  ;;  %3842 = vmatpush.bf16.msra.mxu0 %v8988_v27  ;;  %v8989_v7 = vld [vmem:[%s12016_s23 + $0x790] sm:$0xf0] }
 0x17f   : > { %16940 = vst [vmem:[#allocation74_spill] sm:$0xff] %v12840_v56 }
 0x180   : > { %v12842_v15 = vpop.f32.mrf.mxu3  ;;  %v12844_v0 = vpop.f32.mrf.mxu1  ;;  %3311 = vmatpush.bf16.msra.mxu2 %v8676_v39  ;;  %3801 = vmatpush.bf16.msra.mxu1 %v8848_v5  ;;  %v2436_v39 = vmax.f32 %v12275_v11, %v12542_v48  ;;  %v8869_v11 = vld [vmem:[%s12016_s23 + $0x398] sm:$0xf0]  ;;  %v8875_v48 = vld [vmem:[%s12016_s23 + $0x1a0] sm:$0xf] }
 0x181   : > { %16941 = vst [vmem:[#allocation75_spill] sm:$0xff] %v12842_v15  ;;  %v11889_v15 = vld [vmem:[%s12016_s23 + $0x194] sm:$0xf] }
 0x182   : > { %16942 = vst [vmem:[#allocation76_spill] sm:$0xff] %v12844_v0  ;;  %v12846_v12 = vpop.f32.mrf.mxu0  ;;  %3829 = vmatpush.bf16.msra.mxu3 %v8856_v21  ;;  %3843 = vmatpush.bf16.msra.mxu0 %v8860_v22  ;;  %v8980_v21 = vor.u32 %v11936_v45, %v8979_v42  ;;  %v11904_v0 = vld [vmem:[%s12016_s23 + $0x384] sm:$0xf0]  ;;  %v11907_v42 = vld [vmem:[%s12016_s23 + $0x39c] sm:$0xf0] }
 0x183   : > { %16943 = vst [vmem:[#allocation77_spill] sm:$0xff] %v12846_v12  ;;  %v9000_v12 = vor.u32 %v11922_v4, %v8997_v34  ;;  %v8872_v4 = vor.u32 %v11890_v33, %v8869_v11  ;;  %v8876_v30 = vor.u32 %v11907_v42, %v8875_v48  ;;  %v2440_v11 = vmax.f32 %v12257_v62, %v12582_v20  ;;  %v8877_v20 = vld [vmem:[%s12016_s23 + $0x3a0] sm:$0xf0] }
 0x186   : > { %v12848_v59 = vpop.f32.mrf.mxu2 }
 0x187   : > { %16944 = vst [vmem:[#allocation78_spill] sm:$0xff] %v12848_v59  ;;  %v8992_v59 = vor.u32 %v11921_v28, %v8989_v7  ;;  %v8864_v7 = vor.u32 %v11889_v15, %v8861_v40  ;;  %v11938_v15 = vld [vmem:[%s12016_s23 + $0x794] sm:$0xf0] }
 0x188   : > { %v12853_v27 = vpop.f32.mrf.mxu3  ;;  %v12862_v5 = vpop.f32.mrf.mxu1 }
 0x189   : > { %16945 = vst [vmem:[#allocation79_spill] sm:$0xff] %v12853_v27  ;;  %v8851_v27 = vld [vmem:[%s12016_s23 + $0x188] sm:$0xf] }
 0x18a   : > { %v2893_v22 = vpop.f32.mrf.mxu0  ;;  %v8852_v45 = vor.u32 %v11904_v0, %v8851_v27 }
 0x18b   : > { %v12867_v56 = vmax.f32 %v2436_v39, %v2893_v22  ;;  %8835 = vmatmul.msk.bf16.vlgmr.msrb.gmra.mxu2 %vm1152_vm0, %v12425_v41  ;;  %8838 = vmatmul.msk.bf16.vlgmr.msrb.gmra.mxu1 %vm1152_vm0, %v12425_v41  ;;  %v2437_v39 = vmax.f32 %v12255_v60, %v12580_v43  ;;  %v11941_v22 = vld [vmem:[%s12016_s23 + $0x7ac] sm:$0xf0]  ;;  %v11891_v60 = vld [vmem:[%s12016_s23 + $0x1a4] sm:$0xf] }
 0x18c   : > { %3814 = vmatpush.bf16.msrb.mxu2 %v8980_v21  ;;  %3856 = vmatpush.bf16.msrb.mxu1 %v8992_v59  ;;  %v11923_v59 = vld [vmem:[%s12016_s23 + $0x5a4] sm:$0xf]  ;;  %v9019_v21 = vld [vmem:[%s12016_s23 + $0x5b0] sm:$0xf] }
 0x18d   : > { %8840 = vmatmul.msk.bf16.vlgmr.msrb.gmra.mxu3 %vm1152_vm0, %v12425_v41  ;;  %9097 = vmatmul.msk.bf16.vlgmr.msrb.gmra.mxu0 %vm1152_vm0, %v12425_v41  ;;  %v2468_v41 = vmax.f32 %v12283_v18, %v12566_v57  ;;  %v9005_v18 = vld [vmem:[%s12016_s23 + $0x7a0] sm:$0xf0]  ;;  %v11924_v57 = vld [vmem:[%s12016_s23 + $0x5ac] sm:$0xf]  ;;  %v9020_v62 = vor.u32 %v11941_v22, %v9019_v21  ;;  %v8880_v21 = vor.u32 %v11891_v60, %v8877_v20  ;;  %v11926_v20 = vld [vmem:[%s12016_s23 + $0x5bc] sm:$0xf] }
 0x18e   : > { %v12882_v28 = vpop.f32.mrf.mxu2  ;;  %3884 = vmatpush.bf16.msrb.mxu3 %v9000_v12  ;;  %3898 = vmatpush.bf16.msrb.mxu0 %v9004_v35  ;;  %v8995_v35 = vld [vmem:[%s12016_s23 + $0x598] sm:$0xf] }
 0x18f   : > { %v8996_v42 = vor.u32 %v11938_v15, %v8995_v35  ;;  %v11892_v35 = vld [vmem:[%s12016_s23 + $0x1ac] sm:$0xf] }
 0x190   : > { %v12884_v34 = vpop.f32.mrf.mxu3  ;;  %v12888_v0 = vpop.f32.mrf.mxu1  ;;  %3815 = vmatpush.bf16.msrb.mxu2 %v8852_v45  ;;  %3857 = vmatpush.bf16.msrb.mxu1 %v8864_v7  ;;  %v8885_v15 = vld [vmem:[%s12016_s23 + $0x3a8] sm:$0xf0] }
 0x191   : > { %16946 = vst [vmem:[#allocation80_spill] sm:$0xff] %v12888_v0  ;;  %v8888_v22 = vor.u32 %v11892_v35, %v8885_v15  ;;  %v9029_v35 = vld [vmem:[%s12016_s23 + $0x7b8] sm:$0xf0]  ;;  %v2441_v15 = vmax.f32 %v12295_v29, %v12620_v10  ;;  %v8883_v29 = vld [vmem:[%s12016_s23 + $0x1a8] sm:$0xf] }
 0x192   : > { %v2895_v12 = vpop.f32.mrf.mxu0  ;;  %3885 = vmatpush.bf16.msrb.mxu3 %v8872_v4  ;;  %3899 = vmatpush.bf16.msrb.mxu0 %v8876_v30  ;;  %v9008_v4 = vor.u32 %v11923_v59, %v9005_v18  ;;  %v9016_v30 = vor.u32 %v11924_v57, %v9013_v52  ;;  %v8891_v59 = vld [vmem:[%s12016_s23 + $0x1b0] sm:$0xf]  ;;  %v2439_v52 = vmax.f32 %v12277_v14, %v12602_v13  ;;  %v11908_v10 = vld [vmem:[%s12016_s23 + $0x3a4] sm:$0xf0] }
 0x193   : > { %v12890_v40 = vmax.f32 %v2468_v41, %v2895_v12  ;;  %v8867_v41 = vld [vmem:[%s12016_s23 + $0x198] sm:$0xf]  ;;  %v11909_v18 = vld [vmem:[%s12016_s23 + $0x3ac] sm:$0xf0]  ;;  %v2472_v14 = vmax.f32 %v12281_v17, %v12606_v36  ;;  %v9011_v17 = vld [vmem:[%s12016_s23 + $0x5a8] sm:$0xf] }
 0x194   : > { %v11906_v12 = vld [vmem:[%s12016_s23 + $0x394] sm:$0xf0]  ;;  %v11940_v36 = vld [vmem:[%s12016_s23 + $0x7a4] sm:$0xf0] }
 0x195   : > { %v8868_v57 = vor.u32 %v11906_v12, %v8867_v41  ;;  %v11925_v12 = vld [vmem:[%s12016_s23 + $0x5b4] sm:$0xf] }
 0x196   : > { %v12892_v33 = vpop.f32.mrf.mxu2 }
 0x197   : > { %16947 = vst [vmem:[#allocation81_spill] sm:$0xff] %v12892_v33 }
 0x198   : > { %v12897_v27 = vpop.f32.mrf.mxu3  ;;  %v2907_v48 = vpop.f32.mrf.mxu1 }
 0x199   : > { %16948 = vst [vmem:[#allocation82_spill] sm:$0xff] %v12897_v27  ;;  %v12908_v45 = vmax.f32 %v2437_v39, %v2907_v48  ;;  %v12918_v27 = vld [vmem:[%s16861_s0] sm:$0xff]  ;;  %v8892_v48 = vor.u32 %v11909_v18, %v8891_v59 }
 0x19a   : > { %v2949_v7 = vpop.f32.mrf.mxu0  ;;  %v9035_v18 = vld [vmem:[%s12016_s23 + $0x5c0] sm:$0xf] }
 0x19b   : > { %v12913_v43 = vmax.f32 %v2440_v11, %v2949_v7  ;;  %8839 = vmatmul.msk.bf16.vlgmr.msra.gmra.mxu2 %vm1152_vm0, %v12918_v27  ;;  %9098 = vmatmul.msk.bf16.vlgmr.msra.gmra.mxu1 %vm1152_vm0, %v12918_v27  ;;  %v2469_v7 = vmax.f32 %v12279_v16, %v12604_v9  ;;  %v2471_v16 = vmax.f32 %v12288_v23, %v12613_v61  ;;  %v11943_v23 = vld [vmem:[%s12016_s23 + $0x7bc] sm:$0xf0] }
 0x19c   : > { %3870 = vmatpush.bf16.msra.mxu2 %v8996_v42  ;;  %3912 = vmatpush.bf16.msra.mxu1 %v9008_v4  ;;  %v2444_v61 = vmax.f32 %v12297_v31, %v12622_v53  ;;  %v11894_v31 = vld [vmem:[%s12016_s23 + $0x1bc] sm:$0xf] }
 0x19d   : > { %9100 = vmatmul.msk.bf16.vlgmr.msra.gmra.mxu3 %vm1152_vm0, %v12918_v27  ;;  %9101 = vmatmul.msk.bf16.vlgmr.msra.gmra.mxu0 %vm1152_vm0, %v12918_v27  ;;  %v8901_v53 = vld [vmem:[%s12016_s23 + $0x3b8] sm:$0xf0] }
 0x19e   : > { %v12935_v39 = vpop.f32.mrf.mxu2  ;;  %3940 = vmatpush.bf16.msra.mxu3 %v9016_v30  ;;  %3954 = vmatpush.bf16.msra.mxu0 %v9020_v62  ;;  %v9021_v62 = vld [vmem:[%s12016_s23 + $0x7b0] sm:$0xf0] }
 0x1a0   : > { %v2935_v11 = vpop.f32.mrf.mxu3  ;;  %v2909_v13 = vpop.f32.mrf.mxu1  ;;  %3871 = vmatpush.bf16.msra.mxu2 %v8868_v57  ;;  %3913 = vmatpush.bf16.msra.mxu1 %v8880_v21 }
 0x1a1   : > { %v12939_v42 = vmax.f32 %v2439_v52, %v2935_v11  ;;  %v12943_v4 = vmax.f32 %v2469_v7, %v2909_v13  ;;  %v9012_v52 = vor.u32 %v11940_v36, %v9011_v17  ;;  %v9024_v11 = vor.u32 %v11925_v12, %v9021_v62  ;;  %v11893_v7 = vld [vmem:[%s12016_s23 + $0x1b4] sm:$0xf]  ;;  %v11911_v17 = vld [vmem:[%s12016_s23 + $0x3bc] sm:$0xf0] }
 0x1a2   : > { %v2951_v30 = vpop.f32.mrf.mxu0  ;;  %3941 = vmatpush.bf16.msra.mxu3 %v8888_v22  ;;  %3955 = vmatpush.bf16.msra.mxu0 %v8892_v48  ;;  %v9032_v48 = vor.u32 %v11926_v20, %v9029_v35  ;;  %v9036_v13 = vor.u32 %v11943_v23, %v9035_v18  ;;  %v2438_v36 = vmax.f32 %v12315_v44, %v12640_v2 }
 0x1a3   : > { %v12945_v41 = vmax.f32 %v2472_v14, %v2951_v30  ;;  %v8893_v30 = vld [vmem:[%s12016_s23 + $0x3b0] sm:$0xf0]  ;;  %v8884_v12 = vor.u32 %v11908_v10, %v8883_v29  ;;  %v8904_v35 = vor.u32 %v11894_v31, %v8901_v53  ;;  %v2473_v44 = vmax.f32 %v12319_v49, %v12644_v32  ;;  %v9037_v10 = vld [vmem:[%s12016_s23 + $0x7c0] sm:$0xf0] }
 0x1a4   : > { %v8896_v20 = vor.u32 %v11893_v7, %v8893_v30  ;;  %v2470_v49 = vmax.f32 %v12323_v51, %v12648_v37  ;;  %v11928_v7 = vld [vmem:[%s12016_s23 + $0x5cc] sm:$0xf]  ;;  %v2445_v30 = vmax.f32 %v12335_v63, %v12660_v46  ;;  %v11945_v37 = vld [vmem:[%s12016_s23 + $0x7cc] sm:$0xf0]  ;;  %v8899_v63 = vld [vmem:[%s12016_s23 + $0x1b8] sm:$0xf] }
 0x1a5   : > { %v11910_v46 = vld [vmem:[%s12016_s23 + $0x3b4] sm:$0xf0] }
 0x1a6   : > { %v12949_v9 = vpop.f32.mrf.mxu2 }
 0x1a7   : > { %16949 = vst [vmem:[#allocation83_spill] sm:$0xff] %v12949_v9 }
 0x1a8   : > { %v2937_v60 = vpop.f32.mrf.mxu3  ;;  %v2963_v57 = vpop.f32.mrf.mxu1 }
 0x1a9   : > { %v12959_v59 = vmax.f32 %v2471_v16, %v2937_v60  ;;  %v12965_v21 = vmax.f32 %v2441_v15, %v2963_v57  ;;  %v8907_v16 = vld [vmem:[%s12016_s23 + $0x1c0] sm:$0xf]  ;;  %v2443_v60 = vmax.f32 %v12317_v47, %v12642_v6  ;;  %v2476_v47 = vmax.f32 %v12321_v50, %v12646_v54  ;;  %v9027_v54 = vld [vmem:[%s12016_s23 + $0x5b8] sm:$0xf] }
 0x1aa   : > { %v3005_v22 = vpop.f32.mrf.mxu0  ;;  %v8908_v23 = vor.u32 %v11911_v17, %v8907_v16  ;;  %v2475_v50 = vmax.f32 %v12328_v55, %v12653_v8  ;;  %v9051_v55 = vld [vmem:[%s12016_s23 + $0x5d0] sm:$0xf]  ;;  %v2448_v8 = vmax.f32 %v12337_v1, %v12662_v38  ;;  %v11896_v1 = vld [vmem:[%s12016_s23 + $0x1cc] sm:$0xf] }
 0x1ab   : > { %v12970_v14 = vmax.f32 %v2444_v61, %v3005_v22  ;;  %9099 = vmatmul.msk.bf16.vlgmr.msrb.gmra.mxu2 %vm1152_vm0, %v12918_v27  ;;  %9102 = vmatmul.msk.bf16.vlgmr.msrb.gmra.mxu1 %vm1152_vm0, %v12918_v27  ;;  %v11942_v22 = vld [vmem:[%s12016_s23 + $0x7b4] sm:$0xf0]  ;;  %v8917_v38 = vld [vmem:[%s12016_s23 + $0x3c8] sm:$0xf0] }
 0x1ac   : > { %3926 = vmatpush.bf16.msrb.mxu2 %v9012_v52  ;;  %3968 = vmatpush.bf16.msrb.mxu1 %v9024_v11  ;;  %v11927_v11 = vld [vmem:[%s12016_s23 + $0x5c4] sm:$0xf]  ;;  %v9028_v53 = vor.u32 %v11942_v22, %v9027_v54 }
 0x1ad   : > { %9104 = vmatmul.msk.bf16.vlgmr.msrb.gmra.mxu3 %vm1152_vm0, %v12918_v27  ;;  %9105 = vmatmul.msk.bf16.vlgmr.msrb.gmra.mxu0 %vm1152_vm0, %v12918_v27 }
 0x1ae   : > { %v2921_v62 = vpop.f32.mrf.mxu2  ;;  %3996 = vmatpush.bf16.msrb.mxu3 %v9032_v48  ;;  %4010 = vmatpush.bf16.msrb.mxu0 %v9036_v13  ;;  %v9045_v13 = vld [vmem:[%s12016_s23 + $0x7c8] sm:$0xf0] }
 0x1af   : > { %v12989_v15 = vmax.f32 %v2438_v36, %v2921_v62  ;;  %v9040_v36 = vor.u32 %v11927_v11, %v9037_v10  ;;  %v16950_v11 = vld [vmem:[#allocation45_spill] sm:$0xff] }
 0x1b0   : > { %v2991_v18 = vpop.f32.mrf.mxu3  ;;  %v2965_v6 = vpop.f32.mrf.mxu1  ;;  %3927 = vmatpush.bf16.msrb.mxu2 %v8884_v12  ;;  %3969 = vmatpush.bf16.msrb.mxu1 %v8896_v20  ;;  %v9048_v12 = vor.u32 %v11928_v7, %v9045_v13  ;;  %v9052_v20 = vor.u32 %v11945_v37, %v9051_v55  ;;  %v16954_v55 = vld [vmem:[#allocation47_spill] sm:$0xff]  ;;  %v16955_v37 = vld [vmem:[#allocation4_spill] sm:$0xff] }
 0x1b1   : > { %v12993_v2 = vmax.f32 %v2443_v60, %v2991_v18  ;;  %v12997_v61 = vmax.f32 %v2473_v44, %v2965_v6  ;;  %v11895_v60 = vld [vmem:[%s12016_s23 + $0x1c4] sm:$0xf]  ;;  %v8923_v18 = vld [vmem:[%s12016_s23 + $0x1d0] sm:$0xf]  ;;  %v2442_v44 = vmax.f32 %v12355_v19, %v12680_v25  ;;  %v2447_v6 = vmax.f32 %v12357_v24, %v12682_v58 }
 0x1b2   : > { %v3007_v57 = vpop.f32.mrf.mxu0  ;;  %3997 = vmatpush.bf16.msrb.mxu3 %v8904_v35  ;;  %4011 = vmatpush.bf16.msrb.mxu0 %v8908_v23  ;;  %v8909_v35 = vld [vmem:[%s12016_s23 + $0x3c0] sm:$0xf0]  ;;  %v11913_v23 = vld [vmem:[%s12016_s23 + $0x3cc] sm:$0xf0]  ;;  %v2477_v19 = vmax.f32 %v12359_v26, %v12684_v3  ;;  %v16953_v3 = vld [vmem:[#allocation3_spill] sm:$0xff] }
 0x1b3   : > { %v12999_v52 = vmax.f32 %v2476_v47, %v3007_v57  ;;  %v8900_v47 = vor.u32 %v11910_v46, %v8899_v63  ;;  %v8924_v22 = vor.u32 %v11913_v23, %v8923_v18  ;;  %v16951_v24 = vld [vmem:[#allocation2_spill] sm:$0xff]  ;;  %v11930_v23 = vld [vmem:[%s12016_s23 + $0x5dc] sm:$0xf] }
 0x1b4   : > { %v2480_v58 = vmax.f32 %v16951_v24, %v16950_v11  ;;  %v16952_v26 = vld [vmem:[#allocation46_spill] sm:$0xff] }
 0x1b5   : > { %v11947_v46 = vld [vmem:[%s12016_s23 + $0x7dc] sm:$0xf0] }
 0x1b6   : > { %v2923_v32 = vpop.f32.mrf.mxu2  ;;  %v8939_v24 = vld [vmem:[%s12016_s23 + $0x1e0] sm:$0xf] }
 0x1b7   : > { %v13008_v48 = vmax.f32 %v2470_v49, %v2923_v32  ;;  %v8912_v49 = vor.u32 %v11895_v60, %v8909_v35  ;;  %v11929_v60 = vld [vmem:[%s12016_s23 + $0x5d4] sm:$0xf] }
 0x1b8   : > { %v2993_v29 = vpop.f32.mrf.mxu3  ;;  %v3019_v31 = vpop.f32.mrf.mxu1  ;;  %v16956_v35 = vld [vmem:[#allocation48_spill] sm:$0xff] }
 0x1b9   : > { %v13015_v51 = vmax.f32 %v2475_v50, %v2993_v29  ;;  %v13021_v16 = vmax.f32 %v2445_v30, %v3019_v31  ;;  %v8920_v50 = vor.u32 %v11896_v1, %v8917_v38  ;;  %v2474_v30 = vmax.f32 %v16953_v3, %v16952_v26  ;;  %v16957_v1 = vld [vmem:[#allocation5_spill] sm:$0xff]  ;;  %v11915_v3 = vld [vmem:[%s12016_s23 + $0x3dc] sm:$0xf0] }
 0x1ba   : > { %v3061_v17 = vpop.f32.mrf.mxu0  ;;  %v2449_v38 = vmax.f32 %v16957_v1, %v16956_v35  ;;  %v8940_v35 = vor.u32 %v11915_v3, %v8939_v24  ;;  %v16967_v24 = vld [vmem:[#allocation11_spill] sm:$0xff] }
 0x1bb   : > { %v13026_v62 = vmax.f32 %v2448_v8, %v3061_v17  ;;  %9103 = vmatmul.msk.bf16.vlgmr.msra.gmra.mxu2 %vm1152_vm0, %v12918_v27  ;;  %9106 = vmatmul.msk.bf16.vlgmr.msra.gmra.mxu1 %vm1152_vm0, %v12918_v27  ;;  %v2479_v8 = vmax.f32 %v16955_v37, %v16954_v55  ;;  %v9043_v17 = vld [vmem:[%s12016_s23 + $0x5c8] sm:$0xf]  ;;  %v8925_v55 = vld [vmem:[%s12016_s23 + $0x3d0] sm:$0xf0]  ;;  %v11898_v37 = vld [vmem:[%s12016_s23 + $0x1dc] sm:$0xf] }
 0x1bc   : > { %3982 = vmatpush.bf16.msra.mxu2 %v9028_v53  ;;  %4024 = vmatpush.bf16.msra.mxu1 %v9040_v36  ;;  %v9067_v53 = vld [vmem:[%s12016_s23 + $0x5e0] sm:$0xf]  ;;  %v11944_v36 = vld [vmem:[%s12016_s23 + $0x7c4] sm:$0xf0] }
 0x1bd   : > { %9108 = vmatmul.msk.bf16.vlgmr.msra.gmra.mxu3 %vm1152_vm0, %v12918_v27  ;;  %9109 = vmatmul.msk.bf16.vlgmr.msra.gmra.mxu0 %vm1152_vm0, %v12918_v27 }
 0x1be   : > { %v2977_v57 = vpop.f32.mrf.mxu2  ;;  %4052 = vmatpush.bf16.msra.mxu3 %v9048_v12  ;;  %4066 = vmatpush.bf16.msra.mxu0 %v9052_v20  ;;  %v9053_v20 = vld [vmem:[%s12016_s23 + $0x7d0] sm:$0xf0] }
 0x1bf   : > { %v13045_v32 = vmax.f32 %v2442_v44, %v2977_v57  ;;  %v9061_v44 = vld [vmem:[%s12016_s23 + $0x7d8] sm:$0xf0]  ;;  %v9056_v11 = vor.u32 %v11929_v60, %v9053_v20 }
 0x1c0   : > { %v3047_v54 = vpop.f32.mrf.mxu3  ;;  %v3021_v29 = vpop.f32.mrf.mxu1  ;;  %3983 = vmatpush.bf16.msra.mxu2 %v8900_v47  ;;  %4025 = vmatpush.bf16.msra.mxu1 %v8912_v49  ;;  %v16958_v47 = vld [vmem:[#allocation49_spill] sm:$0xff]  ;;  %v9064_v26 = vor.u32 %v11930_v23, %v9061_v44 }
 0x1c1   : > { %v13049_v25 = vmax.f32 %v2447_v6, %v3047_v54  ;;  %v13053_v10 = vmax.f32 %v2477_v19, %v3021_v29  ;;  %v16959_v6 = vld [vmem:[#allocation6_spill] sm:$0xff]  ;;  %v9068_v19 = vor.u32 %v11947_v46, %v9067_v53  ;;  %v11912_v29 = vld [vmem:[%s12016_s23 + $0x3c4] sm:$0xf0]  ;;  %v16963_v46 = vld [vmem:[#allocation8_spill] sm:$0xff] }
 0x1c2   : > { %v3063_v7 = vpop.f32.mrf.mxu0  ;;  %4053 = vmatpush.bf16.msra.mxu3 %v8920_v50  ;;  %4067 = vmatpush.bf16.msra.mxu0 %v8924_v22  ;;  %v2452_v57 = vmax.f32 %v16959_v6, %v16958_v47  ;;  %v9044_v50 = vor.u32 %v11944_v36, %v9043_v17  ;;  %v16961_v53 = vld [vmem:[#allocation7_spill] sm:$0xff]  ;;  %v16964_v47 = vld [vmem:[#allocation52_spill] sm:$0xff]  ;;  %v16965_v6 = vld [vmem:[#allocation9_spill] sm:$0xff] }
 0x1c3   : > { %v13055_v13 = vmax.f32 %v2480_v58, %v3063_v7  ;;  %v8915_v58 = vld [vmem:[%s12016_s23 + $0x1c8] sm:$0xf] }
 0x1c4   : > { %v8916_v36 = vor.u32 %v11912_v29, %v8915_v58  ;;  %v16968_v29 = vld [vmem:[#allocation55_spill] sm:$0xff] }
 0x1c6   : > { %v2979_v31 = vpop.f32.mrf.mxu2 }
 0x1c7   : > { %v13064_v12 = vmax.f32 %v2474_v30, %v2979_v31  ;;  %v11897_v30 = vld [vmem:[%s12016_s23 + $0x1d4] sm:$0xf]  ;;  %v16960_v31 = vld [vmem:[#allocation50_spill] sm:$0xff] }
 0x1c8   : > { %v3049_v63 = vpop.f32.mrf.mxu3  ;;  %v3075_v49 = vpop.f32.mrf.mxu1  ;;  %v2446_v17 = vmax.f32 %v16961_v53, %v16960_v31  ;;  %v8928_v1 = vor.u32 %v11897_v30, %v8925_v55  ;;  %v9083_v55 = vld [vmem:[%s12016_s23 + $0x5f0] sm:$0xf] }
 0x1c9   : > { %v13071_v18 = vmax.f32 %v2479_v8, %v3049_v63  ;;  %v13077_v54 = vmax.f32 %v2449_v38, %v3075_v49  ;;  %v8933_v8 = vld [vmem:[%s12016_s23 + $0x3d8] sm:$0xf0]  ;;  %v16962_v63 = vld [vmem:[#allocation51_spill] sm:$0xff] }
 0x1ca   : > { %v3117_v22 = vpop.f32.mrf.mxu0  ;;  %v2451_v60 = vmax.f32 %v16963_v46, %v16962_v63  ;;  %v8936_v44 = vor.u32 %v11898_v37, %v8933_v8  ;;  %v11931_v37 = vld [vmem:[%s12016_s23 + $0x5e4] sm:$0xf]  ;;  %v9077_v63 = vld [vmem:[%s12016_s23 + $0x7e8] sm:$0xf0]  ;;  %v16970_v46 = vld [vmem:[#allocation56_spill] sm:$0xff] }
 0x1cb   : > { %v13082_v7 = vmax.f32 %v2452_v57, %v3117_v22  ;;  %9107 = vmatmul.msk.bf16.vlgmr.msrb.gmra.mxu2 %vm1152_vm0, %v12918_v27  ;;  %9110 = vmatmul.msk.bf16.vlgmr.msrb.gmra.mxu1 %vm1152_vm0, %v12918_v27  ;;  %v2481_v57 = vmax.f32 %v16965_v6, %v16964_v47  ;;  %v9069_v8 = vld [vmem:[%s12016_s23 + $0x7e0] sm:$0xf0] }
 0x1cc   : > { %4038 = vmatpush.bf16.msrb.mxu2 %v9044_v50  ;;  %4080 = vmatpush.bf16.msrb.mxu1 %v9056_v11  ;;  %v16966_v11 = vld [vmem:[#allocation54_spill] sm:$0xff] }
 0x1cd   : > { %9112 = vmatmul.msk.bf16.vlgmr.msrb.gmra.mxu3 %vm1152_vm0, %v12918_v27  ;;  %9113 = vmatmul.msk.bf16.vlgmr.msrb.gmra.mxu0 %vm1152_vm0, %v12918_v27  ;;  %v2478_v58 = vmax.f32 %v16967_v24, %v16966_v11  ;;  %v16973_v47 = vld [vmem:[#allocation14_spill] sm:$0xff] }
 0x1ce   : > { %v3033_v20 = vpop.f32.mrf.mxu2  ;;  %4122 = vmatpush.bf16.msrb.mxu0 %v9068_v19  ;;  %4108 = vmatpush.bf16.msrb.mxu3 %v9064_v26  ;;  %v16969_v26 = vld [vmem:[#allocation12_spill] sm:$0xff] }
 0x1cf   : > { %v13101_v38 = vmax.f32 %v2446_v17, %v3033_v20  ;;  %v2483_v3 = vmax.f32 %v16969_v26, %v16968_v29  ;;  %v11949_v17 = vld [vmem:[%s12016_s23 + $0x7ec] sm:$0xf0] }
 0x1d0   : > { %v3103_v23 = vpop.f32.mrf.mxu3  ;;  %v3077_v50 = vpop.f32.mrf.mxu1  ;;  %4039 = vmatpush.bf16.msrb.mxu2 %v8916_v36  ;;  %4081 = vmatpush.bf16.msrb.mxu1 %v8928_v1  ;;  %v11932_v36 = vld [vmem:[%s12016_s23 + $0x5ec] sm:$0xf]  ;;  %v9059_v1 = vld [vmem:[%s12016_s23 + $0x5d8] sm:$0xf]  ;;  %v8955_v29 = vld [vmem:[%s12016_s23 + $0x1f0] sm:$0xf] }
 0x1d1   : > { %v13105_v49 = vmax.f32 %v2451_v60, %v3103_v23  ;;  %v13107_v22 = vmax.f32 %v2481_v57, %v3077_v50  ;;  %v16971_v60 = vld [vmem:[#allocation13_spill] sm:$0xff]  ;;  %v9072_v50 = vor.u32 %v11931_v37, %v9069_v8  ;;  %v9080_v26 = vor.u32 %v11932_v36, %v9077_v63  ;;  %v16975_v8 = vld [vmem:[#allocation58_spill] sm:$0xff] }
 0x1d2   : > { %v13109_v19 = vpop.f32.mrf.mxu0  ;;  %4123 = vmatpush.bf16.msrb.mxu0 %v8940_v35  ;;  %4109 = vmatpush.bf16.msrb.mxu3 %v8936_v44  ;;  %v2453_v20 = vmax.f32 %v16971_v60, %v16970_v46  ;;  %v11946_v23 = vld [vmem:[%s12016_s23 + $0x7d4] sm:$0xf0]  ;;  %v11917_v46 = vld [vmem:[%s12016_s23 + $0x3ec] sm:$0xf0] }
 0x1d3   : > { %v16972_v44 = vld [vmem:[#allocation57_spill] sm:$0xff]  ;;  %v9060_v60 = vor.u32 %v11946_v23, %v9059_v1  ;;  %v16978_v1 = vld [vmem:[#allocation16_spill] sm:$0xff] }
 0x1d4   : > { %v2456_v6 = vmax.f32 %v16973_v47, %v16972_v44  ;;  %v11900_v44 = vld [vmem:[%s12016_s23 + $0x1ec] sm:$0xf]  ;;  %v11914_v37 = vld [vmem:[%s12016_s23 + $0x3d4] sm:$0xf0] }
 0x1d5   : > { %v8949_v47 = vld [vmem:[%s12016_s23 + $0x3e8] sm:$0xf0] }
 0x1d6   : > { %v3035_v30 = vpop.f32.mrf.mxu2 }
 0x1d7   : > { %v13118_v31 = vmax.f32 %v2478_v58, %v3035_v30  ;;  %v9084_v58 = vor.u32 %v11949_v17, %v9083_v55  ;;  %v11899_v30 = vld [vmem:[%s12016_s23 + $0x1e4] sm:$0xf]  ;;  %v8931_v55 = vld [vmem:[%s12016_s23 + $0x1d8] sm:$0xf]  ;;  %v16976_v17 = vld [vmem:[#allocation15_spill] sm:$0xff] }
 0x1d8   : > { %v3105_v53 = vpop.f32.mrf.mxu3  ;;  %v3131_v57 = vpop.f32.mrf.mxu1  ;;  %v2450_v36 = vmax.f32 %v16976_v17, %v16975_v8  ;;  %v8932_v8 = vor.u32 %v11914_v37, %v8931_v55  ;;  %v11198_v55 = vld [vmem:[%s16863_s2 + $0x74] sm:$0xf0]  ;;  %v11934_v37 = vld [vmem:[%s12016_s23 + $0x5fc] sm:$0xf] }
 0x1d9   : > { %v13125_v35 = vmax.f32 %v2483_v3, %v3105_v53  ;;  %v13131_v11 = vmax.f32 %v2453_v20, %v3131_v57  ;;  %v8941_v3 = vld [vmem:[%s12016_s23 + $0x3e0] sm:$0xf0]  ;;  %v16977_v20 = vld [vmem:[#allocation59_spill] sm:$0xff]  ;;  %v8956_v57 = vor.u32 %v11917_v46, %v8955_v29  ;;  %v11933_v46 = vld [vmem:[%s12016_s23 + $0x5f4] sm:$0xf] }
 0x1da   : > { %v3173_v24 = vpop.f32.mrf.mxu0  ;;  %v8944_v63 = vor.u32 %v11899_v30, %v8941_v3  ;;  %v2455_v23 = vmax.f32 %v16978_v1, %v16977_v20  ;;  %v16982_v29 = vld [vmem:[#allocation19_spill] sm:$0xff]  ;;  %v16986_v20 = vld [vmem:[#allocation21_spill] sm:$0xff] }
 0x1db   : > { %v13136_v53 = vmax.f32 %v2456_v6, %v3173_v24  ;;  %9111 = vmatmul.msk.bf16.vlgmr.msra.gmra.mxu2 %vm1152_vm0, %v12918_v27  ;;  %9114 = vmatmul.msk.bf16.vlgmr.msra.gmra.mxu1 %vm1152_vm0, %v12918_v27  ;;  %v8952_v24 = vor.u32 %v11900_v44, %v8949_v47 }
 0x1dc   : > { %4136 = vmatpush.bf16.msra.mxu1 %v9072_v50  ;;  %4094 = vmatpush.bf16.msra.mxu2 %v9060_v60  ;;  %v9085_v60 = vld [vmem:[%s12016_s23 + $0x7f0] sm:$0xf0] }
 0x1dd   : > { %16974 = vst [vmem:[#allocation45_spill] sm:$0xff] %v13136_v53  ;;  %9116 = vmatmul.msk.bf16.vlgmr.msra.gmra.mxu3 %vm1152_vm0, %v12918_v27  ;;  %9117 = vmatmul.msk.bf16.vlgmr.msra.gmra.mxu0 %vm1152_vm0, %v12918_v27 }
 0x1de   : > { %v3089_v6 = vpop.f32.mrf.mxu2  ;;  %4178 = vmatpush.bf16.msra.mxu0 %v9084_v58  ;;  %4164 = vmatpush.bf16.msra.mxu3 %v9080_v26  ;;  %v16981_v58 = vld [vmem:[#allocation62_spill] sm:$0xff] }
 0x1df   : > { %v13155_v9 = vmax.f32 %v2450_v36, %v3089_v6  ;;  %v2482_v26 = vmax.f32 %v16982_v29, %v16981_v58  ;;  %v9093_v36 = vld [vmem:[%s12016_s23 + $0x7f8] sm:$0xf0]  ;;  %v11948_v6 = vld [vmem:[%s12016_s23 + $0x7e4] sm:$0xf0]  ;;  %v9088_v29 = vor.u32 %v11933_v46, %v9085_v60 }
 0x1e0   : > { %v3159_v33 = vpop.f32.mrf.mxu3  ;;  %v13159_v50 = vpop.f32.mrf.mxu1  ;;  %4137 = vmatpush.bf16.msra.mxu1 %v8944_v63  ;;  %4095 = vmatpush.bf16.msra.mxu2 %v8932_v8  ;;  %v16985_v63 = vld [vmem:[#allocation64_spill] sm:$0xff]  ;;  %v11196_v46 = vld [vmem:[%s16863_s2 + $0x64] sm:$0xf0]  ;;  %v11902_v60 = vld [vmem:[%s12016_s23 + $0x1fc] sm:$0xf] }
 0x1e1   : > { %16979 = vst [vmem:[#allocation2_spill] sm:$0xff] %v13155_v9  ;;  %v13157_v17 = vmax.f32 %v2455_v23, %v3159_v33  ;;  %v9187_v33 = vld [vmem:[%s16863_s2 + $0x70] sm:$0xf]  ;;  %v2457_v1 = vmax.f32 %v16986_v20, %v16985_v63  ;;  %v9075_v23 = vld [vmem:[%s12016_s23 + $0x5e8] sm:$0xf]  ;;  %v9096_v63 = vor.u32 %v11934_v37, %v9093_v36  ;;  %v16991_v37 = vld [vmem:[#allocation66_spill] sm:$0xff] }
 0x1e2   : > { %v13161_v30 = vpop.f32.mrf.mxu0  ;;  %4179 = vmatpush.bf16.msra.mxu0 %v8956_v57  ;;  %4165 = vmatpush.bf16.msra.mxu3 %v8952_v24  ;;  %v16987_v57 = vld [vmem:[#allocation65_spill] sm:$0xff]  ;;  %v16988_v24 = vld [vmem:[#allocation22_spill] sm:$0xff]  ;;  %v9188_v0 = vor.u32 %v11198_v55, %v9187_v33  ;;  %v11901_v20 = vld [vmem:[%s12016_s23 + $0x1f4] sm:$0xf] }
 0x1e3   : > { %16980 = vst [vmem:[#allocation46_spill] sm:$0xff] %v13157_v17  ;;  %v2460_v8 = vmax.f32 %v16988_v24, %v16987_v57  ;;  %v8957_v17 = vld [vmem:[%s12016_s23 + $0x3f0] sm:$0xf0]  ;;  %v9076_v57 = vor.u32 %v11948_v6, %v9075_v23  ;;  %v8947_v33 = vld [vmem:[%s12016_s23 + $0x1e8] sm:$0xf] }
 0x1e4   : > { %v11916_v55 = vld [vmem:[%s12016_s23 + $0x3e4] sm:$0xf0] }
 0x1e5   : > { %v16992_v36 = vld [vmem:[#allocation23_spill] sm:$0xff] }
 0x1e6   : > { %v3091_v3 = vpop.f32.mrf.mxu2  ;;  %v2454_v24 = vmax.f32 %v16992_v36, %v16991_v37  ;;  %v9171_v37 = vld [vmem:[%s16863_s2 + $0x50] sm:$0xf] }
 0x1e7   : > { %v13170_v44 = vmax.f32 %v2482_v26, %v3091_v3  ;;  %v9379_v36 = vld [vmem:[%s16863_s2 + $0x1f0] sm:$0xf] }
 0x1e8   : > { %v13172_v47 = vpop.f32.mrf.mxu3  ;;  %v3187_v58 = vpop.f32.mrf.mxu1 }
 0x1e9   : > { %16983 = vst [vmem:[#allocation3_spill] sm:$0xff] %v13170_v44  ;;  %v13185_v26 = vmax.f32 %v2457_v1, %v3187_v58  ;;  %v9179_v44 = vld [vmem:[%s16863_s2 + $0x60] sm:$0xf]  ;;  %v8965_v1 = vld [vmem:[%s12016_s23 + $0x3f8] sm:$0xf0]  ;;  %v16993_v58 = vld [vmem:[#allocation67_spill] sm:$0xff] }
 0x1ea   : > { %16984 = vst [vmem:[#allocation47_spill] sm:$0xff] %v13172_v47  ;;  %v3229_v3 = vpop.f32.mrf.mxu0  ;;  %v9180_v6 = vor.u32 %v11196_v46, %v9179_v44  ;;  %v9163_v46 = vld [vmem:[%s16863_s2 + $0x40] sm:$0xf] }
 0x1eb   : > { %16989 = vst [vmem:[#allocation4_spill] sm:$0xff] %v13185_v26  ;;  %v13192_v9 = vmax.f32 %v2460_v8, %v3229_v3  ;;  %9115 = vmatmul.msk.bf16.vlgmr.msrb.gmra.mxu2 %vm1152_vm0, %v12918_v27  ;;  %9118 = vmatmul.msk.bf16.vlgmr.msrb.gmra.mxu1 %vm1152_vm0, %v12918_v27  ;;  %v8960_v8 = vor.u32 %v11901_v20, %v8957_v17  ;;  %v16994_v3 = vld [vmem:[#allocation24_spill] sm:$0xff] }
 0x1ec   : > { %4192 = vmatpush.bf16.msrb.mxu1 %v9088_v29  ;;  %v8968_v26 = vor.u32 %v11902_v60, %v8965_v1  ;;  %v11194_v29 = vld [vmem:[%s16863_s2 + $0x54] sm:$0xf0]  ;;  %4150 = vmatpush.bf16.msrb.mxu2 %v9076_v57  ;;  %v8948_v17 = vor.u32 %v11916_v55, %v8947_v33  ;;  %v11192_v60 = vld [vmem:[%s16863_s2 + $0x44] sm:$0xf0]  ;;  %v9155_v1 = vld [vmem:[%s16863_s2 + $0x30] sm:$0xf] }
 0x1ed   : > { %16990 = vst [vmem:[#allocation48_spill] sm:$0xff] %v13192_v9  ;;  %9120 = vmatmul.msk.bf16.vlgmr.msrb.gmra.mxu3 %vm1152_vm0, %v12918_v27  ;;  %9121 = vmatmul.msk.bf16.vlgmr.msrb.gmra.mxu0 %vm1152_vm0, %v12918_v27  ;;  %v2459_v9 = vmax.f32 %v16994_v3, %v16993_v58  ;;  %v11214_v57 = vld [vmem:[%s16863_s2 + $0xf4] sm:$0xf0] }
 0x1ee   : > { %6948 = vmatpush.bf16.msrb.mxu0 %v9188_v0  ;;  %v3145_v23 = vpop.f32.mrf.mxu2  ;;  %4220 = vmatpush.bf16.msrb.mxu3 %v9096_v63  ;;  %v9172_v63 = vor.u32 %v11194_v29, %v9171_v37  ;;  %v11190_v55 = vld [vmem:[%s16863_s2 + $0x34] sm:$0xf0]  ;;  %v17003_v29 = vld [vmem:[#allocation30_spill] sm:$0xff] }
 0x1ef   : > { %v13213_v47 = vmax.f32 %v2454_v24, %v3145_v23  ;;  %v11246_v24 = vld [vmem:[%s16863_s2 + $0x1f4] sm:$0xf0] }
 0x1f0   : > { %v3215_v53 = vpop.f32.mrf.mxu3  ;;  %v13223_v0 = vpop.f32.mrf.mxu1  ;;  %4193 = vmatpush.bf16.msrb.mxu1 %v8960_v8  ;;  %4151 = vmatpush.bf16.msrb.mxu2 %v8948_v17  ;;  %v17000_v8 = vld [vmem:[#allocation72_spill] sm:$0xff]  ;;  %v17001_v58 = vld [vmem:[#allocation29_spill] sm:$0xff] }
 0x1f1   : > { %16995 = vst [vmem:[#allocation5_spill] sm:$0xff] %v13213_v47  ;;  %v13221_v20 = vmax.f32 %v2459_v9, %v3215_v53  ;;  %v9164_v53 = vor.u32 %v11192_v60, %v9163_v46  ;;  %v2461_v3 = vmax.f32 %v17001_v58, %v17000_v8  ;;  %v9091_v23 = vld [vmem:[%s12016_s23 + $0x5f8] sm:$0xf]  ;;  %v9156_v47 = vor.u32 %v11190_v55, %v9155_v1  ;;  %v9243_v8 = vld [vmem:[%s16863_s2 + $0xe0] sm:$0xf] }
 0x1f2   : > { %6949 = vmatpush.bf16.msrb.mxu0 %v9180_v6  ;;  %v13225_v44 = vpop.f32.mrf.mxu0  ;;  %4221 = vmatpush.bf16.msrb.mxu3 %v8968_v26  ;;  %v9251_v26 = vld [vmem:[%s16863_s2 + $0xf0] sm:$0xf]  ;;  %v11950_v6 = vld [vmem:[%s12016_s23 + $0x7f4] sm:$0xf0]  ;;  %v11188_v1 = vld [vmem:[%s16863_s2 + $0x24] sm:$0xf0] }
 0x1f3   : > { %16996 = vst [vmem:[#allocation49_spill] sm:$0xff] %v13221_v20  ;;  %v17002_v37 = vld [vmem:[#allocation73_spill] sm:$0xff]  ;;  %v9252_v46 = vor.u32 %v11214_v57, %v9251_v26  ;;  %v11212_v26 = vld [vmem:[%s16863_s2 + $0xe4] sm:$0xf0]  ;;  %v9371_v57 = vld [vmem:[%s16863_s2 + $0x1e0] sm:$0xf] }
 0x1f4   : > { %16997 = vst [vmem:[#allocation6_spill] sm:$0xff] %v13225_v44  ;;  %v2464_v17 = vmax.f32 %v17003_v29, %v17002_v37  ;;  %v11244_v55 = vld [vmem:[%s16863_s2 + $0x1e4] sm:$0xf0]  ;;  %v17006_v58 = vld [vmem:[#allocation74_spill] sm:$0xff]  ;;  %v9244_v29 = vor.u32 %v11212_v26, %v9243_v8  ;;  %v9139_v44 = vld [vmem:[%s16863_s2 + $0x10] sm:$0xf] }
 0x1f6   : > { %6950 = vmatpush.bf16.msrb.mxu0 %v9172_v63  ;;  %v13233_v9 = vpop.f32.mrf.mxu2 }
 0x1f7   : > { %16998 = vst [vmem:[#allocation50_spill] sm:$0xff] %v13233_v9  ;;  %v9147_v9 = vld [vmem:[%s16863_s2 + $0x20] sm:$0xf] }
 0x1f8   : > { %v13244_v33 = vpop.f32.mrf.mxu3  ;;  %v3243_v63 = vpop.f32.mrf.mxu1 }
 0x1f9   : > { %16999 = vst [vmem:[#allocation7_spill] sm:$0xff] %v13244_v33  ;;  %v13261_v60 = vmax.f32 %v2461_v3, %v3243_v63  ;;  %v9380_v33 = vor.u32 %v11246_v24, %v9379_v36  ;;  %v9092_v36 = vor.u32 %v11950_v6, %v9091_v23  ;;  %v11918_v24 = vld [vmem:[%s12016_s23 + $0x3f4] sm:$0xf0]  ;;  %v17007_v3 = vld [vmem:[#allocation31_spill] sm:$0xff]  ;;  %v17009_v63 = vld [vmem:[#allocation32_spill] sm:$0xff]  ;;  %v9148_v6 = vor.u32 %v11188_v1, %v9147_v9 }
 0x1fa   : > { %6951 = vmatpush.bf16.msrb.mxu0 %v9164_v53  ;;  %v3285_v20 = vpop.f32.mrf.mxu0  ;;  %v2458_v37 = vmax.f32 %v17007_v3, %v17006_v58  ;;  %v9235_v58 = vld [vmem:[%s16863_s2 + $0xd0] sm:$0xf] }
 0x1fb   : > { %17004 = vst [vmem:[#allocation51_spill] sm:$0xff] %v13261_v60  ;;  %v13272_v53 = vmax.f32 %v2464_v17, %v3285_v20  ;;  %9119 = vmatmul.msk.bf16.vlgmr.msra.gmra.mxu2 %vm1152_vm0, %v12918_v27  ;;  %9122 = vmatmul.msk.bf16.vlgmr.msra.gmra.mxu1 %vm1152_vm0, %v12918_v27  ;;  %v8963_v20 = vld [vmem:[%s12016_s23 + $0x1f8] sm:$0xf]  ;;  %v17008_v17 = vld [vmem:[#allocation75_spill] sm:$0xff]  ;;  %v9372_v60 = vor.u32 %v11244_v55, %v9371_v57  ;;  %v9363_v9 = vld [vmem:[%s16863_s2 + $0x1d0] sm:$0xf] }
 0x1fc   : > { %6962 = vmatpush.bf16.msra.mxu1 %v9252_v46  ;;  %v11210_v46 = vld [vmem:[%s16863_s2 + $0xd4] sm:$0xf0]  ;;  %4206 = vmatpush.bf16.msra.mxu2 %v9092_v36  ;;  %v8964_v1 = vor.u32 %v11918_v24, %v8963_v20  ;;  %v9227_v36 = vld [vmem:[%s16863_s2 + $0xc0] sm:$0xf]  ;;  %v11240_v20 = vld [vmem:[%s16863_s2 + $0x1c4] sm:$0xf0] }
 0x1fd   : > { %17005 = vst [vmem:[#allocation8_spill] sm:$0xff] %v13272_v53  ;;  %9124 = vmatmul.msk.bf16.vlgmr.msra.gmra.mxu3 %vm1152_vm0, %v12918_v27  ;;  %9125 = vmatmul.msk.bf16.vlgmr.msra.gmra.mxu0 %vm1152_vm0, %v12918_v27  ;;  %v2463_v53 = vmax.f32 %v17009_v63, %v17008_v17  ;;  %v9236_v3 = vor.u32 %v11210_v46, %v9235_v58  ;;  %v9443_v24 = vld [vmem:[%s16863_s2 + $0x270] sm:$0xf] }
 0x1fe   : > { %6952 = vmatpush.bf16.msrb.mxu0 %v9156_v47  ;;  %6990 = vmatpush.bf16.msra.mxu3 %v9380_v33  ;;  %v3201_v23 = vpop.f32.mrf.mxu2  ;;  %v11186_v47 = vld [vmem:[%s16863_s2 + $0x14] sm:$0xf0]  ;;  %v9219_v58 = vld [vmem:[%s16863_s2 + $0xb0] sm:$0xf] }
 0x1ff   : > { %v13306_v8 = vmax.f32 %v2458_v37, %v3201_v23  ;;  %v11242_v33 = vld [vmem:[%s16863_s2 + $0x1d4] sm:$0xf0]  ;;  %v9140_v17 = vor.u32 %v11186_v47, %v9139_v44  ;;  %v9131_v23 = vld [vmem:[%s16863_s2] sm:$0xf] }
 0x200   : > { %v3271_v26 = vpop.f32.mrf.mxu3  ;;  %6963 = vmatpush.bf16.msra.mxu1 %v9244_v29  ;;  %v13319_v55 = vpop.f32.mrf.mxu1  ;;  %v9364_v63 = vor.u32 %v11242_v33, %v9363_v9  ;;  %v9355_v44 = vld [vmem:[%s16863_s2 + $0x1c0] sm:$0xf]  ;;  %4207 = vmatpush.bf16.msra.mxu2 %v8964_v1  ;;  %v11262_v29 = vld [vmem:[%s16863_s2 + $0x274] sm:$0xf0]  ;;  %v9315_v33 = vld [vmem:[%s16863_s2 + $0x170] sm:$0xf] }
 0x201   : > { %17010 = vst [vmem:[#allocation52_spill] sm:$0xff] %v13306_v8  ;;  %v13317_v57 = vmax.f32 %v2463_v53, %v3271_v26  ;;  %v11208_v53 = vld [vmem:[%s16863_s2 + $0xc4] sm:$0xf0]  ;;  %v9356_v47 = vor.u32 %v11240_v20, %v9355_v44  ;;  %v11206_v9 = vld [vmem:[%s16863_s2 + $0xb4] sm:$0xf0] }
 0x202   : > { %6953 = vmatpush.bf16.msrb.mxu0 %v9148_v6  ;;  %6991 = vmatpush.bf16.msra.mxu3 %v9372_v60  ;;  %v13321_v37 = vpop.f32.mrf.mxu0  ;;  %v11184_v60 = vld [vmem:[%s16863_s2 + $0x4] sm:$0xf0]  ;;  %v9228_v6 = vor.u32 %v11208_v53, %v9227_v36  ;;  %v11230_v1 = vld [vmem:[%s16863_s2 + $0x174] sm:$0xf0] }
 0x203   : > { %17011 = vst [vmem:[#allocation9_spill] sm:$0xff] %v13317_v57  ;;  %v9132_v26 = vor.u32 %v11184_v60, %v9131_v23  ;;  %v11238_v23 = vld [vmem:[%s16863_s2 + $0x1b4] sm:$0xf0]  ;;  %v9435_v60 = vld [vmem:[%s16863_s2 + $0x260] sm:$0xf] }
 0x204   : > { %6964 = vmatpush.bf16.msra.mxu1 %v9236_v3  ;;  %v17014_v36 = vld [vmem:[#allocation37_spill] sm:$0xff]  ;;  %v11260_v44 = vld [vmem:[%s16863_s2 + $0x264] sm:$0xf0]  ;;  %v9211_v57 = vld [vmem:[%s16863_s2 + $0xa0] sm:$0xf] }
 0x205   : > { %v2465_v53 = vmax.f32 %v17014_v36, %v12862_v5  ;;  %v11204_v8 = vld [vmem:[%s16863_s2 + $0xa4] sm:$0xf0] }
 0x206   : > { %6954 = vmatpush.bf16.msrb.mxu0 %v9140_v17  ;;  %6992 = vmatpush.bf16.msra.mxu3 %v9364_v63  ;;  %v13350_v46 = vpop.f32.mrf.mxu2  ;;  %v9444_v17 = vor.u32 %v11262_v29, %v9443_v24  ;;  %v9347_v63 = vld [vmem:[%s16863_s2 + $0x1b0] sm:$0xf]  ;;  %v9220_v24 = vor.u32 %v11206_v9, %v9219_v58  ;;  %v9316_v29 = vor.u32 %v11230_v1, %v9315_v33  ;;  %v11228_v58 = vld [vmem:[%s16863_s2 + $0x164] sm:$0xf0]  ;;  %v11258_v1 = vld [vmem:[%s16863_s2 + $0x254] sm:$0xf0] }
 0x207   : > { %17012 = vst [vmem:[#allocation54_spill] sm:$0xff] %v13350_v46  ;;  %v9348_v36 = vor.u32 %v11238_v23, %v9347_v63  ;;  %v11236_v9 = vld [vmem:[%s16863_s2 + $0x1a4] sm:$0xf0]  ;;  %v9427_v33 = vld [vmem:[%s16863_s2 + $0x250] sm:$0xf]  ;;  %v9212_v23 = vor.u32 %v11204_v8, %v9211_v57 }
 0x208   : > { %v13361_v3 = vpop.f32.mrf.mxu3  ;;  %6965 = vmatpush.bf16.msra.mxu1 %v9228_v6  ;;  %v3299_v20 = vpop.f32.mrf.mxu1  ;;  %v9307_v6 = vld [vmem:[%s16863_s2 + $0x160] sm:$0xf]  ;;  %v11202_v46 = vld [vmem:[%s16863_s2 + $0x94] sm:$0xf0] }
 0x209   : > { %17013 = vst [vmem:[#allocation11_spill] sm:$0xff] %v13361_v3  ;;  %v13380_v3 = vmax.f32 %v2465_v53, %v3299_v20  ;;  %v9308_v53 = vor.u32 %v11228_v58, %v9307_v6  ;;  %v11226_v8 = vld [vmem:[%s16863_s2 + $0x154] sm:$0xf0]  ;;  %v9419_v58 = vld [vmem:[%s16863_s2 + $0x240] sm:$0xf] }
 0x20a   : > { %6955 = vmatpush.bf16.msrb.mxu0 %v9132_v26  ;;  %6993 = vmatpush.bf16.msra.mxu3 %v9356_v47  ;;  %v3789_v5 = vpop.f32.mrf.mxu0  ;;  %v9436_v26 = vor.u32 %v11260_v44, %v9435_v60  ;;  %v9339_v47 = vld [vmem:[%s16863_s2 + $0x1a0] sm:$0xf]  ;;  %v9203_v60 = vld [vmem:[%s16863_s2 + $0x90] sm:$0xf] }
 0x20b   : > { %17015 = vst [vmem:[#allocation55_spill] sm:$0xff] %v13380_v3  ;;  %9123 = vmatmul.msk.bf16.vlgmr.msrb.gmra.mxu2 %vm1152_vm0, %v12918_v27  ;;  %9126 = vmatmul.msk.bf16.vlgmr.msrb.gmra.mxu1 %vm1152_vm0, %v12918_v27  ;;  %v9340_v3 = vor.u32 %v11236_v9, %v9339_v47  ;;  %v4228_v47 = vmax.f32 %v12867_v56, %v3789_v5  ;;  %v9291_v56 = vld [vmem:[%s16863_s2 + $0x140] sm:$0xf] }
 0x20c   : > { %6966 = vmatpush.bf16.msra.mxu1 %v9220_v24  ;;  %6976 = vmatpush.bf16.msrb.mxu2 %v9316_v29  ;;  %v9331_v29 = vld [vmem:[%s16863_s2 + $0x190] sm:$0xf] }
 0x20d   : > { %9128 = vmatmul.msk.bf16.vlgmr.msrb.gmra.mxu3 %vm1152_vm0, %v12918_v27  ;;  %v17017_v27 = vld [vmem:[#allocation39_spill] sm:$0xff] }
 0x20e   : > { %7004 = vmatpush.bf16.msra.mxu0 %v9444_v17  ;;  %v17016_v17 = vld [vmem:[#allocation38_spill] sm:$0xff]  ;;  %v2467_v44 = vmax.f32 %v17017_v27, %v12884_v34  ;;  %6994 = vmatpush.bf16.msra.mxu3 %v9348_v36  ;;  %v3257_v20 = vpop.f32.mrf.mxu2  ;;  %v9428_v34 = vor.u32 %v11258_v1, %v9427_v33  ;;  %v11234_v36 = vld [vmem:[%s16863_s2 + $0x194] sm:$0xf0]  ;;  %v9204_v33 = vor.u32 %v11202_v46, %v9203_v60  ;;  %v11224_v46 = vld [vmem:[%s16863_s2 + $0x144] sm:$0xf0] }
 0x20f   : > { %v2462_v63 = vmax.f32 %v17016_v17, %v12882_v28  ;;  %v9299_v28 = vld [vmem:[%s16863_s2 + $0x150] sm:$0xf]  ;;  %v9195_v17 = vld [vmem:[%s16863_s2 + $0x80] sm:$0xf]  ;;  %v9332_v27 = vor.u32 %v11234_v36, %v9331_v29  ;;  %v11310_v36 = vld [vmem:[%s16863_s2 + $0x3f4] sm:$0xf0] }
 0x210   : > { %v3327_v24 = vpop.f32.mrf.mxu3  ;;  %6967 = vmatpush.bf16.msra.mxu1 %v9212_v23  ;;  %6977 = vmatpush.bf16.msrb.mxu2 %v9308_v53  ;;  %v13442_v9 = vpop.f32.mrf.mxu1  ;;  %v9300_v1 = vor.u32 %v11226_v8, %v9299_v28  ;;  %v11232_v53 = vld [vmem:[%s16863_s2 + $0x184] sm:$0xf0]  ;;  %v9411_v60 = vld [vmem:[%s16863_s2 + $0x230] sm:$0xf]  ;;  %v11278_v28 = vld [vmem:[%s16863_s2 + $0x2f4] sm:$0xf0] }
 0x211   : > { %v13425_v57 = vmax.f32 %v2462_v63, %v3257_v20  ;;  %v13433_v6 = vmax.f32 %v2467_v44, %v3327_v24  ;;  %v11200_v44 = vld [vmem:[%s16863_s2 + $0x84] sm:$0xf0]  ;;  %v11254_v20 = vld [vmem:[%s16863_s2 + $0x234] sm:$0xf0]  ;;  %v4292_v8 = vmax.f32 %v4228_v47, 0.0 }
 0x212   : > { %7005 = vmatpush.bf16.msra.mxu0 %v9436_v26  ;;  %v11256_v26 = vld [vmem:[%s16863_s2 + $0x244] sm:$0xf0]  ;;  %6995 = vmatpush.bf16.msra.mxu3 %v9340_v3  ;;  %v3791_v63 = vpop.f32.mrf.mxu0  ;;  %v9323_v3 = vld [vmem:[%s16863_s2 + $0x180] sm:$0xf]  ;;  %v9635_v29 = vld [vmem:[%s16863_s2 + $0x3f0] sm:$0xf] }
 0x213   : > { %17018 = vst [vmem:[#allocation12_spill] sm:$0xff] %v13433_v6  ;;  %v4260_v5 = vmax.f32 %v12890_v40, %v3791_v63  ;;  %v9420_v23 = vor.u32 %v11256_v26, %v9419_v58  ;;  %v9507_v40 = vld [vmem:[%s16863_s2 + $0x2f0] sm:$0xf]  ;;  %v9292_v26 = vor.u32 %v11224_v46, %v9291_v56  ;;  %v9324_v63 = vor.u32 %v11232_v53, %v9323_v3  ;;  %v11252_v46 = vld [vmem:[%s16863_s2 + $0x224] sm:$0xf0] }
 0x214   : > { %6968 = vmatpush.bf16.msra.mxu1 %v9204_v33  ;;  %6978 = vmatpush.bf16.msrb.mxu2 %v9300_v1  ;;  %v9412_v33 = vor.u32 %v11254_v20, %v9411_v60  ;;  %v9508_v1 = vor.u32 %v11278_v28, %v9507_v40  ;;  %v9636_v56 = vor.u32 %v11310_v36, %v9635_v29  ;;  %v9627_v53 = vld [vmem:[%s16863_s2 + $0x3e0] sm:$0xf]  ;;  %v11308_v60 = vld [vmem:[%s16863_s2 + $0x3e4] sm:$0xf0]  ;;  %v9395_v29 = vld [vmem:[%s16863_s2 + $0x210] sm:$0xf] }
 0x215   : > { %v4324_v24 = vmax.f32 %v4260_v5, 0.0  ;;  %v9499_v5 = vld [vmem:[%s16863_s2 + $0x2e0] sm:$0xf] }
 0x216   : > { %7006 = vmatpush.bf16.msra.mxu0 %v9428_v34  ;;  %v9196_v34 = vor.u32 %v11200_v44, %v9195_v17  ;;  %6996 = vmatpush.bf16.msra.mxu3 %v9332_v27  ;;  %v13481_v58 = vpop.f32.mrf.mxu2  ;;  %v9283_v17 = vld [vmem:[%s16863_s2 + $0x130] sm:$0xf]  ;;  %v11222_v44 = vld [vmem:[%s16863_s2 + $0x134] sm:$0xf0]  ;;  %v9403_v27 = vld [vmem:[%s16863_s2 + $0x220] sm:$0xf] }
 0x217   : > { %v13483_v6 = vpack.c.bf16 %v4324_v24, %v4292_v8  ;;  %v9284_v40 = vor.u32 %v11222_v44, %v9283_v17  ;;  %v9404_v28 = vor.u32 %v11252_v46, %v9403_v27  ;;  %v9275_v24 = vld [vmem:[%s16863_s2 + $0x120] sm:$0xf]  ;;  %v17021_v17 = vld [vmem:[#allocation43_spill] sm:$0xff]  ;;  %v9619_v27 = vld [vmem:[%s16863_s2 + $0x3d0] sm:$0xf] }
 0x218   : > { %v13485_v47 = vpop.f32.mrf.mxu3  ;;  %6969 = vmatpush.bf16.msra.mxu1 %v9196_v34  ;;  %v13506_v3 = vpop.f32.mrf.mxu1  ;;  %6979 = vmatpush.bf16.msrb.mxu2 %v9292_v26  ;;  %v11220_v34 = vld [vmem:[%s16863_s2 + $0x124] sm:$0xf0]  ;;  %v11962_v36 = vld [vmem:[%s16861_s0] sm:$0xff]  ;;  %v9628_v26 = vor.u32 %v11308_v60, %v9627_v53  ;;  %v2466_v44 = vmax.f32 %v17021_v17, %v12935_v39  ;;  %v11218_v17 = vld [vmem:[%s16863_s2 + $0x114] sm:$0xf0] }
 0x219   : > { %17019 = vst [vmem:[#allocation56_spill] sm:$0xff] %v13483_v6  ;;  %6956 = vmatmul.bf16.vlgmr.msrb.gmra.mxu0 %v13483_v6 }
 0x21a   : > { %7007 = vmatpush.bf16.msra.mxu0 %v9420_v23  ;;  %17020 = vst [vmem:[#allocation13_spill] sm:$0xff] %v13485_v47  ;;  %v11276_v23 = vld [vmem:[%s16863_s2 + $0x2e4] sm:$0xf0]  ;;  %6997 = vmatpush.bf16.msra.mxu3 %v9324_v63  ;;  %v13514_v20 = vpop.f32.mrf.mxu0  ;;  %v11250_v63 = vld [vmem:[%s16863_s2 + $0x214] sm:$0xf0] }
 0x21b   : > { %v9500_v8 = vor.u32 %v11276_v23, %v9499_v5  ;;  %9127 = vmatmul.msk.bf16.vlgmr.msra.gmra.mxu2 %vm1152_vm0, %v11962_v36  ;;  %v9276_v5 = vor.u32 %v11220_v34, %v9275_v24  ;;  %v9267_v23 = vld [vmem:[%s16863_s2 + $0x110] sm:$0xf]  ;;  %v9396_v60 = vor.u32 %v11250_v63, %v9395_v29  ;;  %v11248_v24 = vld [vmem:[%s16863_s2 + $0x204] sm:$0xf0]  ;;  %v9483_v34 = vld [vmem:[%s16863_s2 + $0x2c0] sm:$0xf] }
 0x21c   : > { %7018 = vmatpush.bf16.msrb.mxu1 %v9508_v1  ;;  %v11274_v1 = vld [vmem:[%s16863_s2 + $0x2d4] sm:$0xf0]  ;;  %6980 = vmatpush.bf16.msrb.mxu2 %v9284_v40  ;;  %v9387_v40 = vld [vmem:[%s16863_s2 + $0x200] sm:$0xf]  ;;  %v11272_v29 = vld [vmem:[%s16863_s2 + $0x2c4] sm:$0xf0] }
 0x21d   : > { %v9611_v63 = vld [vmem:[%s16863_s2 + $0x3c0] sm:$0xf] }
 0x21e   : > { %7008 = vmatpush.bf16.msra.mxu0 %v9412_v33  ;;  %7046 = vmatpush.bf16.msrb.mxu3 %v9636_v56  ;;  %v9491_v33 = vld [vmem:[%s16863_s2 + $0x2d0] sm:$0xf]  ;;  %v11306_v56 = vld [vmem:[%s16863_s2 + $0x3d4] sm:$0xf0]  ;;  %v3313_v46 = vpop.f32.mrf.mxu2 }
 0x21f   : > { %v13549_v53 = vmax.f32 %v2466_v44, %v3313_v46  ;;  %v9492_v36 = vor.u32 %v11274_v1, %v9491_v33  ;;  %v4232_v33 = vmax.f32 %v12913_v43, %v13514_v20  ;;  %v9259_v43 = vld [vmem:[%s16863_s2 + $0x100] sm:$0xf]  ;;  %v11216_v20 = vld [vmem:[%s16863_s2 + $0x104] sm:$0xf0]  ;;  %v9475_v46 = vld [vmem:[%s16863_s2 + $0x2b0] sm:$0xf] }
 0x220   : > { %7019 = vmatpush.bf16.msrb.mxu1 %v9500_v8  ;;  %v13551_v39 = vpop.f32.mrf.mxu3  ;;  %v9620_v8 = vor.u32 %v11306_v56, %v9619_v27  ;;  %v3805_v1 = vpop.f32.mrf.mxu1  ;;  %6981 = vmatpush.bf16.msrb.mxu2 %v9276_v5  ;;  %v9268_v56 = vor.u32 %v11218_v17, %v9267_v23  ;;  %v9388_v5 = vor.u32 %v11248_v24, %v9387_v40  ;;  %v11270_v23 = vld [vmem:[%s16863_s2 + $0x2b4] sm:$0xf0]  ;;  %v9571_v17 = vld [vmem:[%s16863_s2 + $0x370] sm:$0xf] }
 0x221   : > { %17022 = vst [vmem:[#allocation57_spill] sm:$0xff] %v13549_v53  ;;  %v4261_v44 = vmax.f32 %v12943_v4, %v3805_v1  ;;  %v9484_v4 = vor.u32 %v11272_v29, %v9483_v34  ;;  %v11294_v1 = vld [vmem:[%s16863_s2 + $0x374] sm:$0xf0]  ;;  %v4296_v24 = vmax.f32 %v4232_v33, 0.0  ;;  %v9691_v29 = vld [vmem:[%s16863_s2 + $0x460] sm:$0xf]  ;;  %v9476_v33 = vor.u32 %v11270_v23, %v9475_v46 }
 0x222   : > { %7009 = vmatpush.bf16.msra.mxu0 %v9404_v28  ;;  %v4229_v28 = vmax.f32 %v12908_v45, %v13506_v3  ;;  %7047 = vmatpush.bf16.msrb.mxu3 %v9628_v26  ;;  %v11304_v45 = vld [vmem:[%s16863_s2 + $0x3c4] sm:$0xf0]  ;;  %v9699_v3 = vld [vmem:[%s16863_s2 + $0x470] sm:$0xf]  ;;  %v11326_v26 = vld [vmem:[%s16863_s2 + $0x474] sm:$0xf0]  ;;  %v3847_v27 = vpop.f32.mrf.mxu0 }
 0x223   : > { %v4264_v6 = vmax.f32 %v12945_v41, %v3847_v27  ;;  %v4325_v47 = vmax.f32 %v4261_v44, 0.0  ;;  %v9612_v41 = vor.u32 %v11304_v45, %v9611_v63  ;;  %v11302_v40 = vld [vmem:[%s16863_s2 + $0x3b4] sm:$0xf0]  ;;  %v9572_v44 = vor.u32 %v11294_v1, %v9571_v17  ;;  %v9467_v27 = vld [vmem:[%s16863_s2 + $0x2a0] sm:$0xf] }
 0x224   : > { %7020 = vmatpush.bf16.msrb.mxu1 %v9492_v36  ;;  %v4293_v53 = vmax.f32 %v4229_v28, 0.0  ;;  %v9603_v36 = vld [vmem:[%s16863_s2 + $0x3b0] sm:$0xf]  ;;  %v11324_v28 = vld [vmem:[%s16863_s2 + $0x464] sm:$0xf0]  ;;  %6982 = vmatpush.bf16.msrb.mxu2 %v9268_v56 }
 0x225   : > { %v4328_v34 = vmax.f32 %v4264_v6, 0.0  ;;  %v9563_v56 = vld [vmem:[%s16863_s2 + $0x360] sm:$0xf] }
 0x226   : > { %7010 = vmatpush.bf16.msra.mxu0 %v9396_v60  ;;  %7048 = vmatpush.bf16.msrb.mxu3 %v9620_v8  ;;  %v9700_v60 = vor.u32 %v11326_v26, %v9699_v3  ;;  %v4231_v8 = vmax.f32 %v12939_v42, %v13551_v39  ;;  %v13618_v63 = vpack.c.bf16 %v4325_v47, %v4293_v53  ;;  %v13620_v45 = vpop.f32.mrf.mxu2  ;;  %v11268_v42 = vld [vmem:[%s16863_s2 + $0x2a4] sm:$0xf0] }
 0x227   : > { %v9260_v3 = vor.u32 %v11216_v20, %v9259_v43  ;;  %v13622_v26 = vpack.c.bf16 %v4328_v34, %v4296_v24  ;;  %v9604_v53 = vor.u32 %v11302_v40, %v9603_v36  ;;  %v9692_v39 = vor.u32 %v11324_v28, %v9691_v29  ;;  %v11292_v43 = vld [vmem:[%s16863_s2 + $0x364] sm:$0xf0]  ;;  %v9595_v20 = vld [vmem:[%s16863_s2 + $0x3a0] sm:$0xf]  ;;  %v9459_v36 = vld [vmem:[%s16863_s2 + $0x290] sm:$0xf] }
 0x228   : > { %7021 = vmatpush.bf16.msrb.mxu1 %v9484_v4  ;;  %v3833_v6 = vpop.f32.mrf.mxu3  ;;  %v3859_v46 = vpop.f32.mrf.mxu1  ;;  %v11322_v4 = vld [vmem:[%s16863_s2 + $0x454] sm:$0xf0]  ;;  %v4295_v23 = vmax.f32 %v4231_v8, 0.0  ;;  %v9555_v28 = vld [vmem:[%s16863_s2 + $0x350] sm:$0xf] }
 0x229   : > { %v4263_v47 = vmax.f32 %v12959_v59, %v3833_v6  ;;  %6970 = vmatmul.bf16.vlgmr.msra.gmra.mxu1 %v13618_v63  ;;  %v11300_v59 = vld [vmem:[%s16863_s2 + $0x3a4] sm:$0xf0]  ;;  %6983 = vmatpush.bf16.msrb.mxu2 %v9260_v3  ;;  %v11266_v40 = vld [vmem:[%s16863_s2 + $0x294] sm:$0xf0]  ;;  %v9587_v3 = vld [vmem:[%s16863_s2 + $0x390] sm:$0xf] }
 0x22a   : > { %7011 = vmatpush.bf16.msra.mxu0 %v9388_v5  ;;  %7049 = vmatpush.bf16.msrb.mxu3 %v9612_v41  ;;  %v9683_v5 = vld [vmem:[%s16863_s2 + $0x450] sm:$0xf]  ;;  %v3901_v1 = vpop.f32.mrf.mxu0  ;;  %v9468_v41 = vor.u32 %v11268_v42, %v9467_v27  ;;  %v9596_v34 = vor.u32 %v11300_v59, %v9595_v20  ;;  %v11290_v8 = vld [vmem:[%s16863_s2 + $0x354] sm:$0xf0]  ;;  %v9451_v42 = vld [vmem:[%s16863_s2 + $0x280] sm:$0xf]  ;;  %v4233_v59 = vmax.f32 %v12965_v21, %v3859_v46 }
 0x22b   : > { %v4327_v17 = vmax.f32 %v4263_v47, 0.0  ;;  %v9684_v29 = vor.u32 %v11322_v4, %v9683_v5  ;;  %v11298_v6 = vld [vmem:[%s16863_s2 + $0x394] sm:$0xf0]  ;;  %v11288_v20 = vld [vmem:[%s16863_s2 + $0x344] sm:$0xf0] }
 0x22c   : > { %7022 = vmatpush.bf16.msrb.mxu1 %v9476_v33  ;;  %v9675_v33 = vld [vmem:[%s16863_s2 + $0x440] sm:$0xf]  ;;  %v9588_v5 = vor.u32 %v11298_v6, %v9587_v3  ;;  %v11318_v21 = vld [vmem:[%s16863_s2 + $0x434] sm:$0xf0]  ;;  %v9763_v46 = vld [vmem:[%s16863_s2 + $0x4f0] sm:$0xf] }
 0x22d   : > { %7012 = vmatmul.bf16.vlgmr.msra.gmra.mxu0 %v13622_v26  ;;  %7032 = vmatpush.bf16.msra.mxu2 %v9572_v44  ;;  %v13657_v24 = vpack.c.bf16 %v4327_v17, %v4295_v23  ;;  %v11320_v44 = vld [vmem:[%s16863_s2 + $0x444] sm:$0xf0]  ;;  %v9579_v23 = vld [vmem:[%s16863_s2 + $0x380] sm:$0xf] }
 0x22e   : > { %7060 = vmatpush.bf16.msrb.mxu0 %v9700_v60  ;;  %v9564_v60 = vor.u32 %v11292_v43, %v9563_v56  ;;  %7050 = vmatpush.bf16.msrb.mxu3 %v9604_v53  ;;  %v13678_v27 = vpop.f32.mrf.mxu2  ;;  %v9460_v53 = vor.u32 %v11266_v40, %v9459_v36  ;;  %v11264_v56 = vld [vmem:[%s16863_s2 + $0x284] sm:$0xf0]  ;;  %v9547_v43 = vld [vmem:[%s16863_s2 + $0x340] sm:$0xf]  ;;  %v9676_v4 = vor.u32 %v11320_v44, %v9675_v33  ;;  %v11342_v40 = vld [vmem:[%s16863_s2 + $0x4f4] sm:$0xf0] }
 0x22f   : > { %6998 = vmatmul.bf16.vlgmr.msra.gmra.mxu3 %v13657_v24  ;;  %v11296_v17 = vld [vmem:[%s16863_s2 + $0x384] sm:$0xf0]  ;;  %v9548_v3 = vor.u32 %v11288_v20, %v9547_v43  ;;  %v4297_v33 = vmax.f32 %v4233_v59, 0.0 }
 0x230   : > { %7023 = vmatpush.bf16.msrb.mxu1 %v9468_v41  ;;  %v13683_v47 = vpop.f32.mrf.mxu3  ;;  %v9667_v41 = vld [vmem:[%s16863_s2 + $0x430] sm:$0xf]  ;;  %v3861_v36 = vpop.f32.mrf.mxu1  ;;  %v9580_v6 = vor.u32 %v11296_v17, %v9579_v23  ;;  %v11316_v59 = vld [vmem:[%s16863_s2 + $0x424] sm:$0xf0] }
 0x231   : > { %7033 = vmatpush.bf16.msra.mxu2 %v9564_v60  ;;  %v4236_v60 = vmax.f32 %v12970_v14, %v3901_v1  ;;  %v9891_v14 = vld [vmem:[%s16863_s2 + $0x5f0] sm:$0xf]  ;;  %v11374_v1 = vld [vmem:[%s16863_s2 + $0x5f4] sm:$0xf0] }
 0x232   : > { %7061 = vmatpush.bf16.msrb.mxu0 %v9692_v39  ;;  %v9556_v39 = vor.u32 %v11290_v8, %v9555_v28  ;;  %7051 = vmatpush.bf16.msrb.mxu3 %v9596_v34  ;;  %v4265_v34 = vmax.f32 %v12997_v61, %v3861_v36  ;;  %v9452_v28 = vor.u32 %v11264_v56, %v9451_v42  ;;  %v9539_v61 = vld [vmem:[%s16863_s2 + $0x330] sm:$0xf]  ;;  %v11286_v36 = vld [vmem:[%s16863_s2 + $0x334] sm:$0xf0] }
 0x233   : > { %v9668_v42 = vor.u32 %v11318_v21, %v9667_v41  ;;  %v9764_v56 = vor.u32 %v11342_v40, %v9763_v46  ;;  %v9892_v20 = vor.u32 %v11374_v1, %v9891_v14  ;;  %v11372_v41 = vld [vmem:[%s16863_s2 + $0x5e4] sm:$0xf0]  ;;  %v9540_v21 = vor.u32 %v11286_v36, %v9539_v61  ;;  %v9531_v46 = vld [vmem:[%s16863_s2 + $0x320] sm:$0xf]  ;;  %v11338_v61 = vld [vmem:[%s16863_s2 + $0x4d4] sm:$0xf0] }
 0x234   : > { %7024 = vmatpush.bf16.msrb.mxu1 %v9460_v53  ;;  %v4329_v44 = vmax.f32 %v4265_v34, 0.0  ;;  %v4300_v53 = vmax.f32 %v4236_v60, 0.0  ;;  %v11370_v36 = vld [vmem:[%s16863_s2 + $0x5d4] sm:$0xf0] }
 0x235   : > { %7034 = vmatpush.bf16.msra.mxu2 %v9556_v39  ;;  %v4230_v39 = vmax.f32 %v12989_v15, %v13678_v27  ;;  %v11340_v15 = vld [vmem:[%s16863_s2 + $0x4e4] sm:$0xf0]  ;;  %v9883_v27 = vld [vmem:[%s16863_s2 + $0x5e0] sm:$0xf] }
 0x236   : > { %7062 = vmatpush.bf16.msrb.mxu0 %v9684_v29  ;;  %v3903_v29 = vpop.f32.mrf.mxu0  ;;  %7052 = vmatpush.bf16.msrb.mxu3 %v9588_v5  ;;  %v9755_v5 = vld [vmem:[%s16863_s2 + $0x4e0] sm:$0xf]  ;;  %v13741_v23 = vpack.c.bf16 %v4329_v44, %v4297_v33  ;;  %v3819_v17 = vpop.f32.mrf.mxu2 }
 0x237   : > { %v4268_v8 = vmax.f32 %v12999_v52, %v3903_v29  ;;  %v9659_v52 = vld [vmem:[%s16863_s2 + $0x420] sm:$0xf]  ;;  %v11284_v29 = vld [vmem:[%s16863_s2 + $0x324] sm:$0xf0]  ;;  %v4294_v14 = vmax.f32 %v4230_v39, 0.0 }
 0x238   : > { %7025 = vmatpush.bf16.msrb.mxu1 %v9452_v28  ;;  %v9660_v34 = vor.u32 %v11316_v59, %v9659_v52  ;;  %v9651_v28 = vld [vmem:[%s16863_s2 + $0x410] sm:$0xf]  ;;  %v11282_v59 = vld [vmem:[%s16863_s2 + $0x314] sm:$0xf0] }
 0x239   : > { %v4332_v43 = vmax.f32 %v4268_v8, 0.0  ;;  %7035 = vmatpush.bf16.msra.mxu2 %v9548_v3  ;;  %v3915_v8 = vpop.f32.mrf.mxu1  ;;  %v9756_v3 = vor.u32 %v11340_v15, %v9755_v5  ;;  %v11312_v15 = vld [vmem:[%s16863_s2 + $0x404] sm:$0xf0] }
 0x23a   : > { %7063 = vmatpush.bf16.msrb.mxu0 %v9676_v4  ;;  %v4235_v4 = vmax.f32 %v12993_v2, %v13683_v47  ;;  %v4262_v2 = vmax.f32 %v13008_v48, %v3819_v17  ;;  %v3889_v47 = vpop.f32.mrf.mxu3  ;;  %7053 = vmatpush.bf16.msrb.mxu3 %v9580_v6  ;;  %v11314_v48 = vld [vmem:[%s16863_s2 + $0x414] sm:$0xf0]  ;;  %v9747_v6 = vld [vmem:[%s16863_s2 + $0x4d0] sm:$0xf]  ;;  %v9643_v17 = vld [vmem:[%s16863_s2 + $0x400] sm:$0xf] }
 0x23b   : > { %v13752_v60 = vpack.c.bf16 %v4332_v43, %v4300_v53  ;;  %v4267_v40 = vmax.f32 %v13015_v51, %v3889_v47  ;;  %v9884_v51 = vor.u32 %v11372_v41, %v9883_v27  ;;  %7026 = vmatmul.bf16.vlgmr.msrb.gmra.mxu1 %v13741_v23  ;;  %v9532_v53 = vor.u32 %v11284_v29, %v9531_v46  ;;  %v9739_v27 = vld [vmem:[%s16863_s2 + $0x4c0] sm:$0xf]  ;;  %v11390_v29 = vld [vmem:[%s16863_s2 + $0x674] sm:$0xf0] }
 0x23c   : > { %7074 = vmatpush.bf16.msra.mxu1 %v9764_v56  ;;  %v4326_v1 = vmax.f32 %v4262_v2, 0.0  ;;  %v4299_v33 = vmax.f32 %v4235_v4, 0.0  ;;  %v9875_v56 = vld [vmem:[%s16863_s2 + $0x5d0] sm:$0xf]  ;;  %v9652_v43 = vor.u32 %v11314_v48, %v9651_v28  ;;  %v9748_v5 = vor.u32 %v11338_v61, %v9747_v6  ;;  %v11336_v2 = vld [vmem:[%s16863_s2 + $0x4c4] sm:$0xf0] }
 0x23d   : > { %v4331_v44 = vmax.f32 %v4267_v40, 0.0  ;;  %7036 = vmatpush.bf16.msra.mxu2 %v9540_v21  ;;  %v9876_v4 = vor.u32 %v11370_v36, %v9875_v56  ;;  %v9867_v47 = vld [vmem:[%s16863_s2 + $0x5c0] sm:$0xf]  ;;  %v11368_v21 = vld [vmem:[%s16863_s2 + $0x5c4] sm:$0xf0]  ;;  %v4237_v28 = vmax.f32 %v13021_v16, %v3915_v8  ;;  %v9644_v48 = vor.u32 %v11312_v15, %v9643_v17 }
 0x23e   : > { %7064 = vmatpush.bf16.msrb.mxu0 %v9668_v42  ;;  %7102 = vmatpush.bf16.msra.mxu3 %v9892_v20  ;;  %v3957_v42 = vpop.f32.mrf.mxu0  ;;  %v13781_v52 = vpack.c.bf16 %v4326_v1, %v4294_v14  ;;  %v9523_v20 = vld [vmem:[%s16863_s2 + $0x310] sm:$0xf]  ;;  %v13802_v41 = vpop.f32.mrf.mxu2  ;;  %v9515_v14 = vld [vmem:[%s16863_s2 + $0x300] sm:$0xf]  ;;  %v11280_v1 = vld [vmem:[%s16863_s2 + $0x304] sm:$0xf0]  ;;  %v9740_v16 = vor.u32 %v11336_v2, %v9739_v27  ;;  %v9868_v8 = vor.u32 %v11368_v21, %v9867_v47 }
 0x23f   : > { %v13783_v39 = vpack.c.bf16 %v4331_v44, %v4299_v33  ;;  %v9524_v40 = vor.u32 %v11282_v59, %v9523_v20  ;;  %v11334_v61 = vld [vmem:[%s16863_s2 + $0x4b4] sm:$0xf0]  ;;  %v9827_v33 = vld [vmem:[%s16863_s2 + $0x570] sm:$0xf]  ;;  %v9516_v20 = vor.u32 %v11280_v1, %v9515_v14  ;;  %v9947_v59 = vld [vmem:[%s16863_s2 + $0x660] sm:$0xf]  ;;  %v4234_v2 = vmax.f32 %v13045_v32, %v13802_v41 }
 0x240   : > { %7075 = vmatpush.bf16.msra.mxu1 %v9756_v3  ;;  %6984 = vmatmul.bf16.vlgmr.msrb.gmra.mxu2 %v13781_v52  ;;  %v9731_v3 = vld [vmem:[%s16863_s2 + $0x4b0] sm:$0xf]  ;;  %v11358_v44 = vld [vmem:[%s16863_s2 + $0x574] sm:$0xf0]  ;;  %v9723_v27 = vld [vmem:[%s16863_s2 + $0x4a0] sm:$0xf] }
 0x241   : > { %7054 = vmatmul.bf16.vlgmr.msrb.gmra.mxu3 %v13783_v39  ;;  %7037 = vmatpush.bf16.msra.mxu2 %v9532_v53  ;;  %v3917_v6 = vpop.f32.mrf.mxu1  ;;  %v9859_v36 = vld [vmem:[%s16863_s2 + $0x5b0] sm:$0xf]  ;;  %v11366_v53 = vld [vmem:[%s16863_s2 + $0x5b4] sm:$0xf0]  ;;  %v9732_v17 = vor.u32 %v11334_v61, %v9731_v3  ;;  %v9828_v15 = vor.u32 %v11358_v44, %v9827_v33  ;;  %v11332_v41 = vld [vmem:[%s16863_s2 + $0x4a4] sm:$0xf0] }
 0x242   : > { %7065 = vmatpush.bf16.msrb.mxu0 %v9660_v34  ;;  %7103 = vmatpush.bf16.msra.mxu3 %v9884_v51  ;;  %v13813_v46 = vpop.f32.mrf.mxu3  ;;  %v9955_v34 = vld [vmem:[%s16863_s2 + $0x670] sm:$0xf]  ;;  %v4240_v51 = vmax.f32 %v13026_v62, %v3957_v42  ;;  %v4269_v56 = vmax.f32 %v13053_v10, %v3917_v6  ;;  %v11388_v10 = vld [vmem:[%s16863_s2 + $0x664] sm:$0xf0]  ;;  %v9860_v21 = vor.u32 %v11366_v53, %v9859_v36  ;;  %v9851_v14 = vld [vmem:[%s16863_s2 + $0x5a0] sm:$0xf] }
 0x243   : > { %v9956_v42 = vor.u32 %v11390_v29, %v9955_v34  ;;  %v11356_v34 = vld [vmem:[%s16863_s2 + $0x564] sm:$0xf0]  ;;  %v4239_v29 = vmax.f32 %v13049_v25, %v13813_v46  ;;  %v9948_v32 = vor.u32 %v11388_v10, %v9947_v59  ;;  %v11386_v6 = vld [vmem:[%s16863_s2 + $0x654] sm:$0xf0]  ;;  %v9715_v61 = vld [vmem:[%s16863_s2 + $0x490] sm:$0xf] }
 0x244   : > { %7076 = vmatpush.bf16.msra.mxu1 %v9748_v5  ;;  %v4301_v5 = vmax.f32 %v4237_v28, 0.0  ;;  %v11364_v1 = vld [vmem:[%s16863_s2 + $0x5a4] sm:$0xf0]  ;;  %v4298_v33 = vmax.f32 %v4234_v2, 0.0  ;;  %v11354_v36 = vld [vmem:[%s16863_s2 + $0x554] sm:$0xf0] }
 0x245   : > { %7038 = vmatpush.bf16.msra.mxu2 %v9524_v40  ;;  %v9819_v40 = vld [vmem:[%s16863_s2 + $0x560] sm:$0xf]  ;;  %v4303_v53 = vmax.f32 %v4239_v29, 0.0  ;;  %v9843_v10 = vld [vmem:[%s16863_s2 + $0x590] sm:$0xf] }
 0x246   : > { %7066 = vmatpush.bf16.msrb.mxu0 %v9652_v43  ;;  %7104 = vmatpush.bf16.msra.mxu3 %v9876_v4  ;;  %v3959_v62 = vpop.f32.mrf.mxu0  ;;  %v4333_v4 = vmax.f32 %v4269_v56, 0.0  ;;  %v9707_v2 = vld [vmem:[%s16863_s2 + $0x480] sm:$0xf]  ;;  %v11352_v29 = vld [vmem:[%s16863_s2 + $0x544] sm:$0xf0] }
 0x247   : > { %v4272_v43 = vmax.f32 %v13055_v13, %v3959_v62  ;;  %v4304_v13 = vmax.f32 %v4240_v51, 0.0  ;;  %v9939_v51 = vld [vmem:[%s16863_s2 + $0x650] sm:$0xf]  ;;  %v9724_v62 = vor.u32 %v11332_v41, %v9723_v27 }
 0x248   : > { %7077 = vmatpush.bf16.msra.mxu1 %v9740_v16  ;;  %v13868_v28 = vpack.c.bf16 %v4333_v4, %v4301_v5  ;;  %v9940_v59 = vor.u32 %v11386_v6, %v9939_v51  ;;  %v11362_v5 = vld [vmem:[%s16863_s2 + $0x594] sm:$0xf0]  ;;  %v9923_v51 = vld [vmem:[%s16863_s2 + $0x630] sm:$0xf] }
 0x249   : > { %v4336_v47 = vmax.f32 %v4272_v43, 0.0  ;;  %7039 = vmatpush.bf16.msra.mxu2 %v9516_v20  ;;  %v13896_v56 = vpop.f32.mrf.mxu1 }
 0x24a   : > { %7067 = vmatpush.bf16.msrb.mxu0 %v9644_v48  ;;  %7105 = vmatpush.bf16.msra.mxu3 %v9868_v8  ;;  %v3875_v48 = vpop.f32.mrf.mxu2  ;;  %v3945_v46 = vpop.f32.mrf.mxu3  ;;  %v9820_v8 = vor.u32 %v11356_v34, %v9819_v40  ;;  %v11328_v40 = vld [vmem:[%s16863_s2 + $0x484] sm:$0xf0]  ;;  %v9803_v34 = vld [vmem:[%s16863_s2 + $0x540] sm:$0xf] }
 0x24b   : > { %v13879_v3 = vpack.c.bf16 %v4336_v47, %v4304_v13  ;;  %v4266_v25 = vmax.f32 %v13064_v12, %v3875_v48  ;;  %v4271_v16 = vmax.f32 %v13071_v18, %v3945_v46  ;;  %v11330_v12 = vld [vmem:[%s16863_s2 + $0x494] sm:$0xf0]  ;;  %v9811_v18 = vld [vmem:[%s16863_s2 + $0x550] sm:$0xf]  ;;  %v11360_v46 = vld [vmem:[%s16863_s2 + $0x584] sm:$0xf0] }
 0x24c   : > { %7078 = vmatpush.bf16.msra.mxu1 %v9732_v17  ;;  %v9931_v17 = vld [vmem:[%s16863_s2 + $0x640] sm:$0xf]  ;;  %v9812_v13 = vor.u32 %v11354_v36, %v9811_v18  ;;  %v9716_v47 = vor.u32 %v11330_v12, %v9715_v61  ;;  %v17023_v48 = vld [vmem:[#allocation53_spill] sm:$0xff] }
 0x24d   : > { %7068 = vmatmul.bf16.vlgmr.msrb.gmra.mxu0 %v13752_v60  ;;  %7088 = vmatpush.bf16.msrb.mxu2 %v9828_v15  ;;  %v4330_v44 = vmax.f32 %v4266_v25, 0.0  ;;  %v4335_v43 = vmax.f32 %v4271_v16, 0.0  ;;  %v11384_v15 = vld [vmem:[%s16863_s2 + $0x644] sm:$0xf0]  ;;  %v9835_v25 = vld [vmem:[%s16863_s2 + $0x580] sm:$0xf] }
 0x24e   : > { %7116 = vmatpush.bf16.msra.mxu0 %v9956_v42  ;;  %7106 = vmatpush.bf16.msra.mxu3 %v9860_v21  ;;  %v9852_v42 = vor.u32 %v11364_v1, %v9851_v14  ;;  %v4013_v20 = vpop.f32.mrf.mxu0  ;;  %v9844_v21 = vor.u32 %v11362_v5, %v9843_v10  ;;  %v9932_v1 = vor.u32 %v11384_v15, %v9931_v17  ;;  %v11382_v16 = vld [vmem:[%s16863_s2 + $0x634] sm:$0xf0] }
 0x24f   : > { %v13910_v4 = vpack.c.bf16 %v4330_v44, %v4298_v33  ;;  %v13918_v27 = vpack.c.bf16 %v4335_v43, %v4303_v53  ;;  %v11406_v61 = vld [vmem:[%s16863_s2 + $0x6f4] sm:$0xf0]  ;;  %v4241_v33 = vmax.f32 %v13077_v54, %v13896_v56  ;;  %v9804_v44 = vor.u32 %v11352_v29, %v9803_v34  ;;  %v9795_v54 = vld [vmem:[%s16863_s2 + $0x530] sm:$0xf]  ;;  %v11436_v34 = vld [vmem:[%s16863_s2 + $0x7e4] sm:$0xf0] }
 0x250   : > { %7079 = vmatpush.bf16.msra.mxu1 %v9724_v62  ;;  %v10147_v62 = vld [vmem:[%s16863_s2 + $0x7f0] sm:$0xf]  ;;  %v4244_v18 = vmax.f32 %v13082_v7, %v4013_v20  ;;  %v9708_v53 = vor.u32 %v11328_v40, %v9707_v2  ;;  %v11350_v56 = vld [vmem:[%s16863_s2 + $0x534] sm:$0xf0]  ;;  %v9924_v10 = vor.u32 %v11382_v16, %v9923_v51  ;;  %v9915_v7 = vld [vmem:[%s16863_s2 + $0x620] sm:$0xf] }
 0x251   : > { %7089 = vmatpush.bf16.msrb.mxu2 %v9820_v8  ;;  %v10019_v8 = vld [vmem:[%s16863_s2 + $0x6f0] sm:$0xf]  ;;  %v3973_v36 = vpop.f32.mrf.mxu1  ;;  %v11380_v20 = vld [vmem:[%s16863_s2 + $0x624] sm:$0xf0]  ;;  %v4305_v2 = vmax.f32 %v4241_v33, 0.0 }
 0x252   : > { %7117 = vmatpush.bf16.msra.mxu0 %v9948_v32  ;;  %7107 = vmatpush.bf16.msra.mxu3 %v9852_v42  ;;  %v17024_v32 = vld [vmem:[#allocation10_spill] sm:$0xff]  ;;  %v13935_v14 = vpop.f32.mrf.mxu2  ;;  %v13946_v6 = vpop.f32.mrf.mxu3  ;;  %v11438_v42 = vld [vmem:[%s16863_s2 + $0x7f4] sm:$0xf0]  ;;  %v4273_v43 = vmax.f32 %v13107_v22, %v3973_v36  ;;  %v10020_v5 = vor.u32 %v11406_v61, %v10019_v8  ;;  %v11404_v22 = vld [vmem:[%s16863_s2 + $0x6e4] sm:$0xf0]  ;;  %v4308_v29 = vmax.f32 %v4244_v18, 0.0 }
 0x253   : > { %v2484_v41 = vmax.f32 %v17024_v32, %v17023_v48  ;;  %7040 = vmatmul.bf16.vlgmr.msra.gmra.mxu2 %v13910_v4  ;;  %v10148_v15 = vor.u32 %v11438_v42, %v10147_v62  ;;  %v10139_v40 = vld [vmem:[%s16863_s2 + $0x7e0] sm:$0xf]  ;;  %v4238_v48 = vmax.f32 %v13101_v38, %v13935_v14  ;;  %v11348_v38 = vld [vmem:[%s16863_s2 + $0x524] sm:$0xf0]  ;;  %v9907_v14 = vld [vmem:[%s16863_s2 + $0x610] sm:$0xf] }
 0x254   : > { %7080 = vmatpush.bf16.msra.mxu1 %v9716_v47  ;;  %v4337_v47 = vmax.f32 %v4273_v43, 0.0  ;;  %v9787_v16 = vld [vmem:[%s16863_s2 + $0x520] sm:$0xf]  ;;  %v10140_v61 = vor.u32 %v11436_v34, %v10139_v40  ;;  %v10003_v33 = vld [vmem:[%s16863_s2 + $0x6d0] sm:$0xf] }
 0x255   : > { %v3380_v12 = vmax.f32 %v2484_v41, %v13109_v19  ;;  %7090 = vmatpush.bf16.msrb.mxu2 %v9812_v13  ;;  %v9836_v19 = vor.u32 %v11360_v46, %v9835_v25  ;;  %v10011_v13 = vld [vmem:[%s16863_s2 + $0x6e0] sm:$0xf]  ;;  %v9916_v41 = vor.u32 %v11380_v20, %v9915_v7  ;;  %v10131_v62 = vld [vmem:[%s16863_s2 + $0x7d0] sm:$0xf]  ;;  %v11434_v42 = vld [vmem:[%s16863_s2 + $0x7d4] sm:$0xf0] }
 0x256   : > { %7118 = vmatpush.bf16.msra.mxu0 %v9940_v59  ;;  %7108 = vmatpush.bf16.msra.mxu3 %v9844_v21  ;;  %v4015_v59 = vpop.f32.mrf.mxu0  ;;  %v9796_v21 = vor.u32 %v11350_v56, %v9795_v54  ;;  %v13996_v25 = vpack.c.bf16 %v4337_v47, %v4305_v2  ;;  %v10012_v51 = vor.u32 %v11404_v22, %v10011_v13  ;;  %v4302_v18 = vmax.f32 %v4238_v48, 0.0  ;;  %v9779_v54 = vld [vmem:[%s16863_s2 + $0x510] sm:$0xf]  ;;  %v9899_v7 = vld [vmem:[%s16863_s2 + $0x600] sm:$0xf] }
 0x257   : > { %v4276_v17 = vmax.f32 %v3380_v12, %v4015_v59  ;;  %v11378_v12 = vld [vmem:[%s16863_s2 + $0x614] sm:$0xf0]  ;;  %v11376_v20 = vld [vmem:[%s16863_s2 + $0x604] sm:$0xf0]  ;;  %v9995_v13 = vld [vmem:[%s16863_s2 + $0x6c0] sm:$0xf] }
 0x258   : > { %7081 = vmatpush.bf16.msra.mxu1 %v9708_v53  ;;  %v11400_v22 = vld [vmem:[%s16863_s2 + $0x6c4] sm:$0xf0]  ;;  %v10123_v2 = vld [vmem:[%s16863_s2 + $0x7c0] sm:$0xf]  ;;  %v10211_v40 = vld [vmem:[%s16863_s2 + $0x870] sm:$0xf] }
 0x259   : > { %7091 = vmatpush.bf16.msrb.mxu2 %v9804_v44  ;;  %v4340_v32 = vmax.f32 %v4276_v17, 0.0  ;;  %v11402_v44 = vld [vmem:[%s16863_s2 + $0x6d4] sm:$0xf0]  ;;  %v14028_v53 = vpop.f32.mrf.mxu1  ;;  %v9771_v48 = vld [vmem:[%s16863_s2 + $0x500] sm:$0xf] }
 0x25a   : > { %7119 = vmatpush.bf16.msra.mxu0 %v9932_v1  ;;  %7109 = vmatpush.bf16.msra.mxu3 %v9836_v19  ;;  %v4243_v1 = vmax.f32 %v13105_v49, %v13946_v6  ;;  %v3931_v46 = vpop.f32.mrf.mxu2  ;;  %v4001_v6 = vpop.f32.mrf.mxu3  ;;  %v9788_v19 = vor.u32 %v11348_v38, %v9787_v16  ;;  %v11454_v34 = vld [vmem:[%s16863_s2 + $0x874] sm:$0xf0]  ;;  %v9996_v16 = vor.u32 %v11400_v22, %v9995_v13  ;;  %v11344_v38 = vld [vmem:[%s16863_s2 + $0x504] sm:$0xf0] }
 0x25b   : > { %v14007_v8 = vpack.c.bf16 %v4340_v32, %v4308_v29  ;;  %v4270_v49 = vmax.f32 %v13118_v31, %v3931_v46  ;;  %7082 = vmatmul.bf16.vlgmr.msra.gmra.mxu1 %v13868_v28  ;;  %v4275_v31 = vmax.f32 %v13125_v35, %v4001_v6  ;;  %v11346_v35 = vld [vmem:[%s16863_s2 + $0x514] sm:$0xf0]  ;;  %v17025_v32 = vld [vmem:[#allocation60_spill] sm:$0xff]  ;;  %v11396_v13 = vld [vmem:[%s16863_s2 + $0x6a4] sm:$0xf0] }
 0x25c   : > { %7130 = vmatpush.bf16.msrb.mxu1 %v10020_v5  ;;  %v4307_v56 = vmax.f32 %v4243_v1, 0.0  ;;  %v10004_v5 = vor.u32 %v11402_v44, %v10003_v33  ;;  %v9780_v29 = vor.u32 %v11346_v35, %v9779_v54  ;;  %v17027_v6 = vld [vmem:[#allocation61_spill] sm:$0xff]  ;;  %v10203_v35 = vld [vmem:[%s16863_s2 + $0x860] sm:$0xf] }
 0x25d   : > { %7110 = vmatmul.bf16.vlgmr.msra.gmra.mxu3 %v13918_v27  ;;  %7092 = vmatpush.bf16.msrb.mxu2 %v9796_v21  ;;  %v4334_v36 = vmax.f32 %v4270_v49, 0.0  ;;  %v4339_v43 = vmax.f32 %v4275_v31, 0.0  ;;  %v11432_v21 = vld [vmem:[%s16863_s2 + $0x7c4] sm:$0xf0]  ;;  %v11398_v49 = vld [vmem:[%s16863_s2 + $0x6b4] sm:$0xf0]  ;;  %v10212_v31 = vor.u32 %v11454_v34, %v10211_v40 }
 0x25e   : > { %7120 = vmatpush.bf16.msra.mxu0 %v9924_v10  ;;  %7158 = vmatpush.bf16.msrb.mxu3 %v10148_v15  ;;  %v14036_v59 = vpop.f32.mrf.mxu0  ;;  %v9908_v10 = vor.u32 %v11378_v12, %v9907_v14  ;;  %v10132_v15 = vor.u32 %v11434_v42, %v10131_v62  ;;  %v9987_v14 = vld [vmem:[%s16863_s2 + $0x6b0] sm:$0xf]  ;;  %v10124_v44 = vor.u32 %v11432_v21, %v10123_v2  ;;  %v11422_v42 = vld [vmem:[%s16863_s2 + $0x774] sm:$0xf0]  ;;  %v11420_v40 = vld [vmem:[%s16863_s2 + $0x764] sm:$0xf0] }
 0x25f   : > { %v14044_v17 = vpack.c.bf16 %v4334_v36, %v4302_v18  ;;  %v14055_v47 = vpack.c.bf16 %v4339_v43, %v4307_v56  ;;  %v10083_v62 = vld [vmem:[%s16863_s2 + $0x770] sm:$0xf]  ;;  %v11430_v54 = vld [vmem:[%s16863_s2 + $0x7b4] sm:$0xf0]  ;;  %v11452_v56 = vld [vmem:[%s16863_s2 + $0x864] sm:$0xf0]  ;;  %v9988_v21 = vor.u32 %v11398_v49, %v9987_v14 }
 0x260   : > { %7131 = vmatpush.bf16.msrb.mxu1 %v10012_v51  ;;  %v9900_v51 = vor.u32 %v11376_v20, %v9899_v7  ;;  %v10115_v18 = vld [vmem:[%s16863_s2 + $0x7b0] sm:$0xf]  ;;  %v17029_v43 = vld [vmem:[#allocation63_spill] sm:$0xff]  ;;  %v17031_v7 = vld [vmem:[#allocation45_spill] sm:$0xff]  ;;  %v9772_v20 = vor.u32 %v11344_v38, %v9771_v48  ;;  %v10204_v48 = vor.u32 %v11452_v56, %v10203_v35 }
 0x261   : > { %7093 = vmatpush.bf16.msrb.mxu2 %v9788_v19  ;;  %v4245_v19 = vmax.f32 %v13131_v11, %v14028_v53  ;;  %v4248_v11 = vmax.f32 %v17031_v7, %v14036_v59  ;;  %v4029_v53 = vpop.f32.mrf.mxu1  ;;  %v10075_v59 = vld [vmem:[%s16863_s2 + $0x760] sm:$0xf]  ;;  %v10195_v49 = vld [vmem:[%s16863_s2 + $0x850] sm:$0xf]  ;;  %v11418_v7 = vld [vmem:[%s16863_s2 + $0x754] sm:$0xf0] }
 0x262   : > { %7121 = vmatpush.bf16.msra.mxu0 %v9916_v41  ;;  %7159 = vmatpush.bf16.msrb.mxu3 %v10140_v61  ;;  %v17026_v41 = vld [vmem:[#allocation17_spill] sm:$0xff]  ;;  %v14071_v46 = vpop.f32.mrf.mxu2  ;;  %v17028_v61 = vld [vmem:[#allocation18_spill] sm:$0xff]  ;;  %v14084_v33 = vpop.f32.mrf.mxu3  ;;  %v9971_v35 = vld [vmem:[%s16863_s2 + $0x690] sm:$0xf] }
 0x263   : > { %v2485_v1 = vmax.f32 %v17026_v41, %v17025_v32  ;;  %v2488_v12 = vmax.f32 %v17028_v61, %v17027_v6  ;;  %v10107_v32 = vld [vmem:[%s16863_s2 + $0x7a0] sm:$0xf]  ;;  %v11428_v41 = vld [vmem:[%s16863_s2 + $0x7a4] sm:$0xf0]  ;;  %v11450_v6 = vld [vmem:[%s16863_s2 + $0x854] sm:$0xf0] }
 0x264   : > { %7132 = vmatpush.bf16.msrb.mxu1 %v10004_v5  ;;  %v4312_v61 = vmax.f32 %v4248_v11, 0.0  ;;  %v10099_v11 = vld [vmem:[%s16863_s2 + $0x790] sm:$0xf] }
 0x265   : > { %v3381_v36 = vmax.f32 %v2485_v1, %v13159_v50  ;;  %v3384_v50 = vmax.f32 %v2488_v12, %v13161_v30  ;;  %7094 = vmatpush.bf16.msrb.mxu2 %v9780_v29  ;;  %v10084_v30 = vor.u32 %v11422_v42, %v10083_v62  ;;  %v10116_v29 = vor.u32 %v11430_v54, %v10115_v18  ;;  %v17032_v1 = vld [vmem:[#allocation47_spill] sm:$0xff]  ;;  %v17033_v12 = vld [vmem:[#allocation2_spill] sm:$0xff] }
 0x266   : > { %7122 = vmatpush.bf16.msra.mxu0 %v9908_v10  ;;  %7160 = vmatpush.bf16.msrb.mxu3 %v10132_v15  ;;  %v17030_v10 = vld [vmem:[#allocation20_spill] sm:$0xff]  ;;  %v9979_v15 = vld [vmem:[%s16863_s2 + $0x6a0] sm:$0xf]  ;;  %v4071_v2 = vpop.f32.mrf.mxu0  ;;  %v10076_v62 = vor.u32 %v11420_v40, %v10075_v59  ;;  %v10108_v54 = vor.u32 %v11428_v41, %v10107_v32  ;;  %v11392_v32 = vld [vmem:[%s16863_s2 + $0x684] sm:$0xf0] }
 0x267   : > { %v2487_v5 = vmax.f32 %v17030_v10, %v17029_v43  ;;  %v4277_v22 = vmax.f32 %v3381_v36, %v4029_v53  ;;  %v4280_v34 = vmax.f32 %v3384_v50, %v4071_v2  ;;  %v9980_v14 = vor.u32 %v11396_v13, %v9979_v15  ;;  %v17034_v42 = vld [vmem:[#allocation46_spill] sm:$0xff]  ;;  %v17035_v43 = vld [vmem:[#allocation3_spill] sm:$0xff]  ;;  %v10067_v50 = vld [vmem:[%s16863_s2 + $0x750] sm:$0xf] }
 0x268   : > { %7133 = vmatpush.bf16.msrb.mxu1 %v9996_v16  ;;  %v4309_v16 = vmax.f32 %v4245_v19, 0.0  ;;  %v4247_v18 = vmax.f32 %v17034_v42, %v14084_v33  ;;  %v10187_v15 = vld [vmem:[%s16863_s2 + $0x840] sm:$0xf]  ;;  %v11448_v13 = vld [vmem:[%s16863_s2 + $0x844] sm:$0xf0] }
 0x269   : > { %v4341_v38 = vmax.f32 %v4277_v22, 0.0  ;;  %7095 = vmatpush.bf16.msrb.mxu2 %v9772_v20  ;;  %v11426_v20 = vld [vmem:[%s16863_s2 + $0x794] sm:$0xf0]  ;;  %v10059_v41 = vld [vmem:[%s16863_s2 + $0x740] sm:$0xf] }
 0x26a   : > { %7123 = vmatpush.bf16.msra.mxu0 %v9900_v51  ;;  %7161 = vmatpush.bf16.msrb.mxu3 %v10124_v44  ;;  %v3383_v51 = vmax.f32 %v2487_v5, %v17032_v1  ;;  %v4242_v44 = vmax.f32 %v17033_v12, %v14071_v46  ;;  %v3987_v19 = vpop.f32.mrf.mxu2  ;;  %v11394_v46 = vld [vmem:[%s16863_s2 + $0x694] sm:$0xf0]  ;;  %v4057_v10 = vpop.f32.mrf.mxu3  ;;  %v10196_v5 = vor.u32 %v11450_v6, %v10195_v49  ;;  %v4311_v59 = vmax.f32 %v4247_v18, 0.0  ;;  %v11424_v49 = vld [vmem:[%s16863_s2 + $0x784] sm:$0xf0]  ;;  %v17036_v18 = vld [vmem:[#allocation68_spill] sm:$0xff] }
 0x26b   : > { %v14142_v36 = vpack.c.bf16 %v4341_v38, %v4309_v16  ;;  %v4274_v33 = vmax.f32 %v17035_v43, %v3987_v19  ;;  %v10188_v16 = vor.u32 %v11448_v13, %v10187_v15  ;;  %v11416_v38 = vld [vmem:[%s16863_s2 + $0x744] sm:$0xf0]  ;;  %v11446_v12 = vld [vmem:[%s16863_s2 + $0x834] sm:$0xf0]  ;;  %v17040_v13 = vld [vmem:[#allocation4_spill] sm:$0xff] }
 0x26c   : > { %7134 = vmatpush.bf16.msrb.mxu1 %v9988_v21  ;;  %7096 = vmatmul.bf16.vlgmr.msrb.gmra.mxu2 %v14044_v17  ;;  %v4279_v53 = vmax.f32 %v3383_v51, %v4057_v10  ;;  %v4306_v22 = vmax.f32 %v4242_v44, 0.0  ;;  %v14172_v21 = vpop.f32.mrf.mxu1  ;;  %v10100_v51 = vor.u32 %v11426_v20, %v10099_v11  ;;  %v10275_v44 = vld [vmem:[%s16863_s2 + $0x8f0] sm:$0xf]  ;;  %v11502_v42 = vld [vmem:[%s16863_s2 + $0x9f4] sm:$0xf0]  ;;  %v10060_v43 = vor.u32 %v11416_v38, %v10059_v41  ;;  %v17039_v10 = vld [vmem:[#allocation26_spill] sm:$0xff] }
 0x26d   : > { %7124 = vmatmul.bf16.vlgmr.msra.gmra.mxu0 %v13879_v3  ;;  %7144 = vmatpush.bf16.msra.mxu2 %v10084_v30  ;;  %v4338_v2 = vmax.f32 %v4274_v33, 0.0  ;;  %v9963_v30 = vld [vmem:[%s16863_s2 + $0x680] sm:$0xf]  ;;  %v17037_v19 = vld [vmem:[#allocation25_spill] sm:$0xff] }
 0x26e   : > { %7172 = vmatpush.bf16.msrb.mxu0 %v10212_v31  ;;  %v4344_v31 = vmax.f32 %v4280_v34, 0.0  ;;  %7162 = vmatpush.bf16.msrb.mxu3 %v10116_v29  ;;  %v4343_v40 = vmax.f32 %v4279_v53, 0.0  ;;  %v14177_v34 = vpop.f32.mrf.mxu0  ;;  %v9972_v29 = vor.u32 %v11394_v46, %v9971_v35  ;;  %v9964_v46 = vor.u32 %v11392_v32, %v9963_v30  ;;  %v17038_v33 = vld [vmem:[#allocation69_spill] sm:$0xff]  ;;  %v10051_v53 = vld [vmem:[%s16863_s2 + $0x730] sm:$0xf]  ;;  %v17042_v32 = vld [vmem:[#allocation27_spill] sm:$0xff] }
 0x26f   : > { %v14185_v1 = vpack.c.bf16 %v4338_v2, %v4306_v22  ;;  %v11414_v20 = vld [vmem:[%s16863_s2 + $0x734] sm:$0xf0]  ;;  %v4249_v22 = vmax.f32 %v17040_v13, %v14172_v21  ;;  %v17043_v41 = vld [vmem:[#allocation6_spill] sm:$0xff]  ;;  %v17044_v21 = vld [vmem:[#allocation48_spill] sm:$0xff] }
 0x270   : > { %v14150_v56 = vpack.c.bf16 %v4344_v31, %v4312_v61  ;;  %7135 = vmatpush.bf16.msrb.mxu1 %v9980_v14  ;;  %v10091_v14 = vld [vmem:[%s16863_s2 + $0x780] sm:$0xf]  ;;  %v14196_v6 = vpack.c.bf16 %v4343_v40, %v4311_v59  ;;  %v10179_v61 = vld [vmem:[%s16863_s2 + $0x830] sm:$0xf]  ;;  %v11470_v31 = vld [vmem:[%s16863_s2 + $0x8f4] sm:$0xf0] }
 0x271   : > { %7145 = vmatpush.bf16.msra.mxu2 %v10076_v62  ;;  %v10403_v62 = vld [vmem:[%s16863_s2 + $0x9f0] sm:$0xf]  ;;  %v10180_v11 = vor.u32 %v11446_v12, %v10179_v61  ;;  %v10276_v2 = vor.u32 %v11470_v31, %v10275_v44  ;;  %v10171_v59 = vld [vmem:[%s16863_s2 + $0x820] sm:$0xf]  ;;  %v11444_v40 = vld [vmem:[%s16863_s2 + $0x824] sm:$0xf0] }
 0x272   : > { %7173 = vmatpush.bf16.msrb.mxu0 %v10204_v48  ;;  %v10068_v48 = vor.u32 %v11418_v7, %v10067_v50  ;;  %7163 = vmatpush.bf16.msrb.mxu3 %v10108_v54  ;;  %v2489_v54 = vmax.f32 %v17037_v19, %v17036_v18  ;;  %v14218_v35 = vpop.f32.mrf.mxu2  ;;  %v14222_v50 = vpop.f32.mrf.mxu3  ;;  %v10092_v7 = vor.u32 %v11424_v49, %v10091_v14  ;;  %v11468_v14 = vld [vmem:[%s16863_s2 + $0x8e4] sm:$0xf0]  ;;  %v10395_v49 = vld [vmem:[%s16863_s2 + $0x9e0] sm:$0xf]  ;;  %v17046_v44 = vld [vmem:[#allocation28_spill] sm:$0xff] }
 0x273   : > { %v10404_v30 = vor.u32 %v11502_v42, %v10403_v62  ;;  %v11500_v61 = vld [vmem:[%s16863_s2 + $0x9e4] sm:$0xf0]  ;;  %v10052_v42 = vor.u32 %v11414_v20, %v10051_v53  ;;  %v10043_v18 = vld [vmem:[%s16863_s2 + $0x720] sm:$0xf]  ;;  %v4313_v53 = vmax.f32 %v4249_v22, 0.0 }
 0x274   : > { %7136 = vmatpush.bf16.msrb.mxu1 %v9972_v29  ;;  %v3385_v15 = vmax.f32 %v2489_v54, %v13223_v0  ;;  %v10267_v29 = vld [vmem:[%s16863_s2 + $0x8e0] sm:$0xf]  ;;  %v4085_v38 = vpop.f32.mrf.mxu1  ;;  %v17045_v12 = vld [vmem:[#allocation71_spill] sm:$0xff]  ;;  %v11466_v13 = vld [vmem:[%s16863_s2 + $0x8d4] sm:$0xf0] }
 0x275   : > { %7146 = vmatpush.bf16.msra.mxu2 %v10068_v48  ;;  %v17041_v48 = vld [vmem:[#allocation70_spill] sm:$0xff]  ;;  %v2491_v31 = vmax.f32 %v17046_v44, %v17045_v12 }
 0x276   : > { %7174 = vmatpush.bf16.msrb.mxu0 %v10196_v5  ;;  %v2492_v5 = vmax.f32 %v17039_v10, %v17038_v33  ;;  %7164 = vmatpush.bf16.msrb.mxu3 %v10100_v51  ;;  %v2486_v0 = vmax.f32 %v17042_v32, %v17041_v48  ;;  %v4281_v62 = vmax.f32 %v3385_v15, %v4085_v38  ;;  %v17047_v19 = vld [vmem:[#allocation50_spill] sm:$0xff]  ;;  %v10259_v15 = vld [vmem:[%s16863_s2 + $0x8d0] sm:$0xf]  ;;  %v17049_v32 = vld [vmem:[#allocation5_spill] sm:$0xff] }
 0x277   : > { %v10172_v10 = vor.u32 %v11444_v40, %v10171_v59  ;;  %v17048_v59 = vld [vmem:[#allocation7_spill] sm:$0xff]  ;;  %v10155_v12 = vld [vmem:[%s16863_s2 + $0x800] sm:$0xf] }
 0x278   : > { %v3388_v51 = vmax.f32 %v2492_v5, %v17043_v41  ;;  %7137 = vmatpush.bf16.msrb.mxu1 %v9964_v46  ;;  %v3382_v54 = vmax.f32 %v2486_v0, %v17047_v19  ;;  %v11412_v5 = vld [vmem:[%s16863_s2 + $0x724] sm:$0xf0]  ;;  %v10163_v46 = vld [vmem:[%s16863_s2 + $0x810] sm:$0xf]  ;;  %v4345_v20 = vmax.f32 %v4281_v62, 0.0  ;;  %v3387_v40 = vmax.f32 %v2491_v31, %v17048_v59 }
 0x279   : > { %7147 = vmatpush.bf16.msra.mxu2 %v10060_v43  ;;  %v11442_v43 = vld [vmem:[%s16863_s2 + $0x814] sm:$0xf0]  ;;  %v4246_v0 = vmax.f32 %v17049_v32, %v14218_v35  ;;  %v10260_v31 = vor.u32 %v11466_v13, %v10259_v15  ;;  %v10027_v59 = vld [vmem:[%s16863_s2 + $0x700] sm:$0xf] }
 0x27a   : > { %7175 = vmatpush.bf16.msrb.mxu0 %v10188_v16  ;;  %v4252_v16 = vmax.f32 %v17044_v21, %v14177_v34  ;;  %v4127_v34 = vpop.f32.mrf.mxu0  ;;  %7165 = vmatpush.bf16.msrb.mxu3 %v10092_v7  ;;  %v10268_v7 = vor.u32 %v11468_v14, %v10267_v29  ;;  %v17050_v29 = vld [vmem:[#allocation49_spill] sm:$0xff]  ;;  %v4043_v35 = vpop.f32.mrf.mxu2  ;;  %v10044_v21 = vor.u32 %v11412_v5, %v10043_v18  ;;  %v11464_v18 = vld [vmem:[%s16863_s2 + $0x8c4] sm:$0xf0] }
 0x27b   : > { %v4284_v33 = vmax.f32 %v3388_v51, %v4127_v34  ;;  %7138 = vmatmul.bf16.vlgmr.msrb.gmra.mxu1 %v13996_v25  ;;  %v4251_v41 = vmax.f32 %v17050_v29, %v14222_v50  ;;  %v14289_v51 = vpack.c.bf16 %v4345_v20, %v4313_v53  ;;  %v4278_v38 = vmax.f32 %v3382_v54, %v4043_v35  ;;  %v4113_v14 = vpop.f32.mrf.mxu3  ;;  %v11410_v50 = vld [vmem:[%s16863_s2 + $0x714] sm:$0xf0]  ;;  %v11440_v34 = vld [vmem:[%s16863_s2 + $0x804] sm:$0xf0]  ;;  %v17051_v29 = vld [vmem:[#allocation76_spill] sm:$0xff] }
 0x27c   : > { %7186 = vmatpush.bf16.msra.mxu1 %v10276_v2  ;;  %v4316_v48 = vmax.f32 %v4252_v16, 0.0  ;;  %v10387_v2 = vld [vmem:[%s16863_s2 + $0x9d0] sm:$0xf]  ;;  %v4283_v44 = vmax.f32 %v3387_v40, %v4113_v14  ;;  %v4310_v19 = vmax.f32 %v4246_v0, 0.0  ;;  %v11496_v5 = vld [vmem:[%s16863_s2 + $0x9c4] sm:$0xf0]  ;;  %v10156_v13 = vor.u32 %v11440_v34, %v10155_v12 }
 0x27d   : > { %v4348_v22 = vmax.f32 %v4284_v33, 0.0  ;;  %7166 = vmatmul.bf16.vlgmr.msrb.gmra.mxu3 %v14055_v47  ;;  %7148 = vmatpush.bf16.msra.mxu2 %v10052_v42  ;;  %v10251_v42 = vld [vmem:[%s16863_s2 + $0x8c0] sm:$0xf]  ;;  %v4342_v54 = vmax.f32 %v4278_v38, 0.0  ;;  %v14312_v33 = vpop.f32.mrf.mxu1  ;;  %v11408_v40 = vld [vmem:[%s16863_s2 + $0x704] sm:$0xf0] }
 0x27e   : > { %7176 = vmatpush.bf16.msrb.mxu0 %v10180_v11  ;;  %7214 = vmatpush.bf16.msra.mxu3 %v10404_v30  ;;  %v10396_v11 = vor.u32 %v11500_v61, %v10395_v49  ;;  %v11498_v30 = vld [vmem:[%s16863_s2 + $0x9d4] sm:$0xf0]  ;;  %v10164_v49 = vor.u32 %v11442_v43, %v10163_v46  ;;  %v10035_v61 = vld [vmem:[%s16863_s2 + $0x710] sm:$0xf]  ;;  %v4315_v46 = vmax.f32 %v4251_v41, 0.0  ;;  %v4347_v43 = vmax.f32 %v4283_v44, 0.0 }
 0x27f   : > { %v14292_v16 = vpack.c.bf16 %v4348_v22, %v4316_v48  ;;  %v10388_v62 = vor.u32 %v11498_v30, %v10387_v2  ;;  %v10036_v20 = vor.u32 %v11410_v50, %v10035_v61  ;;  %v14328_v15 = vpack.c.bf16 %v4342_v54, %v4310_v19  ;;  %v10243_v22 = vld [vmem:[%s16863_s2 + $0x8b0] sm:$0xf]  ;;  %v11486_v30 = vld [vmem:[%s16863_s2 + $0x974] sm:$0xf0]  ;;  %v10459_v12 = vld [vmem:[%s16863_s2 + $0xa60] sm:$0xf] }
 0x280   : > { %7187 = vmatpush.bf16.msra.mxu1 %v10268_v7  ;;  %v10467_v7 = vld [vmem:[%s16863_s2 + $0xa70] sm:$0xf]  ;;  %v14336_v48 = vpack.c.bf16 %v4347_v43, %v4315_v46  ;;  %v10252_v32 = vor.u32 %v11464_v18, %v10251_v42  ;;  %v17052_v41 = vld [vmem:[#allocation33_spill] sm:$0xff]  ;;  %v10028_v50 = vor.u32 %v11408_v40, %v10027_v59  ;;  %v11516_v44 = vld [vmem:[%s16863_s2 + $0xa64] sm:$0xf0] }
 0x281   : > { %7149 = vmatpush.bf16.msra.mxu2 %v10044_v21  ;;  %v10339_v2 = vld [vmem:[%s16863_s2 + $0x970] sm:$0xf]  ;;  %v2493_v35 = vmax.f32 %v17052_v41, %v17051_v29  ;;  %v11462_v38 = vld [vmem:[%s16863_s2 + $0x8b4] sm:$0xf0]  ;;  %v17055_v54 = vld [vmem:[#allocation51_spill] sm:$0xff] }
 0x282   : > { %7177 = vmatpush.bf16.msrb.mxu0 %v10172_v10  ;;  %7215 = vmatpush.bf16.msra.mxu3 %v10396_v11  ;;  %v10379_v10 = vld [vmem:[%s16863_s2 + $0x9c0] sm:$0xf]  ;;  %v14320_v53 = vpop.f32.mrf.mxu0  ;;  %v11518_v11 = vld [vmem:[%s16863_s2 + $0xa74] sm:$0xf0]  ;;  %v10371_v14 = vld [vmem:[%s16863_s2 + $0x9b0] sm:$0xf]  ;;  %v14358_v61 = vpop.f32.mrf.mxu2  ;;  %v10340_v19 = vor.u32 %v11486_v30, %v10339_v2 }
 0x283   : > { %v10380_v0 = vor.u32 %v11496_v5, %v10379_v10  ;;  %v10468_v21 = vor.u32 %v11518_v11, %v10467_v7  ;;  %v3389_v42 = vmax.f32 %v2493_v35, %v13319_v55  ;;  %v14369_v18 = vpop.f32.mrf.mxu3  ;;  %v4253_v10 = vmax.f32 %v17055_v54, %v14312_v33  ;;  %v10235_v43 = vld [vmem:[%s16863_s2 + $0x8a0] sm:$0xf]  ;;  %v11484_v55 = vld [vmem:[%s16863_s2 + $0x964] sm:$0xf0]  ;;  %v17058_v59 = vld [vmem:[#allocation8_spill] sm:$0xff] }
 0x284   : > { %7188 = vmatpush.bf16.msra.mxu1 %v10260_v31  ;;  %v17053_v31 = vld [vmem:[#allocation77_spill] sm:$0xff]  ;;  %v10244_v5 = vor.u32 %v11462_v38, %v10243_v22  ;;  %v17056_v7 = vld [vmem:[#allocation78_spill] sm:$0xff]  ;;  %v17057_v11 = vld [vmem:[#allocation35_spill] sm:$0xff]  ;;  %v4256_v40 = vmax.f32 %v17058_v59, %v14320_v53 }
 0x285   : > { %7150 = vmatpush.bf16.msra.mxu2 %v10036_v20  ;;  %v10331_v20 = vld [vmem:[%s16863_s2 + $0x960] sm:$0xf]  ;;  %v11460_v22 = vld [vmem:[%s16863_s2 + $0x8a4] sm:$0xf0]  ;;  %v10451_v29 = vld [vmem:[%s16863_s2 + $0xa50] sm:$0xf] }
 0x286   : > { %7178 = vmatpush.bf16.msrb.mxu0 %v10164_v49  ;;  %7216 = vmatpush.bf16.msra.mxu3 %v10388_v62  ;;  %v11494_v49 = vld [vmem:[%s16863_s2 + $0x9b4] sm:$0xf0]  ;;  %v17054_v62 = vld [vmem:[#allocation34_spill] sm:$0xff]  ;;  %v11492_v30 = vld [vmem:[%s16863_s2 + $0x9a4] sm:$0xf0] }
 0x287   : > { %v2496_v34 = vmax.f32 %v17054_v62, %v17053_v31  ;;  %v10372_v46 = vor.u32 %v11494_v49, %v10371_v14  ;;  %v10363_v2 = vld [vmem:[%s16863_s2 + $0x9a0] sm:$0xf]  ;;  %v11514_v41 = vld [vmem:[%s16863_s2 + $0xa54] sm:$0xf0]  ;;  %v17059_v35 = vld [vmem:[#allocation79_spill] sm:$0xff]  ;;  %v4317_v62 = vmax.f32 %v4253_v10, 0.0 }
 0x288   : > { %7189 = vmatpush.bf16.msra.mxu1 %v10252_v32  ;;  %v4141_v32 = vpop.f32.mrf.mxu1  ;;  %v17061_v14 = vld [vmem:[#allocation54_spill] sm:$0xff]  ;;  %v11458_v31 = vld [vmem:[%s16863_s2 + $0x894] sm:$0xf0]  ;;  %v10364_v54 = vor.u32 %v11492_v30, %v10363_v2  ;;  %v10452_v10 = vor.u32 %v11514_v41, %v10451_v29  ;;  %v11456_v29 = vld [vmem:[%s16863_s2 + $0x884] sm:$0xf0] }
 0x289   : > { %v3392_v33 = vmax.f32 %v2496_v34, %v13321_v37  ;;  %7151 = vmatpush.bf16.msra.mxu2 %v10028_v50  ;;  %v4285_v37 = vmax.f32 %v3389_v42, %v4141_v32  ;;  %v10332_v50 = vor.u32 %v11484_v55, %v10331_v20  ;;  %v10236_v42 = vor.u32 %v11460_v22, %v10235_v43  ;;  %v11482_v20 = vld [vmem:[%s16863_s2 + $0x954] sm:$0xf0]  ;;  %v17063_v43 = vld [vmem:[#allocation11_spill] sm:$0xff]  ;;  %v10315_v41 = vld [vmem:[%s16863_s2 + $0x940] sm:$0xf] }
 0x28a   : > { %7179 = vmatpush.bf16.msrb.mxu0 %v10156_v13  ;;  %7217 = vmatpush.bf16.msra.mxu3 %v10380_v0  ;;  %v2490_v13 = vmax.f32 %v17057_v11, %v17056_v7  ;;  %v10460_v0 = vor.u32 %v11516_v44, %v10459_v12  ;;  %v4183_v53 = vpop.f32.mrf.mxu0  ;;  %v10227_v44 = vld [vmem:[%s16863_s2 + $0x890] sm:$0xf]  ;;  %v4320_v55 = vmax.f32 %v4256_v40, 0.0  ;;  %v17064_v59 = vld [vmem:[#allocation9_spill] sm:$0xff]  ;;  %v11512_v22 = vld [vmem:[%s16863_s2 + $0xa44] sm:$0xf0] }
 0x28b   : > { %v4288_v12 = vmax.f32 %v3392_v33, %v4183_v53  ;;  %v4349_v34 = vmax.f32 %v4285_v37, 0.0  ;;  %v17062_v7 = vld [vmem:[#allocation52_spill] sm:$0xff]  ;;  %v4255_v40 = vmax.f32 %v17064_v59, %v14369_v18  ;;  %v4169_v37 = vpop.f32.mrf.mxu3  ;;  %v10219_v18 = vld [vmem:[%s16863_s2 + $0x880] sm:$0xf] }
 0x28c   : > { %v3386_v49 = vmax.f32 %v2490_v13, %v17061_v14  ;;  %7190 = vmatpush.bf16.msra.mxu1 %v10244_v5  ;;  %v4250_v11 = vmax.f32 %v17062_v7, %v14358_v61  ;;  %7152 = vmatmul.bf16.vlgmr.msra.gmra.mxu2 %v14185_v1  ;;  %v10355_v5 = vld [vmem:[%s16863_s2 + $0x990] sm:$0xf]  ;;  %v4099_v61 = vpop.f32.mrf.mxu2  ;;  %v11480_v14 = vld [vmem:[%s16863_s2 + $0x944] sm:$0xf0] }
 0x28d   : > { %7180 = vmatmul.bf16.vlgmr.msrb.gmra.mxu0 %v14007_v8  ;;  %7200 = vmatpush.bf16.msrb.mxu2 %v10340_v19  ;;  %v10323_v19 = vld [vmem:[%s16863_s2 + $0x950] sm:$0xf]  ;;  %v4352_v13 = vmax.f32 %v4288_v12, 0.0  ;;  %v14430_v32 = vpack.c.bf16 %v4349_v34, %v4317_v62  ;;  %v11488_v12 = vld [vmem:[%s16863_s2 + $0x984] sm:$0xf0] }
 0x28e   : > { %7228 = vmatpush.bf16.msra.mxu0 %v10468_v21  ;;  %v17060_v21 = vld [vmem:[#allocation36_spill] sm:$0xff]  ;;  %7218 = vmatpush.bf16.msra.mxu3 %v10372_v46  ;;  %v11490_v46 = vld [vmem:[%s16863_s2 + $0x994] sm:$0xf0]  ;;  %v4282_v30 = vmax.f32 %v3386_v49, %v4099_v61  ;;  %v10324_v53 = vor.u32 %v11482_v20, %v10323_v19  ;;  %v10347_v49 = vld [vmem:[%s16863_s2 + $0x980] sm:$0xf] }
 0x28f   : > { %v2495_v38 = vmax.f32 %v17060_v21, %v17059_v35  ;;  %v14438_v2 = vpack.c.bf16 %v4352_v13, %v4320_v55  ;;  %v10228_v21 = vor.u32 %v11458_v31, %v10227_v44  ;;  %v10435_v44 = vld [vmem:[%s16863_s2 + $0xa30] sm:$0xf]  ;;  %v11510_v31 = vld [vmem:[%s16863_s2 + $0xa34] sm:$0xf0] }
 0x290   : > { %7191 = vmatpush.bf16.msra.mxu1 %v10236_v42  ;;  %v4346_v62 = vmax.f32 %v4282_v30, 0.0  ;;  %v4195_v34 = vpop.f32.mrf.mxu1  ;;  %v10531_v20 = vld [vmem:[%s16863_s2 + $0xaf0] sm:$0xf]  ;;  %v11534_v55 = vld [vmem:[%s16863_s2 + $0xaf4] sm:$0xf0] }
 0x291   : > { %v3391_v33 = vmax.f32 %v2495_v38, %v17063_v43  ;;  %7201 = vmatpush.bf16.msrb.mxu2 %v10332_v50  ;;  %v10356_v38 = vor.u32 %v11490_v46, %v10355_v5  ;;  %v4314_v50 = vmax.f32 %v4250_v11, 0.0  ;;  %v10316_v11 = vor.u32 %v11480_v14, %v10315_v41  ;;  %v10659_v13 = vld [vmem:[%s16863_s2 + $0xbf0] sm:$0xf]  ;;  %v11478_v61 = vld [vmem:[%s16863_s2 + $0x934] sm:$0xf0] }
 0x292   : > { %7229 = vmatpush.bf16.msra.mxu0 %v10460_v0  ;;  %v10443_v0 = vld [vmem:[%s16863_s2 + $0xa40] sm:$0xf]  ;;  %7219 = vmatpush.bf16.msra.mxu3 %v10364_v54  ;;  %v4319_v54 = vmax.f32 %v4255_v40, 0.0  ;;  %v10220_v46 = vor.u32 %v11456_v29, %v10219_v18  ;;  %v10348_v43 = vor.u32 %v11488_v12, %v10347_v49  ;;  %v10532_v59 = vor.u32 %v11534_v55, %v10531_v20  ;;  %v10307_v40 = vld [vmem:[%s16863_s2 + $0x930] sm:$0xf]  ;;  %v17067_v12 = vld [vmem:[#allocation55_spill] sm:$0xff] }
 0x293   : > { %v4287_v35 = vmax.f32 %v3391_v33, %v4169_v37  ;;  %v10444_v42 = vor.u32 %v11512_v22, %v10443_v0  ;;  %v14470_v7 = vpack.c.bf16 %v4346_v62, %v4314_v50  ;;  %v10436_v33 = vor.u32 %v11510_v31, %v10435_v44  ;;  %v10427_v0 = vld [vmem:[%s16863_s2 + $0xa20] sm:$0xf]  ;;  %v17065_v22 = vld [vmem:[#allocation80_spill] sm:$0xff]  ;;  %v11508_v29 = vld [vmem:[%s16863_s2 + $0xa24] sm:$0xf0] }
 0x294   : > { %7192 = vmatpush.bf16.msra.mxu1 %v10228_v21  ;;  %v17066_v30 = vld [vmem:[#allocation40_spill] sm:$0xff]  ;;  %v14491_v18 = vpop.f32.mrf.mxu2  ;;  %v10523_v41 = vld [vmem:[%s16863_s2 + $0xae0] sm:$0xf]  ;;  %v14502_v21 = vpop.f32.mrf.mxu3  ;;  %v11564_v14 = vld [vmem:[%s16863_s2 + $0xbe4] sm:$0xf0]  ;;  %v4257_v50 = vmax.f32 %v17067_v12, %v4195_v34  ;;  %v10308_v62 = vor.u32 %v11478_v61, %v10307_v40  ;;  %v10428_v44 = vor.u32 %v11508_v29, %v10427_v0 }
 0x295   : > { %v4351_v19 = vmax.f32 %v4287_v35, 0.0  ;;  %7202 = vmatpush.bf16.msrb.mxu2 %v10324_v53  ;;  %v2497_v37 = vmax.f32 %v17066_v30, %v17065_v22  ;;  %v11532_v35 = vld [vmem:[%s16863_s2 + $0xae4] sm:$0xf0]  ;;  %v17068_v34 = vld [vmem:[#allocation81_spill] sm:$0xff]  ;;  %v10643_v61 = vld [vmem:[%s16863_s2 + $0xbd0] sm:$0xf] }
 0x296   : > { %7230 = vmatpush.bf16.msra.mxu0 %v10452_v10  ;;  %v11566_v10 = vld [vmem:[%s16863_s2 + $0xbf4] sm:$0xf0]  ;;  %7220 = vmatpush.bf16.msra.mxu3 %v10356_v38  ;;  %v10651_v38 = vld [vmem:[%s16863_s2 + $0xbe0] sm:$0xf]  ;;  %v10524_v31 = vor.u32 %v11532_v35, %v10523_v41  ;;  %v4321_v30 = vmax.f32 %v4257_v50, 0.0  ;;  %v4254_v41 = vmax.f32 %v13425_v57, %v14491_v18  ;;  %v17073_v57 = vld [vmem:[#allocation12_spill] sm:$0xff] }
 0x297   : > { %v14478_v5 = vpack.c.bf16 %v4351_v19, %v4319_v54  ;;  %v10660_v53 = vor.u32 %v11566_v10, %v10659_v13  ;;  %v3393_v49 = vmax.f32 %v2497_v37, %v13442_v9  ;;  %v10299_v54 = vld [vmem:[%s16863_s2 + $0x920] sm:$0xf]  ;;  %v11476_v19 = vld [vmem:[%s16863_s2 + $0x924] sm:$0xf0]  ;;  %v10419_v9 = vld [vmem:[%s16863_s2 + $0xa10] sm:$0xf]  ;;  %v10652_v13 = vor.u32 %v11564_v14, %v10651_v38 }
 0x298   : > { %7193 = vmatpush.bf16.msra.mxu1 %v10220_v46  ;;  %v17069_v20 = vld [vmem:[#allocation41_spill] sm:$0xff]  ;;  %v10515_v46 = vld [vmem:[%s16863_s2 + $0xad0] sm:$0xf]  ;;  %v4259_v18 = vmax.f32 %v17073_v57, %v14502_v21  ;;  %v11560_v21 = vld [vmem:[%s16863_s2 + $0xbc4] sm:$0xf0] }
 0x299   : > { %7203 = vmatpush.bf16.msrb.mxu2 %v10316_v11  ;;  %v2494_v55 = vmax.f32 %v17069_v20, %v17068_v34  ;;  %v11506_v10 = vld [vmem:[%s16863_s2 + $0xa14] sm:$0xf0]  ;;  %v10291_v29 = vld [vmem:[%s16863_s2 + $0x910] sm:$0xf] }
 0x29a   : > { %7231 = vmatpush.bf16.msra.mxu0 %v10444_v42  ;;  %7221 = vmatpush.bf16.msra.mxu3 %v10348_v43  ;;  %v4197_v42 = vpop.f32.mrf.mxu1  ;;  %v11530_v43 = vld [vmem:[%s16863_s2 + $0xad4] sm:$0xf0]  ;;  %v10420_v35 = vor.u32 %v11506_v10, %v10419_v9  ;;  %v10723_v20 = vld [vmem:[%s16863_s2 + $0xc70] sm:$0xf]  ;;  %v10283_v10 = vld [vmem:[%s16863_s2 + $0x900] sm:$0xf] }
 0x29b   : > { %v4289_v11 = vmax.f32 %v3393_v49, %v4197_v42  ;;  %7194 = vmatmul.bf16.vlgmr.msra.gmra.mxu1 %v14142_v36  ;;  %v11562_v0 = vld [vmem:[%s16863_s2 + $0xbd4] sm:$0xf0]  ;;  %v3390_v22 = vmax.f32 %v2494_v55, %v13481_v58  ;;  %v10516_v38 = vor.u32 %v11530_v43, %v10515_v46  ;;  %v10411_v58 = vld [vmem:[%s16863_s2 + $0xa00] sm:$0xf]  ;;  %v11504_v49 = vld [vmem:[%s16863_s2 + $0xa04] sm:$0xf0] }
 0x29c   : > { %7242 = vmatpush.bf16.msrb.mxu1 %v10532_v59  ;;  %v17071_v59 = vld [vmem:[#allocation42_spill] sm:$0xff]  ;;  %v11474_v14 = vld [vmem:[%s16863_s2 + $0x914] sm:$0xf0]  ;;  %v10644_v42 = vor.u32 %v11562_v0, %v10643_v61  ;;  %v4225_v34 = vpop.f32.mrf.mxu3  ;;  %v11472_v46 = vld [vmem:[%s16863_s2 + $0x904] sm:$0xf0] }
 0x29d   : > { %7222 = vmatmul.bf16.vlgmr.msra.gmra.mxu3 %v14196_v6  ;;  %7204 = vmatpush.bf16.msrb.mxu2 %v10308_v62  ;;  %v4353_v37 = vmax.f32 %v4289_v11, 0.0  ;;  %v17072_v12 = vld [vmem:[#allocation13_spill] sm:$0xff]  ;;  %v10499_v43 = vld [vmem:[%s16863_s2 + $0xab0] sm:$0xf] }
 0x29e   : > { %7232 = vmatpush.bf16.msra.mxu0 %v10436_v33  ;;  %7270 = vmatpush.bf16.msrb.mxu3 %v10660_v53  ;;  %v17070_v33 = vld [vmem:[#allocation82_spill] sm:$0xff]  ;;  %v10300_v53 = vor.u32 %v11476_v19, %v10299_v54  ;;  %v11528_v54 = vld [vmem:[%s16863_s2 + $0xac4] sm:$0xf0]  ;;  %v11582_v55 = vld [vmem:[%s16863_s2 + $0xc74] sm:$0xf0] }
 0x29f   : > { %v2499_v40 = vmax.f32 %v17071_v59, %v17070_v33  ;;  %v14560_v62 = vpack.c.bf16 %v4353_v37, %v4321_v30  ;;  %v10635_v19 = vld [vmem:[%s16863_s2 + $0xbc0] sm:$0xf]  ;;  %v4318_v33 = vmax.f32 %v4254_v41, 0.0  ;;  %v11526_v0 = vld [vmem:[%s16863_s2 + $0xab4] sm:$0xf0]  ;;  %v4323_v30 = vmax.f32 %v4259_v18, 0.0 }
 0x2a0   : > { %7243 = vmatpush.bf16.msrb.mxu1 %v10524_v31  ;;  %v10507_v31 = vld [vmem:[%s16863_s2 + $0xac0] sm:$0xf]  ;;  %v11550_v41 = vld [vmem:[%s16863_s2 + $0xb74] sm:$0xf0]  ;;  %v10500_v57 = vor.u32 %v11526_v0, %v10499_v43  ;;  %v10611_v0 = vld [vmem:[%s16863_s2 + $0xb90] sm:$0xf] }
 0x2a1   : > { %v3395_v50 = vmax.f32 %v2499_v40, %v17072_v12  ;;  %7205 = vmatpush.bf16.msrb.mxu2 %v10300_v53  ;;  %v10412_v40 = vor.u32 %v11504_v49, %v10411_v58  ;;  %v10508_v61 = vor.u32 %v11528_v54, %v10507_v31  ;;  %v10636_v53 = vor.u32 %v11560_v21, %v10635_v19  ;;  %v10715_v58 = vld [vmem:[%s16863_s2 + $0xc60] sm:$0xf]  ;;  %v11580_v49 = vld [vmem:[%s16863_s2 + $0xc64] sm:$0xf0]  ;;  %v11522_v43 = vld [vmem:[%s16863_s2 + $0xa94] sm:$0xf0] }
 0x2a2   : > { %7233 = vmatpush.bf16.msra.mxu0 %v10428_v44  ;;  %7271 = vmatpush.bf16.msrb.mxu3 %v10652_v13  ;;  %v4155_v44 = vpop.f32.mrf.mxu2  ;;  %v10292_v13 = vor.u32 %v11474_v14, %v10291_v29  ;;  %v10724_v29 = vor.u32 %v11582_v55, %v10723_v20  ;;  %v11558_v14 = vld [vmem:[%s16863_s2 + $0xbb4] sm:$0xf0]  ;;  %v10716_v54 = vor.u32 %v11580_v49, %v10715_v58  ;;  %v10587_v19 = vld [vmem:[%s16863_s2 + $0xb60] sm:$0xf]  ;;  %v11556_v20 = vld [vmem:[%s16863_s2 + $0xba4] sm:$0xf0] }
 0x2a3   : > { %v4286_v9 = vmax.f32 %v3390_v22, %v4155_v44  ;;  %v4291_v11 = vmax.f32 %v3395_v50, %v4225_v34  ;;  %v10595_v22 = vld [vmem:[%s16863_s2 + $0xb70] sm:$0xf]  ;;  %v10284_v50 = vor.u32 %v11472_v46, %v10283_v10  ;;  %v11524_v44 = vld [vmem:[%s16863_s2 + $0xaa4] sm:$0xf0]  ;;  %v10619_v34 = vld [vmem:[%s16863_s2 + $0xba0] sm:$0xf] }
 0x2a4   : > { %7244 = vmatpush.bf16.msrb.mxu1 %v10516_v38  ;;  %v10596_v18 = vor.u32 %v11550_v41, %v10595_v22  ;;  %v10707_v55 = vld [vmem:[%s16863_s2 + $0xc50] sm:$0xf]  ;;  %v17074_v22 = vld [vmem:[#allocation83_spill] sm:$0xff]  ;;  %v10475_v49 = vld [vmem:[%s16863_s2 + $0xa80] sm:$0xf] }
 0x2a5   : > { %v4350_v59 = vmax.f32 %v4286_v9, 0.0  ;;  %v4355_v37 = vmax.f32 %v4291_v11, 0.0  ;;  %7206 = vmatpush.bf16.msrb.mxu2 %v10292_v13  ;;  %v11548_v9 = vld [vmem:[%s16863_s2 + $0xb64] sm:$0xf0]  ;;  %v11578_v11 = vld [vmem:[%s16863_s2 + $0xc54] sm:$0xf0] }
 0x2a6   : > { %7234 = vmatpush.bf16.msra.mxu0 %v10420_v35  ;;  %7272 = vmatpush.bf16.msrb.mxu3 %v10644_v42  ;;  %v10627_v35 = vld [vmem:[%s16863_s2 + $0xbb0] sm:$0xf]  ;;  %v10491_v42 = vld [vmem:[%s16863_s2 + $0xaa0] sm:$0xf]  ;;  %v10588_v10 = vor.u32 %v11548_v9, %v10587_v19  ;;  %v11576_v41 = vld [vmem:[%s16863_s2 + $0xc44] sm:$0xf0] }
 0x2a7   : > { %v14601_v38 = vpack.c.bf16 %v4350_v59, %v4318_v33  ;;  %v14612_v12 = vpack.c.bf16 %v4355_v37, %v4323_v30  ;;  %v10628_v31 = vor.u32 %v11558_v14, %v10627_v35  ;;  %v10492_v13 = vor.u32 %v11524_v44, %v10491_v42  ;;  %v10483_v46 = vld [vmem:[%s16863_s2 + $0xa90] sm:$0xf]  ;;  %v11552_v19 = vld [vmem:[%s16863_s2 + $0xb84] sm:$0xf0] }
 0x2a8   : > { %7245 = vmatpush.bf16.msrb.mxu1 %v10508_v61  ;;  %v10620_v33 = vor.u32 %v11556_v20, %v10619_v34  ;;  %v10708_v59 = vor.u32 %v11578_v11, %v10707_v55  ;;  %v11546_v61 = vld [vmem:[%s16863_s2 + $0xb54] sm:$0xf0]  ;;  %v17075_v30 = vld [vmem:[#allocation44_spill] sm:$0xff]  ;;  %v10484_v14 = vor.u32 %v11522_v43, %v10483_v46 }
 0x2a9   : > { %7207 = vmatpush.bf16.msrb.mxu2 %v10284_v50  ;;  %v2498_v37 = vmax.f32 %v17075_v30, %v17074_v22  ;;  %v11520_v50 = vld [vmem:[%s16863_s2 + $0xa84] sm:$0xf0]  ;;  %v10691_v34 = vld [vmem:[%s16863_s2 + $0xc30] sm:$0xf]  ;;  %v11598_v11 = vld [vmem:[%s16863_s2 + $0xcf4] sm:$0xf0] }
 0x2aa   : > { %7235 = vmatpush.bf16.msra.mxu0 %v10412_v40  ;;  %7273 = vmatpush.bf16.msrb.mxu3 %v10636_v53  ;;  %v4209_v21 = vpop.f32.mrf.mxu2  ;;  %v10579_v40 = vld [vmem:[%s16863_s2 + $0xb50] sm:$0xf]  ;;  %v11554_v53 = vld [vmem:[%s16863_s2 + $0xb94] sm:$0xf0]  ;;  %v10476_v46 = vor.u32 %v11520_v50, %v10475_v49  ;;  %v11628_v49 = vld [vmem:[%s16863_s2 + $0xde4] sm:$0xf0] }
 0x2ab   : > { %v3394_v35 = vmax.f32 %v2498_v37, %v13620_v45  ;;  %v10580_v58 = vor.u32 %v11546_v61, %v10579_v40  ;;  %v10612_v45 = vor.u32 %v11554_v53, %v10611_v0  ;;  %v10787_v20 = vld [vmem:[%s16863_s2 + $0xcf0] sm:$0xf]  ;;  %v11542_v22 = vld [vmem:[%s16863_s2 + $0xb34] sm:$0xf0]  ;;  %v10683_v53 = vld [vmem:[%s16863_s2 + $0xc20] sm:$0xf] }
 0x2ac   : > { %7246 = vmatpush.bf16.msrb.mxu1 %v10500_v57  ;;  %7208 = vmatmul.bf16.vlgmr.msrb.gmra.mxu2 %v14328_v15  ;;  %v10571_v57 = vld [vmem:[%s16863_s2 + $0xb40] sm:$0xf]  ;;  %v10563_v0 = vld [vmem:[%s16863_s2 + $0xb30] sm:$0xf]  ;;  %v10788_v30 = vor.u32 %v11598_v11, %v10787_v20 }
 0x2ad   : > { %7236 = vmatmul.bf16.vlgmr.msra.gmra.mxu0 %v14150_v56  ;;  %7256 = vmatpush.bf16.msra.mxu2 %v10596_v18  ;;  %v17076_v18 = vld [vmem:[#allocation57_spill] sm:$0xff]  ;;  %v10564_v50 = vor.u32 %v11542_v22, %v10563_v0  ;;  %v10547_v11 = vld [vmem:[%s16863_s2 + $0xb10] sm:$0xf]  ;;  %v11624_v0 = vld [vmem:[%s16863_s2 + $0xdc4] sm:$0xf0] }
 0x2ae   : > { %7284 = vmatpush.bf16.msrb.mxu0 %v10724_v29  ;;  %7274 = vmatpush.bf16.msrb.mxu3 %v10628_v31  ;;  %v10699_v29 = vld [vmem:[%s16863_s2 + $0xc40] sm:$0xf]  ;;  %v4258_v42 = vmax.f32 %v17076_v18, %v4209_v21  ;;  %v11544_v31 = vld [vmem:[%s16863_s2 + $0xb44] sm:$0xf0]  ;;  %v11574_v21 = vld [vmem:[%s16863_s2 + $0xc34] sm:$0xf0] }
 0x2af   : > { %v10700_v44 = vor.u32 %v11576_v41, %v10699_v29  ;;  %v10572_v43 = vor.u32 %v11544_v31, %v10571_v57  ;;  %v10692_v61 = vor.u32 %v11574_v21, %v10691_v34  ;;  %v11572_v29 = vld [vmem:[%s16863_s2 + $0xc24] sm:$0xf0]  ;;  %v10779_v41 = vld [vmem:[%s16863_s2 + $0xce0] sm:$0xf]  ;;  %v10675_v31 = vld [vmem:[%s16863_s2 + $0xc10] sm:$0xf] }
 0x2b0   : > { %7247 = vmatpush.bf16.msrb.mxu1 %v10492_v13  ;;  %v10915_v13 = vld [vmem:[%s16863_s2 + $0xdf0] sm:$0xf]  ;;  %v10684_v57 = vor.u32 %v11572_v29, %v10683_v53  ;;  %v10555_v18 = vld [vmem:[%s16863_s2 + $0xb20] sm:$0xf]  ;;  %v11626_v21 = vld [vmem:[%s16863_s2 + $0xdd4] sm:$0xf0] }
 0x2b1   : > { %7257 = vmatpush.bf16.msra.mxu2 %v10588_v10  ;;  %v11630_v10 = vld [vmem:[%s16863_s2 + $0xdf4] sm:$0xf0]  ;;  %v10899_v34 = vld [vmem:[%s16863_s2 + $0xdd0] sm:$0xf]  ;;  %v10539_v29 = vld [vmem:[%s16863_s2 + $0xb00] sm:$0xf] }
 0x2b2   : > { %7285 = vmatpush.bf16.msrb.mxu0 %v10716_v54  ;;  %7275 = vmatpush.bf16.msrb.mxu3 %v10620_v33  ;;  %v10603_v54 = vld [vmem:[%s16863_s2 + $0xb80] sm:$0xf]  ;;  %v4211_v9 = vpop.f32.mrf.mxu2  ;;  %v4322_v33 = vmax.f32 %v4258_v42, 0.0  ;;  %v10916_v37 = vor.u32 %v11630_v10, %v10915_v13  ;;  %v11540_v42 = vld [vmem:[%s16863_s2 + $0xb24] sm:$0xf0] }
 0x2b3   : > { %v4290_v55 = vmax.f32 %v3394_v35, %v4211_v9  ;;  %v10604_v40 = vor.u32 %v11552_v19, %v10603_v54  ;;  %v11570_v54 = vld [vmem:[%s16863_s2 + $0xc14] sm:$0xf0]  ;;  %v10771_v19 = vld [vmem:[%s16863_s2 + $0xcd0] sm:$0xf]  ;;  %v10556_v20 = vor.u32 %v11540_v42, %v10555_v18 }
 0x2b4   : > { %7248 = vmatpush.bf16.msrb.mxu1 %v10484_v14  ;;  %v11596_v14 = vld [vmem:[%s16863_s2 + $0xce4] sm:$0xf0]  ;;  %v11594_v9 = vld [vmem:[%s16863_s2 + $0xcd4] sm:$0xf0] }
 0x2b5   : > { %7258 = vmatpush.bf16.msra.mxu2 %v10580_v58  ;;  %v10907_v58 = vld [vmem:[%s16863_s2 + $0xde0] sm:$0xf]  ;;  %v11538_v13 = vld [vmem:[%s16863_s2 + $0xb14] sm:$0xf0]  ;;  %v10772_v10 = vor.u32 %v11594_v9, %v10771_v19  ;;  %v11644_v19 = vld [vmem:[%s16863_s2 + $0xe64] sm:$0xf0] }
 0x2b6   : > { %7286 = vmatpush.bf16.msrb.mxu0 %v10708_v59  ;;  %7276 = vmatpush.bf16.msrb.mxu3 %v10612_v45  ;;  %v4354_v59 = vmax.f32 %v4290_v55, 0.0  ;;  %v10780_v45 = vor.u32 %v11596_v14, %v10779_v41  ;;  %v10676_v55 = vor.u32 %v11570_v54, %v10675_v31  ;;  %v10548_v22 = vor.u32 %v11538_v13, %v10547_v11  ;;  %v11536_v41 = vld [vmem:[%s16863_s2 + $0xb04] sm:$0xf0]  ;;  %v11590_v42 = vld [vmem:[%s16863_s2 + $0xcb4] sm:$0xf0] }
 0x2b7   : > { %v10540_v31 = vor.u32 %v11536_v41, %v10539_v29  ;;  %v10971_v54 = vld [vmem:[%s16863_s2 + $0xe60] sm:$0xf]  ;;  %v11612_v11 = vld [vmem:[%s16863_s2 + $0xd64] sm:$0xf0]  ;;  %v11586_v29 = vld [vmem:[%s16863_s2 + $0xc94] sm:$0xf0] }
 0x2b8   : > { %v14719_v35 = vpack.c.bf16 %v4354_v59, %v4322_v33  ;;  %7249 = vmatpush.bf16.msrb.mxu1 %v10476_v46  ;;  %v10900_v46 = vor.u32 %v11626_v21, %v10899_v34  ;;  %v11568_v33 = vld [vmem:[%s16863_s2 + $0xc04] sm:$0xf0]  ;;  %v10763_v59 = vld [vmem:[%s16863_s2 + $0xcc0] sm:$0xf]  ;;  %v10972_v13 = vor.u32 %v11644_v19, %v10971_v54  ;;  %v10867_v41 = vld [vmem:[%s16863_s2 + $0xd90] sm:$0xf] }
 0x2b9   : > { %7259 = vmatpush.bf16.msra.mxu2 %v10572_v43  ;;  %v10667_v43 = vld [vmem:[%s16863_s2 + $0xc00] sm:$0xf] }
 0x2ba   : > { %7287 = vmatpush.bf16.msrb.mxu0 %v10700_v44  ;;  %7277 = vmatpush.bf16.msrb.mxu3 %v10604_v40  ;;  %v10908_v44 = vor.u32 %v11628_v49, %v10907_v58  ;;  %v11592_v40 = vld [vmem:[%s16863_s2 + $0xcc4] sm:$0xf0]  ;;  %v10668_v53 = vor.u32 %v11568_v33, %v10667_v43  ;;  %v10755_v49 = vld [vmem:[%s16863_s2 + $0xcb0] sm:$0xf]  ;;  %v10859_v19 = vld [vmem:[%s16863_s2 + $0xd80] sm:$0xf] }
 0x2bb   : > { %7250 = vmatmul.bf16.vlgmr.msrb.gmra.mxu1 %v14289_v51  ;;  %v10764_v14 = vor.u32 %v11592_v40, %v10763_v59  ;;  %v10756_v34 = vor.u32 %v11590_v42, %v10755_v49  ;;  %v11620_v43 = vld [vmem:[%s16863_s2 + $0xda4] sm:$0xf0]  ;;  %v10963_v33 = vld [vmem:[%s16863_s2 + $0xe50] sm:$0xf]  ;;  %v11642_v59 = vld [vmem:[%s16863_s2 + $0xe54] sm:$0xf0] }
 0x2bc   : > { %7298 = vmatpush.bf16.msra.mxu1 %v10788_v30  ;;  %v10979_v30 = vld [vmem:[%s16863_s2 + $0xe70] sm:$0xf]  ;;  %v11640_v49 = vld [vmem:[%s16863_s2 + $0xe44] sm:$0xf0] }
 0x2bd   : > { %7278 = vmatmul.bf16.vlgmr.msrb.gmra.mxu3 %v14336_v48  ;;  %7260 = vmatpush.bf16.msra.mxu2 %v10564_v50  ;;  %v10851_v50 = vld [vmem:[%s16863_s2 + $0xd70] sm:$0xf] }
 0x2be   : > { %7288 = vmatpush.bf16.msrb.mxu0 %v10692_v61  ;;  %7326 = vmatpush.bf16.msra.mxu3 %v10916_v37  ;;  %v10891_v61 = vld [vmem:[%s16863_s2 + $0xdc0] sm:$0xf]  ;;  %v11646_v37 = vld [vmem:[%s16863_s2 + $0xe74] sm:$0xf0] }
 0x2bf   : > { %v10892_v58 = vor.u32 %v11624_v0, %v10891_v61  ;;  %v10980_v18 = vor.u32 %v11646_v37, %v10979_v30  ;;  %v10835_v30 = vld [vmem:[%s16863_s2 + $0xd50] sm:$0xf]  ;;  %v11610_v37 = vld [vmem:[%s16863_s2 + $0xd54] sm:$0xf0] }
 0x2c0   : > { %7299 = vmatpush.bf16.msra.mxu1 %v10780_v45  ;;  %v10883_v45 = vld [vmem:[%s16863_s2 + $0xdb0] sm:$0xf] }
 0x2c1   : > { %7261 = vmatpush.bf16.msra.mxu2 %v10556_v20  ;;  %v10747_v20 = vld [vmem:[%s16863_s2 + $0xca0] sm:$0xf] }
 0x2c2   : > { %7289 = vmatpush.bf16.msrb.mxu0 %v10684_v57  ;;  %7327 = vmatpush.bf16.msra.mxu3 %v10908_v44  ;;  %v11614_v57 = vld [vmem:[%s16863_s2 + $0xd74] sm:$0xf0] }
 0x2c3   : > { %v11622_v44 = vld [vmem:[%s16863_s2 + $0xdb4] sm:$0xf0]  ;;  %v10852_v9 = vor.u32 %v11614_v57, %v10851_v50  ;;  %v10836_v50 = vor.u32 %v11610_v37, %v10835_v30  ;;  %v10731_v57 = vld [vmem:[%s16863_s2 + $0xc80] sm:$0xf]  ;;  %v11636_v30 = vld [vmem:[%s16863_s2 + $0xe24] sm:$0xf0] }
 0x2c4   : > { %7300 = vmatpush.bf16.msra.mxu1 %v10772_v10  ;;  %v10884_v21 = vor.u32 %v11622_v44, %v10883_v45  ;;  %v11588_v10 = vld [vmem:[%s16863_s2 + $0xca4] sm:$0xf0]  ;;  %v10827_v44 = vld [vmem:[%s16863_s2 + $0xd40] sm:$0xf] }
 0x2c5   : > { %7262 = vmatpush.bf16.msra.mxu2 %v10548_v22  ;;  %v10748_v61 = vor.u32 %v11588_v10, %v10747_v20  ;;  %v10739_v22 = vld [vmem:[%s16863_s2 + $0xc90] sm:$0xf]  ;;  %v11584_v45 = vld [vmem:[%s16863_s2 + $0xc84] sm:$0xf0]  ;;  %v11694_v10 = vld [vmem:[%s16863_s2 + $0xff4] sm:$0xf0] }
 0x2c6   : > { %7290 = vmatpush.bf16.msrb.mxu0 %v10676_v55  ;;  %7328 = vmatpush.bf16.msra.mxu3 %v10900_v46  ;;  %v10843_v55 = vld [vmem:[%s16863_s2 + $0xd60] sm:$0xf]  ;;  %v11043_v20 = vld [vmem:[%s16863_s2 + $0xef0] sm:$0xf] }
 0x2c7   : > { %v10875_v46 = vld [vmem:[%s16863_s2 + $0xda0] sm:$0xf]  ;;  %v10844_v40 = vor.u32 %v11612_v11, %v10843_v55  ;;  %v11662_v55 = vld [vmem:[%s16863_s2 + $0xef4] sm:$0xf0] }
 0x2c8   : > { %7301 = vmatpush.bf16.msra.mxu1 %v10764_v14  ;;  %v10876_v0 = vor.u32 %v11620_v43, %v10875_v46  ;;  %v11618_v14 = vld [vmem:[%s16863_s2 + $0xd94] sm:$0xf0]  ;;  %v10732_v46 = vor.u32 %v11584_v45, %v10731_v57  ;;  %v11035_v37 = vld [vmem:[%s16863_s2 + $0xee0] sm:$0xf]  ;;  %v11604_v57 = vld [vmem:[%s16863_s2 + $0xd24] sm:$0xf0] }
 0x2c9   : > { %7263 = vmatpush.bf16.msra.mxu2 %v10540_v31  ;;  %v10868_v42 = vor.u32 %v11618_v14, %v10867_v41  ;;  %v11608_v31 = vld [vmem:[%s16863_s2 + $0xd44] sm:$0xf0]  ;;  %v11634_v45 = vld [vmem:[%s16863_s2 + $0xe14] sm:$0xf0] }
 0x2ca   : > { %7291 = vmatpush.bf16.msrb.mxu0 %v10668_v53  ;;  %7329 = vmatpush.bf16.msra.mxu3 %v10892_v58  ;;  %v10964_v53 = vor.u32 %v11642_v59, %v10963_v33  ;;  %v10955_v58 = vld [vmem:[%s16863_s2 + $0xe40] sm:$0xf]  ;;  %v10828_v11 = vor.u32 %v11608_v31, %v10827_v44  ;;  %v11044_v59 = vor.u32 %v11662_v55, %v11043_v20  ;;  %v11692_v41 = vld [vmem:[%s16863_s2 + $0xfe4] sm:$0xf0]  ;;  %v11027_v44 = vld [vmem:[%s16863_s2 + $0xed0] sm:$0xf] }
 0x2cb   : > { %v10956_v54 = vor.u32 %v11640_v49, %v10955_v58  ;;  %v11658_v31 = vld [vmem:[%s16863_s2 + $0xed4] sm:$0xf0] }
 0x2cc   : > { %7302 = vmatpush.bf16.msra.mxu1 %v10756_v34  ;;  %7264 = vmatmul.bf16.vlgmr.msra.gmra.mxu2 %v14470_v7  ;;  %v10947_v34 = vld [vmem:[%s16863_s2 + $0xe30] sm:$0xf]  ;;  %v11028_v20 = vor.u32 %v11658_v31, %v11027_v44  ;;  %v11602_v55 = vld [vmem:[%s16863_s2 + $0xd14] sm:$0xf0] }
 0x2cd   : > { %7292 = vmatmul.bf16.vlgmr.msrb.gmra.mxu0 %v14292_v16  ;;  %7312 = vmatpush.bf16.msrb.mxu2 %v10852_v9  ;;  %v11616_v9 = vld [vmem:[%s16863_s2 + $0xd84] sm:$0xf0] }
 0x2ce   : > { %7340 = vmatpush.bf16.msra.mxu0 %v10980_v18  ;;  %7330 = vmatpush.bf16.msra.mxu3 %v10884_v21  ;;  %v10740_v18 = vor.u32 %v11586_v29, %v10739_v22  ;;  %v11638_v21 = vld [vmem:[%s16863_s2 + $0xe34] sm:$0xf0]  ;;  %v10860_v43 = vor.u32 %v11616_v9, %v10859_v19  ;;  %v11163_v29 = vld [vmem:[%s16863_s2 + $0xfe0] sm:$0xf] }
 0x2cf   : > { %v10948_v33 = vor.u32 %v11638_v21, %v10947_v34  ;;  %v11690_v19 = vld [vmem:[%s16863_s2 + $0xfd4] sm:$0xf0]  ;;  %v10803_v34 = vld [vmem:[%s16863_s2 + $0xd10] sm:$0xf] }
 0x2d0   : > { %7303 = vmatpush.bf16.msra.mxu1 %v10748_v61  ;;  %v11606_v61 = vld [vmem:[%s16863_s2 + $0xd34] sm:$0xf0] }
 0x2d1   : > { %7313 = vmatpush.bf16.msrb.mxu2 %v10844_v40  ;;  %v10819_v40 = vld [vmem:[%s16863_s2 + $0xd30] sm:$0xf] }
 0x2d2   : > { %7341 = vmatpush.bf16.msra.mxu0 %v10972_v13  ;;  %7331 = vmatpush.bf16.msra.mxu3 %v10876_v0  ;;  %v11171_v13 = vld [vmem:[%s16863_s2 + $0xff0] sm:$0xf]  ;;  %v10939_v0 = vld [vmem:[%s16863_s2 + $0xe20] sm:$0xf]  ;;  %v10820_v14 = vor.u32 %v11606_v61, %v10819_v40  ;;  %v11197_v40 = vld [vmem:[%s16863_s2 + $0x74] sm:$0xf] }
 0x2d3   : > { %v11172_v22 = vor.u32 %v11694_v10, %v11171_v13  ;;  %v10940_v58 = vor.u32 %v11636_v30, %v10939_v0  ;;  %v11632_v13 = vld [vmem:[%s16863_s2 + $0xe04] sm:$0xf0]  ;;  %v9189_v61 = vld [vmem:[%s16863_s2 + $0x78] sm:$0xf0]  ;;  %v10804_v0 = vor.u32 %v11602_v55, %v10803_v34 }
 0x2d4   : > { %7304 = vmatpush.bf16.msra.mxu1 %v10740_v18  ;;  %v10931_v18 = vld [vmem:[%s16863_s2 + $0xe10] sm:$0xf]  ;;  %v11676_v55 = vld [vmem:[%s16863_s2 + $0xf64] sm:$0xf0] }
 0x2d5   : > { %7314 = vmatpush.bf16.msrb.mxu2 %v10836_v50  ;;  %v10811_v50 = vld [vmem:[%s16863_s2 + $0xd20] sm:$0xf]  ;;  %v10932_v21 = vor.u32 %v11634_v45, %v10931_v18  ;;  %v11686_v18 = vld [vmem:[%s16863_s2 + $0xfb4] sm:$0xf0]  ;;  %v9181_v45 = vld [vmem:[%s16863_s2 + $0x68] sm:$0xf0] }
 0x2d6   : > { %7342 = vmatpush.bf16.msra.mxu0 %v10964_v53  ;;  %7332 = vmatpush.bf16.msra.mxu3 %v10868_v42  ;;  %v11660_v53 = vld [vmem:[%s16863_s2 + $0xee4] sm:$0xf0]  ;;  %v11164_v42 = vor.u32 %v11692_v41, %v11163_v29  ;;  %v10812_v9 = vor.u32 %v11604_v57, %v10811_v50  ;;  %v11011_v29 = vld [vmem:[%s16863_s2 + $0xeb0] sm:$0xf]  ;;  %v11654_v41 = vld [vmem:[%s16863_s2 + $0xeb4] sm:$0xf0] }
 0x2d7   : > { %v11036_v49 = vor.u32 %v11660_v53, %v11035_v37  ;;  %v11600_v53 = vld [vmem:[%s16863_s2 + $0xd04] sm:$0xf0]  ;;  %v11678_v50 = vld [vmem:[%s16863_s2 + $0xf74] sm:$0xf0]  ;;  %v11139_v57 = vld [vmem:[%s16863_s2 + $0xfb0] sm:$0xf]  ;;  %v11012_v31 = vor.u32 %v11654_v41, %v11011_v29 }
 0x2d8   : > { %7305 = vmatpush.bf16.msra.mxu1 %v10732_v46  ;;  %v11019_v46 = vld [vmem:[%s16863_s2 + $0xec0] sm:$0xf]  ;;  %v11140_v34 = vor.u32 %v11686_v18, %v11139_v57  ;;  %v11191_v29 = vld [vmem:[%s16863_s2 + $0x44] sm:$0xf]  ;;  %v9165_v41 = vld [vmem:[%s16863_s2 + $0x48] sm:$0xf0] }
 0x2d9   : > { %7315 = vmatpush.bf16.msrb.mxu2 %v10828_v11  ;;  %v10923_v11 = vld [vmem:[%s16863_s2 + $0xe00] sm:$0xf] }
 0x2da   : > { %7343 = vmatpush.bf16.msra.mxu0 %v10956_v54  ;;  %7333 = vmatpush.bf16.msra.mxu3 %v10860_v43  ;;  %v11155_v54 = vld [vmem:[%s16863_s2 + $0xfd0] sm:$0xf]  ;;  %v11656_v43 = vld [vmem:[%s16863_s2 + $0xec4] sm:$0xf0]  ;;  %v10924_v30 = vor.u32 %v11632_v13, %v10923_v11  ;;  %v11131_v11 = vld [vmem:[%s16863_s2 + $0xfa0] sm:$0xf] }
 0x2db   : > { %7306 = vmatmul.bf16.vlgmr.msra.gmra.mxu1 %v14430_v32  ;;  %v11156_v10 = vor.u32 %v11690_v19, %v11155_v54  ;;  %v11020_v37 = vor.u32 %v11656_v43, %v11019_v46  ;;  %v11003_v19 = vld [vmem:[%s16863_s2 + $0xea0] sm:$0xf]  ;;  %v11684_v13 = vld [vmem:[%s16863_s2 + $0xfa4] sm:$0xf0]  ;;  %v9173_v46 = vld [vmem:[%s16863_s2 + $0x58] sm:$0xf0] }
 0x2dc   : > { %7354 = vmatpush.bf16.msrb.mxu1 %v11044_v59  ;;  %v11688_v59 = vld [vmem:[%s16863_s2 + $0xfc4] sm:$0xf0]  ;;  %v11083_v57 = vld [vmem:[%s16863_s2 + $0xf40] sm:$0xf] }
 0x2dd   : > { %7334 = vmatmul.bf16.vlgmr.msra.gmra.mxu3 %v14478_v5  ;;  %7316 = vmatpush.bf16.msrb.mxu2 %v10820_v14 }
 0x2de   : > { %7344 = vmatpush.bf16.msra.mxu0 %v10948_v33  ;;  %7382 = vmatpush.bf16.msrb.mxu3 %v11172_v22  ;;  %v11147_v33 = vld [vmem:[%s16863_s2 + $0xfc0] sm:$0xf] }
 0x2df   : > { %v10795_v22 = vld [vmem:[%s16863_s2 + $0xd00] sm:$0xf]  ;;  %v11148_v14 = vor.u32 %v11688_v59, %v11147_v33  ;;  %v10995_v59 = vld [vmem:[%s16863_s2 + $0xe90] sm:$0xf] }
 0x2e0   : > { %7355 = vmatpush.bf16.msrb.mxu1 %v11036_v49  ;;  %v11107_v49 = vld [vmem:[%s16863_s2 + $0xf70] sm:$0xf]  ;;  %v10796_v44 = vor.u32 %v11600_v53, %v10795_v22  ;;  %v11682_v53 = vld [vmem:[%s16863_s2 + $0xf94] sm:$0xf0] }
 0x2e1   : > { %7317 = vmatpush.bf16.msrb.mxu2 %v10812_v9  ;;  %v11108_v54 = vor.u32 %v11678_v50, %v11107_v49  ;;  %v11652_v9 = vld [vmem:[%s16863_s2 + $0xea4] sm:$0xf0]  ;;  %v11091_v22 = vld [vmem:[%s16863_s2 + $0xf50] sm:$0xf]  ;;  %v10987_v49 = vld [vmem:[%s16863_s2 + $0xe80] sm:$0xf] }
 0x2e2   : > { %7345 = vmatpush.bf16.msra.mxu0 %v10940_v58  ;;  %7383 = vmatpush.bf16.msrb.mxu3 %v11164_v42  ;;  %v9192_v58 = vor.u32 %v11197_v40, %v9189_v61  ;;  %v11195_v42 = vld [vmem:[%s16863_s2 + $0x64] sm:$0xf]  ;;  %v11004_v43 = vor.u32 %v11652_v9, %v11003_v19  ;;  %v11650_v40 = vld [vmem:[%s16863_s2 + $0xe94] sm:$0xf0]  ;;  %v11132_v61 = vor.u32 %v11684_v13, %v11131_v11  ;;  %v11648_v50 = vld [vmem:[%s16863_s2 + $0xe84] sm:$0xf0] }
 0x2e3   : > { %v9157_v19 = vld [vmem:[%s16863_s2 + $0x38] sm:$0xf0]  ;;  %v11213_v9 = vld [vmem:[%s16863_s2 + $0xf4] sm:$0xf] }
 0x2e4   : > { %7356 = vmatpush.bf16.msrb.mxu1 %v11028_v20  ;;  %v11099_v20 = vld [vmem:[%s16863_s2 + $0xf60] sm:$0xf] }
 0x2e5   : > { %7318 = vmatpush.bf16.msrb.mxu2 %v10804_v0  ;;  %v11100_v33 = vor.u32 %v11676_v55, %v11099_v20  ;;  %v9381_v20 = vld [vmem:[%s16863_s2 + $0x1f8] sm:$0xf0]  ;;  %v10988_v55 = vor.u32 %v11648_v50, %v10987_v49  ;;  %v11185_v50 = vld [vmem:[%s16863_s2 + $0x14] sm:$0xf] }
 0x2e6   : > { %7346 = vmatpush.bf16.msra.mxu0 %v10932_v21  ;;  %7384 = vmatpush.bf16.msrb.mxu3 %v11156_v10  ;;  %v9184_v21 = vor.u32 %v11195_v42, %v9181_v45  ;;  %v11193_v10 = vld [vmem:[%s16863_s2 + $0x54] sm:$0xf]  ;;  %v9168_v42 = vor.u32 %v11191_v29, %v9165_v41  ;;  %v11672_v45 = vld [vmem:[%s16863_s2 + $0xf44] sm:$0xf0]  ;;  %v11067_v41 = vld [vmem:[%s16863_s2 + $0xf20] sm:$0xf] }
 0x2e7   : > { %v9176_v0 = vor.u32 %v11193_v10, %v9173_v46  ;;  %v11084_v11 = vor.u32 %v11672_v45, %v11083_v57  ;;  %v11075_v46 = vld [vmem:[%s16863_s2 + $0xf30] sm:$0xf]  ;;  %v9141_v57 = vld [vmem:[%s16863_s2 + $0x18] sm:$0xf0]  ;;  %v11241_v45 = vld [vmem:[%s16863_s2 + $0x1d4] sm:$0xf] }
 0x2e8   : > { %7357 = vmatpush.bf16.msrb.mxu1 %v11020_v37  ;;  %v11123_v37 = vld [vmem:[%s16863_s2 + $0xf90] sm:$0xf] }
 0x2e9   : > { %7319 = vmatpush.bf16.msrb.mxu2 %v10796_v44  ;;  %v11124_v18 = vor.u32 %v11682_v53, %v11123_v37  ;;  %v11115_v44 = vld [vmem:[%s16863_s2 + $0xf80] sm:$0xf]  ;;  %v9373_v37 = vld [vmem:[%s16863_s2 + $0x1e8] sm:$0xf0] }
 0x2ea   : > { %7347 = vmatpush.bf16.msra.mxu0 %v10924_v30  ;;  %7385 = vmatpush.bf16.msrb.mxu3 %v11148_v14  ;;  %v11674_v30 = vld [vmem:[%s16863_s2 + $0xf54] sm:$0xf0]  ;;  %v10996_v14 = vor.u32 %v11650_v40, %v10995_v59  ;;  %v11187_v40 = vld [vmem:[%s16863_s2 + $0x24] sm:$0xf] }
 0x2ec   : > { %7358 = vmatpush.bf16.msrb.mxu1 %v11012_v31  ;;  %7320 = vmatmul.bf16.vlgmr.msrb.gmra.mxu2 %v14601_v38  ;;  %v11680_v31 = vld [vmem:[%s16863_s2 + $0xf84] sm:$0xf0] }
 0x2ed   : > { %7348 = vmatmul.bf16.vlgmr.msra.gmra.mxu0 %v14438_v2  ;;  %7368 = vmatpush.bf16.msra.mxu2 %v11108_v54  ;;  %v11189_v54 = vld [vmem:[%s16863_s2 + $0x34] sm:$0xf]  ;;  %v11116_v13 = vor.u32 %v11680_v31, %v11115_v44  ;;  %v9365_v44 = vld [vmem:[%s16863_s2 + $0x1d8] sm:$0xf0] }
 0x2ee   : > { %7396 = vmatpush.bf16.msrb.mxu0 %v9192_v58  ;;  %7386 = vmatpush.bf16.msrb.mxu3 %v11140_v34  ;;  %v11092_v58 = vor.u32 %v11674_v30, %v11091_v22  ;;  %v9253_v34 = vld [vmem:[%s16863_s2 + $0xf8] sm:$0xf0]  ;;  %v9160_v10 = vor.u32 %v11189_v54, %v9157_v19  ;;  %v9245_v22 = vld [vmem:[%s16863_s2 + $0xe8] sm:$0xf0]  ;;  %v11243_v30 = vld [vmem:[%s16863_s2 + $0x1e4] sm:$0xf]  ;;  %v9144_v54 = vor.u32 %v11185_v50, %v9141_v57 }
 0x2ef   : > { %v9376_v49 = vor.u32 %v11243_v30, %v9373_v37  ;;  %v11059_v19 = vld [vmem:[%s16863_s2 + $0xf10] sm:$0xf]  ;;  %v11205_v37 = vld [vmem:[%s16863_s2 + $0xb4] sm:$0xf]  ;;  %v11259_v57 = vld [vmem:[%s16863_s2 + $0x264] sm:$0xf] }
 0x2f0   : > { %7359 = vmatpush.bf16.msrb.mxu1 %v11004_v43  ;;  %v11670_v43 = vld [vmem:[%s16863_s2 + $0xf34] sm:$0xf0] }
 0x2f1   : > { %7369 = vmatpush.bf16.msra.mxu2 %v11100_v33  ;;  %v9256_v33 = vor.u32 %v11213_v9, %v9253_v34  ;;  %v11076_v53 = vor.u32 %v11670_v43, %v11075_v46  ;;  %v11666_v9 = vld [vmem:[%s16863_s2 + $0xf14] sm:$0xf0]  ;;  %v9357_v46 = vld [vmem:[%s16863_s2 + $0x1c8] sm:$0xf0] }
 0x2f2   : > { %7397 = vmatpush.bf16.msrb.mxu0 %v9184_v21  ;;  %7387 = vmatpush.bf16.msrb.mxu3 %v11132_v61  ;;  %v11245_v21 = vld [vmem:[%s16863_s2 + $0x1f4] sm:$0xf]  ;;  %v9149_v61 = vld [vmem:[%s16863_s2 + $0x28] sm:$0xf0]  ;;  %v11060_v43 = vor.u32 %v11666_v9, %v11059_v19 }
 0x2f3   : > { %v9384_v59 = vor.u32 %v11245_v21, %v9381_v20  ;;  %v9152_v29 = vor.u32 %v11187_v40, %v9149_v61  ;;  %v9368_v21 = vor.u32 %v11241_v45, %v9365_v44  ;;  %v11183_v20 = vld [vmem:[%s16863_s2 + $0x4] sm:$0xf]  ;;  %v11051_v61 = vld [vmem:[%s16863_s2 + $0xf00] sm:$0xf]  ;;  %v9309_v19 = vld [vmem:[%s16863_s2 + $0x168] sm:$0xf0] }
 0x2f4   : > { %7360 = vmatpush.bf16.msrb.mxu1 %v10996_v14  ;;  %v11668_v14 = vld [vmem:[%s16863_s2 + $0xf24] sm:$0xf0] }
 0x2f5   : > { %7370 = vmatpush.bf16.msra.mxu2 %v11092_v58  ;;  %v11068_v31 = vor.u32 %v11668_v14, %v11067_v41  ;;  %v9221_v14 = vld [vmem:[%s16863_s2 + $0xb8] sm:$0xf0] }
 0x2f6   : > { %7398 = vmatpush.bf16.msrb.mxu0 %v9176_v0  ;;  %7388 = vmatpush.bf16.msrb.mxu3 %v11124_v18  ;;  %v11211_v0 = vld [vmem:[%s16863_s2 + $0xe4] sm:$0xf]  ;;  %v11209_v18 = vld [vmem:[%s16863_s2 + $0xd4] sm:$0xf]  ;;  %v9224_v45 = vor.u32 %v11205_v37, %v9221_v14 }
 0x2f7   : > { %v9248_v58 = vor.u32 %v11211_v0, %v9245_v22  ;;  %v11664_v0 = vld [vmem:[%s16863_s2 + $0xf04] sm:$0xf0]  ;;  %v11255_v37 = vld [vmem:[%s16863_s2 + $0x244] sm:$0xf] }
 0x2f8   : > { %7361 = vmatpush.bf16.msrb.mxu1 %v10988_v55  ;;  %v9133_v55 = vld [vmem:[%s16863_s2 + $0x8] sm:$0xf0]  ;;  %v11052_v50 = vor.u32 %v11664_v0, %v11051_v61  ;;  %v9205_v0 = vld [vmem:[%s16863_s2 + $0x98] sm:$0xf0] }
 0x2f9   : > { %7371 = vmatpush.bf16.msra.mxu2 %v11084_v11  ;;  %v11207_v11 = vld [vmem:[%s16863_s2 + $0xc4] sm:$0xf]  ;;  %v9136_v40 = vor.u32 %v11183_v20, %v9133_v55  ;;  %v9341_v20 = vld [vmem:[%s16863_s2 + $0x1a8] sm:$0xf0]  ;;  %v17077_v55 = vld [vmem:[#allocation56_spill] sm:$0xff] }
 0x2fa   : > { %7399 = vmatpush.bf16.msrb.mxu0 %v9168_v42  ;;  %7389 = vmatpush.bf16.msrb.mxu3 %v11116_v13  ;;  %v9237_v42 = vld [vmem:[%s16863_s2 + $0xd8] sm:$0xf0]  ;;  %v9229_v13 = vld [vmem:[%s16863_s2 + $0xc8] sm:$0xf0] }
 0x2fb   : > { %7362 = vmatmul.bf16.vlgmr.msrb.gmra.mxu1 %v14560_v62  ;;  %v9240_v34 = vor.u32 %v11209_v18, %v9237_v42  ;;  %v9232_v22 = vor.u32 %v11207_v11, %v9229_v13  ;;  %v9437_v18 = vld [vmem:[%s16863_s2 + $0x268] sm:$0xf0]  ;;  %v11257_v11 = vld [vmem:[%s16863_s2 + $0x254] sm:$0xf]  ;;  %v9429_v13 = vld [vmem:[%s16863_s2 + $0x258] sm:$0xf0] }
 0x2fc   : > { %7410 = vmatpush.bf16.msra.mxu1 %v9256_v33  ;;  %v11261_v33 = vld [vmem:[%s16863_s2 + $0x274] sm:$0xf]  ;;  %v9440_v9 = vor.u32 %v11259_v57, %v9437_v18  ;;  %v9432_v61 = vor.u32 %v11257_v11, %v9429_v13  ;;  %v9293_v57 = vld [vmem:[%s16863_s2 + $0x148] sm:$0xf0] }
 0x2fd   : > { %7390 = vmatmul.bf16.vlgmr.msrb.gmra.mxu3 %v14612_v12  ;;  %7372 = vmatpush.bf16.msra.mxu2 %v11076_v53  ;;  %v11229_v53 = vld [vmem:[%s16863_s2 + $0x174] sm:$0xf] }
 0x2fe   : > { %7400 = vmatpush.bf16.msrb.mxu0 %v9160_v10  ;;  %7438 = vmatpush.bf16.msra.mxu3 %v9384_v59  ;;  %v11239_v10 = vld [vmem:[%s16863_s2 + $0x1c4] sm:$0xf]  ;;  %v9445_v59 = vld [vmem:[%s16863_s2 + $0x278] sm:$0xf0] }
 0x2ff   : > { %v9360_v30 = vor.u32 %v11239_v10, %v9357_v46  ;;  %v9448_v41 = vor.u32 %v11261_v33, %v9445_v59  ;;  %v11201_v33 = vld [vmem:[%s16863_s2 + $0x94] sm:$0xf] }
 0x300   : > { %7411 = vmatpush.bf16.msra.mxu1 %v9248_v58  ;;  %v11237_v58 = vld [vmem:[%s16863_s2 + $0x1b4] sm:$0xf]  ;;  %v9208_v14 = vor.u32 %v11201_v33, %v9205_v0  ;;  %v11307_v0 = vld [vmem:[%s16863_s2 + $0x3e4] sm:$0xf] }
 0x301   : > { %7373 = vmatpush.bf16.msra.mxu2 %v11068_v31  ;;  %v11203_v31 = vld [vmem:[%s16863_s2 + $0xa4] sm:$0xf]  ;;  %v11225_v59 = vld [vmem:[%s16863_s2 + $0x154] sm:$0xf] }
 0x302   : > { %7401 = vmatpush.bf16.msrb.mxu0 %v9152_v29  ;;  %7439 = vmatpush.bf16.msra.mxu3 %v9376_v49  ;;  %v9317_v29 = vld [vmem:[%s16863_s2 + $0x178] sm:$0xf0] }
 0x303   : > { %v9349_v49 = vld [vmem:[%s16863_s2 + $0x1b8] sm:$0xf0]  ;;  %v9320_v42 = vor.u32 %v11229_v53, %v9317_v29  ;;  %v9421_v53 = vld [vmem:[%s16863_s2 + $0x248] sm:$0xf0] }
 0x304   : > { %7412 = vmatpush.bf16.msra.mxu1 %v9240_v34  ;;  %v9352_v44 = vor.u32 %v11237_v58, %v9349_v49  ;;  %v9213_v34 = vld [vmem:[%s16863_s2 + $0xa8] sm:$0xf0]  ;;  %v9424_v18 = vor.u32 %v11255_v37, %v9421_v53 }
 0x305   : > { %7374 = vmatpush.bf16.msra.mxu2 %v11060_v43  ;;  %v9216_v46 = vor.u32 %v11203_v31, %v9213_v34  ;;  %v9197_v49 = vld [vmem:[%s16863_s2 + $0x88] sm:$0xf0]  ;;  %v9413_v31 = vld [vmem:[%s16863_s2 + $0x238] sm:$0xf0]  ;;  %v11309_v34 = vld [vmem:[%s16863_s2 + $0x3f4] sm:$0xf] }
 0x306   : > { %7402 = vmatpush.bf16.msrb.mxu0 %v9144_v54  ;;  %7440 = vmatpush.bf16.msra.mxu3 %v9368_v21  ;;  %v11227_v54 = vld [vmem:[%s16863_s2 + $0x164] sm:$0xf] }
 0x307   : > { %v11235_v21 = vld [vmem:[%s16863_s2 + $0x1a4] sm:$0xf]  ;;  %v9312_v10 = vor.u32 %v11227_v54, %v9309_v19  ;;  %v11277_v54 = vld [vmem:[%s16863_s2 + $0x2f4] sm:$0xf]  ;;  %v9509_v19 = vld [vmem:[%s16863_s2 + $0x2f8] sm:$0xf0] }
 0x308   : > { %7413 = vmatpush.bf16.msra.mxu1 %v9232_v22  ;;  %v9344_v43 = vor.u32 %v11235_v21, %v9341_v20  ;;  %v11233_v22 = vld [vmem:[%s16863_s2 + $0x194] sm:$0xf]  ;;  %v9637_v21 = vld [vmem:[%s16863_s2 + $0x3f8] sm:$0xf0]  ;;  %v9512_v13 = vor.u32 %v11277_v54, %v9509_v19  ;;  %v11247_v54 = vld [vmem:[%s16863_s2 + $0x204] sm:$0xf] }
 0x309   : > { %7375 = vmatpush.bf16.msra.mxu2 %v11052_v50  ;;  %v11223_v50 = vld [vmem:[%s16863_s2 + $0x144] sm:$0xf]  ;;  %v9640_v33 = vor.u32 %v11309_v34, %v9637_v21  ;;  %v9389_v19 = vld [vmem:[%s16863_s2 + $0x208] sm:$0xf0] }
 0x30a   : > { %7403 = vmatpush.bf16.msrb.mxu0 %v9136_v40  ;;  %7441 = vmatpush.bf16.msra.mxu3 %v9360_v30  ;;  %v9301_v40 = vld [vmem:[%s16863_s2 + $0x158] sm:$0xf0]  ;;  %v11271_v34 = vld [vmem:[%s16863_s2 + $0x2c4] sm:$0xf]  ;;  %v9485_v21 = vld [vmem:[%s16863_s2 + $0x2c8] sm:$0xf0] }
 0x30b   : > { %v9333_v30 = vld [vmem:[%s16863_s2 + $0x198] sm:$0xf0]  ;;  %v9304_v29 = vor.u32 %v11225_v59, %v9301_v40  ;;  %v9405_v59 = vld [vmem:[%s16863_s2 + $0x228] sm:$0xf0]  ;;  %v11275_v40 = vld [vmem:[%s16863_s2 + $0x2e4] sm:$0xf] }
 0x30c   : > { %7414 = vmatpush.bf16.msra.mxu1 %v9224_v45  ;;  %7376 = vmatmul.bf16.vlgmr.msra.gmra.mxu2 %v14719_v35  ;;  %v9336_v58 = vor.u32 %v11233_v22, %v9333_v30  ;;  %v9325_v45 = vld [vmem:[%s16863_s2 + $0x188] sm:$0xf0] }
 0x30d   : > { %7404 = vmatmul.bf16.vlgmr.msrb.gmra.mxu0 %v17077_v55  ;;  %7424 = vmatpush.bf16.msrb.mxu2 %v9320_v42  ;;  %v11231_v42 = vld [vmem:[%s16863_s2 + $0x184] sm:$0xf]  ;;  %v9629_v22 = vld [vmem:[%s16863_s2 + $0x3e8] sm:$0xf0] }
 0x30e   : > { %7452 = vmatpush.bf16.msra.mxu0 %v9448_v41  ;;  %7442 = vmatpush.bf16.msra.mxu3 %v9352_v44  ;;  %v11199_v41 = vld [vmem:[%s16863_s2 + $0x84] sm:$0xf]  ;;  %v11253_v44 = vld [vmem:[%s16863_s2 + $0x234] sm:$0xf]  ;;  %v9328_v55 = vor.u32 %v11231_v42, %v9325_v45  ;;  %v9621_v42 = vld [vmem:[%s16863_s2 + $0x3d8] sm:$0xf0] }
 0x30f   : > { %v9200_v20 = vor.u32 %v11199_v41, %v9197_v49  ;;  %v9416_v11 = vor.u32 %v11253_v44, %v9413_v31  ;;  %v9277_v41 = vld [vmem:[%s16863_s2 + $0x128] sm:$0xf0]  ;;  %v9397_v49 = vld [vmem:[%s16863_s2 + $0x218] sm:$0xf0]  ;;  %v11217_v44 = vld [vmem:[%s16863_s2 + $0x114] sm:$0xf] }
 0x310   : > { %7415 = vmatpush.bf16.msra.mxu1 %v9216_v46  ;;  %v9285_v46 = vld [vmem:[%s16863_s2 + $0x138] sm:$0xf0] }
 0x311   : > { %7425 = vmatpush.bf16.msrb.mxu2 %v9312_v10  ;;  %v11221_v10 = vld [vmem:[%s16863_s2 + $0x134] sm:$0xf] }
 0x312   : > { %7453 = vmatpush.bf16.msra.mxu0 %v9440_v9  ;;  %7443 = vmatpush.bf16.msra.mxu3 %v9344_v43  ;;  %v9296_v9 = vor.u32 %v11223_v50, %v9293_v57  ;;  %v11251_v43 = vld [vmem:[%s16863_s2 + $0x224] sm:$0xf]  ;;  %v9288_v30 = vor.u32 %v11221_v10, %v9285_v46  ;;  %v11273_v50 = vld [vmem:[%s16863_s2 + $0x2d4] sm:$0xf]  ;;  %v9493_v57 = vld [vmem:[%s16863_s2 + $0x2d8] sm:$0xf0] }
 0x313   : > { %v9408_v37 = vor.u32 %v11251_v43, %v9405_v59  ;;  %v11215_v46 = vld [vmem:[%s16863_s2 + $0x104] sm:$0xf]  ;;  %v9392_v43 = vor.u32 %v11247_v54, %v9389_v19  ;;  %v9261_v59 = vld [vmem:[%s16863_s2 + $0x108] sm:$0xf0]  ;;  %v11321_v54 = vld [vmem:[%s16863_s2 + $0x454] sm:$0xf] }
 0x314   : > { %7416 = vmatpush.bf16.msra.mxu1 %v9208_v14  ;;  %v11249_v14 = vld [vmem:[%s16863_s2 + $0x214] sm:$0xf]  ;;  %v9685_v19 = vld [vmem:[%s16863_s2 + $0x458] sm:$0xf0] }
 0x315   : > { %7426 = vmatpush.bf16.msrb.mxu2 %v9304_v29  ;;  %v11219_v29 = vld [vmem:[%s16863_s2 + $0x124] sm:$0xf]  ;;  %v9400_v31 = vor.u32 %v11249_v14, %v9397_v49  ;;  %v9693_v14 = vld [vmem:[%s16863_s2 + $0x468] sm:$0xf0] }
 0x316   : > { %7454 = vmatpush.bf16.msra.mxu0 %v9432_v61  ;;  %7444 = vmatpush.bf16.msra.mxu3 %v9336_v58  ;;  %v9501_v61 = vld [vmem:[%s16863_s2 + $0x2e8] sm:$0xf0]  ;;  %v9632_v58 = vor.u32 %v11307_v0, %v9629_v22  ;;  %v9280_v45 = vor.u32 %v11219_v29, %v9277_v41  ;;  %v9605_v29 = vld [vmem:[%s16863_s2 + $0x3b8] sm:$0xf0]  ;;  %v11323_v41 = vld [vmem:[%s16863_s2 + $0x464] sm:$0xf] }
 0x317   : > { %v9504_v53 = vor.u32 %v11275_v40, %v9501_v61  ;;  %v11269_v40 = vld [vmem:[%s16863_s2 + $0x2b4] sm:$0xf]  ;;  %v9477_v61 = vld [vmem:[%s16863_s2 + $0x2b8] sm:$0xf0] }
 0x318   : > { %7417 = vmatpush.bf16.msra.mxu1 %v9200_v20  ;;  %v11303_v20 = vld [vmem:[%s16863_s2 + $0x3c4] sm:$0xf]  ;;  %v9480_v49 = vor.u32 %v11269_v40, %v9477_v61  ;;  %v9453_v61 = vld [vmem:[%s16863_s2 + $0x288] sm:$0xf0] }
 0x319   : > { %7427 = vmatpush.bf16.msrb.mxu2 %v9296_v9 }
 0x31a   : > { %7455 = vmatpush.bf16.msra.mxu0 %v9424_v18  ;;  %7445 = vmatpush.bf16.msra.mxu3 %v9328_v55  ;;  %v11305_v18 = vld [vmem:[%s16863_s2 + $0x3d4] sm:$0xf]  ;;  %v9613_v55 = vld [vmem:[%s16863_s2 + $0x3c8] sm:$0xf0] }
 0x31b   : > { %7418 = vmatmul.bf16.vlgmr.msra.gmra.mxu1 %v13618_v63  ;;  %v9496_v63 = vor.u32 %v11273_v50, %v9493_v57  ;;  %v9624_v9 = vor.u32 %v11305_v18, %v9621_v42  ;;  %v9616_v0 = vor.u32 %v11303_v20, %v9613_v55  ;;  %v11267_v57 = vld [vmem:[%s16863_s2 + $0x2a4] sm:$0xf]  ;;  %v9469_v18 = vld [vmem:[%s16863_s2 + $0x2a8] sm:$0xf0]  ;;  %v9461_v20 = vld [vmem:[%s16863_s2 + $0x298] sm:$0xf0] }
 0x31c   : > { %7466 = vmatpush.bf16.msrb.mxu1 %v9512_v13  ;;  %v9701_v13 = vld [vmem:[%s16863_s2 + $0x478] sm:$0xf0] }
 0x31d   : > { %7446 = vmatmul.bf16.vlgmr.msra.gmra.mxu3 %v13657_v24  ;;  %7428 = vmatpush.bf16.msrb.mxu2 %v9288_v30  ;;  %v9269_v24 = vld [vmem:[%s16863_s2 + $0x118] sm:$0xf0]  ;;  %v11293_v30 = vld [vmem:[%s16863_s2 + $0x374] sm:$0xf] }
 0x31e   : > { %7456 = vmatpush.bf16.msra.mxu0 %v9416_v11  ;;  %7494 = vmatpush.bf16.msrb.mxu3 %v9640_v33  ;;  %v11325_v11 = vld [vmem:[%s16863_s2 + $0x474] sm:$0xf]  ;;  %v9272_v10 = vor.u32 %v11217_v44, %v9269_v24  ;;  %v9488_v33 = vor.u32 %v11271_v34, %v9485_v21  ;;  %v11291_v44 = vld [vmem:[%s16863_s2 + $0x364] sm:$0xf]  ;;  %v9597_v24 = vld [vmem:[%s16863_s2 + $0x3a8] sm:$0xf0] }
 0x31f   : > { %v9704_v22 = vor.u32 %v11325_v11, %v9701_v13  ;;  %v11265_v21 = vld [vmem:[%s16863_s2 + $0x294] sm:$0xf]  ;;  %v9688_v11 = vor.u32 %v11321_v54, %v9685_v19  ;;  %v9557_v13 = vld [vmem:[%s16863_s2 + $0x358] sm:$0xf0]  ;;  %v11315_v19 = vld [vmem:[%s16863_s2 + $0x424] sm:$0xf] }
 0x320   : > { %7467 = vmatpush.bf16.msrb.mxu1 %v9504_v53  ;;  %v11301_v53 = vld [vmem:[%s16863_s2 + $0x3b4] sm:$0xf] }
 0x321   : > { %7429 = vmatpush.bf16.msrb.mxu2 %v9280_v45  ;;  %v9608_v42 = vor.u32 %v11301_v53, %v9605_v29  ;;  %v9696_v45 = vor.u32 %v11323_v41, %v9693_v14  ;;  %v11295_v53 = vld [vmem:[%s16863_s2 + $0x384] sm:$0xf]  ;;  %v9581_v29 = vld [vmem:[%s16863_s2 + $0x388] sm:$0xf0]  ;;  %v11317_v41 = vld [vmem:[%s16863_s2 + $0x434] sm:$0xf] }
 0x322   : > { %7457 = vmatpush.bf16.msra.mxu0 %v9408_v37  ;;  %7495 = vmatpush.bf16.msrb.mxu3 %v9632_v58  ;;  %v9573_v37 = vld [vmem:[%s16863_s2 + $0x378] sm:$0xf0]  ;;  %v9264_v58 = vor.u32 %v11215_v46, %v9261_v59  ;;  %v9464_v59 = vor.u32 %v11265_v21, %v9461_v20  ;;  %v9757_v21 = vld [vmem:[%s16863_s2 + $0x4e8] sm:$0xf0]  ;;  %v11371_v20 = vld [vmem:[%s16863_s2 + $0x5e4] sm:$0xf] }
 0x323   : > { %v9576_v50 = vor.u32 %v11293_v30, %v9573_v37  ;;  %v9589_v46 = vld [vmem:[%s16863_s2 + $0x398] sm:$0xf0]  ;;  %v9549_v37 = vld [vmem:[%s16863_s2 + $0x348] sm:$0xf0] }
 0x324   : > { %7468 = vmatpush.bf16.msrb.mxu1 %v9496_v63  ;;  %v11299_v63 = vld [vmem:[%s16863_s2 + $0x3a4] sm:$0xf]  ;;  %v9669_v14 = vld [vmem:[%s16863_s2 + $0x438] sm:$0xf0] }
 0x325   : > { %7430 = vmatpush.bf16.msrb.mxu2 %v9272_v10  ;;  %v9600_v55 = vor.u32 %v11299_v63, %v9597_v24  ;;  %v11297_v10 = vld [vmem:[%s16863_s2 + $0x394] sm:$0xf]  ;;  %v9541_v63 = vld [vmem:[%s16863_s2 + $0x338] sm:$0xf0] }
 0x326   : > { %7458 = vmatpush.bf16.msra.mxu0 %v9400_v31  ;;  %7496 = vmatpush.bf16.msrb.mxu3 %v9624_v9  ;;  %v9565_v31 = vld [vmem:[%s16863_s2 + $0x368] sm:$0xf0]  ;;  %v9472_v9 = vor.u32 %v11267_v57, %v9469_v18  ;;  %v9893_v57 = vld [vmem:[%s16863_s2 + $0x5f8] sm:$0xf0] }
 0x327   : > { %v9568_v34 = vor.u32 %v11291_v44, %v9565_v31  ;;  %v9672_v44 = vor.u32 %v11317_v41, %v9669_v14  ;;  %v11285_v31 = vld [vmem:[%s16863_s2 + $0x334] sm:$0xf]  ;;  %v9645_v41 = vld [vmem:[%s16863_s2 + $0x408] sm:$0xf0]  ;;  %v11335_v14 = vld [vmem:[%s16863_s2 + $0x4c4] sm:$0xf] }
 0x328   : > { %7469 = vmatpush.bf16.msrb.mxu1 %v9488_v33  ;;  %v9677_v33 = vld [vmem:[%s16863_s2 + $0x448] sm:$0xf0] }
 0x329   : > { %7431 = vmatpush.bf16.msrb.mxu2 %v9264_v58  ;;  %v11341_v58 = vld [vmem:[%s16863_s2 + $0x4f4] sm:$0xf] }
 0x32a   : > { %7459 = vmatpush.bf16.msra.mxu0 %v9392_v43  ;;  %7497 = vmatpush.bf16.msrb.mxu3 %v9616_v0  ;;  %v11319_v43 = vld [vmem:[%s16863_s2 + $0x444] sm:$0xf] }
 0x32b   : > { %v11287_v0 = vld [vmem:[%s16863_s2 + $0x344] sm:$0xf]  ;;  %v9680_v30 = vor.u32 %v11319_v43, %v9677_v33  ;;  %v11313_v33 = vld [vmem:[%s16863_s2 + $0x414] sm:$0xf] }
 0x32c   : > { %7470 = vmatpush.bf16.msrb.mxu1 %v9480_v49  ;;  %7432 = vmatmul.bf16.vlgmr.msrb.gmra.mxu2 %v13781_v52  ;;  %v11263_v52 = vld [vmem:[%s16863_s2 + $0x284] sm:$0xf]  ;;  %v9765_v49 = vld [vmem:[%s16863_s2 + $0x4f8] sm:$0xf0] }
 0x32d   : > { %7460 = vmatmul.bf16.vlgmr.msra.gmra.mxu0 %v13622_v26  ;;  %7480 = vmatpush.bf16.msra.mxu2 %v9576_v50  ;;  %v11289_v26 = vld [vmem:[%s16863_s2 + $0x354] sm:$0xf]  ;;  %v9456_v18 = vor.u32 %v11263_v52, %v9453_v61  ;;  %v9768_v24 = vor.u32 %v11341_v58, %v9765_v49  ;;  %v9749_v52 = vld [vmem:[%s16863_s2 + $0x4d8] sm:$0xf0]  ;;  %v9741_v58 = vld [vmem:[%s16863_s2 + $0x4c8] sm:$0xf0] }
 0x32e   : > { %7508 = vmatpush.bf16.msrb.mxu0 %v9704_v22  ;;  %7498 = vmatpush.bf16.msrb.mxu3 %v9608_v42  ;;  %v9560_v40 = vor.u32 %v11289_v26, %v9557_v13  ;;  %v9592_v22 = vor.u32 %v11297_v10, %v9589_v46  ;;  %v11373_v50 = vld [vmem:[%s16863_s2 + $0x5f4] sm:$0xf]  ;;  %v9552_v42 = vor.u32 %v11287_v0, %v9549_v37  ;;  %v11283_v13 = vld [vmem:[%s16863_s2 + $0x324] sm:$0xf]  ;;  %v9533_v10 = vld [vmem:[%s16863_s2 + $0x328] sm:$0xf0] }
 0x32f   : > { %v9896_v54 = vor.u32 %v11373_v50, %v9893_v57  ;;  %v11369_v61 = vld [vmem:[%s16863_s2 + $0x5d4] sm:$0xf]  ;;  %v9877_v0 = vld [vmem:[%s16863_s2 + $0x5d8] sm:$0xf0]  ;;  %v11367_v49 = vld [vmem:[%s16863_s2 + $0x5c4] sm:$0xf] }
 0x330   : > { %7471 = vmatpush.bf16.msrb.mxu1 %v9472_v9  ;;  %v9661_v9 = vld [vmem:[%s16863_s2 + $0x428] sm:$0xf0]  ;;  %v9525_v37 = vld [vmem:[%s16863_s2 + $0x318] sm:$0xf0] }
 0x331   : > { %7481 = vmatpush.bf16.msra.mxu2 %v9568_v34  ;;  %v11339_v34 = vld [vmem:[%s16863_s2 + $0x4e4] sm:$0xf]  ;;  %v9664_v26 = vor.u32 %v11315_v19, %v9661_v9  ;;  %v9869_v50 = vld [vmem:[%s16863_s2 + $0x5c8] sm:$0xf0]  ;;  %v11357_v19 = vld [vmem:[%s16863_s2 + $0x574] sm:$0xf] }
 0x332   : > { %7509 = vmatpush.bf16.msrb.mxu0 %v9696_v45  ;;  %7499 = vmatpush.bf16.msrb.mxu3 %v9600_v55  ;;  %v9584_v45 = vor.u32 %v11295_v53, %v9581_v29  ;;  %v9885_v55 = vld [vmem:[%s16863_s2 + $0x5e8] sm:$0xf0]  ;;  %v9760_v46 = vor.u32 %v11339_v34, %v9757_v21  ;;  %v9880_v29 = vor.u32 %v11369_v61, %v9877_v0  ;;  %v9829_v9 = vld [vmem:[%s16863_s2 + $0x578] sm:$0xf0]  ;;  %v11363_v0 = vld [vmem:[%s16863_s2 + $0x5a4] sm:$0xf] }
 0x333   : > { %v9888_v43 = vor.u32 %v11371_v20, %v9885_v55  ;;  %v9733_v21 = vld [vmem:[%s16863_s2 + $0x4b8] sm:$0xf0]  ;;  %v11365_v20 = vld [vmem:[%s16863_s2 + $0x5b4] sm:$0xf]  ;;  %v9725_v61 = vld [vmem:[%s16863_s2 + $0x4a8] sm:$0xf0] }
 0x334   : > { %7472 = vmatpush.bf16.msrb.mxu1 %v9464_v59  ;;  %v9653_v59 = vld [vmem:[%s16863_s2 + $0x418] sm:$0xf0] }
 0x335   : > { %7482 = vmatpush.bf16.msra.mxu2 %v9560_v40  ;;  %v11337_v40 = vld [vmem:[%s16863_s2 + $0x4d4] sm:$0xf]  ;;  %v9861_v55 = vld [vmem:[%s16863_s2 + $0x5b8] sm:$0xf0] }
 0x336   : > { %7510 = vmatpush.bf16.msrb.mxu0 %v9688_v11  ;;  %7500 = vmatpush.bf16.msrb.mxu3 %v9592_v22  ;;  %v9544_v11 = vor.u32 %v11285_v31, %v9541_v63  ;;  %v9536_v22 = vor.u32 %v11283_v13, %v9533_v10  ;;  %v9752_v53 = vor.u32 %v11337_v40, %v9749_v52  ;;  %v9517_v31 = vld [vmem:[%s16863_s2 + $0x308] sm:$0xf0] }
 0x337   : > { %v9744_v63 = vor.u32 %v11335_v14, %v9741_v58  ;;  %v9949_v13 = vld [vmem:[%s16863_s2 + $0x668] sm:$0xf0]  ;;  %v9832_v10 = vor.u32 %v11357_v19, %v9829_v9  ;;  %v9717_v58 = vld [vmem:[%s16863_s2 + $0x498] sm:$0xf0]  ;;  %v11359_v19 = vld [vmem:[%s16863_s2 + $0x584] sm:$0xf] }
 0x338   : > { %7473 = vmatpush.bf16.msrb.mxu1 %v9456_v18  ;;  %v11389_v18 = vld [vmem:[%s16863_s2 + $0x674] sm:$0xf]  ;;  %v9821_v40 = vld [vmem:[%s16863_s2 + $0x568] sm:$0xf0] }
 0x339   : > { %7483 = vmatpush.bf16.msra.mxu2 %v9552_v42  ;;  %v9957_v42 = vld [vmem:[%s16863_s2 + $0x678] sm:$0xf0]  ;;  %v9837_v9 = vld [vmem:[%s16863_s2 + $0x588] sm:$0xf0] }
 0x33a   : > { %7511 = vmatpush.bf16.msrb.mxu0 %v9680_v30  ;;  %7501 = vmatpush.bf16.msrb.mxu3 %v9584_v45  ;;  %v9656_v30 = vor.u32 %v11313_v33, %v9653_v59  ;;  %v9960_v34 = vor.u32 %v11389_v18, %v9957_v42  ;;  %v11331_v33 = vld [vmem:[%s16863_s2 + $0x4a4] sm:$0xf] }
 0x33b   : > { %7474 = vmatmul.bf16.vlgmr.msrb.gmra.mxu1 %v13741_v23  ;;  %v11281_v23 = vld [vmem:[%s16863_s2 + $0x314] sm:$0xf]  ;;  %v11355_v59 = vld [vmem:[%s16863_s2 + $0x564] sm:$0xf] }
 0x33c   : > { %7522 = vmatpush.bf16.msra.mxu1 %v9768_v24  ;;  %v9528_v57 = vor.u32 %v11281_v23, %v9525_v37  ;;  %v9872_v24 = vor.u32 %v11367_v49, %v9869_v50  ;;  %v9941_v23 = vld [vmem:[%s16863_s2 + $0x658] sm:$0xf0]  ;;  %v9824_v37 = vor.u32 %v11355_v59, %v9821_v40  ;;  %v11361_v49 = vld [vmem:[%s16863_s2 + $0x594] sm:$0xf]  ;;  %v11327_v42 = vld [vmem:[%s16863_s2 + $0x484] sm:$0xf] }
 0x33d   : > { %7502 = vmatmul.bf16.vlgmr.msrb.gmra.mxu3 %v13783_v39  ;;  %7484 = vmatpush.bf16.msra.mxu2 %v9544_v11  ;;  %v11311_v39 = vld [vmem:[%s16863_s2 + $0x404] sm:$0xf]  ;;  %v9845_v50 = vld [vmem:[%s16863_s2 + $0x598] sm:$0xf0]  ;;  %v11349_v59 = vld [vmem:[%s16863_s2 + $0x534] sm:$0xf] }
 0x33e   : > { %7512 = vmatpush.bf16.msrb.mxu0 %v9672_v44  ;;  %7550 = vmatpush.bf16.msra.mxu3 %v9896_v54  ;;  %v9648_v45 = vor.u32 %v11311_v39, %v9645_v41  ;;  %v11279_v44 = vld [vmem:[%s16863_s2 + $0x304] sm:$0xf]  ;;  %v11333_v54 = vld [vmem:[%s16863_s2 + $0x4b4] sm:$0xf]  ;;  %v9813_v41 = vld [vmem:[%s16863_s2 + $0x558] sm:$0xf0] }
 0x33f   : > { %v9520_v11 = vor.u32 %v11279_v44, %v9517_v31  ;;  %v11329_v39 = vld [vmem:[%s16863_s2 + $0x494] sm:$0xf]  ;;  %v9848_v44 = vor.u32 %v11361_v49, %v9845_v50  ;;  %v9709_v31 = vld [vmem:[%s16863_s2 + $0x488] sm:$0xf0]  ;;  %v9797_v40 = vld [vmem:[%s16863_s2 + $0x538] sm:$0xf0] }
 0x340   : > { %7523 = vmatpush.bf16.msra.mxu1 %v9760_v46  ;;  %v9736_v46 = vor.u32 %v11333_v54, %v9733_v21  ;;  %v9925_v21 = vld [vmem:[%s16863_s2 + $0x638] sm:$0xf0]  ;;  %v11401_v50 = vld [vmem:[%s16863_s2 + $0x6d4] sm:$0xf] }
 0x341   : > { %7485 = vmatpush.bf16.msra.mxu2 %v9536_v22  ;;  %v9853_v22 = vld [vmem:[%s16863_s2 + $0x5a8] sm:$0xf0]  ;;  %v9909_v49 = vld [vmem:[%s16863_s2 + $0x618] sm:$0xf0] }
 0x342   : > { %7513 = vmatpush.bf16.msrb.mxu0 %v9664_v26  ;;  %7551 = vmatpush.bf16.msra.mxu3 %v9888_v43  ;;  %v11387_v26 = vld [vmem:[%s16863_s2 + $0x664] sm:$0xf]  ;;  %v9864_v43 = vor.u32 %v11365_v20, %v9861_v55  ;;  %v11405_v20 = vld [vmem:[%s16863_s2 + $0x6f4] sm:$0xf]  ;;  %v10021_v55 = vld [vmem:[%s16863_s2 + $0x6f8] sm:$0xf0] }
 0x343   : > { %v9952_v52 = vor.u32 %v11387_v26, %v9949_v13  ;;  %v11437_v26 = vld [vmem:[%s16863_s2 + $0x7f4] sm:$0xf]  ;;  %v10149_v13 = vld [vmem:[%s16863_s2 + $0x7f8] sm:$0xf0] }
 0x344   : > { %7524 = vmatpush.bf16.msra.mxu1 %v9752_v53  ;;  %v9728_v53 = vor.u32 %v11331_v33, %v9725_v61  ;;  %v10024_v33 = vor.u32 %v11405_v20, %v10021_v55  ;;  %v10152_v61 = vor.u32 %v11437_v26, %v10149_v13  ;;  %v10213_v20 = vld [vmem:[%s16863_s2 + $0x878] sm:$0xf0] }
 0x345   : > { %7486 = vmatpush.bf16.msra.mxu2 %v9528_v57  ;;  %v11383_v57 = vld [vmem:[%s16863_s2 + $0x644] sm:$0xf] }
 0x346   : > { %7514 = vmatpush.bf16.msrb.mxu0 %v9656_v30  ;;  %7552 = vmatpush.bf16.msra.mxu3 %v9880_v29  ;;  %v11385_v30 = vld [vmem:[%s16863_s2 + $0x654] sm:$0xf]  ;;  %v9856_v29 = vor.u32 %v11363_v0, %v9853_v22  ;;  %v9917_v0 = vld [vmem:[%s16863_s2 + $0x628] sm:$0xf0]  ;;  %v11403_v22 = vld [vmem:[%s16863_s2 + $0x6e4] sm:$0xf] }
 0x347   : > { %v9944_v14 = vor.u32 %v11385_v30, %v9941_v23  ;;  %v10013_v30 = vld [vmem:[%s16863_s2 + $0x6e8] sm:$0xf0]  ;;  %v11435_v23 = vld [vmem:[%s16863_s2 + $0x7e4] sm:$0xf] }
 0x348   : > { %7525 = vmatpush.bf16.msra.mxu1 %v9744_v63  ;;  %v11351_v63 = vld [vmem:[%s16863_s2 + $0x544] sm:$0xf] }
 0x349   : > { %7487 = vmatpush.bf16.msra.mxu2 %v9520_v11 }
 0x34a   : > { %7515 = vmatpush.bf16.msrb.mxu0 %v9648_v45  ;;  %7553 = vmatpush.bf16.msra.mxu3 %v9872_v24  ;;  %v9720_v45 = vor.u32 %v11329_v39, %v9717_v58  ;;  %v9805_v24 = vld [vmem:[%s16863_s2 + $0x548] sm:$0xf0]  ;;  %v10016_v39 = vor.u32 %v11403_v22, %v10013_v30  ;;  %v11451_v22 = vld [vmem:[%s16863_s2 + $0x864] sm:$0xf] }
 0x34b   : > { %v9808_v11 = vor.u32 %v11351_v63, %v9805_v24  ;;  %v9901_v63 = vld [vmem:[%s16863_s2 + $0x608] sm:$0xf0] }
 0x34c   : > { %7526 = vmatpush.bf16.msra.mxu1 %v9736_v46  ;;  %7488 = vmatmul.bf16.vlgmr.msra.gmra.mxu2 %v13910_v4  ;;  %v9933_v4 = vld [vmem:[%s16863_s2 + $0x648] sm:$0xf0]  ;;  %v9840_v46 = vor.u32 %v11359_v19, %v9837_v9  ;;  %v11431_v9 = vld [vmem:[%s16863_s2 + $0x7c4] sm:$0xf] }
 0x34d   : > { %7516 = vmatmul.bf16.vlgmr.msrb.gmra.mxu0 %v13752_v60  ;;  %7536 = vmatpush.bf16.msrb.mxu2 %v9832_v10  ;;  %v11353_v60 = vld [vmem:[%s16863_s2 + $0x554] sm:$0xf]  ;;  %v9936_v54 = vor.u32 %v11383_v57, %v9933_v4  ;;  %v9712_v10 = vor.u32 %v11327_v42, %v9709_v31  ;;  %v10005_v57 = vld [vmem:[%s16863_s2 + $0x6d8] sm:$0xf0]  ;;  %v11375_v31 = vld [vmem:[%s16863_s2 + $0x604] sm:$0xf] }
 0x34e   : > { %7564 = vmatpush.bf16.msra.mxu0 %v9960_v34  ;;  %7554 = vmatpush.bf16.msra.mxu3 %v9864_v43  ;;  %v9816_v18 = vor.u32 %v11353_v60, %v9813_v41  ;;  %v11381_v34 = vld [vmem:[%s16863_s2 + $0x634] sm:$0xf]  ;;  %v11347_v60 = vld [vmem:[%s16863_s2 + $0x524] sm:$0xf]  ;;  %v9789_v41 = vld [vmem:[%s16863_s2 + $0x528] sm:$0xf0]  ;;  %v9904_v26 = vor.u32 %v11375_v31, %v9901_v63 }
 0x34f   : > { %v9928_v43 = vor.u32 %v11381_v34, %v9925_v21  ;;  %v11433_v4 = vld [vmem:[%s16863_s2 + $0x7d4] sm:$0xf]  ;;  %v9792_v42 = vor.u32 %v11347_v60, %v9789_v41  ;;  %v9997_v19 = vld [vmem:[%s16863_s2 + $0x6c8] sm:$0xf0]  ;;  %v10069_v63 = vld [vmem:[%s16863_s2 + $0x758] sm:$0xf0] }
 0x350   : > { %7527 = vmatpush.bf16.msra.mxu1 %v9728_v53  ;;  %v9800_v53 = vor.u32 %v11349_v59, %v9797_v40  ;;  %v10125_v34 = vld [vmem:[%s16863_s2 + $0x7c8] sm:$0xf0]  ;;  %v11453_v21 = vld [vmem:[%s16863_s2 + $0x874] sm:$0xf] }
 0x351   : > { %7537 = vmatpush.bf16.msrb.mxu2 %v9824_v37  ;;  %v10141_v37 = vld [vmem:[%s16863_s2 + $0x7e8] sm:$0xf0]  ;;  %v10216_v59 = vor.u32 %v11453_v21, %v10213_v20  ;;  %v11421_v40 = vld [vmem:[%s16863_s2 + $0x774] sm:$0xf]  ;;  %v15850_v21 = vpop.f32.mrf.mxu2 }
 0x352   : > { %7565 = vmatpush.bf16.msra.mxu0 %v9952_v52  ;;  %7555 = vmatpush.bf16.msra.mxu3 %v9856_v29  ;;  %v11379_v52 = vld [vmem:[%s16863_s2 + $0x624] sm:$0xf]  ;;  %v10144_v58 = vor.u32 %v11435_v23, %v10141_v37  ;;  %v10205_v30 = vld [vmem:[%s16863_s2 + $0x868] sm:$0xf0] }
 0x353   : > { %v9920_v29 = vor.u32 %v11379_v52, %v9917_v0  ;;  %v10085_v52 = vld [vmem:[%s16863_s2 + $0x778] sm:$0xf0]  ;;  %v10208_v41 = vor.u32 %v11451_v22, %v10205_v30 }
 0x354   : > { %7528 = vmatpush.bf16.msra.mxu1 %v9720_v45  ;;  %v11345_v45 = vld [vmem:[%s16863_s2 + $0x514] sm:$0xf]  ;;  %v10117_v0 = vld [vmem:[%s16863_s2 + $0x7b8] sm:$0xf0] }
 0x355   : > { %7538 = vmatpush.bf16.msrb.mxu2 %v9816_v18  ;;  %v10133_v18 = vld [vmem:[%s16863_s2 + $0x7d8] sm:$0xf0] }
 0x356   : > { %7566 = vmatpush.bf16.msra.mxu0 %v9944_v14  ;;  %7556 = vmatpush.bf16.msra.mxu3 %v9848_v44  ;;  %v11377_v14 = vld [vmem:[%s16863_s2 + $0x614] sm:$0xf]  ;;  %v10136_v24 = vor.u32 %v11433_v4, %v10133_v18  ;;  %v10197_v4 = vld [vmem:[%s16863_s2 + $0x858] sm:$0xf0]  ;;  %v15821_v18 = vpop.f32.mrf.mxu0 }
 0x357   : > { %v9912_v44 = vor.u32 %v11377_v14, %v9909_v49  ;;  %v11419_v14 = vld [vmem:[%s16863_s2 + $0x764] sm:$0xf]  ;;  %v10405_v22 = vld [vmem:[%s16863_s2 + $0x9f8] sm:$0xf0] }
 0x358   : > { %7529 = vmatpush.bf16.msra.mxu1 %v9712_v10  ;;  %v9773_v10 = vld [vmem:[%s16863_s2 + $0x508] sm:$0xf0]  ;;  %v11427_v49 = vld [vmem:[%s16863_s2 + $0x7a4] sm:$0xf] }
 0x359   : > { %7539 = vmatpush.bf16.msrb.mxu2 %v9808_v11  ;;  %v11343_v11 = vld [vmem:[%s16863_s2 + $0x504] sm:$0xf] }
 0x35a   : > { %7567 = vmatpush.bf16.msra.mxu0 %v9936_v54  ;;  %7557 = vmatpush.bf16.msra.mxu3 %v9840_v46  ;;  %v11399_v54 = vld [vmem:[%s16863_s2 + $0x6c4] sm:$0xf]  ;;  %v11397_v46 = vld [vmem:[%s16863_s2 + $0x6b4] sm:$0xf]  ;;  %v9776_v23 = vor.u32 %v11343_v11, %v9773_v10  ;;  %v9965_v11 = vld [vmem:[%s16863_s2 + $0x688] sm:$0xf0] }
 0x35b   : > { %7530 = vmatmul.bf16.vlgmr.msra.gmra.mxu1 %v13868_v28  ;;  %v10008_v28 = vor.u32 %v11401_v50, %v10005_v57  ;;  %v10000_v13 = vor.u32 %v11399_v54, %v9997_v19  ;;  %v10109_v50 = vld [vmem:[%s16863_s2 + $0x7a8] sm:$0xf0]  ;;  %v11449_v57 = vld [vmem:[%s16863_s2 + $0x854] sm:$0xf]  ;;  %v15838_v54 = vpop.f32.mrf.mxu1  ;;  %v10101_v19 = vld [vmem:[%s16863_s2 + $0x798] sm:$0xf0] }
 0x35c   : > { %7578 = vmatpush.bf16.msrb.mxu1 %v10024_v33  ;;  %v10128_v33 = vor.u32 %v11431_v9, %v10125_v34  ;;  %v10200_v31 = vor.u32 %v11449_v57, %v10197_v4  ;;  %v11447_v9 = vld [vmem:[%s16863_s2 + $0x844] sm:$0xf]  ;;  %v10189_v34 = vld [vmem:[%s16863_s2 + $0x848] sm:$0xf0] }
 0x35d   : > { %7558 = vmatmul.bf16.vlgmr.msra.gmra.mxu3 %v13918_v27  ;;  %7540 = vmatpush.bf16.msrb.mxu2 %v9800_v53  ;;  %v9781_v27 = vld [vmem:[%s16863_s2 + $0x518] sm:$0xf0]  ;;  %v10088_v53 = vor.u32 %v11421_v40, %v10085_v52  ;;  %v10192_v10 = vor.u32 %v11447_v9, %v10189_v34  ;;  %v11469_v52 = vld [vmem:[%s16863_s2 + $0x8f4] sm:$0xf]  ;;  %v11467_v57 = vld [vmem:[%s16863_s2 + $0x8e4] sm:$0xf] }
 0x35e   : > { %7568 = vmatpush.bf16.msra.mxu0 %v9928_v43  ;;  %7606 = vmatpush.bf16.msrb.mxu3 %v10152_v61  ;;  %v9784_v55 = vor.u32 %v11345_v45, %v9781_v27  ;;  %v9989_v43 = vld [vmem:[%s16863_s2 + $0x6b8] sm:$0xf0]  ;;  %v11429_v61 = vld [vmem:[%s16863_s2 + $0x7b4] sm:$0xf]  ;;  %v10112_v27 = vor.u32 %v11427_v49, %v10109_v50  ;;  %v11443_v49 = vld [vmem:[%s16863_s2 + $0x824] sm:$0xf] }
 0x35f   : > { %v9992_v37 = vor.u32 %v11397_v46, %v9989_v43  ;;  %v10120_v60 = vor.u32 %v11429_v61, %v10117_v0  ;;  %v10061_v46 = vld [vmem:[%s16863_s2 + $0x748] sm:$0xf0]  ;;  %v11423_v43 = vld [vmem:[%s16863_s2 + $0x784] sm:$0xf]  ;;  %v10181_v40 = vld [vmem:[%s16863_s2 + $0x838] sm:$0xf0] }
 0x360   : > { %7579 = vmatpush.bf16.msrb.mxu1 %v10016_v39  ;;  %v9981_v39 = vld [vmem:[%s16863_s2 + $0x6a8] sm:$0xf0]  ;;  %v10277_v61 = vld [vmem:[%s16863_s2 + $0x8f8] sm:$0xf0]  ;;  %v11501_v0 = vld [vmem:[%s16863_s2 + $0x9f4] sm:$0xf] }
 0x361   : > { %7541 = vmatpush.bf16.msrb.mxu2 %v9792_v42  ;;  %v10173_v50 = vld [vmem:[%s16863_s2 + $0x828] sm:$0xf0]  ;;  %v11441_v9 = vld [vmem:[%s16863_s2 + $0x814] sm:$0xf]  ;;  %v10165_v34 = vld [vmem:[%s16863_s2 + $0x818] sm:$0xf0] }
 0x362   : > { %7569 = vmatpush.bf16.msra.mxu0 %v9920_v29  ;;  %7607 = vmatpush.bf16.msrb.mxu3 %v10144_v58  ;;  %v11395_v29 = vld [vmem:[%s16863_s2 + $0x6a4] sm:$0xf]  ;;  %v10077_v58 = vld [vmem:[%s16863_s2 + $0x768] sm:$0xf0] }
 0x363   : > { %v9984_v42 = vor.u32 %v11395_v29, %v9981_v39  ;;  %v10080_v45 = vor.u32 %v11419_v14, %v10077_v58  ;;  %v11413_v39 = vld [vmem:[%s16863_s2 + $0x734] sm:$0xf]  ;;  %v10280_v14 = vor.u32 %v11469_v52, %v10277_v61  ;;  %v10408_v58 = vor.u32 %v11501_v0, %v10405_v22  ;;  %v10269_v4 = vld [vmem:[%s16863_s2 + $0x8e8] sm:$0xf0]  ;;  %v11495_v61 = vld [vmem:[%s16863_s2 + $0x9c4] sm:$0xf] }
 0x364   : > { %7580 = vmatpush.bf16.msrb.mxu1 %v10008_v28  ;;  %v9973_v28 = vld [vmem:[%s16863_s2 + $0x698] sm:$0xf0]  ;;  %v10253_v52 = vld [vmem:[%s16863_s2 + $0x8c8] sm:$0xf0] }
 0x365   : > { %7542 = vmatpush.bf16.msrb.mxu2 %v9784_v55  ;;  %v10381_v0 = vld [vmem:[%s16863_s2 + $0x9c8] sm:$0xf0] }
 0x366   : > { %7570 = vmatpush.bf16.msra.mxu0 %v9912_v44  ;;  %7608 = vmatpush.bf16.msrb.mxu3 %v10136_v24  ;;  %v11393_v44 = vld [vmem:[%s16863_s2 + $0x694] sm:$0xf] }
 0x367   : > { %v11425_v24 = vld [vmem:[%s16863_s2 + $0x794] sm:$0xf]  ;;  %v9976_v20 = vor.u32 %v11393_v44, %v9973_v28  ;;  %v15916_v44 = vpop.f32.mrf.mxu1 }
 0x368   : > { %7581 = vmatpush.bf16.msrb.mxu1 %v10000_v13  ;;  %v10104_v13 = vor.u32 %v11425_v24, %v10101_v19  ;;  %v10272_v24 = vor.u32 %v11467_v57, %v10269_v4  ;;  %v11485_v57 = vld [vmem:[%s16863_s2 + $0x974] sm:$0xf]  ;;  %v10341_v4 = vld [vmem:[%s16863_s2 + $0x978] sm:$0xf0] }
 0x369   : > { %7543 = vmatpush.bf16.msrb.mxu2 %v9776_v23 }
 0x36a   : > { %7571 = vmatpush.bf16.msra.mxu0 %v9904_v26  ;;  %7609 = vmatpush.bf16.msrb.mxu3 %v10128_v33  ;;  %v11415_v26 = vld [vmem:[%s16863_s2 + $0x744] sm:$0xf]  ;;  %v10093_v33 = vld [vmem:[%s16863_s2 + $0x788] sm:$0xf0] }
 0x36b   : > { %v10064_v23 = vor.u32 %v11415_v26, %v10061_v46 }
 0x36c   : > { %7582 = vmatpush.bf16.msrb.mxu1 %v9992_v37  ;;  %7544 = vmatmul.bf16.vlgmr.msrb.gmra.mxu2 %v14044_v17  ;;  %v11391_v17 = vld [vmem:[%s16863_s2 + $0x684] sm:$0xf]  ;;  %v15888_v37 = vpop.f32.mrf.mxu3 }
 0x36d   : > { %7572 = vmatmul.bf16.vlgmr.msra.gmra.mxu0 %v13879_v3  ;;  %7592 = vmatpush.bf16.msra.mxu2 %v10088_v53  ;;  %v11417_v3 = vld [vmem:[%s16863_s2 + $0x754] sm:$0xf]  ;;  %v9968_v30 = vor.u32 %v11391_v17, %v9965_v11  ;;  %v10096_v53 = vor.u32 %v11423_v43, %v10093_v33  ;;  %v10389_v11 = vld [vmem:[%s16863_s2 + $0x9d8] sm:$0xf0]  ;;  %v10157_v33 = vld [vmem:[%s16863_s2 + $0x808] sm:$0xf0] }
 0x36e   : > { %7620 = vmatpush.bf16.msrb.mxu0 %v10216_v59  ;;  %7610 = vmatpush.bf16.msrb.mxu3 %v10120_v60  ;;  %v10072_v55 = vor.u32 %v11417_v3, %v10069_v63  ;;  %v11445_v59 = vld [vmem:[%s16863_s2 + $0x834] sm:$0xf]  ;;  %v10053_v60 = vld [vmem:[%s16863_s2 + $0x738] sm:$0xf0]  ;;  %v10045_v3 = vld [vmem:[%s16863_s2 + $0x728] sm:$0xf0]  ;;  %v15924_v63 = vpop.f32.mrf.mxu2 }
 0x36f   : > { %v10184_v29 = vor.u32 %v11445_v59, %v10181_v40  ;;  %v10056_v28 = vor.u32 %v11413_v39, %v10053_v60  ;;  %v11497_v17 = vld [vmem:[%s16863_s2 + $0x9d4] sm:$0xf]  ;;  %v11463_v59 = vld [vmem:[%s16863_s2 + $0x8c4] sm:$0xf]  ;;  %v10029_v60 = vld [vmem:[%s16863_s2 + $0x708] sm:$0xf0] }
 0x370   : > { %7583 = vmatpush.bf16.msrb.mxu1 %v9984_v42  ;;  %v11499_v42 = vld [vmem:[%s16863_s2 + $0x9e4] sm:$0xf]  ;;  %v10392_v43 = vor.u32 %v11497_v17, %v10389_v11  ;;  %v10333_v11 = vld [vmem:[%s16863_s2 + $0x968] sm:$0xf0] }
 0x371   : > { %7593 = vmatpush.bf16.msra.mxu2 %v10080_v45  ;;  %v10397_v45 = vld [vmem:[%s16863_s2 + $0x9e8] sm:$0xf0]  ;;  %v11407_v39 = vld [vmem:[%s16863_s2 + $0x704] sm:$0xf] }
 0x372   : > { %7621 = vmatpush.bf16.msrb.mxu0 %v10208_v41  ;;  %7611 = vmatpush.bf16.msrb.mxu3 %v10112_v27  ;;  %v15896_v41 = vpop.f32.mrf.mxu0  ;;  %v10176_v27 = vor.u32 %v11443_v49, %v10173_v50  ;;  %v10400_v19 = vor.u32 %v11499_v42, %v10397_v45  ;;  %v10384_v49 = vor.u32 %v11495_v61, %v10381_v0  ;;  %v11461_v50 = vld [vmem:[%s16863_s2 + $0x8b4] sm:$0xf]  ;;  %v10245_v45 = vld [vmem:[%s16863_s2 + $0x8b8] sm:$0xf0]  ;;  %v11483_v17 = vld [vmem:[%s16863_s2 + $0x964] sm:$0xf] }
 0x373   : > { %v11481_v0 = vld [vmem:[%s16863_s2 + $0x954] sm:$0xf] }
 0x374   : > { %7584 = vmatpush.bf16.msrb.mxu1 %v9976_v20  ;;  %v11465_v20 = vld [vmem:[%s16863_s2 + $0x8d4] sm:$0xf]  ;;  %v15961_v40 = vpop.f32.mrf.mxu3 }
 0x375   : > { %7594 = vmatpush.bf16.msra.mxu2 %v10072_v55  ;;  %v10261_v55 = vld [vmem:[%s16863_s2 + $0x8d8] sm:$0xf0] }
 0x376   : > { %7622 = vmatpush.bf16.msrb.mxu0 %v10200_v31  ;;  %7612 = vmatpush.bf16.msrb.mxu3 %v10104_v13  ;;  %v11411_v31 = vld [vmem:[%s16863_s2 + $0x724] sm:$0xf]  ;;  %v10168_v13 = vor.u32 %v11441_v9, %v10165_v34  ;;  %v10264_v46 = vor.u32 %v11465_v20, %v10261_v55  ;;  %v10344_v9 = vor.u32 %v11485_v57, %v10341_v4 }
 0x377   : > { %v10048_v26 = vor.u32 %v11411_v31, %v10045_v3  ;;  %v16006_v31 = vpop.f32.mrf.mxu2  ;;  %v10032_v3 = vor.u32 %v11407_v39, %v10029_v60  ;;  %v10248_v34 = vor.u32 %v11461_v50, %v10245_v45  ;;  %v11459_v55 = vld [vmem:[%s16863_s2 + $0x8a4] sm:$0xf]  ;;  %v10357_v39 = vld [vmem:[%s16863_s2 + $0x998] sm:$0xf0]  ;;  %v10221_v45 = vld [vmem:[%s16863_s2 + $0x888] sm:$0xf0] }
 0x378   : > { %7585 = vmatpush.bf16.msrb.mxu1 %v9968_v30  ;;  %v11455_v50 = vld [vmem:[%s16863_s2 + $0x884] sm:$0xf] }
 0x379   : > { %7595 = vmatpush.bf16.msra.mxu2 %v10064_v23  ;;  %v11517_v23 = vld [vmem:[%s16863_s2 + $0xa74] sm:$0xf] }
 0x37a   : > { %7623 = vmatpush.bf16.msrb.mxu0 %v10192_v10  ;;  %7613 = vmatpush.bf16.msrb.mxu3 %v10096_v53  ;;  %v10037_v10 = vld [vmem:[%s16863_s2 + $0x718] sm:$0xf0]  ;;  %v15972_v22 = vpop.f32.mrf.mxu0 }
 0x37b   : > { %7586 = vmatmul.bf16.vlgmr.msrb.gmra.mxu1 %v13996_v25  ;;  %v11409_v25 = vld [vmem:[%s16863_s2 + $0x714] sm:$0xf]  ;;  %v10469_v53 = vld [vmem:[%s16863_s2 + $0xa78] sm:$0xf0] }
 0x37c   : > { %7634 = vmatpush.bf16.msra.mxu1 %v10280_v14  ;;  %v10040_v30 = vor.u32 %v11409_v25, %v10037_v10  ;;  %v15986_v14 = vpop.f32.mrf.mxu1  ;;  %v10472_v42 = vor.u32 %v11517_v23, %v10469_v53  ;;  %v11491_v25 = vld [vmem:[%s16863_s2 + $0x9a4] sm:$0xf]  ;;  %v10365_v10 = vld [vmem:[%s16863_s2 + $0x9a8] sm:$0xf0]  ;;  %v10229_v53 = vld [vmem:[%s16863_s2 + $0x898] sm:$0xf0] }
 0x37d   : > { %7614 = vmatmul.bf16.vlgmr.msrb.gmra.mxu3 %v14055_v47  ;;  %7596 = vmatpush.bf16.msra.mxu2 %v10056_v28  ;;  %v11439_v47 = vld [vmem:[%s16863_s2 + $0x804] sm:$0xf]  ;;  %v11493_v28 = vld [vmem:[%s16863_s2 + $0x9b4] sm:$0xf]  ;;  %v10368_v61 = vor.u32 %v11491_v25, %v10365_v10  ;;  %v10224_v25 = vor.u32 %v11455_v50, %v10221_v45  ;;  %v10301_v45 = vld [vmem:[%s16863_s2 + $0x928] sm:$0xf0] }
 0x37e   : > { %7624 = vmatpush.bf16.msrb.mxu0 %v10184_v29  ;;  %7662 = vmatpush.bf16.msra.mxu3 %v10408_v58  ;;  %v10160_v29 = vor.u32 %v11439_v47, %v10157_v33  ;;  %v10256_v58 = vor.u32 %v11463_v59, %v10253_v52  ;;  %v16039_v47 = vpop.f32.mrf.mxu3  ;;  %v10336_v33 = vor.u32 %v11483_v17, %v10333_v11  ;;  %v10533_v17 = vld [vmem:[%s16863_s2 + $0xaf8] sm:$0xf0] }
 0x37f   : > { %v16073_v57 = vpop.f32.mrf.mxu2 }
 0x380   : > { %7635 = vmatpush.bf16.msra.mxu1 %v10272_v24  ;;  %v11515_v24 = vld [vmem:[%s16863_s2 + $0xa64] sm:$0xf] }
 0x381   : > { %7597 = vmatpush.bf16.msra.mxu2 %v10048_v26 }
 0x382   : > { %7625 = vmatpush.bf16.msrb.mxu0 %v10176_v27  ;;  %7663 = vmatpush.bf16.msra.mxu3 %v10400_v19  ;;  %v10373_v27 = vld [vmem:[%s16863_s2 + $0x9b8] sm:$0xf0]  ;;  %v10461_v19 = vld [vmem:[%s16863_s2 + $0xa68] sm:$0xf0]  ;;  %v16041_v59 = vpop.f32.mrf.mxu0 }
 0x383   : > { %v10376_v20 = vor.u32 %v11493_v28, %v10373_v27  ;;  %v10464_v26 = vor.u32 %v11515_v24, %v10461_v19  ;;  %v11479_v28 = vld [vmem:[%s16863_s2 + $0x944] sm:$0xf]  ;;  %v10317_v27 = vld [vmem:[%s16863_s2 + $0x948] sm:$0xf0] }
 0x384   : > { %7636 = vmatpush.bf16.msra.mxu1 %v10264_v46  ;;  %v11513_v46 = vld [vmem:[%s16863_s2 + $0xa54] sm:$0xf]  ;;  %v16062_v60 = vpop.f32.mrf.mxu1  ;;  %v11487_v24 = vld [vmem:[%s16863_s2 + $0x984] sm:$0xf]  ;;  %v10349_v19 = vld [vmem:[%s16863_s2 + $0x988] sm:$0xf0]  ;;  %v10320_v11 = vor.u32 %v11479_v28, %v10317_v27 }
 0x385   : > { %7598 = vmatpush.bf16.msra.mxu2 %v10040_v30  ;;  %v10325_v30 = vld [vmem:[%s16863_s2 + $0x958] sm:$0xf0]  ;;  %v10352_v10 = vor.u32 %v11487_v24, %v10349_v19  ;;  %v6974_v19 = vadd.f32 %v15916_v44, %v15896_v41  ;;  %v11473_v41 = vld [vmem:[%s16863_s2 + $0x914] sm:$0xf] }
 0x386   : > { %7626 = vmatpush.bf16.msrb.mxu0 %v10168_v13  ;;  %7664 = vmatpush.bf16.msra.mxu3 %v10392_v43  ;;  %v10237_v13 = vld [vmem:[%s16863_s2 + $0x8a8] sm:$0xf0]  ;;  %v10453_v43 = vld [vmem:[%s16863_s2 + $0xa58] sm:$0xf0] }
 0x387   : > { %v10240_v52 = vor.u32 %v11459_v55, %v10237_v13  ;;  %v10456_v23 = vor.u32 %v11513_v46, %v10453_v43  ;;  %v11533_v55 = vld [vmem:[%s16863_s2 + $0xaf4] sm:$0xf]  ;;  %v16113_v46 = vpop.f32.mrf.mxu3  ;;  %v10421_v27 = vld [vmem:[%s16863_s2 + $0xa18] sm:$0xf0] }
 0x388   : > { %7637 = vmatpush.bf16.msra.mxu1 %v10256_v58  ;;  %v11511_v58 = vld [vmem:[%s16863_s2 + $0xa44] sm:$0xf]  ;;  %v10517_v24 = vld [vmem:[%s16863_s2 + $0xad8] sm:$0xf0] }
 0x389   : > { %7599 = vmatpush.bf16.msra.mxu2 %v10032_v3 }
 0x38a   : > { %7627 = vmatpush.bf16.msrb.mxu0 %v10160_v29  ;;  %7665 = vmatpush.bf16.msra.mxu3 %v10384_v49  ;;  %v11489_v29 = vld [vmem:[%s16863_s2 + $0x994] sm:$0xf]  ;;  %v10328_v49 = vor.u32 %v11481_v0, %v10325_v30  ;;  %v16111_v13 = vpop.f32.mrf.mxu0  ;;  %v10429_v30 = vld [vmem:[%s16863_s2 + $0xa28] sm:$0xf0] }
 0x38c   : > { %7638 = vmatpush.bf16.msra.mxu1 %v10248_v34  ;;  %7600 = vmatmul.bf16.vlgmr.msra.gmra.mxu2 %v14185_v1  ;;  %v10445_v1 = vld [vmem:[%s16863_s2 + $0xa48] sm:$0xf0]  ;;  %v6972_v34 = vadd.f32 %v15838_v54, %v15821_v18  ;;  %v10661_v18 = vld [vmem:[%s16863_s2 + $0xbf8] sm:$0xf0] }
 0x38d   : > { %7628 = vmatmul.bf16.vlgmr.msrb.gmra.mxu0 %v14007_v8  ;;  %7648 = vmatpush.bf16.msrb.mxu2 %v10344_v9  ;;  %v11457_v8 = vld [vmem:[%s16863_s2 + $0x894] sm:$0xf]  ;;  %v10448_v3 = vor.u32 %v11511_v58, %v10445_v1  ;;  %v16142_v1 = vpop.f32.mrf.mxu2 }
 0x38e   : > { %7676 = vmatpush.bf16.msra.mxu0 %v10472_v42  ;;  %7666 = vmatpush.bf16.msra.mxu3 %v10376_v20  ;;  %v10232_v4 = vor.u32 %v11457_v8, %v10229_v53  ;;  %v10360_v42 = vor.u32 %v11489_v29, %v10357_v39  ;;  %v11509_v9 = vld [vmem:[%s16863_s2 + $0xa34] sm:$0xf]  ;;  %v10437_v20 = vld [vmem:[%s16863_s2 + $0xa38] sm:$0xf0]  ;;  %v6986_v54 = vadd.f32 %v15850_v21, %v6972_v34  ;;  %v11507_v21 = vld [vmem:[%s16863_s2 + $0xa24] sm:$0xf]  ;;  %v16124_v8 = vpop.f32.mrf.mxu1 }
 0x38f   : > { %v10440_v43 = vor.u32 %v11509_v9, %v10437_v20  ;;  %v10525_v53 = vld [vmem:[%s16863_s2 + $0xae8] sm:$0xf0]  ;;  %v11563_v29 = vld [vmem:[%s16863_s2 + $0xbe4] sm:$0xf]  ;;  %v10432_v50 = vor.u32 %v11507_v21, %v10429_v30  ;;  %v11561_v9 = vld [vmem:[%s16863_s2 + $0xbd4] sm:$0xf]  ;;  %v16177_v44 = vpop.f32.mrf.mxu3 }
 0x390   : > { %7639 = vmatpush.bf16.msra.mxu1 %v10240_v52  ;;  %v11477_v52 = vld [vmem:[%s16863_s2 + $0x934] sm:$0xf]  ;;  %v10653_v39 = vld [vmem:[%s16863_s2 + $0xbe8] sm:$0xf0]  ;;  %v7000_v58 = vadd.f32 %v15888_v37, %v6986_v54  ;;  %v10645_v34 = vld [vmem:[%s16863_s2 + $0xbd8] sm:$0xf0] }
 0x391   : > { %7649 = vmatpush.bf16.msrb.mxu2 %v10336_v33  ;;  %v10536_v33 = vor.u32 %v11533_v55, %v10533_v17  ;;  %v11505_v37 = vld [vmem:[%s16863_s2 + $0xa14] sm:$0xf]  ;;  %v10656_v28 = vor.u32 %v11563_v29, %v10653_v39  ;;  %v11527_v54 = vld [vmem:[%s16863_s2 + $0xac4] sm:$0xf]  ;;  %v10285_v39 = vld [vmem:[%s16863_s2 + $0x908] sm:$0xf0] }
 0x392   : > { %7677 = vmatpush.bf16.msra.mxu0 %v10464_v26  ;;  %7667 = vmatpush.bf16.msra.mxu3 %v10368_v61  ;;  %v11565_v26 = vld [vmem:[%s16863_s2 + $0xbf4] sm:$0xf]  ;;  %v10309_v61 = vld [vmem:[%s16863_s2 + $0x938] sm:$0xf0]  ;;  %v7014_v20 = vadd.f32 %v15972_v22, %v7000_v58  ;;  %v11503_v22 = vld [vmem:[%s16863_s2 + $0xa04] sm:$0xf] }
 0x393   : > { %v10664_v0 = vor.u32 %v11565_v26, %v10661_v18  ;;  %v10413_v26 = vld [vmem:[%s16863_s2 + $0xa08] sm:$0xf0]  ;;  %v16188_v18 = vpop.f32.mrf.mxu0  ;;  %v11471_v30 = vld [vmem:[%s16863_s2 + $0x904] sm:$0xf]  ;;  %v10501_v58 = vld [vmem:[%s16863_s2 + $0xab8] sm:$0xf0] }
 0x394   : > { %7640 = vmatpush.bf16.msra.mxu1 %v10232_v4 }
 0x395   : > { %7650 = vmatpush.bf16.msrb.mxu2 %v10328_v49  ;;  %v10312_v49 = vor.u32 %v11477_v52, %v10309_v61  ;;  %v10725_v52 = vld [vmem:[%s16863_s2 + $0xc78] sm:$0xf0]  ;;  %v7028_v61 = vadd.f32 %v15986_v14, %v7014_v20  ;;  %v11525_v14 = vld [vmem:[%s16863_s2 + $0xab4] sm:$0xf]  ;;  %v10493_v20 = vld [vmem:[%s16863_s2 + $0xaa8] sm:$0xf0] }
 0x396   : > { %7678 = vmatpush.bf16.msra.mxu0 %v10456_v23  ;;  %7668 = vmatpush.bf16.msra.mxu3 %v10360_v42  ;;  %v11531_v23 = vld [vmem:[%s16863_s2 + $0xae4] sm:$0xf]  ;;  %v16209_v21 = vpop.f32.mrf.mxu1 }
 0x397   : > { %v10528_v4 = vor.u32 %v11531_v23, %v10525_v53  ;;  %v11475_v42 = vld [vmem:[%s16863_s2 + $0x924] sm:$0xf]  ;;  %v10416_v53 = vor.u32 %v11503_v22, %v10413_v26  ;;  %v16264_v22 = vpop.f32.mrf.mxu3  ;;  %v11577_v26 = vld [vmem:[%s16863_s2 + $0xc54] sm:$0xf] }
 0x398   : > { %7641 = vmatpush.bf16.msra.mxu1 %v10224_v25  ;;  %v10304_v55 = vor.u32 %v11475_v42, %v10301_v45  ;;  %v10509_v25 = vld [vmem:[%s16863_s2 + $0xac8] sm:$0xf0]  ;;  %v11549_v42 = vld [vmem:[%s16863_s2 + $0xb74] sm:$0xf]  ;;  %v10597_v45 = vld [vmem:[%s16863_s2 + $0xb78] sm:$0xf0] }
 0x399   : > { %7651 = vmatpush.bf16.msrb.mxu2 %v10320_v11  ;;  %v10293_v11 = vld [vmem:[%s16863_s2 + $0x918] sm:$0xf0]  ;;  %v10512_v29 = vor.u32 %v11527_v54, %v10509_v25 }
 0x39a   : > { %7679 = vmatpush.bf16.msra.mxu0 %v10448_v3  ;;  %7669 = vmatpush.bf16.msra.mxu3 %v10352_v10  ;;  %v11529_v3 = vld [vmem:[%s16863_s2 + $0xad4] sm:$0xf]  ;;  %v11559_v10 = vld [vmem:[%s16863_s2 + $0xbc4] sm:$0xf] }
 0x39b   : > { %7642 = vmatmul.bf16.vlgmr.msra.gmra.mxu1 %v14142_v36  ;;  %v6988_v36 = vadd.f32 %v15924_v63, %v6974_v19  ;;  %v10520_v17 = vor.u32 %v11529_v3, %v10517_v24  ;;  %v10648_v63 = vor.u32 %v11561_v9, %v10645_v34  ;;  %v10288_v3 = vor.u32 %v11471_v30, %v10285_v39  ;;  %v11523_v34 = vld [vmem:[%s16863_s2 + $0xaa4] sm:$0xf]  ;;  %v11545_v30 = vld [vmem:[%s16863_s2 + $0xb54] sm:$0xf] }
 0x39c   : > { %7690 = vmatpush.bf16.msrb.mxu1 %v10536_v33  ;;  %v11581_v33 = vld [vmem:[%s16863_s2 + $0xc74] sm:$0xf]  ;;  %v10504_v19 = vor.u32 %v11525_v14, %v10501_v58  ;;  %v10600_v9 = vor.u32 %v11549_v42, %v10597_v45  ;;  %v11575_v39 = vld [vmem:[%s16863_s2 + $0xc44] sm:$0xf]  ;;  %v10701_v14 = vld [vmem:[%s16863_s2 + $0xc48] sm:$0xf0] }
 0x39d   : > { %7670 = vmatmul.bf16.vlgmr.msra.gmra.mxu3 %v14196_v6  ;;  %7652 = vmatpush.bf16.msrb.mxu2 %v10312_v49  ;;  %v10424_v6 = vor.u32 %v11505_v37, %v10421_v27  ;;  %v7002_v23 = vadd.f32 %v15961_v40, %v6988_v36  ;;  %v7042_v49 = vadd.f32 %v16006_v31, %v7028_v61  ;;  %v11557_v37 = vld [vmem:[%s16863_s2 + $0xbb4] sm:$0xf]  ;;  %v10629_v31 = vld [vmem:[%s16863_s2 + $0xbb8] sm:$0xf0]  ;;  %v10717_v27 = vld [vmem:[%s16863_s2 + $0xc68] sm:$0xf0] }
 0x39e   : > { %7680 = vmatpush.bf16.msra.mxu0 %v10440_v43  ;;  %7718 = vmatpush.bf16.msrb.mxu3 %v10664_v0  ;;  %v10637_v43 = vld [vmem:[%s16863_s2 + $0xbc8] sm:$0xf0]  ;;  %v10296_v0 = vor.u32 %v11473_v41, %v10293_v11  ;;  %v16253_v41 = vpop.f32.mrf.mxu0  ;;  %v10632_v36 = vor.u32 %v11557_v37, %v10629_v31  ;;  %v11555_v11 = vld [vmem:[%s16863_s2 + $0xba4] sm:$0xf]  ;;  %v16275_v54 = vpop.f32.mrf.mxu1  ;;  %v10704_v45 = vor.u32 %v11575_v39, %v10701_v14  ;;  %v11569_v14 = vld [vmem:[%s16863_s2 + $0xc14] sm:$0xf] }
 0x39f   : > { %v10640_v40 = vor.u32 %v11559_v10, %v10637_v43  ;;  %v7016_v24 = vadd.f32 %v16041_v59, %v7002_v23  ;;  %v10496_v10 = vor.u32 %v11523_v34, %v10493_v20  ;;  %v10581_v23 = vld [vmem:[%s16863_s2 + $0xb58] sm:$0xf0]  ;;  %v10573_v37 = vld [vmem:[%s16863_s2 + $0xb48] sm:$0xf0]  ;;  %v11551_v31 = vld [vmem:[%s16863_s2 + $0xb84] sm:$0xf] }
 0x3a0   : > { %7691 = vmatpush.bf16.msrb.mxu1 %v10528_v4  ;;  %v10728_v4 = vor.u32 %v11581_v33, %v10725_v52  ;;  %v11521_v33 = vld [vmem:[%s16863_s2 + $0xa94] sm:$0xf]  ;;  %v10485_v52 = vld [vmem:[%s16863_s2 + $0xa98] sm:$0xf0] }
 0x3a1   : > { %7653 = vmatpush.bf16.msrb.mxu2 %v10304_v55  ;;  %v7056_v55 = vadd.f32 %v16039_v47, %v7042_v49  ;;  %v10621_v47 = vld [vmem:[%s16863_s2 + $0xba8] sm:$0xf0]  ;;  %v7030_v25 = vadd.f32 %v16062_v60, %v7016_v24  ;;  %v10488_v58 = vor.u32 %v11521_v33, %v10485_v52  ;;  %v10584_v49 = vor.u32 %v11545_v30, %v10581_v23  ;;  %v10693_v24 = vld [vmem:[%s16863_s2 + $0xc38] sm:$0xf0]  ;;  %v11629_v20 = vld [vmem:[%s16863_s2 + $0xdf4] sm:$0xf] }
 0x3a2   : > { %7681 = vmatpush.bf16.msra.mxu0 %v10432_v50  ;;  %7719 = vmatpush.bf16.msrb.mxu3 %v10656_v28  ;;  %v16225_v50 = vpop.f32.mrf.mxu2  ;;  %v11579_v28 = vld [vmem:[%s16863_s2 + $0xc64] sm:$0xf] }
 0x3a3   : > { %v10720_v59 = vor.u32 %v11579_v28, %v10717_v27  ;;  %v7070_v61 = vadd.f32 %v16111_v13, %v7056_v55  ;;  %v7044_v13 = vadd.f32 %v16073_v57, %v7030_v25  ;;  %v10477_v57 = vld [vmem:[%s16863_s2 + $0xa88] sm:$0xf0]  ;;  %v10917_v55 = vld [vmem:[%s16863_s2 + $0xdf8] sm:$0xf0]  ;;  %v11595_v33 = vld [vmem:[%s16863_s2 + $0xce4] sm:$0xf] }
 0x3a4   : > { %7692 = vmatpush.bf16.msrb.mxu1 %v10520_v17  ;;  %v10589_v17 = vld [vmem:[%s16863_s2 + $0xb68] sm:$0xf0]  ;;  %v10920_v25 = vor.u32 %v11629_v20, %v10917_v55  ;;  %v11539_v23 = vld [vmem:[%s16863_s2 + $0xb24] sm:$0xf] }
 0x3a5   : > { %7654 = vmatpush.bf16.msrb.mxu2 %v10296_v0  ;;  %v10605_v28 = vld [vmem:[%s16863_s2 + $0xb88] sm:$0xf0]  ;;  %v7058_v27 = vadd.f32 %v16113_v46, %v7044_v13  ;;  %v10789_v46 = vld [vmem:[%s16863_s2 + $0xcf8] sm:$0xf0]  ;;  %v11623_v20 = vld [vmem:[%s16863_s2 + $0xdc4] sm:$0xf] }
 0x3a6   : > { %7682 = vmatpush.bf16.msra.mxu0 %v10424_v6  ;;  %7720 = vmatpush.bf16.msrb.mxu3 %v10648_v63  ;;  %v11547_v6 = vld [vmem:[%s16863_s2 + $0xb64] sm:$0xf]  ;;  %v10709_v63 = vld [vmem:[%s16863_s2 + $0xc58] sm:$0xf0]  ;;  %v10893_v55 = vld [vmem:[%s16863_s2 + $0xdc8] sm:$0xf0] }
 0x3a7   : > { %v10592_v43 = vor.u32 %v11547_v6, %v10589_v17  ;;  %v10712_v60 = vor.u32 %v11577_v26, %v10709_v63  ;;  %v16351_v6 = vpop.f32.mrf.mxu1  ;;  %v7072_v26 = vadd.f32 %v16188_v18, %v7058_v27  ;;  %v10781_v18 = vld [vmem:[%s16863_s2 + $0xce8] sm:$0xf0] }
 0x3a8   : > { %7693 = vmatpush.bf16.msrb.mxu1 %v10512_v29  ;;  %v10613_v29 = vld [vmem:[%s16863_s2 + $0xb98] sm:$0xf0] }
 0x3a9   : > { %7655 = vmatpush.bf16.msrb.mxu2 %v10288_v3  ;;  %v16328_v3 = vpop.f32.mrf.mxu3  ;;  %v7086_v13 = vadd.f32 %v16209_v21, %v7072_v26  ;;  %v10773_v21 = vld [vmem:[%s16863_s2 + $0xcd8] sm:$0xf0] }
 0x3aa   : > { %7683 = vmatpush.bf16.msra.mxu0 %v10416_v53  ;;  %7721 = vmatpush.bf16.msrb.mxu3 %v10640_v40  ;;  %v16286_v0 = vpop.f32.mrf.mxu2  ;;  %v11553_v53 = vld [vmem:[%s16863_s2 + $0xb94] sm:$0xf]  ;;  %v11543_v40 = vld [vmem:[%s16863_s2 + $0xb44] sm:$0xf] }
 0x3ab   : > { %v10616_v42 = vor.u32 %v11553_v53, %v10613_v29  ;;  %v10557_v53 = vld [vmem:[%s16863_s2 + $0xb28] sm:$0xf0]  ;;  %v10784_v29 = vor.u32 %v11595_v33, %v10781_v18  ;;  %v10757_v33 = vld [vmem:[%s16863_s2 + $0xcb8] sm:$0xf0] }
 0x3ac   : > { %7694 = vmatpush.bf16.msrb.mxu1 %v10504_v19  ;;  %7656 = vmatmul.bf16.vlgmr.msrb.gmra.mxu2 %v14328_v15  ;;  %v11519_v15 = vld [vmem:[%s16863_s2 + $0xa84] sm:$0xf]  ;;  %v11597_v19 = vld [vmem:[%s16863_s2 + $0xcf4] sm:$0xf]  ;;  %v10885_v18 = vld [vmem:[%s16863_s2 + $0xdb8] sm:$0xf0] }
 0x3ad   : > { %7684 = vmatmul.bf16.vlgmr.msra.gmra.mxu0 %v14150_v56  ;;  %7704 = vmatpush.bf16.msra.mxu2 %v10600_v9  ;;  %v10624_v56 = vor.u32 %v11555_v11, %v10621_v47  ;;  %v16339_v9 = vpop.f32.mrf.mxu0  ;;  %v11541_v11 = vld [vmem:[%s16863_s2 + $0xb34] sm:$0xf]  ;;  %v10565_v47 = vld [vmem:[%s16863_s2 + $0xb38] sm:$0xf0]  ;;  %v10792_v63 = vor.u32 %v11597_v19, %v10789_v46  ;;  %v10765_v46 = vld [vmem:[%s16863_s2 + $0xcc8] sm:$0xf0] }
 0x3ae   : > { %7732 = vmatpush.bf16.msrb.mxu0 %v10728_v4  ;;  %7722 = vmatpush.bf16.msrb.mxu3 %v10632_v36  ;;  %v7084_v4 = vadd.f32 %v16124_v8, %v7070_v61  ;;  %v11573_v8 = vld [vmem:[%s16863_s2 + $0xc34] sm:$0xf]  ;;  %v10480_v36 = vor.u32 %v11519_v15, %v10477_v57  ;;  %v10568_v30 = vor.u32 %v11541_v11, %v10565_v47  ;;  %v11535_v47 = vld [vmem:[%s16863_s2 + $0xb04] sm:$0xf] }
 0x3af   : > { %v10696_v17 = vor.u32 %v11573_v8, %v10693_v24  ;;  %v10669_v8 = vld [vmem:[%s16863_s2 + $0xc08] sm:$0xf0]  ;;  %v11591_v24 = vld [vmem:[%s16863_s2 + $0xcc4] sm:$0xf] }
 0x3b0   : > { %7695 = vmatpush.bf16.msrb.mxu1 %v10496_v10  ;;  %v7098_v34 = vadd.f32 %v16142_v1, %v7084_v4  ;;  %v10608_v1 = vor.u32 %v11551_v31, %v10605_v28  ;;  %v11571_v10 = vld [vmem:[%s16863_s2 + $0xc24] sm:$0xf]  ;;  %v10901_v4 = vld [vmem:[%s16863_s2 + $0xdd8] sm:$0xf0]  ;;  %v11537_v31 = vld [vmem:[%s16863_s2 + $0xb14] sm:$0xf]  ;;  %v10768_v26 = vor.u32 %v11591_v24, %v10765_v46 }
 0x3b1   : > { %7705 = vmatpush.bf16.msra.mxu2 %v10592_v43  ;;  %v10685_v43 = vld [vmem:[%s16863_s2 + $0xc28] sm:$0xf0]  ;;  %v10549_v28 = vld [vmem:[%s16863_s2 + $0xb18] sm:$0xf0] }
 0x3b2   : > { %7733 = vmatpush.bf16.msrb.mxu0 %v10720_v59  ;;  %7723 = vmatpush.bf16.msrb.mxu3 %v10624_v56  ;;  %v10576_v59 = vor.u32 %v11543_v40, %v10573_v37  ;;  %v7112_v52 = vadd.f32 %v16177_v44, %v7098_v34  ;;  %v16370_v61 = vpop.f32.mrf.mxu2  ;;  %v11627_v56 = vld [vmem:[%s16863_s2 + $0xde4] sm:$0xf]  ;;  %v10688_v44 = vor.u32 %v11571_v10, %v10685_v43  ;;  %v11625_v40 = vld [vmem:[%s16863_s2 + $0xdd4] sm:$0xf]  ;;  %v10853_v10 = vld [vmem:[%s16863_s2 + $0xd78] sm:$0xf0] }
 0x3b3   : > { %v10904_v27 = vor.u32 %v11625_v40, %v10901_v4  ;;  %v11619_v40 = vld [vmem:[%s16863_s2 + $0xda4] sm:$0xf]  ;;  %v10877_v4 = vld [vmem:[%s16863_s2 + $0xda8] sm:$0xf0]  ;;  %v10741_v24 = vld [vmem:[%s16863_s2 + $0xc98] sm:$0xf0] }
 0x3b4   : > { %7696 = vmatpush.bf16.msrb.mxu1 %v10488_v58  ;;  %v10677_v58 = vld [vmem:[%s16863_s2 + $0xc18] sm:$0xf0]  ;;  %v7126_v15 = vadd.f32 %v16253_v41, %v7112_v52  ;;  %v16414_v41 = vpop.f32.mrf.mxu1  ;;  %v11621_v52 = vld [vmem:[%s16863_s2 + $0xdb4] sm:$0xf] }
 0x3b5   : > { %7706 = vmatpush.bf16.msra.mxu2 %v10584_v49  ;;  %v11593_v49 = vld [vmem:[%s16863_s2 + $0xcd4] sm:$0xf]  ;;  %v16398_v57 = vpop.f32.mrf.mxu0  ;;  %v10680_v37 = vor.u32 %v11569_v14, %v10677_v58  ;;  %v11587_v14 = vld [vmem:[%s16863_s2 + $0xca4] sm:$0xf]  ;;  %v10869_v46 = vld [vmem:[%s16863_s2 + $0xd98] sm:$0xf0] }
 0x3b6   : > { %7734 = vmatpush.bf16.msrb.mxu0 %v10712_v60  ;;  %7724 = vmatpush.bf16.msrb.mxu3 %v10616_v42  ;;  %v10909_v60 = vld [vmem:[%s16863_s2 + $0xde8] sm:$0xf0]  ;;  %v7100_v42 = vadd.f32 %v16225_v50, %v7086_v13  ;;  %v10776_v50 = vor.u32 %v11593_v49, %v10773_v21  ;;  %v7140_v19 = vadd.f32 %v16275_v54, %v7126_v15  ;;  %v11645_v54 = vld [vmem:[%s16863_s2 + $0xe74] sm:$0xf]  ;;  %v11611_v58 = vld [vmem:[%s16863_s2 + $0xd64] sm:$0xf] }
 0x3b7   : > { %v10912_v39 = vor.u32 %v11627_v56, %v10909_v60  ;;  %v10845_v49 = vld [vmem:[%s16863_s2 + $0xd68] sm:$0xf0] }
 0x3b8   : > { %7697 = vmatpush.bf16.msrb.mxu1 %v10480_v36  ;;  %v7114_v36 = vadd.f32 %v16264_v22, %v7100_v42  ;;  %v10541_v22 = vld [vmem:[%s16863_s2 + $0xb08] sm:$0xf0] }
 0x3b9   : > { %7707 = vmatpush.bf16.msra.mxu2 %v10576_v59  ;;  %v10552_v59 = vor.u32 %v11537_v31, %v10549_v28  ;;  %v10749_v21 = vld [vmem:[%s16863_s2 + $0xca8] sm:$0xf0] }
 0x3ba   : > { %7735 = vmatpush.bf16.msrb.mxu0 %v10704_v45  ;;  %7725 = vmatpush.bf16.msrb.mxu3 %v10608_v1  ;;  %v16411_v45 = vpop.f32.mrf.mxu3  ;;  %v16432_v34 = vpop.f32.mrf.mxu2  ;;  %v10981_v1 = vld [vmem:[%s16863_s2 + $0xe78] sm:$0xf0]  ;;  %v7128_v56 = vadd.f32 %v16339_v9, %v7114_v36 }
 0x3bb   : > { %7698 = vmatmul.bf16.vlgmr.msrb.gmra.mxu1 %v14289_v51  ;;  %v10560_v51 = vor.u32 %v11539_v23, %v10557_v53  ;;  %v10984_v43 = vor.u32 %v11645_v54, %v10981_v1  ;;  %v10973_v23 = vld [vmem:[%s16863_s2 + $0xe68] sm:$0xf0]  ;;  %v11583_v54 = vld [vmem:[%s16863_s2 + $0xc84] sm:$0xf] }
 0x3bc   : > { %7746 = vmatpush.bf16.msra.mxu1 %v10792_v63  ;;  %v10896_v63 = vor.u32 %v11623_v20, %v10893_v55  ;;  %v16496_v15 = vpop.f32.mrf.mxu1  ;;  %v7142_v42 = vadd.f32 %v16351_v6, %v7128_v56  ;;  %v10752_v6 = vor.u32 %v11587_v14, %v10749_v21  ;;  %v11639_v20 = vld [vmem:[%s16863_s2 + $0xe44] sm:$0xf]  ;;  %v11605_v14 = vld [vmem:[%s16863_s2 + $0xd34] sm:$0xf]  ;;  %v10941_v21 = vld [vmem:[%s16863_s2 + $0xe28] sm:$0xf0] }
 0x3bd   : > { %7726 = vmatmul.bf16.vlgmr.msrb.gmra.mxu3 %v14336_v48  ;;  %7708 = vmatpush.bf16.msra.mxu2 %v10568_v30  ;;  %v11567_v48 = vld [vmem:[%s16863_s2 + $0xc04] sm:$0xf]  ;;  %v10544_v30 = vor.u32 %v11535_v47, %v10541_v22  ;;  %v16484_v53 = vpop.f32.mrf.mxu0  ;;  %v10733_v22 = vld [vmem:[%s16863_s2 + $0xc88] sm:$0xf0] }
 0x3be   : > { %7736 = vmatpush.bf16.msrb.mxu0 %v10696_v17  ;;  %7774 = vmatpush.bf16.msra.mxu3 %v10920_v25  ;;  %v7154_v17 = vadd.f32 %v16286_v0, %v7140_v19  ;;  %v10672_v11 = vor.u32 %v11567_v48, %v10669_v8  ;;  %v11589_v25 = vld [vmem:[%s16863_s2 + $0xcb4] sm:$0xf] }
 0x3bf   : > { %v11613_v0 = vld [vmem:[%s16863_s2 + $0xd74] sm:$0xf]  ;;  %v10760_v9 = vor.u32 %v11589_v25, %v10757_v33  ;;  %v11615_v25 = vld [vmem:[%s16863_s2 + $0xd84] sm:$0xf]  ;;  %v10949_v33 = vld [vmem:[%s16863_s2 + $0xe38] sm:$0xf0] }
 0x3c0   : > { %7747 = vmatpush.bf16.msra.mxu1 %v10784_v29  ;;  %v7168_v13 = vadd.f32 %v16328_v3, %v7154_v17  ;;  %v10856_v29 = vor.u32 %v11613_v0, %v10853_v10  ;;  %v11585_v48 = vld [vmem:[%s16863_s2 + $0xc94] sm:$0xf]  ;;  %v10861_v0 = vld [vmem:[%s16863_s2 + $0xd88] sm:$0xf0] }
 0x3c1   : > { %7709 = vmatpush.bf16.msra.mxu2 %v10560_v51  ;;  %v11641_v51 = vld [vmem:[%s16863_s2 + $0xe54] sm:$0xf] }
 0x3c2   : > { %7737 = vmatpush.bf16.msrb.mxu0 %v10688_v44  ;;  %7775 = vmatpush.bf16.msra.mxu3 %v10912_v39  ;;  %v16476_v60 = vpop.f32.mrf.mxu3  ;;  %v11643_v44 = vld [vmem:[%s16863_s2 + $0xe64] sm:$0xf]  ;;  %v10888_v39 = vor.u32 %v11621_v52, %v10885_v18  ;;  %v7182_v31 = vadd.f32 %v16398_v57, %v7168_v13  ;;  %v16516_v28 = vpop.f32.mrf.mxu2  ;;  %v11609_v8 = vld [vmem:[%s16863_s2 + $0xd54] sm:$0xf]  ;;  %v10837_v57 = vld [vmem:[%s16863_s2 + $0xd58] sm:$0xf0]  ;;  %v10736_v13 = vor.u32 %v11583_v54, %v10733_v22 }
 0x3c3   : > { %v10976_v3 = vor.u32 %v11643_v44, %v10973_v23  ;;  %v11617_v19 = vld [vmem:[%s16863_s2 + $0xd94] sm:$0xf]  ;;  %v11045_v18 = vld [vmem:[%s16863_s2 + $0xef8] sm:$0xf0] }
 0x3c4   : > { %7748 = vmatpush.bf16.msra.mxu1 %v10776_v50  ;;  %v10848_v50 = vor.u32 %v11611_v58, %v10845_v49  ;;  %v7196_v55 = vadd.f32 %v16414_v41, %v7182_v31  ;;  %v10872_v47 = vor.u32 %v11617_v19, %v10869_v46  ;;  %v11607_v41 = vld [vmem:[%s16863_s2 + $0xd44] sm:$0xf]  ;;  %v11637_v10 = vld [vmem:[%s16863_s2 + $0xe34] sm:$0xf]  ;;  %v11173_v44 = vld [vmem:[%s16863_s2 + $0xff8] sm:$0xf0] }
 0x3c5   : > { %7710 = vmatpush.bf16.msra.mxu2 %v10552_v59  ;;  %v7237_v36 = vpop.f32.mrf.mxu0  ;;  %v10840_v59 = vor.u32 %v11609_v8, %v10837_v57  ;;  %v11661_v52 = vld [vmem:[%s16863_s2 + $0xef4] sm:$0xf]  ;;  %v10821_v58 = vld [vmem:[%s16863_s2 + $0xd38] sm:$0xf0]  ;;  %v11635_v49 = vld [vmem:[%s16863_s2 + $0xe24] sm:$0xf] }
 0x3c6   : > { %7738 = vmatpush.bf16.msrb.mxu0 %v10680_v37  ;;  %7776 = vmatpush.bf16.msra.mxu3 %v10904_v27  ;;  %v10965_v37 = vld [vmem:[%s16863_s2 + $0xe58] sm:$0xf0]  ;;  %v7156_v27 = vadd.f32 %v16370_v61, %v7142_v42  ;;  %v11691_v42 = vld [vmem:[%s16863_s2 + $0xfe4] sm:$0xf]  ;;  %v10824_v31 = vor.u32 %v11605_v14, %v10821_v58  ;;  %v11657_v19 = vld [vmem:[%s16863_s2 + $0xed4] sm:$0xf] }
 0x3c7   : > { %v10968_v61 = vor.u32 %v11641_v51, %v10965_v37  ;;  %v11029_v46 = vld [vmem:[%s16863_s2 + $0xed8] sm:$0xf0]  ;;  %v11685_v14 = vld [vmem:[%s16863_s2 + $0xfb4] sm:$0xf] }
 0x3c8   : > { %7749 = vmatpush.bf16.msra.mxu1 %v10768_v26  ;;  %v7170_v1 = vadd.f32 %v16411_v45, %v7156_v27  ;;  %v10829_v26 = vld [vmem:[%s16863_s2 + $0xd48] sm:$0xf0]  ;;  %v10944_v27 = vor.u32 %v11635_v49, %v10941_v21  ;;  %v11032_v54 = vor.u32 %v11657_v19, %v11029_v46  ;;  %v11141_v58 = vld [vmem:[%s16863_s2 + $0xfb8] sm:$0xf0]  ;;  %v756_v21 = vld [vmem:[%s16865_s4 + $0x70] sm:$0xff] }
 0x3c9   : > { %7711 = vmatpush.bf16.msra.mxu2 %v10544_v30  ;;  %v10832_v30 = vor.u32 %v11607_v41, %v10829_v26  ;;  %v10925_v41 = vld [vmem:[%s16863_s2 + $0xe08] sm:$0xf0]  ;;  %v11655_v26 = vld [vmem:[%s16863_s2 + $0xec4] sm:$0xf]  ;;  %v10997_v46 = vld [vmem:[%s16863_s2 + $0xe98] sm:$0xf0] }
 0x3ca   : > { %7739 = vmatpush.bf16.msrb.mxu0 %v10672_v11  ;;  %7777 = vmatpush.bf16.msra.mxu3 %v10896_v63  ;;  %v16549_v17 = vpop.f32.mrf.mxu3  ;;  %v10744_v11 = vor.u32 %v11585_v48, %v10741_v24  ;;  %v16560_v63 = vpop.f32.mrf.mxu1  ;;  %v7184_v23 = vadd.f32 %v16484_v53, %v7170_v1  ;;  %v10813_v48 = vld [vmem:[%s16863_s2 + $0xd28] sm:$0xf0]  ;;  %v10933_v24 = vld [vmem:[%s16863_s2 + $0xe18] sm:$0xf0]  ;;  %v11631_v1 = vld [vmem:[%s16863_s2 + $0xe04] sm:$0xf] }
 0x3cb   : > { %v16581_v56 = vpop.f32.mrf.mxu2 }
 0x3cc   : > { %7750 = vmatpush.bf16.msra.mxu1 %v10760_v9  ;;  %7712 = vmatmul.bf16.vlgmr.msra.gmra.mxu2 %v14470_v7  ;;  %v10957_v7 = vld [vmem:[%s16863_s2 + $0xe48] sm:$0xf0]  ;;  %v10952_v9 = vor.u32 %v11637_v10, %v10949_v33  ;;  %v7198_v51 = vadd.f32 %v16496_v15, %v7184_v23  ;;  %v11633_v15 = vld [vmem:[%s16863_s2 + $0xe14] sm:$0xf] }
 0x3cd   : > { %7740 = vmatmul.bf16.vlgmr.msrb.gmra.mxu0 %v14292_v16  ;;  %7760 = vmatpush.bf16.msrb.mxu2 %v10856_v29  ;;  %v10880_v16 = vor.u32 %v11619_v40, %v10877_v4  ;;  %v10960_v45 = vor.u32 %v11639_v20, %v10957_v7  ;;  %v10864_v29 = vor.u32 %v11615_v25, %v10861_v0  ;;  %v11659_v40 = vld [vmem:[%s16863_s2 + $0xee4] sm:$0xf]  ;;  %v11037_v4 = vld [vmem:[%s16863_s2 + $0xee8] sm:$0xf0]  ;;  %v11157_v7 = vld [vmem:[%s16863_s2 + $0xfd8] sm:$0xf0] }
 0x3ce   : > { %7788 = vmatpush.bf16.msra.mxu0 %v10984_v43  ;;  %7778 = vmatpush.bf16.msra.mxu3 %v10888_v39  ;;  %v7210_v43 = vadd.f32 %v16432_v34, %v7196_v55  ;;  %v11693_v34 = vld [vmem:[%s16863_s2 + $0xff4] sm:$0xf]  ;;  %v11048_v39 = vor.u32 %v11661_v52, %v11045_v18  ;;  %v7212_v57 = vadd.f32 %v16516_v28, %v7198_v51  ;;  %v757_v52 = vld [vmem:[%s16865_s4 + $0x78] sm:$0xff]  ;;  %v11599_v18 = vld [vmem:[%s16863_s2 + $0xd04] sm:$0xf] }
 0x3cf   : > { %v11689_v28 = vld [vmem:[%s16863_s2 + $0xfd4] sm:$0xf]  ;;  %v11651_v51 = vld [vmem:[%s16863_s2 + $0xea4] sm:$0xf] }
 0x3d0   : > { %7751 = vmatpush.bf16.msra.mxu1 %v10752_v6  ;;  %v7224_v53 = vadd.f32 %v16476_v60, %v7210_v43  ;;  %v11165_v60 = vld [vmem:[%s16863_s2 + $0xfe8] sm:$0xf0]  ;;  %v11040_v6 = vor.u32 %v11659_v40, %v11037_v4  ;;  %v11160_v22 = vor.u32 %v11689_v28, %v11157_v7  ;;  %v10928_v43 = vor.u32 %v11631_v1, %v10925_v41  ;;  %v11653_v23 = vld [vmem:[%s16863_s2 + $0xeb4] sm:$0xf]  ;;  %v11093_v7 = vld [vmem:[%s16863_s2 + $0xf58] sm:$0xf0] }
 0x3d1   : > { %7761 = vmatpush.bf16.msrb.mxu2 %v10848_v50  ;;  %v7239_v50 = vpop.f32.mrf.mxu0  ;;  %v11647_v41 = vld [vmem:[%s16863_s2 + $0xe84] sm:$0xf] }
 0x3d2   : > { %7789 = vmatpush.bf16.msra.mxu0 %v10976_v3  ;;  %7779 = vmatpush.bf16.msra.mxu3 %v10880_v16  ;;  %v11176_v3 = vor.u32 %v11693_v34, %v11173_v44  ;;  %v16616_v37 = vpop.f32.mrf.mxu3  ;;  %v11603_v16 = vld [vmem:[%s16863_s2 + $0xd24] sm:$0xf]  ;;  %v7238_v8 = vadd.f32 %v7237_v36, %v7224_v53  ;;  %v7253_v20 = vpop.f32.mrf.mxu1 }
 0x3d3   : > { %v10816_v55 = vor.u32 %v11603_v16, %v10813_v48  ;;  %v7267_v36 = vpop.f32.mrf.mxu2 }
 0x3d4   : > { %7752 = vmatpush.bf16.msra.mxu1 %v10744_v11  ;;  %v7252_v11 = vadd.f32 %v16560_v63, %v7238_v8  ;;  %v11687_v63 = vld [vmem:[%s16863_s2 + $0xfc4] sm:$0xf] }
 0x3d5   : > { %7762 = vmatpush.bf16.msrb.mxu2 %v10840_v59  ;;  %v10936_v59 = vor.u32 %v11633_v15, %v10933_v24  ;;  %v755_v15 = vld [vmem:[%s16865_s4 + $0x68] sm:$0xff]  ;;  %v754_v8 = vld [vmem:[%s16865_s4 + $0x60] sm:$0xff] }
 0x3d6   : > { %7790 = vmatpush.bf16.msra.mxu0 %v10968_v61  ;;  %7780 = vmatpush.bf16.msra.mxu3 %v10872_v47  ;;  %v11168_v61 = vor.u32 %v11691_v42, %v11165_v60  ;;  %v7226_v47 = vadd.f32 %v16549_v17, %v7212_v57  ;;  %v11149_v17 = vld [vmem:[%s16863_s2 + $0xfc8] sm:$0xf0]  ;;  %v7266_v25 = vadd.f32 %v16581_v56, %v7252_v11 }
 0x3d7   : > { %v11152_v44 = vor.u32 %v11687_v63, %v11149_v17  ;;  %v11144_v60 = vor.u32 %v11685_v14, %v11141_v58  ;;  %v11085_v17 = vld [vmem:[%s16863_s2 + $0xf48] sm:$0xf0] }
 0x3d8   : > { %7753 = vmatpush.bf16.msra.mxu1 %v10736_v13  ;;  %v7240_v56 = vadd.f32 %v7239_v50, %v7226_v47  ;;  %v11013_v13 = vld [vmem:[%s16863_s2 + $0xeb8] sm:$0xf0]  ;;  %v7280_v49 = vadd.f32 %v16616_v37, %v7266_v25  ;;  %v11005_v37 = vld [vmem:[%s16863_s2 + $0xea8] sm:$0xf0]  ;;  %v11679_v25 = vld [vmem:[%s16863_s2 + $0xf84] sm:$0xf] }
 0x3d9   : > { %7763 = vmatpush.bf16.msrb.mxu2 %v10832_v30  ;;  %v7293_v10 = vpop.f32.mrf.mxu0  ;;  %v10797_v30 = vld [vmem:[%s16863_s2 + $0xd08] sm:$0xf0]  ;;  %v11016_v40 = vor.u32 %v11653_v23, %v11013_v13  ;;  %v11008_v57 = vor.u32 %v11651_v51, %v11005_v37  ;;  %v11077_v23 = vld [vmem:[%s16863_s2 + $0xf38] sm:$0xf0]  ;;  %v746_v51 = vld [vmem:[%s16865_s4 + $0x20] sm:$0xff] }
 0x3da   : > { %7791 = vmatpush.bf16.msra.mxu0 %v10960_v45  ;;  %7781 = vmatpush.bf16.msra.mxu3 %v10864_v29  ;;  %v11021_v45 = vld [vmem:[%s16863_s2 + $0xec8] sm:$0xf0]  ;;  %v7281_v34 = vpop.f32.mrf.mxu3  ;;  %v11677_v29 = vld [vmem:[%s16863_s2 + $0xf74] sm:$0xf]  ;;  %v10800_v53 = vor.u32 %v11599_v18, %v10797_v30  ;;  %v7254_v4 = vadd.f32 %v7253_v20, %v7240_v56  ;;  %v7294_v16 = vadd.f32 %v7293_v10, %v7280_v49  ;;  %v750_v18 = vld [vmem:[%s16865_s4 + $0x40] sm:$0xff] }
 0x3db   : > { %7754 = vmatmul.bf16.vlgmr.msra.gmra.mxu1 %v14430_v32  ;;  %v11601_v32 = vld [vmem:[%s16863_s2 + $0xd14] sm:$0xf]  ;;  %v11024_v33 = vor.u32 %v11655_v26, %v11021_v45  ;;  %v11101_v50 = vld [vmem:[%s16863_s2 + $0xf68] sm:$0xf0]  ;;  %v11671_v45 = vld [vmem:[%s16863_s2 + $0xf44] sm:$0xf] }
 0x3dc   : > { %7802 = vmatpush.bf16.msrb.mxu1 %v11048_v39  ;;  %v11109_v39 = vld [vmem:[%s16863_s2 + $0xf78] sm:$0xf0]  ;;  %v7268_v48 = vadd.f32 %v7267_v36, %v7254_v4  ;;  %v11673_v20 = vld [vmem:[%s16863_s2 + $0xf54] sm:$0xf]  ;;  %v10989_v26 = vld [vmem:[%s16863_s2 + $0xe88] sm:$0xf0]  ;;  %v11088_v30 = vor.u32 %v11671_v45, %v11085_v17 }
 0x3dd   : > { %7782 = vmatmul.bf16.vlgmr.msra.gmra.mxu3 %v14478_v5  ;;  %7764 = vmatpush.bf16.msrb.mxu2 %v10824_v31  ;;  %v10805_v5 = vld [vmem:[%s16863_s2 + $0xd18] sm:$0xf0]  ;;  %v11112_v42 = vor.u32 %v11677_v29, %v11109_v39  ;;  %v11675_v31 = vld [vmem:[%s16863_s2 + $0xf64] sm:$0xf]  ;;  %v11096_v47 = vor.u32 %v11673_v20, %v11093_v7  ;;  %v748_v49 = vld [vmem:[%s16865_s4 + $0x30] sm:$0xff] }
 0x3de   : > { %7792 = vmatpush.bf16.msra.mxu0 %v10952_v9  ;;  %7830 = vmatpush.bf16.msrb.mxu3 %v11176_v3  ;;  %v10808_v0 = vor.u32 %v11601_v32, %v10805_v5  ;;  %v7307_v9 = vpop.f32.mrf.mxu1  ;;  %v7321_v3 = vpop.f32.mrf.mxu2  ;;  %v11104_v24 = vor.u32 %v11675_v31, %v11101_v50  ;;  %v11125_v36 = vld [vmem:[%s16863_s2 + $0xf98] sm:$0xf0]  ;;  %v747_v4 = vld [vmem:[%s16865_s4 + $0x28] sm:$0xff] }
 0x3df   : > { %v753_v32 = vld [vmem:[%s16865_s4 + $0x58] sm:$0xff] }
 0x3e0   : > { %7803 = vmatpush.bf16.msrb.mxu1 %v11040_v6  ;;  %v11133_v6 = vld [vmem:[%s16863_s2 + $0xfa8] sm:$0xf0]  ;;  %v11061_v31 = vld [vmem:[%s16863_s2 + $0xf18] sm:$0xf0] }
 0x3e1   : > { %7765 = vmatpush.bf16.msrb.mxu2 %v10816_v55  ;;  %v7295_v28 = vpop.f32.mrf.mxu0  ;;  %v11681_v55 = vld [vmem:[%s16863_s2 + $0xf94] sm:$0xf] }
 0x3e2   : > { %7793 = vmatpush.bf16.msra.mxu0 %v10944_v27  ;;  %7831 = vmatpush.bf16.msrb.mxu3 %v11168_v61  ;;  %v11683_v27 = vld [vmem:[%s16863_s2 + $0xfa4] sm:$0xf]  ;;  %v7335_v61 = vpop.f32.mrf.mxu3 }
 0x3e3   : > { %v11136_v19 = vor.u32 %v11683_v27, %v11133_v6  ;;  %v745_v27 = vld [vmem:[%s16865_s4 + $0x18] sm:$0xff] }
 0x3e4   : > { %7804 = vmatpush.bf16.msrb.mxu1 %v11032_v54  ;;  %v7282_v54 = vadd.f32 %v7281_v34, %v7268_v48  ;;  %v744_v48 = vld [vmem:[%s16865_s4 + $0x10] sm:$0xff] }
 0x3e5   : > { %7766 = vmatpush.bf16.msrb.mxu2 %v10808_v0  ;;  %v11117_v0 = vld [vmem:[%s16863_s2 + $0xf88] sm:$0xf0] }
 0x3e6   : > { %7794 = vmatpush.bf16.msra.mxu0 %v10936_v59  ;;  %7832 = vmatpush.bf16.msrb.mxu3 %v11160_v22  ;;  %v7308_v59 = vadd.f32 %v7307_v9, %v7294_v16  ;;  %v7309_v5 = vpop.f32.mrf.mxu1  ;;  %v11128_v22 = vor.u32 %v11681_v55, %v11125_v36  ;;  %v7323_v63 = vpop.f32.mrf.mxu2  ;;  %v7296_v10 = vadd.f32 %v7295_v28, %v7282_v54  ;;  %v749_v9 = vld [vmem:[%s16865_s4 + $0x38] sm:$0xff]  ;;  %v742_v28 = vld [vmem:[%s16865_s4] sm:$0xff] }
 0x3e7   : > { %v11120_v56 = vor.u32 %v11679_v25, %v11117_v0 }
 0x3e8   : > { %7805 = vmatpush.bf16.msrb.mxu1 %v11024_v33  ;;  %v7322_v11 = vadd.f32 %v7321_v3, %v7308_v59  ;;  %v10992_v33 = vor.u32 %v11647_v41, %v10989_v26  ;;  %v7310_v13 = vadd.f32 %v7309_v5, %v7296_v10 }
 0x3e9   : > { %7767 = vmatpush.bf16.msrb.mxu2 %v10800_v53  ;;  %v7349_v34 = vpop.f32.mrf.mxu0 }
 0x3ea   : > { %7795 = vmatpush.bf16.msra.mxu0 %v10928_v43  ;;  %7833 = vmatpush.bf16.msrb.mxu3 %v11152_v44  ;;  %v751_v43 = vld [vmem:[%s16865_s4 + $0x48] sm:$0xff]  ;;  %v11669_v44 = vld [vmem:[%s16863_s2 + $0xf34] sm:$0xf]  ;;  %v7337_v29 = vpop.f32.mrf.mxu3  ;;  %v7324_v58 = vadd.f32 %v7323_v63, %v7310_v13 }
 0x3eb   : > { %v11080_v53 = vor.u32 %v11669_v44, %v11077_v23 }
 0x3ec   : > { %7806 = vmatpush.bf16.msrb.mxu1 %v11016_v40  ;;  %7768 = vmatmul.bf16.vlgmr.msrb.gmra.mxu2 %v14601_v38  ;;  %v752_v38 = vld [vmem:[%s16865_s4 + $0x50] sm:$0xff]  ;;  %v11069_v40 = vld [vmem:[%s16863_s2 + $0xf28] sm:$0xf0] }
 0x3ed   : > { %7796 = vmatmul.bf16.vlgmr.msra.gmra.mxu0 %v14438_v2  ;;  %7816 = vmatpush.bf16.msra.mxu2 %v11112_v42  ;;  %v11649_v2 = vld [vmem:[%s16863_s2 + $0xe94] sm:$0xf] }
 0x3ee   : > { %7854 = vmatpush.msrb.mxu0 %v757_v52  ;;  %7834 = vmatpush.bf16.msrb.mxu3 %v11144_v60  ;;  %v11000_v1 = vor.u32 %v11649_v2, %v10997_v46  ;;  %v7336_v52 = vadd.f32 %v7335_v61, %v7322_v11  ;;  %v7363_v39 = vpop.f32.mrf.mxu1  ;;  %v7377_v3 = vpop.f32.mrf.mxu2  ;;  %v7338_v60 = vadd.f32 %v7337_v29, %v7324_v58  ;;  %v11053_v61 = vld [vmem:[%s16863_s2 + $0xf08] sm:$0xf0]  ;;  %v738_v2 = vld [vmem:[%s16864_s3] sm:$0xff] }
 0x3f0   : > { %7855 = vmatpush.msrb.mxu0 %v756_v21  ;;  %7807 = vmatpush.bf16.msrb.mxu1 %v11008_v57  ;;  %v7350_v14 = vadd.f32 %v7349_v34, %v7336_v52  ;;  %v11667_v21 = vld [vmem:[%s16863_s2 + $0xf24] sm:$0xf] }
 0x3f1   : > { %7817 = vmatpush.bf16.msra.mxu2 %v11104_v24  ;;  %v11072_v37 = vor.u32 %v11667_v21, %v11069_v40  ;;  %v7351_v6 = vpop.f32.mrf.mxu0  ;;  %v11663_v57 = vld [vmem:[%s16863_s2 + $0xf04] sm:$0xf] }
 0x3f2   : > { %7856 = vmatpush.msrb.mxu0 %v755_v15  ;;  %7835 = vmatpush.bf16.msrb.mxu3 %v11136_v19  ;;  %v7364_v42 = vadd.f32 %v7363_v39, %v7350_v14  ;;  %v7391_v50 = vpop.f32.mrf.mxu3  ;;  %v7352_v16 = vadd.f32 %v7351_v6, %v7338_v60  ;;  %v743_v19 = vld [vmem:[%s16865_s4 + $0x8] sm:$0xff]  ;;  %v11056_v7 = vor.u32 %v11663_v57, %v11053_v61 }
 0x3f4   : > { %7857 = vmatpush.msrb.mxu0 %v754_v8  ;;  %7808 = vmatpush.bf16.msrb.mxu1 %v11000_v1 }
 0x3f5   : > { %7818 = vmatpush.bf16.msra.mxu2 %v11096_v47 }
 0x3f6   : > { %7858 = vmatpush.msrb.mxu0 %v753_v32  ;;  %7836 = vmatpush.bf16.msrb.mxu3 %v11128_v22  ;;  %v7365_v8 = vpop.f32.mrf.mxu1  ;;  %v7379_v46 = vpop.f32.mrf.mxu2 }
 0x3f7   : > { %v7366_v20 = vadd.f32 %v7365_v8, %v7352_v16 }
 0x3f8   : > { %7859 = vmatpush.msrb.mxu0 %v752_v38  ;;  %7809 = vmatpush.bf16.msrb.mxu1 %v10992_v33  ;;  %v740_v38 = vld [vmem:[%s16864_s3 + $0x10] sm:$0xff] }
 0x3f9   : > { %7819 = vmatpush.bf16.msra.mxu2 %v11088_v30  ;;  %v7380_v36 = vadd.f32 %v7379_v46, %v7366_v20  ;;  %v7405_v59 = vpop.f32.mrf.mxu0 }
 0x3fa   : > { %7860 = vmatpush.msrb.mxu0 %v751_v43  ;;  %7837 = vmatpush.bf16.msrb.mxu3 %v11120_v56  ;;  %v7393_v54 = vpop.f32.mrf.mxu3 }
 0x3fb   : > { %7810 = vmatmul.bf16.vlgmr.msrb.gmra.mxu1 %v14560_v62  ;;  %v11665_v62 = vld [vmem:[%s16863_s2 + $0xf14] sm:$0xf]  ;;  %v7394_v5 = vadd.f32 %v7393_v54, %v7380_v36 }
 0x3fc   : > { %7861 = vmatpush.msrb.mxu0 %v750_v18  ;;  %v11064_v15 = vor.u32 %v11665_v62, %v11061_v31 }
 0x3fd   : > { %7838 = vmatmul.bf16.vlgmr.msrb.gmra.mxu3 %v14612_v12  ;;  %7820 = vmatpush.bf16.msra.mxu2 %v11080_v53  ;;  %v7378_v12 = vadd.f32 %v7377_v3, %v7364_v42  ;;  %v7846_v1 = vmul.f32 %v7394_v5, %v740_v38 }
 0x3fe   : > { %7862 = vmatpush.msrb.mxu0 %v749_v9  ;;  %v7419_v32 = vpop.f32.mrf.mxu1  ;;  %v7433_v47 = vpop.f32.mrf.mxu2 }
 0x3ff   : > { %v7392_v24 = vadd.f32 %v7391_v50, %v7378_v12  ;;  %v7420_v33 = vadd.f32 %v7419_v32, %v7405_v59 }
 0x400   : > { %7863 = vmatpush.msrb.mxu0 %v748_v49 }
 0x401   : > { %7821 = vmatpush.bf16.msra.mxu2 %v11072_v37  ;;  %v7844_v55 = vmul.f32 %v7392_v24, %v738_v2  ;;  %v7407_v22 = vpop.f32.mrf.mxu0  ;;  %v7434_v30 = vadd.f32 %v7433_v47, %v7420_v33 }
 0x402   : > { %7864 = vmatpush.msrb.mxu0 %v747_v4  ;;  %v7447_v11 = vpop.f32.mrf.mxu3 }
 0x403   : > { %v7448_v34 = vadd.f32 %v7447_v11, %v7434_v30 }
 0x404   : > { %7865 = vmatpush.msrb.mxu0 %v746_v51 }
 0x405   : > { %7822 = vmatpush.bf16.msra.mxu2 %v11064_v15 }
 0x406   : > { %7866 = vmatpush.msrb.mxu0 %v745_v27  ;;  %v7421_v41 = vpop.f32.mrf.mxu1  ;;  %v7435_v63 = vpop.f32.mrf.mxu2 }
 0x407   : > { %v7422_v44 = vadd.f32 %v7421_v41, %v7407_v22 }
 0x408   : > { %7867 = vmatpush.msrb.mxu0 %v744_v48 }
 0x409   : > { %7823 = vmatpush.bf16.msra.mxu2 %v11056_v7  ;;  %v7461_v26 = vpop.f32.mrf.mxu0  ;;  %v7436_v9 = vadd.f32 %v7435_v63, %v7422_v44  ;;  %v759_v44 = vld [vmem:[%s16865_s4 + $0x88] sm:$0xff] }
 0x40a   : > { %7868 = vmatpush.msrb.mxu0 %v743_v19  ;;  %v7449_v45 = vpop.f32.mrf.mxu3  ;;  %v7462_v29 = vadd.f32 %v7461_v26, %v7448_v34 }
 0x40b   : > { %v7450_v49 = vadd.f32 %v7449_v45, %v7436_v9 }
 0x40c   : > { %7869 = vmatpush.msrb.mxu0 %v742_v28  ;;  %7824 = vmatmul.bf16.vlgmr.msra.gmra.mxu2 %v14719_v35 }
 0x40d   : > { %7870 = vmatmul.f32.vlgmr.msrb.gmra.mxu0 %v7844_v55 }
 0x40e   : > { %v7475_v17 = vpop.f32.mrf.mxu1  ;;  %v7489_v0 = vpop.f32.mrf.mxu2 }
 0x40f   : > { %v7476_v58 = vadd.f32 %v7475_v17, %v7462_v29 }
 0x411   : > { %v7463_v10 = vpop.f32.mrf.mxu0  ;;  %v7490_v53 = vadd.f32 %v7489_v0, %v7476_v58  ;;  %v761_v0 = vld [vmem:[%s16865_s4 + $0x98] sm:$0xff] }
 0x412   : > { %v7503_v25 = vpop.f32.mrf.mxu3  ;;  %v7464_v3 = vadd.f32 %v7463_v10, %v7450_v49  ;;  %7889 = vmatpush.msra.mxu1 %v761_v0  ;;  %v760_v10 = vld [vmem:[%s16865_s4 + $0x90] sm:$0xff] }
 0x413   : > { %v7504_v42 = vadd.f32 %v7503_v25, %v7490_v53 }
 0x414   : > { %7890 = vmatpush.msra.mxu1 %v760_v10 }
 0x415   : > { %7873 = vmatmul.f32.gmra.mxu0 %v7846_v1 }
 0x416   : > { %v7477_v43 = vpop.f32.mrf.mxu1  ;;  %v7491_v18 = vpop.f32.mrf.mxu2  ;;  %7891 = vmatpush.msra.mxu1 %v759_v44 }
 0x417   : > { %v7478_v51 = vadd.f32 %v7477_v43, %v7464_v3 }
 0x419   : > { %v7517_v35 = vpop.f32.mrf.mxu0  ;;  %v7492_v62 = vadd.f32 %v7491_v18, %v7478_v51 }
 0x41a   : > { %v7505_v52 = vpop.f32.mrf.mxu3  ;;  %v7518_v37 = vadd.f32 %v7517_v35, %v7504_v42 }
 0x41b   : > { %v7506_v27 = vadd.f32 %v7505_v52, %v7492_v62 }
 0x41e   : > { %v7531_v56 = vpop.f32.mrf.mxu1  ;;  %v7545_v13 = vpop.f32.mrf.mxu2 }
 0x41f   : > { %v7532_v12 = vadd.f32 %v7531_v56, %v7518_v37 }
 0x421   : > { %v7519_v39 = vpop.f32.mrf.mxu0  ;;  %v7546_v16 = vadd.f32 %v7545_v13, %v7532_v12 }
 0x422   : > { %v7559_v23 = vpop.f32.mrf.mxu3  ;;  %v7520_v15 = vadd.f32 %v7519_v39, %v7506_v27 }
 0x423   : > { %v7560_v8 = vadd.f32 %v7559_v23, %v7546_v16 }
 0x426   : > { %v7533_v14 = vpop.f32.mrf.mxu1  ;;  %v7547_v4 = vpop.f32.mrf.mxu2 }
 0x427   : > { %v7534_v57 = vadd.f32 %v7533_v14, %v7520_v15  ;;  %v758_v14 = vld [vmem:[%s16865_s4 + $0x80] sm:$0xff] }
 0x428   : > { %7892 = vmatpush.msra.mxu1 %v758_v14 }
 0x429   : > { %v7573_v21 = vpop.f32.mrf.mxu0  ;;  %v7548_v46 = vadd.f32 %v7547_v4, %v7534_v57 }
 0x42a   : > { %v7561_v40 = vpop.f32.mrf.mxu3  ;;  %v7574_v2 = vadd.f32 %v7573_v21, %v7560_v8 }
 0x42b   : > { %v7562_v7 = vadd.f32 %v7561_v40, %v7548_v46 }
 0x42e   : > { %v7587_v60 = vpop.f32.mrf.mxu1  ;;  %v7601_v50 = vpop.f32.mrf.mxu2 }
 0x42f   : > { %v7588_v28 = vadd.f32 %v7587_v60, %v7574_v2 }
 0x431   : > { %v7575_v6 = vpop.f32.mrf.mxu0  ;;  %v7602_v55 = vadd.f32 %v7601_v50, %v7588_v28 }
 0x432   : > { %v7615_v31 = vpop.f32.mrf.mxu3  ;;  %v7576_v54 = vadd.f32 %v7575_v6, %v7562_v7 }
 0x433   : > { %v7616_v5 = vadd.f32 %v7615_v31, %v7602_v55  ;;  %v739_v55 = vld [vmem:[%s16864_s3 + $0x8] sm:$0xff] }
 0x436   : > { %v7589_v48 = vpop.f32.mrf.mxu1  ;;  %v7603_v19 = vpop.f32.mrf.mxu2 }
 0x437   : > { %v7590_v1 = vadd.f32 %v7589_v48, %v7576_v54 }
 0x439   : > { %v7629_v61 = vpop.f32.mrf.mxu0  ;;  %v7604_v47 = vadd.f32 %v7603_v19, %v7590_v1 }
 0x43a   : > { %v7617_v24 = vpop.f32.mrf.mxu3  ;;  %v7630_v11 = vadd.f32 %v7629_v61, %v7616_v5 }
 0x43b   : > { %v7618_v63 = vadd.f32 %v7617_v24, %v7604_v47  ;;  %v741_v47 = vld [vmem:[%s16864_s3 + $0x18] sm:$0xff] }
 0x43e   : > { %v7643_v20 = vpop.f32.mrf.mxu1  ;;  %v7657_v59 = vpop.f32.mrf.mxu2 }
 0x43f   : > { %v7644_v45 = vadd.f32 %v7643_v20, %v7630_v11 }
 0x441   : > { %v7631_v32 = vpop.f32.mrf.mxu0  ;;  %v7658_v25 = vadd.f32 %v7657_v59, %v7644_v45 }
 0x442   : > { %v7671_v36 = vpop.f32.mrf.mxu3  ;;  %v7632_v43 = vadd.f32 %v7631_v32, %v7618_v63 }
 0x443   : > { %v7672_v33 = vadd.f32 %v7671_v36, %v7658_v25 }
 0x446   : > { %v7645_v38 = vpop.f32.mrf.mxu1  ;;  %v7659_v26 = vpop.f32.mrf.mxu2 }
 0x447   : > { %v7646_v18 = vadd.f32 %v7645_v38, %v7632_v43 }
 0x449   : > { %v7685_v22 = vpop.f32.mrf.mxu0  ;;  %v7660_v34 = vadd.f32 %v7659_v26, %v7646_v18  ;;  %v11971_v26 = vmov 0.0  }
 0x44a   : > { %v7673_v41 = vpop.f32.mrf.mxu3  ;;  %v7686_v56 = vadd.f32 %v7685_v22, %v7672_v33  ;;  %762 = vst [vmem:[%s222_s14] sm:$0xff] %v11971_v26 }
 0x44b   : > { %v7674_v29 = vadd.f32 %v7673_v41, %v7660_v34 }
 0x44e   : > { %v7699_v17 = vpop.f32.mrf.mxu1 }
 0x44f   : > { %v7713_v52 = vpop.f32.mrf.mxu2  ;;  %v7700_v13 = vadd.f32 %v7699_v17, %v7686_v56 }
 0x451   : > { %v7687_v30 = vpop.f32.mrf.mxu0  ;;  %v7714_v39 = vadd.f32 %v7713_v52, %v7700_v13 }
 0x452   : > { %v7727_v35 = vpop.f32.mrf.mxu3  ;;  %v7688_v53 = vadd.f32 %v7687_v30, %v7674_v29 }
 0x453   : > { %v7728_v21 = vadd.f32 %v7727_v35, %v7714_v39 }
 0x456   : > { %v7701_v23 = vpop.f32.mrf.mxu1 }
 0x457   : > { %v7715_v49 = vpop.f32.mrf.mxu2  ;;  %v7702_v40 = vadd.f32 %v7701_v23, %v7688_v53 }
 0x459   : > { %v7741_v9 = vpop.f32.mrf.mxu0  ;;  %v7716_v42 = vadd.f32 %v7715_v49, %v7702_v40 }
 0x45a   : > { %v7729_v58 = vpop.f32.mrf.mxu3  ;;  %v7742_v4 = vadd.f32 %v7741_v9, %v7728_v21 }
 0x45b   : > { %v7730_v31 = vadd.f32 %v7729_v58, %v7716_v42 }
 0x45e   : > { %v7755_v3 = vpop.f32.mrf.mxu1 }
 0x45f   : > { %v7756_v62 = vadd.f32 %v7755_v3, %v7742_v4 }
 0x461   : > { %v7743_v37 = vpop.f32.mrf.mxu0 }
 0x462   : > { %v7783_v60 = vpop.f32.mrf.mxu3  ;;  %v7744_v27 = vadd.f32 %v7743_v37, %v7730_v31 }
 0x466   : > { %v7757_v50 = vpop.f32.mrf.mxu1 }
 0x467   : > { %v7758_v8 = vadd.f32 %v7757_v50, %v7744_v27 }
 0x46a   : > { %v7797_v6 = vpop.f32.mrf.mxu0  ;;  %v7785_v48 = vpop.f32.mrf.mxu3 }
 0x46f   : > { %v7769_v51 = vpop.f32.mrf.mxu2 }
 0x470   : > { %v7770_v12 = vadd.f32 %v7769_v51, %v7756_v62 }
 0x472   : > { %v7784_v16 = vadd.f32 %v7783_v60, %v7770_v12  ;;  %v7799_v7 = vpop.f32.mrf.mxu0 }
 0x474   : > { %v7798_v61 = vadd.f32 %v7797_v6, %v7784_v16 }
 0x477   : > { %v7771_v15 = vpop.f32.mrf.mxu2 }
 0x478   : > { %v7811_v57 = vpop.f32.mrf.mxu1  ;;  %v7772_v24 = vadd.f32 %v7771_v15, %v7758_v8 }
 0x479   : > { %v7812_v19 = vadd.f32 %v7811_v57, %v7798_v61 }
 0x47a   : > { %v7786_v2 = vadd.f32 %v7785_v48, %v7772_v24 }
 0x47c   : > { %v7800_v36 = vadd.f32 %v7799_v7, %v7786_v2 }
 0x480   : > { %v7839_v46 = vpop.f32.mrf.mxu3  ;;  %v7813_v54 = vpop.f32.mrf.mxu1 }
 0x481   : > { %v7814_v5 = vadd.f32 %v7813_v54, %v7800_v36 }
 0x488   : > { %v7841_v11 = vpop.f32.mrf.mxu3 }
 0x48a   : > { %v7871_v45 = vpop.f32.mrf.mxu0 }
 0x48f   : > { %v7825_v20 = vpop.f32.mrf.mxu2 }
 0x490   : > { %v7826_v28 = vadd.f32 %v7825_v20, %v7812_v19 }
 0x492   : > { %v7840_v59 = vadd.f32 %v7839_v46, %v7826_v28  ;;  %v7874_v25 = vpop.f32.mrf.mxu0 }
 0x494   : > { %v7845_v32 = vmul.f32 %v7840_v59, %v739_v55 }
 0x496   : > { %11177 = vmatmul.msk.f32.vlgmr.msra.gmra.mxu1 %vm1152_vm0, %v7845_v32 }
 0x497   : > { %v7827_v38 = vpop.f32.mrf.mxu2 }
 0x498   : > { %v7828_v1 = vadd.f32 %v7827_v38, %v7814_v5 }
 0x49a   : > { %v7842_v22 = vadd.f32 %v7841_v11, %v7828_v1 }
 0x49c   : > { %v7847_v41 = vmul.f32 %v7842_v22, %v741_v47 }
 0x49e   : > { %11178 = vmatmul.msk.f32.gmra.mxu1 %vm1152_vm0, %v7847_v41 }
 0x513   : > { %v7894_v63 = vpop.f32.mrf.mxu1 }
 0x514   : > { %v7895_v17 = vadd.f32 %v7894_v63, %v7871_v45 }
 0x516   : > { %v7901_v43 = vsel %vm7900_vm1, %v7895_v17, 0.0 }
 0x51b   : > { %v7897_v0 = vpop.f32.mrf.mxu1 }
 0x51c   : > { %v7898_v10 = vadd.f32 %v7897_v0, %v7874_v25 }
 0x51e   : > { %v7902_v33 = vsel %vm7900_vm1, %v7898_v10, 0.0 }
 0x51f   : > { %v7903_v35 = vadd.f32 %v7902_v33, %v7901_v43 }
 0x521   : > { %v7904_v52 = vrot.slane %v7903_v35, 4 }
 0x523   : > { %v7905_v18 = vadd.f32 %v7904_v52, %v7903_v35 }
 0x525   : > { %v7906_v30 = vrot.slane %v7905_v18, 2 }
 0x527   : > { %v7907_v56 = vadd.f32 %v7906_v30, %v7905_v18 }
 0x529   : > { %v7908_v34 = vrot.slane %v7907_v56, 1 }
 0x52b   : > { %v7909_v44 = vadd.f32 %v7908_v34, %v7907_v56 }
 0x52d   : > { %7911 = vst.msk [vmem:[%s222_s14] sm:$0x1] %vm7910_vm2, %v7909_v44 }
 0x52e PF: > { %s15_s18 = sadd.s32 1, %s11969_s18  }
 0x52f   : > { %p12_p4 = scmp.ge.s32.totalorder %s15_s18, 4  }
 0x531   :  { %14 = sbr.rel (!%p12_p4) target bundleno = 1 (0x1), region = 70 }

</bundles_post_ra>
